<compile_context>
chip_gen: v6e
topology: v6e:2x2x1
jax: 0.10.0
libtpu: 0.0.40
codegen_flags: <defaults>
</compile_context>

<pallas_src>
import functools
import math

import jax
import jax.numpy as jnp
from jax.experimental import pallas as pl
from jax.experimental.pallas import tpu as pltpu

MXU_DTYPE = jnp.bfloat16            # matmul operand dtype (f32 accumulate)
LN_EPS = 1e-5


def _vmem_limit_bytes():
    # v5e/v6e: 128 MiB physical -> allow ~96 MiB; v7x: 64 MiB -> stay <= ~48 MiB.
    try:
        cap = pltpu.get_tpu_info().vmem_capacity_bytes
    except Exception:  # interpret mode / older API — conservative fallback
        cap = 64 * 1024 * 1024
    return int(min(96 * 1024 * 1024, cap * 3 // 4))


VMEM_LIMIT_BYTES = _vmem_limit_bytes()


def _tile(n, cap):
    """Largest tile: the full n if it fits, else the biggest multiple-of-8 divisor <= cap."""
    if n <= cap:
        return n
    t = (cap // 8) * 8
    while t >= 8:
        if n % t == 0:
            return t
        t -= 8
    # TODO(synk): pad n to a tileable multiple instead of one huge block.
    return n


def _tree_sum(terms):
    """Pairwise tree reduction (gives the VLIW scheduler ILP vs a serial chain)."""
    terms = list(terms)
    while len(terms) > 1:
        nxt = [terms[i] + terms[i + 1] for i in range(0, len(terms) - 1, 2)]
        if len(terms) % 2:
            nxt.append(terms[-1])
        terms = nxt
    return terms[0]


# ------------------------- fused query projection + softmax -------------------------

def pl_query_proj(tgt, pos, qa_w, qa_b, n_heads, n_levels, n_points):
    """z = (tgt+pos) @ [off_w|attn_w] + b; per-head softmax over L*P attention logits."""
    B, Lq, C = tgt.shape
    M = B * Lq
    LP = n_levels * n_points
    n_off = n_heads * LP * 2
    n_attn = n_heads * LP
    n_total = n_off + n_attn
    tm = _tile(M, 1024)
    nt = M // tm

    def kernel(t_ref, p_ref, w_ref, b_ref, off_ref, attn_ref):
        q = t_ref[...] + p_ref[...]
        z = jnp.dot(q.astype(MXU_DTYPE), w_ref[...],
                    preferred_element_type=jnp.float32) + b_ref[...]
        off_ref[...] = z[:, :n_off]
        logits = z[:, n_off:]
        parts = []
        for h in range(n_heads):
            lg = logits[:, h * LP:(h + 1) * LP]
            m = jnp.max(lg, axis=-1, keepdims=True)
            e = jnp.exp(lg - m)
            parts.append(e / jnp.sum(e, axis=-1, keepdims=True))   # exact divide (parity)
        attn_ref[...] = jnp.concatenate(parts, axis=-1)            # single lane-dense store

    off, attn = pl.pallas_call(
        kernel,
        out_shape=(jax.ShapeDtypeStruct((M, n_off), jnp.float32),
                   jax.ShapeDtypeStruct((M, n_attn), jnp.float32)),
        grid=(nt,),
        in_specs=[pl.BlockSpec((tm, C), lambda i: (i, 0)),
                  pl.BlockSpec((tm, C), lambda i: (i, 0)),
                  pl.BlockSpec((C, n_total), lambda i: (0, 0)),   # resident bf16 weights
                  pl.BlockSpec((1, n_total), lambda i: (0, 0))],
        out_specs=(pl.BlockSpec((tm, n_off), lambda i: (i, 0)),
                   pl.BlockSpec((tm, n_attn), lambda i: (i, 0))),
        compiler_params=pltpu.CompilerParams(
            dimension_semantics=("parallel",),
            vmem_limit_bytes=VMEM_LIMIT_BYTES),
        cost_estimate=pl.CostEstimate(flops=2 * M * C * n_total, transcendentals=M * n_attn,
                                      bytes_accessed=4 * M * (2 * C + n_total) + 2 * C * n_total),
    )(tgt.reshape(M, C), pos.reshape(M, C), qa_w, qa_b.reshape(1, n_total))
    return off.reshape(B, Lq, n_off), attn.reshape(B, Lq, n_attn)


# ---------------- glue: corner indices + combined bilinear/attention weights ----------------

def build_corner_index_weights(off, attn, reference_points, spatial_shapes,
                               level_start_index, n_heads, n_levels, n_points):
    """Tiny elementwise math only: flat value-row index + weight per sampled corner."""
    B, Lq, _ = off.shape
    H, L, P = n_heads, n_levels, n_points
    off = off.reshape(B, Lq, H, L, P, 2)
    attn = attn.reshape(B, Lq, H, L, P)
    normalizer = jnp.array([[w, h] for (h, w) in spatial_shapes], jnp.float32)  # (L,2)=[W,H]
    loc = (reference_points[:, :, None, :, None, :]
           + off / normalizer[None, None, None, :, None, :])                    # (B,Lq,H,L,P,2)
    idx_list, w_list = [], []
    for lvl in range(L):
        H_l, W_l = spatial_shapes[lvl]
        start = level_start_index[lvl]
        x = loc[:, :, :, lvl, :, 0] * W_l - 0.5    # grid_sample, align_corners=False
        y = loc[:, :, :, lvl, :, 1] * H_l - 0.5
        x0 = jnp.floor(x)
        y0 = jnp.floor(y)
        lx = x - x0
        ly = y - y0
        x0i = x0.astype(jnp.int32)
        y0i = y0.astype(jnp.int32)
        a_l = attn[:, :, :, lvl, :]                # (B,Lq,H,P)
        for dy, dx in ((0, 0), (0, 1), (1, 0), (1, 1)):
            xi = x0i + dx
            yi = y0i + dy
            valid = ((xi >= 0) & (xi < W_l) & (yi >= 0) & (yi < H_l)).astype(jnp.float32)
            wx = lx if dx == 1 else 1.0 - lx
            wy = ly if dy == 1 else 1.0 - ly
            w_list.append(wx * wy * valid * a_l)   # zero-padding handled by mask
            idx_list.append(start + jnp.clip(yi, 0, H_l - 1) * W_l + jnp.clip(xi, 0, W_l - 1))
    K = L * P * 4
    idx = jnp.stack(idx_list, axis=-1).reshape(B, Lq, H, K).astype(jnp.int32)
    wts = jnp.stack(w_list, axis=-1).reshape(B, Lq, H, K)
    return idx.reshape(B, Lq, H * K), wts.reshape(B, Lq, H * K)


# -------- fused value-proj + gather/aggregate + out-proj + residual + LayerNorm --------

def pl_deform_attn_agg(idx, wts, value_in, residual, ap, ln_g, ln_b, n_heads,
                       max_q_tile=256, max_l_tile=1024):
    """grid=(B, Lq-tiles, Lin-chunks): value-proj + MXU gather (chunked reduction) +
    consolidated out-proj + residual + LayerNorm with an f32 VMEM accumulator."""
    B, Lq, HK = idx.shape
    _, Lin, C = value_in.shape
    H = n_heads
    Dh = C // H
    K = HK // H
    tq = _tile(Lq, max_q_tile)
    tl = _tile(Lin, max_l_tile)
    nq = Lq // tq
    nl = Lin // tl

    def kernel(idx_ref, wts_ref, val_ref, res_ref, vw_ref, vb_ref, ow_ref, ob_ref,
               g_ref, bb_ref, o_ref, agg_ref):
        l = pl.program_id(2)

        @pl.when(l == 0)
        def _():
            agg_ref[...] = jnp.zeros_like(agg_ref)

        # value projection for this Lin chunk (bf16 operands, f32 accumulate)
        v = jnp.dot(val_ref[0], vw_ref[...],
                    preferred_element_type=jnp.float32) + vb_ref[...]          # (tl, C) f32
        idx_b = idx_ref[0]                                                     # (tq, H*K) int32
        w_b = wts_ref[0]                                                       # (tq, H*K) f32
        # chunk-local one-hot columns: (1, tl) iota offset by the chunk start.
        col = l * tl + jax.lax.broadcasted_iota(jnp.int32, (1, tl), 1)

        head_parts = []
        for h in range(H):
            # per-head dense attention map A_h (tq, tl): K select-terms, tree-summed.
            terms = []
            for k in range(K):
                c0 = h * K + k
                terms.append(jnp.where(idx_b[:, c0:c0 + 1] == col,
                                       w_b[:, c0:c0 + 1], 0.0))
            a = _tree_sum(terms)                                               # (tq, tl)
            v_h = v[:, h * Dh:(h + 1) * Dh]                                    # (tl, Dh)
            head_parts.append(jnp.dot(a.astype(MXU_DTYPE), v_h.astype(MXU_DTYPE),
                                      preferred_element_type=jnp.float32))     # (tq, Dh)
        # accumulate head-concatenated aggregation; out-proj applied once at the end.
        agg_ref[...] += jnp.concatenate(head_parts, axis=-1)                   # (tq, C)

        @pl.when(l == pl.num_programs(2) - 1)
        def _():
            proj = jnp.dot(agg_ref[...].astype(MXU_DTYPE), ow_ref[...],
                           preferred_element_type=jnp.float32) + ob_ref[...]   # one K=C matmul
            hsum = res_ref[0] + proj
            mu = jnp.mean(hsum, axis=-1, keepdims=True)
            var = jnp.mean(jnp.square(hsum - mu), axis=-1, keepdims=True)
            o_ref[0] = (hsum - mu) * jax.lax.rsqrt(var + LN_EPS) * g_ref[...] + bb_ref[...]

    flops = 2 * B * (Lin * C * C + Lq * Lin * C + Lq * C * C)
    bytes_accessed = (4 * (idx.size + wts.size + residual.size + B * Lq * C)
                      + 2 * value_in.size + 4 * C * C)

    return pl.pallas_call(
        kernel,
        out_shape=jax.ShapeDtypeStruct((B, Lq, C), jnp.float32),
        grid=(B, nq, nl),
        in_specs=[pl.BlockSpec((1, tq, HK), lambda b, q, l: (b, q, 0)),
                  pl.BlockSpec((1, tq, HK), lambda b, q, l: (b, q, 0)),
                  pl.BlockSpec((1, tl, C), lambda b, q, l: (b, l, 0)),   # bf16 value chunk stream
                  pl.BlockSpec((1, tq, C), lambda b, q, l: (b, q, 0)),
                  pl.BlockSpec((C, C), lambda b, q, l: (0, 0)),          # resident bf16 weights
                  pl.BlockSpec((1, C), lambda b, q, l: (0, 0)),
                  pl.BlockSpec((C, C), lambda b, q, l: (0, 0)),
                  pl.BlockSpec((1, C), lambda b, q, l: (0, 0)),
                  pl.BlockSpec((1, C), lambda b, q, l: (0, 0)),
                  pl.BlockSpec((1, C), lambda b, q, l: (0, 0))],
        out_specs=pl.BlockSpec((1, tq, C), lambda b, q, l: (b, q, 0)),
        scratch_shapes=[pltpu.VMEM((tq, C), jnp.float32)],
        compiler_params=pltpu.CompilerParams(
            dimension_semantics=("parallel", "parallel", "arbitrary"),
            vmem_limit_bytes=VMEM_LIMIT_BYTES),
        cost_estimate=pl.CostEstimate(flops=flops, transcendentals=0,
                                      bytes_accessed=bytes_accessed),
    )(idx, wts, value_in.astype(MXU_DTYPE), residual,
      ap["value_w"], ap["value_b"].reshape(1, C),
      ap["out_w"], ap["out_b"].reshape(1, C),
      ln_g.reshape(1, C), ln_b.reshape(1, C))
    # TODO(synk): for extremely sparse K vs Lin, a manual-DMA row gather beats the
    # one-hot matmul; the chunked reduction above is the MXU-friendly middle ground.


# ---------------------- fused FFN: lin1 + ReLU + lin2 + add + LN ----------------------

def pl_ffn_ln(x, w1, b1, w2, b2, ln_g, ln_b):
    B, Lq, C = x.shape
    M = B * Lq
    dff = w1.shape[1]
    tm = _tile(M, 512)          # smaller cap: f32 intermediates + resident w1/w2 on v7x
    nt = M // tm

    def kernel(x_ref, w1_ref, b1_ref, w2_ref, b2_ref, g_ref, bb_ref, o_ref):
        x_v = x_ref[...]
        h = jnp.dot(x_v.astype(MXU_DTYPE), w1_ref[...],
                    preferred_element_type=jnp.float32) + b1_ref[...]
        h = jnp.maximum(h, 0.0).astype(MXU_DTYPE)        # bf16 intermediate feeds bf16 dot
        y = jnp.dot(h, w2_ref[...], preferred_element_type=jnp.float32) + b2_ref[...]
        z = x_v + y
        mu = jnp.mean(z, axis=-1, keepdims=True)
        var = jnp.mean(jnp.square(z - mu), axis=-1, keepdims=True)
        o_ref[...] = (z - mu) * jax.lax.rsqrt(var + LN_EPS) * g_ref[...] + bb_ref[...]

    out = pl.pallas_call(
        kernel,
        out_shape=jax.ShapeDtypeStruct((M, C), jnp.float32),
        grid=(nt,),
        in_specs=[pl.BlockSpec((tm, C), lambda i: (i, 0)),
                  pl.BlockSpec((C, dff), lambda i: (0, 0)),   # resident bf16 weights
                  pl.BlockSpec((1, dff), lambda i: (0, 0)),
                  pl.BlockSpec((dff, C), lambda i: (0, 0)),
                  pl.BlockSpec((1, C), lambda i: (0, 0)),
                  pl.BlockSpec((1, C), lambda i: (0, 0)),
                  pl.BlockSpec((1, C), lambda i: (0, 0))],
        out_specs=pl.BlockSpec((tm, C), lambda i: (i, 0)),
        compiler_params=pltpu.CompilerParams(
            dimension_semantics=("parallel",),
            vmem_limit_bytes=VMEM_LIMIT_BYTES),
        cost_estimate=pl.CostEstimate(flops=4 * M * C * dff, transcendentals=0,
                                      bytes_accessed=8 * M * C + 4 * C * dff),
    )(x.reshape(M, C), w1, b1.reshape(1, dff), w2, b2.reshape(1, C),
      ln_g.reshape(1, C), ln_b.reshape(1, C))
    return out.reshape(B, Lq, C)


# --------------------------- decoder layer / decoder ---------------------------

def decoder_layer_forward(cfg, p, tgt, src_bf16, pos, tgt_ref, t2s_ref):
    # Dropout layers are identity in eval mode; key_padding_masks assumed None.
    H, P = cfg["n_heads"], cfg["n_points"]
    # self deformable attention on tgt (query = tgt + pos, value = tgt), then norm2
    sa = p["self_attn"]
    off, attn = pl_query_proj(tgt, pos, sa["qa_w"], sa["qa_b"], H, cfg["n_levels_tgt"], P)
    idx, wts = build_corner_index_weights(off, attn, tgt_ref, cfg["tgt_spatial_shapes"],
                                          cfg["tgt_lsi"], H, cfg["n_levels_tgt"], P)
    tgt = pl_deform_attn_agg(idx, wts, tgt, tgt, sa, p["norm2_g"], p["norm2_b"], H)
    # cross deformable attention over src (query = tgt + pos, value = src), then norm1
    ca = p["cross_attn"]
    off, attn = pl_query_proj(tgt, pos, ca["qa_w"], ca["qa_b"], H, cfg["n_levels_src"], P)
    idx, wts = build_corner_index_weights(off, attn, t2s_ref, cfg["src_spatial_shapes"],
                                          cfg["src_lsi"], H, cfg["n_levels_src"], P)
    tgt = pl_deform_attn_agg(idx, wts, src_bf16, tgt, ca, p["norm1_g"], p["norm1_b"], H)
    # FFN + norm3
    tgt = pl_ffn_ln(tgt, p["lin1_w"], p["lin1_b"], p["lin2_w"], p["lin2_b"],
                    p["norm3_g"], p["norm3_b"])
    return tgt


def get_reference_points(spatial_shapes, valid_ratios):
    ref_list = []
    for lvl, (H_, W_) in enumerate(spatial_shapes):
        ref_y, ref_x = jnp.meshgrid(
            jnp.linspace(0.5, H_ - 0.5, H_, dtype=jnp.float32),
            jnp.linspace(0.5, W_ - 0.5, W_, dtype=jnp.float32),
            indexing="ij")
        ref_y = ref_y.reshape(-1)[None] / (valid_ratios[:, None, lvl, 1] * H_)
        ref_x = ref_x.reshape(-1)[None] / (valid_ratios[:, None, lvl, 0] * W_)
        ref_list.append(jnp.stack((ref_x, ref_y), -1))
    reference_points = jnp.concatenate(ref_list, 1)
    reference_points = reference_points[:, :, None] * valid_ratios[:, None]
    return reference_points


def deform_transformer_decoder(cfg, params, tgt, src, tgt_pos_embed, t2s_reference_points,
                               tgt_valid_ratios, src_valid_ratios,
                               return_intermediate=False):
    tgt_ref = get_reference_points(cfg["tgt_spatial_shapes"], tgt_valid_ratios)
    t2s_ref = t2s_reference_points[:, :, None] * src_valid_ratios[:, None]
    src_bf16 = src.astype(MXU_DTYPE)     # cast once; reused (and DMA'd at half width) every layer
    output = tgt
    intermediate = []
    for layer_p in params["layers"]:
        output = decoder_layer_forward(cfg, layer_p, output, src_bf16, tgt_pos_embed,
                                       tgt_ref, t2s_ref)
        if return_intermediate:
            intermediate.append(output)
    if return_intermediate:
        return jnp.stack(intermediate)
    return output[None]     # matches output.unsqueeze(0)


# ------------------------------ parameter init ------------------------------

def _init_linear(key, fan_in, fan_out, scale=None):
    if scale is None:
        scale = 1.0 / math.sqrt(fan_in)
    kw, kb = jax.random.split(key)
    w = jax.random.uniform(kw, (fan_in, fan_out), jnp.float32, -scale, scale)
    b = jax.random.uniform(kb, (fan_out,), jnp.float32, -scale, scale)
    return w, b


def init_msda(key, d_model, n_heads, n_levels, n_points):
    k1, k2, k3, k4 = jax.random.split(key, 4)
    off_w, off_b = _init_linear(k1, d_model, n_heads * n_levels * n_points * 2, scale=0.02)
    attn_w, attn_b = _init_linear(k2, d_model, n_heads * n_levels * n_points)
    val_w, val_b = _init_linear(k3, d_model, d_model)
    out_w, out_b = _init_linear(k4, d_model, d_model)
    return dict(qa_w=jnp.concatenate([off_w, attn_w], axis=1).astype(MXU_DTYPE),
                qa_b=jnp.concatenate([off_b, attn_b]),
                value_w=val_w.astype(MXU_DTYPE), value_b=val_b,
                out_w=out_w.astype(MXU_DTYPE), out_b=out_b)


def init_decoder(key, num_layers, d_model, n_heads, n_points,
                 n_levels_tgt, n_levels_src, dff):
    layers = []
    for _ in range(num_layers):
        key, k1, k2, k3, k4 = jax.random.split(key, 5)
        lw1, lb1 = _init_linear(k3, d_model, dff)
        lw2, lb2 = _init_linear(k4, dff, d_model)
        layers.append(dict(
            self_attn=init_msda(k1, d_model, n_heads, n_levels_tgt, n_points),
            cross_attn=init_msda(k2, d_model, n_heads, n_levels_src, n_points),
            lin1_w=lw1.astype(MXU_DTYPE), lin1_b=lb1,
            lin2_w=lw2.astype(MXU_DTYPE), lin2_b=lb2,
            norm1_g=jnp.ones((d_model,), jnp.float32), norm1_b=jnp.zeros((d_model,), jnp.float32),
            norm2_g=jnp.ones((d_model,), jnp.float32), norm2_b=jnp.zeros((d_model,), jnp.float32),
            norm3_g=jnp.ones((d_model,), jnp.float32), norm3_b=jnp.zeros((d_model,), jnp.float32),
        ))
    return dict(layers=layers)


# ------------------------------------ main ------------------------------------

if __name__ == "__main__":
    key = jax.random.PRNGKey(0)

    B = 2
    d_model = 32
    n_heads = 4
    n_points = 2
    dff = 64
    num_layers = 2
    tgt_spatial_shapes = ((4, 4), (2, 2))     # target query pyramid levels
    src_spatial_shapes = ((8, 8), (4, 4))     # source memory pyramid levels
    L_tgt, L_src = len(tgt_spatial_shapes), len(src_spatial_shapes)
    Lq = sum(h * w for h, w in tgt_spatial_shapes)   # 20
    Ls = sum(h * w for h, w in src_spatial_shapes)   # 80

    def level_start_index(shapes):
        idx = [0]
        for h, w in shapes[:-1]:
            idx.append(idx[-1] + h * w)
        return tuple(idx)

    cfg = dict(n_heads=n_heads, n_points=n_points,
               n_levels_tgt=L_tgt, n_levels_src=L_src,
               tgt_spatial_shapes=tgt_spatial_shapes,
               src_spatial_shapes=src_spatial_shapes,
               tgt_lsi=level_start_index(tgt_spatial_shapes),
               src_lsi=level_start_index(src_spatial_shapes))

    key, k0, k1, k2, k3, k4, k5, kp = jax.random.split(key, 8)
    tgt = jax.random.normal(k0, (B, Lq, d_model), jnp.float32)
    src = jax.random.normal(k1, (B, Ls, d_model), jnp.float32)
    tgt_pos_embed = jax.random.normal(k2, (B, Lq, d_model), jnp.float32)
    t2s_reference_points = jax.random.uniform(k3, (B, Lq, 2), jnp.float32, 0.1, 0.9)
    tgt_valid_ratios = jax.random.uniform(k4, (B, L_tgt, 2), jnp.float32, 0.85, 1.0)
    src_valid_ratios = jax.random.uniform(k5, (B, L_src, 2), jnp.float32, 0.85, 1.0)

    params = init_decoder(kp, num_layers, d_model, n_heads, n_points,
                          L_tgt, L_src, dff)

    fwd = jax.jit(functools.partial(deform_transformer_decoder, cfg))
    out = fwd(params, tgt, src, tgt_pos_embed, t2s_reference_points,
              tgt_valid_ratios, src_valid_ratios)
    out = jax.block_until_ready(out)

    assert out.shape == (1, B, Lq, d_model), out.shape
    assert bool(jnp.all(jnp.isfinite(out)))
    print("KERNEL_OK")
</pallas_src>

<mosaic_0001>
module attributes {stable_mosaic.version = 11 : i64} {
  func.func @kernel(%arg0: i32, %arg1: memref<40x32xf32, #tpu.memory_space<vmem>>, %arg2: memref<40x32xf32, #tpu.memory_space<vmem>>, %arg3: memref<32x48xbf16, #tpu.memory_space<vmem>>, %arg4: memref<1x48xf32, #tpu.memory_space<vmem>>, %arg5: memref<40x32xf32, #tpu.memory_space<vmem>>, %arg6: memref<40x16xf32, #tpu.memory_space<vmem>>) attributes {dimension_semantics = [#tpu.dimension_semantics<parallel>], iteration_bounds = array<i64: 1>, scalar_prefetch = 0 : i64, scratch_operands = 0 : i64, tpu.core_type = #tpu.core_type<tc>, window_params = [{transform_indices = @transform_0, window_bounds = array<i64: 40, 32>}, {transform_indices = @transform_1, window_bounds = array<i64: 40, 32>}, {pipeline_mode = #tpu.pipeline_mode<synchronous>, transform_indices = @transform_2, window_bounds = array<i64: 32, 48>}, {pipeline_mode = #tpu.pipeline_mode<synchronous>, transform_indices = @transform_3, window_bounds = array<i64: 1, 48>}, {transform_indices = @transform_4, window_bounds = array<i64: 40, 32>}, {transform_indices = @transform_5, window_bounds = array<i64: 40, 16>}]} {
    %c0 = arith.constant 0 : index
    %c0_0 = arith.constant 0 : index
    %0 = vector.load %arg1[%c0, %c0_0] : memref<40x32xf32, #tpu.memory_space<vmem>>, vector<40x32xf32>
    %c0_1 = arith.constant 0 : index
    %c0_2 = arith.constant 0 : index
    %1 = vector.load %arg2[%c0_1, %c0_2] : memref<40x32xf32, #tpu.memory_space<vmem>>, vector<40x32xf32>
    %2 = arith.addf %0, %1 : vector<40x32xf32>
    %3 = arith.truncf %2 : vector<40x32xf32> to vector<40x32xbf16>
    %c0_3 = arith.constant 0 : index
    %c0_4 = arith.constant 0 : index
    %4 = vector.load %arg3[%c0_3, %c0_4] : memref<32x48xbf16, #tpu.memory_space<vmem>>, vector<32x48xbf16>
    %cst = arith.constant dense<0.000000e+00> : vector<40x48xf32>
    %5 = tpu.matmul %3, %4, %cst {dimension_numbers = #tpu.dot_dimension_numbers<[1], [0], [0], [1], [0, 0, 1, 1], [], []>} : vector<40x32xbf16>, vector<32x48xbf16>, vector<40x48xf32> -> vector<40x48xf32>
    %c0_5 = arith.constant 0 : index
    %c0_6 = arith.constant 0 : index
    %6 = vector.load %arg4[%c0_5, %c0_6] : memref<1x48xf32, #tpu.memory_space<vmem>>, vector<1x48xf32>
    %7 = vector.broadcast %6 : vector<1x48xf32> to vector<40x48xf32>
    %8 = arith.addf %5, %7 : vector<40x48xf32>
    %9 = vector.extract_strided_slice %8 {offsets = [0, 0], sizes = [40, 32], strides = [1, 1]} : vector<40x48xf32> to vector<40x32xf32>
    %c0_7 = arith.constant 0 : index
    %c0_8 = arith.constant 0 : index
    %10 = vector.load %arg5[%c0_7, %c0_8] : memref<40x32xf32, #tpu.memory_space<vmem>>, vector<40x32xf32>
    tpu.vector_store %arg5[%c0_7, %c0_8], %9 {strides = array<i32>} : memref<40x32xf32, #tpu.memory_space<vmem>>, vector<40x32xf32>,
    %11 = vector.extract_strided_slice %8 {offsets = [0, 32], sizes = [40, 16], strides = [1, 1]} : vector<40x48xf32> to vector<40x16xf32>
    %12 = vector.extract_strided_slice %11 {offsets = [0, 0], sizes = [40, 4], strides = [1, 1]} : vector<40x16xf32> to vector<40x4xf32>
    %cst_9 = arith.constant dense<0xFF800000> : vector<40xf32>
    %13 = vector.multi_reduction <maximumf>, %12, %cst_9 [1] : vector<40x4xf32> to vector<40xf32>
    %14 = vector.shape_cast %13 : vector<40xf32> to vector<40x1xf32>
    %15 = vector.broadcast %14 : vector<40x1xf32> to vector<40x4xf32>
    %16 = arith.subf %12, %15 : vector<40x4xf32>
    %17 = math.exp %16 : vector<40x4xf32>
    %cst_10 = arith.constant dense<0.000000e+00> : vector<40xf32>
    %18 = vector.multi_reduction <add>, %17, %cst_10 [1] : vector<40x4xf32> to vector<40xf32>
    %19 = vector.shape_cast %18 : vector<40xf32> to vector<40x1xf32>
    %20 = vector.broadcast %19 : vector<40x1xf32> to vector<40x4xf32>
    %21 = arith.divf %17, %20 : vector<40x4xf32>
    %22 = vector.extract_strided_slice %11 {offsets = [0, 4], sizes = [40, 4], strides = [1, 1]} : vector<40x16xf32> to vector<40x4xf32>
    %cst_11 = arith.constant dense<0xFF800000> : vector<40xf32>
    %23 = vector.multi_reduction <maximumf>, %22, %cst_11 [1] : vector<40x4xf32> to vector<40xf32>
    %24 = vector.shape_cast %23 : vector<40xf32> to vector<40x1xf32>
    %25 = vector.broadcast %24 : vector<40x1xf32> to vector<40x4xf32>
    %26 = arith.subf %22, %25 : vector<40x4xf32>
    %27 = math.exp %26 : vector<40x4xf32>
    %cst_12 = arith.constant dense<0.000000e+00> : vector<40xf32>
    %28 = vector.multi_reduction <add>, %27, %cst_12 [1] : vector<40x4xf32> to vector<40xf32>
    %29 = vector.shape_cast %28 : vector<40xf32> to vector<40x1xf32>
    %30 = vector.broadcast %29 : vector<40x1xf32> to vector<40x4xf32>
    %31 = arith.divf %27, %30 : vector<40x4xf32>
    %32 = vector.extract_strided_slice %11 {offsets = [0, 8], sizes = [40, 4], strides = [1, 1]} : vector<40x16xf32> to vector<40x4xf32>
    %cst_13 = arith.constant dense<0xFF800000> : vector<40xf32>
    %33 = vector.multi_reduction <maximumf>, %32, %cst_13 [1] : vector<40x4xf32> to vector<40xf32>
    %34 = vector.shape_cast %33 : vector<40xf32> to vector<40x1xf32>
    %35 = vector.broadcast %34 : vector<40x1xf32> to vector<40x4xf32>
    %36 = arith.subf %32, %35 : vector<40x4xf32>
    %37 = math.exp %36 : vector<40x4xf32>
    %cst_14 = arith.constant dense<0.000000e+00> : vector<40xf32>
    %38 = vector.multi_reduction <add>, %37, %cst_14 [1] : vector<40x4xf32> to vector<40xf32>
    %39 = vector.shape_cast %38 : vector<40xf32> to vector<40x1xf32>
    %40 = vector.broadcast %39 : vector<40x1xf32> to vector<40x4xf32>
    %41 = arith.divf %37, %40 : vector<40x4xf32>
    %42 = vector.extract_strided_slice %11 {offsets = [0, 12], sizes = [40, 4], strides = [1, 1]} : vector<40x16xf32> to vector<40x4xf32>
    %cst_15 = arith.constant dense<0xFF800000> : vector<40xf32>
    %43 = vector.multi_reduction <maximumf>, %42, %cst_15 [1] : vector<40x4xf32> to vector<40xf32>
    %44 = vector.shape_cast %43 : vector<40xf32> to vector<40x1xf32>
    %45 = vector.broadcast %44 : vector<40x1xf32> to vector<40x4xf32>
    %46 = arith.subf %42, %45 : vector<40x4xf32>
    %47 = math.exp %46 : vector<40x4xf32>
    %cst_16 = arith.constant dense<0.000000e+00> : vector<40xf32>
    %48 = vector.multi_reduction <add>, %47, %cst_16 [1] : vector<40x4xf32> to vector<40xf32>
    %49 = vector.shape_cast %48 : vector<40xf32> to vector<40x1xf32>
    %50 = vector.broadcast %49 : vector<40x1xf32> to vector<40x4xf32>
    %51 = arith.divf %47, %50 : vector<40x4xf32>
    %52 = tpu.concatenate %21, %31, %41, %51 in 1 : vector<40x4xf32>, vector<40x4xf32>, vector<40x4xf32>, vector<40x4xf32> -> vector<40x16xf32>
    %c0_17 = arith.constant 0 : index
    %c0_18 = arith.constant 0 : index
    %53 = vector.load %arg6[%c0_17, %c0_18] : memref<40x16xf32, #tpu.memory_space<vmem>>, vector<40x16xf32>
    tpu.vector_store %arg6[%c0_17, %c0_18], %52 {strides = array<i32>} : memref<40x16xf32, #tpu.memory_space<vmem>>, vector<40x16xf32>,
    return
  }
  func.func @transform_0(%arg0: i32) -> (i32, i32) {
    %c0_i32 = arith.constant 0 : i32
    %c0_i32_0 = arith.constant 0 : i32
    return %arg0, %c0_i32 : i32, i32
  }
  func.func @transform_1(%arg0: i32) -> (i32, i32) {
    %c0_i32 = arith.constant 0 : i32
    %c0_i32_0 = arith.constant 0 : i32
    return %arg0, %c0_i32 : i32, i32
  }
  func.func @transform_2(%arg0: i32) -> (i32, i32) {
    %c0_i32 = arith.constant 0 : i32
    %c0_i32_0 = arith.constant 0 : i32
    %c0_i32_1 = arith.constant 0 : i32
    return %c0_i32, %c0_i32_0 : i32, i32
  }
  func.func @transform_3(%arg0: i32) -> (i32, i32) {
    %c0_i32 = arith.constant 0 : i32
    %c0_i32_0 = arith.constant 0 : i32
    %c0_i32_1 = arith.constant 0 : i32
    return %c0_i32, %c0_i32_0 : i32, i32
  }
  func.func @transform_4(%arg0: i32) -> (i32, i32) {
    %c0_i32 = arith.constant 0 : i32
    %c0_i32_0 = arith.constant 0 : i32
    return %arg0, %c0_i32 : i32, i32
  }
  func.func @transform_5(%arg0: i32) -> (i32, i32) {
    %c0_i32 = arith.constant 0 : i32
    %c0_i32_0 = arith.constant 0 : i32
    return %arg0, %c0_i32 : i32, i32
  }
}

module attributes {stable_mosaic.version = 11 : i64} {
  func.func @kernel(%arg0: i32, %arg1: i32, %arg2: i32, %arg3: memref<1x20x64xi32, #tpu.memory_space<vmem>>, %arg4: memref<1x20x64xf32, #tpu.memory_space<vmem>>, %arg5: memref<1x20x32xbf16, #tpu.memory_space<vmem>>, %arg6: memref<1x20x32xf32, #tpu.memory_space<vmem>>, %arg7: memref<32x32xbf16, #tpu.memory_space<vmem>>, %arg8: memref<1x32xf32, #tpu.memory_space<vmem>>, %arg9: memref<32x32xbf16, #tpu.memory_space<vmem>>, %arg10: memref<1x32xf32, #tpu.memory_space<vmem>>, %arg11: memref<1x32xf32, #tpu.memory_space<vmem>>, %arg12: memref<1x32xf32, #tpu.memory_space<vmem>>, %arg13: memref<1x20x32xf32, #tpu.memory_space<vmem>>, %arg14: memref<20x32xf32, #tpu.memory_space<vmem>>) attributes {dimension_semantics = [#tpu.dimension_semantics<parallel>, #tpu.dimension_semantics<parallel>, #tpu.dimension_semantics<arbitrary>], iteration_bounds = array<i64: 2, 1, 1>, scalar_prefetch = 0 : i64, scratch_operands = 1 : i64, tpu.core_type = #tpu.core_type<tc>, window_params = [{transform_indices = @transform_0, window_bounds = array<i64: 1, 20, 64>}, {transform_indices = @transform_1, window_bounds = array<i64: 1, 20, 64>}, {transform_indices = @transform_2, window_bounds = array<i64: 1, 20, 32>}, {transform_indices = @transform_3, window_bounds = array<i64: 1, 20, 32>}, {pipeline_mode = #tpu.pipeline_mode<synchronous>, transform_indices = @transform_4, window_bounds = array<i64: 32, 32>}, {pipeline_mode = #tpu.pipeline_mode<synchronous>, transform_indices = @transform_5, window_bounds = array<i64: 1, 32>}, {pipeline_mode = #tpu.pipeline_mode<synchronous>, transform_indices = @transform_6, window_bounds = array<i64: 32, 32>}, {pipeline_mode = #tpu.pipeline_mode<synchronous>, transform_indices = @transform_7, window_bounds = array<i64: 1, 32>}, {pipeline_mode = #tpu.pipeline_mode<synchronous>, transform_indices = @transform_8, window_bounds = array<i64: 1, 32>}, {pipeline_mode = #tpu.pipeline_mode<synchronous>, transform_indices = @transform_9, window_bounds = array<i64: 1, 32>}, {transform_indices = @transform_10, window_bounds = array<i64: 1, 20, 32>}]} {
    %c0_i32 = arith.constant 0 : i32
    %0 = arith.cmpi eq, %arg2, %c0_i32 : i32
    %1 = arith.extui %0 : i1 to i32
    %c0_i32_0 = arith.constant 0 : i32
    %2 = arith.cmpi ne, %1, %c0_i32_0 : i32
    scf.if %2 {
      %cst_87 = arith.constant 0.000000e+00 : f32
      %677 = vector.broadcast %cst_87 : f32 to vector<20x32xf32>
      %c0_88 = arith.constant 0 : index
      %c0_89 = arith.constant 0 : index
      %678 = vector.load %arg14[%c0_88, %c0_89] : memref<20x32xf32, #tpu.memory_space<vmem>>, vector<20x32xf32>
      tpu.vector_store %arg14[%c0_88, %c0_89], %677 {strides = array<i32>} : memref<20x32xf32, #tpu.memory_space<vmem>>, vector<20x32xf32>,
    } else {
    }
    %c0 = arith.constant 0 : index
    %c0_1 = arith.constant 0 : index
    %c0_2 = arith.constant 0 : index
    %3 = vector.load %arg5[%c0, %c0_1, %c0_2] : memref<1x20x32xbf16, #tpu.memory_space<vmem>>, vector<1x20x32xbf16>
    %4 = vector.shape_cast %3 : vector<1x20x32xbf16> to vector<20x32xbf16>
    %c0_3 = arith.constant 0 : index
    %c0_4 = arith.constant 0 : index
    %5 = vector.load %arg7[%c0_3, %c0_4] : memref<32x32xbf16, #tpu.memory_space<vmem>>, vector<32x32xbf16>
    %cst = arith.constant dense<0.000000e+00> : vector<20x32xf32>
    %6 = tpu.matmul %4, %5, %cst {dimension_numbers = #tpu.dot_dimension_numbers<[1], [0], [0], [1], [0, 0, 1, 1], [], []>} : vector<20x32xbf16>, vector<32x32xbf16>, vector<20x32xf32> -> vector<20x32xf32>
    %c0_5 = arith.constant 0 : index
    %c0_6 = arith.constant 0 : index
    %7 = vector.load %arg8[%c0_5, %c0_6] : memref<1x32xf32, #tpu.memory_space<vmem>>, vector<1x32xf32>
    %8 = vector.broadcast %7 : vector<1x32xf32> to vector<20x32xf32>
    %9 = arith.addf %6, %8 : vector<20x32xf32>
    %c0_7 = arith.constant 0 : index
    %c0_8 = arith.constant 0 : index
    %c0_9 = arith.constant 0 : index
    %10 = vector.load %arg3[%c0_7, %c0_8, %c0_9] : memref<1x20x64xi32, #tpu.memory_space<vmem>>, vector<1x20x64xi32>
    %11 = vector.shape_cast %10 : vector<1x20x64xi32> to vector<20x64xi32>
    %c0_10 = arith.constant 0 : index
    %c0_11 = arith.constant 0 : index
    %c0_12 = arith.constant 0 : index
    %12 = vector.load %arg4[%c0_10, %c0_11, %c0_12] : memref<1x20x64xf32, #tpu.memory_space<vmem>>, vector<1x20x64xf32>
    %13 = vector.shape_cast %12 : vector<1x20x64xf32> to vector<20x64xf32>
    %c20_i32 = arith.constant 20 : i32
    %14 = arith.muli %arg2, %c20_i32 : i32
    %15 = tpu.iota {dimensions = array<i32: 1>} : vector<1x20xi32>
    %16 = vector.broadcast %14 : i32 to vector<1x20xi32>
    %17 = arith.addi %16, %15 : vector<1x20xi32>
    %18 = vector.extract_strided_slice %11 {offsets = [0, 0], sizes = [20, 1], strides = [1, 1]} : vector<20x64xi32> to vector<20x1xi32>
    %19 = vector.broadcast %18 : vector<20x1xi32> to vector<20x20xi32>
    %20 = vector.broadcast %17 : vector<1x20xi32> to vector<20x20xi32>
    %21 = arith.cmpi eq, %19, %20 : vector<20x20xi32>
    %22 = vector.extract_strided_slice %13 {offsets = [0, 0], sizes = [20, 1], strides = [1, 1]} : vector<20x64xf32> to vector<20x1xf32>
    %cst_13 = arith.constant 0.000000e+00 : f32
    %23 = vector.shape_cast %22 : vector<20x1xf32> to vector<20x1xf32>
    %24 = vector.broadcast %23 : vector<20x1xf32> to vector<20x20xf32>
    %25 = vector.broadcast %cst_13 : f32 to vector<20x20xf32>
    %26 = arith.select %21, %24, %25 : vector<20x20xi1>, vector<20x20xf32>
    %27 = vector.extract_strided_slice %11 {offsets = [0, 1], sizes = [20, 1], strides = [1, 1]} : vector<20x64xi32> to vector<20x1xi32>
    %28 = vector.broadcast %27 : vector<20x1xi32> to vector<20x20xi32>
    %29 = vector.broadcast %17 : vector<1x20xi32> to vector<20x20xi32>
    %30 = arith.cmpi eq, %28, %29 : vector<20x20xi32>
    %31 = vector.extract_strided_slice %13 {offsets = [0, 1], sizes = [20, 1], strides = [1, 1]} : vector<20x64xf32> to vector<20x1xf32>
    %cst_14 = arith.constant 0.000000e+00 : f32
    %32 = vector.shape_cast %31 : vector<20x1xf32> to vector<20x1xf32>
    %33 = vector.broadcast %32 : vector<20x1xf32> to vector<20x20xf32>
    %34 = vector.broadcast %cst_14 : f32 to vector<20x20xf32>
    %35 = arith.select %30, %33, %34 : vector<20x20xi1>, vector<20x20xf32>
    %36 = vector.extract_strided_slice %11 {offsets = [0, 2], sizes = [20, 1], strides = [1, 1]} : vector<20x64xi32> to vector<20x1xi32>
    %37 = vector.broadcast %36 : vector<20x1xi32> to vector<20x20xi32>
    %38 = vector.broadcast %17 : vector<1x20xi32> to vector<20x20xi32>
    %39 = arith.cmpi eq, %37, %38 : vector<20x20xi32>
    %40 = vector.extract_strided_slice %13 {offsets = [0, 2], sizes = [20, 1], strides = [1, 1]} : vector<20x64xf32> to vector<20x1xf32>
    %cst_15 = arith.constant 0.000000e+00 : f32
    %41 = vector.shape_cast %40 : vector<20x1xf32> to vector<20x1xf32>
    %42 = vector.broadcast %41 : vector<20x1xf32> to vector<20x20xf32>
    %43 = vector.broadcast %cst_15 : f32 to vector<20x20xf32>
    %44 = arith.select %39, %42, %43 : vector<20x20xi1>, vector<20x20xf32>
    %45 = vector.extract_strided_slice %11 {offsets = [0, 3], sizes = [20, 1], strides = [1, 1]} : vector<20x64xi32> to vector<20x1xi32>
    %46 = vector.broadcast %45 : vector<20x1xi32> to vector<20x20xi32>
    %47 = vector.broadcast %17 : vector<1x20xi32> to vector<20x20xi32>
    %48 = arith.cmpi eq, %46, %47 : vector<20x20xi32>
    %49 = vector.extract_strided_slice %13 {offsets = [0, 3], sizes = [20, 1], strides = [1, 1]} : vector<20x64xf32> to vector<20x1xf32>
    %cst_16 = arith.constant 0.000000e+00 : f32
    %50 = vector.shape_cast %49 : vector<20x1xf32> to vector<20x1xf32>
    %51 = vector.broadcast %50 : vector<20x1xf32> to vector<20x20xf32>
    %52 = vector.broadcast %cst_16 : f32 to vector<20x20xf32>
    %53 = arith.select %48, %51, %52 : vector<20x20xi1>, vector<20x20xf32>
    %54 = vector.extract_strided_slice %11 {offsets = [0, 4], sizes = [20, 1], strides = [1, 1]} : vector<20x64xi32> to vector<20x1xi32>
    %55 = vector.broadcast %54 : vector<20x1xi32> to vector<20x20xi32>
    %56 = vector.broadcast %17 : vector<1x20xi32> to vector<20x20xi32>
    %57 = arith.cmpi eq, %55, %56 : vector<20x20xi32>
    %58 = vector.extract_strided_slice %13 {offsets = [0, 4], sizes = [20, 1], strides = [1, 1]} : vector<20x64xf32> to vector<20x1xf32>
    %cst_17 = arith.constant 0.000000e+00 : f32
    %59 = vector.shape_cast %58 : vector<20x1xf32> to vector<20x1xf32>
    %60 = vector.broadcast %59 : vector<20x1xf32> to vector<20x20xf32>
    %61 = vector.broadcast %cst_17 : f32 to vector<20x20xf32>
    %62 = arith.select %57, %60, %61 : vector<20x20xi1>, vector<20x20xf32>
    %63 = vector.extract_strided_slice %11 {offsets = [0, 5], sizes = [20, 1], strides = [1, 1]} : vector<20x64xi32> to vector<20x1xi32>
    %64 = vector.broadcast %63 : vector<20x1xi32> to vector<20x20xi32>
    %65 = vector.broadcast %17 : vector<1x20xi32> to vector<20x20xi32>
    %66 = arith.cmpi eq, %64, %65 : vector<20x20xi32>
    %67 = vector.extract_strided_slice %13 {offsets = [0, 5], sizes = [20, 1], strides = [1, 1]} : vector<20x64xf32> to vector<20x1xf32>
    %cst_18 = arith.constant 0.000000e+00 : f32
    %68 = vector.shape_cast %67 : vector<20x1xf32> to vector<20x1xf32>
    %69 = vector.broadcast %68 : vector<20x1xf32> to vector<20x20xf32>
    %70 = vector.broadcast %cst_18 : f32 to vector<20x20xf32>
    %71 = arith.select %66, %69, %70 : vector<20x20xi1>, vector<20x20xf32>
    %72 = vector.extract_strided_slice %11 {offsets = [0, 6], sizes = [20, 1], strides = [1, 1]} : vector<20x64xi32> to vector<20x1xi32>
    %73 = vector.broadcast %72 : vector<20x1xi32> to vector<20x20xi32>
    %74 = vector.broadcast %17 : vector<1x20xi32> to vector<20x20xi32>
    %75 = arith.cmpi eq, %73, %74 : vector<20x20xi32>
    %76 = vector.extract_strided_slice %13 {offsets = [0, 6], sizes = [20, 1], strides = [1, 1]} : vector<20x64xf32> to vector<20x1xf32>
    %cst_19 = arith.constant 0.000000e+00 : f32
    %77 = vector.shape_cast %76 : vector<20x1xf32> to vector<20x1xf32>
    %78 = vector.broadcast %77 : vector<20x1xf32> to vector<20x20xf32>
    %79 = vector.broadcast %cst_19 : f32 to vector<20x20xf32>
    %80 = arith.select %75, %78, %79 : vector<20x20xi1>, vector<20x20xf32>
    %81 = vector.extract_strided_slice %11 {offsets = [0, 7], sizes = [20, 1], strides = [1, 1]} : vector<20x64xi32> to vector<20x1xi32>
    %82 = vector.broadcast %81 : vector<20x1xi32> to vector<20x20xi32>
    %83 = vector.broadcast %17 : vector<1x20xi32> to vector<20x20xi32>
    %84 = arith.cmpi eq, %82, %83 : vector<20x20xi32>
    %85 = vector.extract_strided_slice %13 {offsets = [0, 7], sizes = [20, 1], strides = [1, 1]} : vector<20x64xf32> to vector<20x1xf32>
    %cst_20 = arith.constant 0.000000e+00 : f32
    %86 = vector.shape_cast %85 : vector<20x1xf32> to vector<20x1xf32>
    %87 = vector.broadcast %86 : vector<20x1xf32> to vector<20x20xf32>
    %88 = vector.broadcast %cst_20 : f32 to vector<20x20xf32>
    %89 = arith.select %84, %87, %88 : vector<20x20xi1>, vector<20x20xf32>
    %90 = vector.extract_strided_slice %11 {offsets = [0, 8], sizes = [20, 1], strides = [1, 1]} : vector<20x64xi32> to vector<20x1xi32>
    %91 = vector.broadcast %90 : vector<20x1xi32> to vector<20x20xi32>
    %92 = vector.broadcast %17 : vector<1x20xi32> to vector<20x20xi32>
    %93 = arith.cmpi eq, %91, %92 : vector<20x20xi32>
    %94 = vector.extract_strided_slice %13 {offsets = [0, 8], sizes = [20, 1], strides = [1, 1]} : vector<20x64xf32> to vector<20x1xf32>
    %cst_21 = arith.constant 0.000000e+00 : f32
    %95 = vector.shape_cast %94 : vector<20x1xf32> to vector<20x1xf32>
    %96 = vector.broadcast %95 : vector<20x1xf32> to vector<20x20xf32>
    %97 = vector.broadcast %cst_21 : f32 to vector<20x20xf32>
    %98 = arith.select %93, %96, %97 : vector<20x20xi1>, vector<20x20xf32>
    %99 = vector.extract_strided_slice %11 {offsets = [0, 9], sizes = [20, 1], strides = [1, 1]} : vector<20x64xi32> to vector<20x1xi32>
    %100 = vector.broadcast %99 : vector<20x1xi32> to vector<20x20xi32>
    %101 = vector.broadcast %17 : vector<1x20xi32> to vector<20x20xi32>
    %102 = arith.cmpi eq, %100, %101 : vector<20x20xi32>
    %103 = vector.extract_strided_slice %13 {offsets = [0, 9], sizes = [20, 1], strides = [1, 1]} : vector<20x64xf32> to vector<20x1xf32>
    %cst_22 = arith.constant 0.000000e+00 : f32
    %104 = vector.shape_cast %103 : vector<20x1xf32> to vector<20x1xf32>
    %105 = vector.broadcast %104 : vector<20x1xf32> to vector<20x20xf32>
    %106 = vector.broadcast %cst_22 : f32 to vector<20x20xf32>
    %107 = arith.select %102, %105, %106 : vector<20x20xi1>, vector<20x20xf32>
    %108 = vector.extract_strided_slice %11 {offsets = [0, 10], sizes = [20, 1], strides = [1, 1]} : vector<20x64xi32> to vector<20x1xi32>
    %109 = vector.broadcast %108 : vector<20x1xi32> to vector<20x20xi32>
    %110 = vector.broadcast %17 : vector<1x20xi32> to vector<20x20xi32>
    %111 = arith.cmpi eq, %109, %110 : vector<20x20xi32>
    %112 = vector.extract_strided_slice %13 {offsets = [0, 10], sizes = [20, 1], strides = [1, 1]} : vector<20x64xf32> to vector<20x1xf32>
    %cst_23 = arith.constant 0.000000e+00 : f32
    %113 = vector.shape_cast %112 : vector<20x1xf32> to vector<20x1xf32>
    %114 = vector.broadcast %113 : vector<20x1xf32> to vector<20x20xf32>
    %115 = vector.broadcast %cst_23 : f32 to vector<20x20xf32>
    %116 = arith.select %111, %114, %115 : vector<20x20xi1>, vector<20x20xf32>
    %117 = vector.extract_strided_slice %11 {offsets = [0, 11], sizes = [20, 1], strides = [1, 1]} : vector<20x64xi32> to vector<20x1xi32>
    %118 = vector.broadcast %117 : vector<20x1xi32> to vector<20x20xi32>
    %119 = vector.broadcast %17 : vector<1x20xi32> to vector<20x20xi32>
    %120 = arith.cmpi eq, %118, %119 : vector<20x20xi32>
    %121 = vector.extract_strided_slice %13 {offsets = [0, 11], sizes = [20, 1], strides = [1, 1]} : vector<20x64xf32> to vector<20x1xf32>
    %cst_24 = arith.constant 0.000000e+00 : f32
    %122 = vector.shape_cast %121 : vector<20x1xf32> to vector<20x1xf32>
    %123 = vector.broadcast %122 : vector<20x1xf32> to vector<20x20xf32>
    %124 = vector.broadcast %cst_24 : f32 to vector<20x20xf32>
    %125 = arith.select %120, %123, %124 : vector<20x20xi1>, vector<20x20xf32>
    %126 = vector.extract_strided_slice %11 {offsets = [0, 12], sizes = [20, 1], strides = [1, 1]} : vector<20x64xi32> to vector<20x1xi32>
    %127 = vector.broadcast %126 : vector<20x1xi32> to vector<20x20xi32>
    %128 = vector.broadcast %17 : vector<1x20xi32> to vector<20x20xi32>
    %129 = arith.cmpi eq, %127, %128 : vector<20x20xi32>
    %130 = vector.extract_strided_slice %13 {offsets = [0, 12], sizes = [20, 1], strides = [1, 1]} : vector<20x64xf32> to vector<20x1xf32>
    %cst_25 = arith.constant 0.000000e+00 : f32
    %131 = vector.shape_cast %130 : vector<20x1xf32> to vector<20x1xf32>
    %132 = vector.broadcast %131 : vector<20x1xf32> to vector<20x20xf32>
    %133 = vector.broadcast %cst_25 : f32 to vector<20x20xf32>
    %134 = arith.select %129, %132, %133 : vector<20x20xi1>, vector<20x20xf32>
    %135 = vector.extract_strided_slice %11 {offsets = [0, 13], sizes = [20, 1], strides = [1, 1]} : vector<20x64xi32> to vector<20x1xi32>
    %136 = vector.broadcast %135 : vector<20x1xi32> to vector<20x20xi32>
    %137 = vector.broadcast %17 : vector<1x20xi32> to vector<20x20xi32>
    %138 = arith.cmpi eq, %136, %137 : vector<20x20xi32>
    %139 = vector.extract_strided_slice %13 {offsets = [0, 13], sizes = [20, 1], strides = [1, 1]} : vector<20x64xf32> to vector<20x1xf32>
    %cst_26 = arith.constant 0.000000e+00 : f32
    %140 = vector.shape_cast %139 : vector<20x1xf32> to vector<20x1xf32>
    %141 = vector.broadcast %140 : vector<20x1xf32> to vector<20x20xf32>
    %142 = vector.broadcast %cst_26 : f32 to vector<20x20xf32>
    %143 = arith.select %138, %141, %142 : vector<20x20xi1>, vector<20x20xf32>
    %144 = vector.extract_strided_slice %11 {offsets = [0, 14], sizes = [20, 1], strides = [1, 1]} : vector<20x64xi32> to vector<20x1xi32>
    %145 = vector.broadcast %144 : vector<20x1xi32> to vector<20x20xi32>
    %146 = vector.broadcast %17 : vector<1x20xi32> to vector<20x20xi32>
    %147 = arith.cmpi eq, %145, %146 : vector<20x20xi32>
    %148 = vector.extract_strided_slice %13 {offsets = [0, 14], sizes = [20, 1], strides = [1, 1]} : vector<20x64xf32> to vector<20x1xf32>
    %cst_27 = arith.constant 0.000000e+00 : f32
    %149 = vector.shape_cast %148 : vector<20x1xf32> to vector<20x1xf32>
    %150 = vector.broadcast %149 : vector<20x1xf32> to vector<20x20xf32>
    %151 = vector.broadcast %cst_27 : f32 to vector<20x20xf32>
    %152 = arith.select %147, %150, %151 : vector<20x20xi1>, vector<20x20xf32>
    %153 = vector.extract_strided_slice %11 {offsets = [0, 15], sizes = [20, 1], strides = [1, 1]} : vector<20x64xi32> to vector<20x1xi32>
    %154 = vector.broadcast %153 : vector<20x1xi32> to vector<20x20xi32>
    %155 = vector.broadcast %17 : vector<1x20xi32> to vector<20x20xi32>
    %156 = arith.cmpi eq, %154, %155 : vector<20x20xi32>
    %157 = vector.extract_strided_slice %13 {offsets = [0, 15], sizes = [20, 1], strides = [1, 1]} : vector<20x64xf32> to vector<20x1xf32>
    %cst_28 = arith.constant 0.000000e+00 : f32
    %158 = vector.shape_cast %157 : vector<20x1xf32> to vector<20x1xf32>
    %159 = vector.broadcast %158 : vector<20x1xf32> to vector<20x20xf32>
    %160 = vector.broadcast %cst_28 : f32 to vector<20x20xf32>
    %161 = arith.select %156, %159, %160 : vector<20x20xi1>, vector<20x20xf32>
    %162 = arith.addf %26, %35 : vector<20x20xf32>
    %163 = arith.addf %44, %53 : vector<20x20xf32>
    %164 = arith.addf %62, %71 : vector<20x20xf32>
    %165 = arith.addf %80, %89 : vector<20x20xf32>
    %166 = arith.addf %98, %107 : vector<20x20xf32>
    %167 = arith.addf %116, %125 : vector<20x20xf32>
    %168 = arith.addf %134, %143 : vector<20x20xf32>
    %169 = arith.addf %152, %161 : vector<20x20xf32>
    %170 = arith.addf %162, %163 : vector<20x20xf32>
    %171 = arith.addf %164, %165 : vector<20x20xf32>
    %172 = arith.addf %166, %167 : vector<20x20xf32>
    %173 = arith.addf %168, %169 : vector<20x20xf32>
    %174 = arith.addf %170, %171 : vector<20x20xf32>
    %175 = arith.addf %172, %173 : vector<20x20xf32>
    %176 = arith.addf %174, %175 : vector<20x20xf32>
    %177 = vector.extract_strided_slice %9 {offsets = [0, 0], sizes = [20, 8], strides = [1, 1]} : vector<20x32xf32> to vector<20x8xf32>
    %178 = arith.truncf %176 : vector<20x20xf32> to vector<20x20xbf16>
    %179 = arith.truncf %177 : vector<20x8xf32> to vector<20x8xbf16>
    %cst_29 = arith.constant dense<0.000000e+00> : vector<20x8xf32>
    %180 = tpu.matmul %178, %179, %cst_29 {dimension_numbers = #tpu.dot_dimension_numbers<[1], [0], [0], [1], [0, 0, 1, 1], [], []>} : vector<20x20xbf16>, vector<20x8xbf16>, vector<20x8xf32> -> vector<20x8xf32>
    %181 = vector.extract_strided_slice %11 {offsets = [0, 16], sizes = [20, 1], strides = [1, 1]} : vector<20x64xi32> to vector<20x1xi32>
    %182 = vector.broadcast %181 : vector<20x1xi32> to vector<20x20xi32>
    %183 = vector.broadcast %17 : vector<1x20xi32> to vector<20x20xi32>
    %184 = arith.cmpi eq, %182, %183 : vector<20x20xi32>
    %185 = vector.extract_strided_slice %13 {offsets = [0, 16], sizes = [20, 1], strides = [1, 1]} : vector<20x64xf32> to vector<20x1xf32>
    %cst_30 = arith.constant 0.000000e+00 : f32
    %186 = vector.shape_cast %185 : vector<20x1xf32> to vector<20x1xf32>
    %187 = vector.broadcast %186 : vector<20x1xf32> to vector<20x20xf32>
    %188 = vector.broadcast %cst_30 : f32 to vector<20x20xf32>
    %189 = arith.select %184, %187, %188 : vector<20x20xi1>, vector<20x20xf32>
    %190 = vector.extract_strided_slice %11 {offsets = [0, 17], sizes = [20, 1], strides = [1, 1]} : vector<20x64xi32> to vector<20x1xi32>
    %191 = vector.broadcast %190 : vector<20x1xi32> to vector<20x20xi32>
    %192 = vector.broadcast %17 : vector<1x20xi32> to vector<20x20xi32>
    %193 = arith.cmpi eq, %191, %192 : vector<20x20xi32>
    %194 = vector.extract_strided_slice %13 {offsets = [0, 17], sizes = [20, 1], strides = [1, 1]} : vector<20x64xf32> to vector<20x1xf32>
    %cst_31 = arith.constant 0.000000e+00 : f32
    %195 = vector.shape_cast %194 : vector<20x1xf32> to vector<20x1xf32>
    %196 = vector.broadcast %195 : vector<20x1xf32> to vector<20x20xf32>
    %197 = vector.broadcast %cst_31 : f32 to vector<20x20xf32>
    %198 = arith.select %193, %196, %197 : vector<20x20xi1>, vector<20x20xf32>
    %199 = vector.extract_strided_slice %11 {offsets = [0, 18], sizes = [20, 1], strides = [1, 1]} : vector<20x64xi32> to vector<20x1xi32>
    %200 = vector.broadcast %199 : vector<20x1xi32> to vector<20x20xi32>
    %201 = vector.broadcast %17 : vector<1x20xi32> to vector<20x20xi32>
    %202 = arith.cmpi eq, %200, %201 : vector<20x20xi32>
    %203 = vector.extract_strided_slice %13 {offsets = [0, 18], sizes = [20, 1], strides = [1, 1]} : vector<20x64xf32> to vector<20x1xf32>
    %cst_32 = arith.constant 0.000000e+00 : f32
    %204 = vector.shape_cast %203 : vector<20x1xf32> to vector<20x1xf32>
    %205 = vector.broadcast %204 : vector<20x1xf32> to vector<20x20xf32>
    %206 = vector.broadcast %cst_32 : f32 to vector<20x20xf32>
    %207 = arith.select %202, %205, %206 : vector<20x20xi1>, vector<20x20xf32>
    %208 = vector.extract_strided_slice %11 {offsets = [0, 19], sizes = [20, 1], strides = [1, 1]} : vector<20x64xi32> to vector<20x1xi32>
    %209 = vector.broadcast %208 : vector<20x1xi32> to vector<20x20xi32>
    %210 = vector.broadcast %17 : vector<1x20xi32> to vector<20x20xi32>
    %211 = arith.cmpi eq, %209, %210 : vector<20x20xi32>
    %212 = vector.extract_strided_slice %13 {offsets = [0, 19], sizes = [20, 1], strides = [1, 1]} : vector<20x64xf32> to vector<20x1xf32>
    %cst_33 = arith.constant 0.000000e+00 : f32
    %213 = vector.shape_cast %212 : vector<20x1xf32> to vector<20x1xf32>
    %214 = vector.broadcast %213 : vector<20x1xf32> to vector<20x20xf32>
    %215 = vector.broadcast %cst_33 : f32 to vector<20x20xf32>
    %216 = arith.select %211, %214, %215 : vector<20x20xi1>, vector<20x20xf32>
    %217 = vector.extract_strided_slice %11 {offsets = [0, 20], sizes = [20, 1], strides = [1, 1]} : vector<20x64xi32> to vector<20x1xi32>
    %218 = vector.broadcast %217 : vector<20x1xi32> to vector<20x20xi32>
    %219 = vector.broadcast %17 : vector<1x20xi32> to vector<20x20xi32>
    %220 = arith.cmpi eq, %218, %219 : vector<20x20xi32>
    %221 = vector.extract_strided_slice %13 {offsets = [0, 20], sizes = [20, 1], strides = [1, 1]} : vector<20x64xf32> to vector<20x1xf32>
    %cst_34 = arith.constant 0.000000e+00 : f32
    %222 = vector.shape_cast %221 : vector<20x1xf32> to vector<20x1xf32>
    %223 = vector.broadcast %222 : vector<20x1xf32> to vector<20x20xf32>
    %224 = vector.broadcast %cst_34 : f32 to vector<20x20xf32>
    %225 = arith.select %220, %223, %224 : vector<20x20xi1>, vector<20x20xf32>
    %226 = vector.extract_strided_slice %11 {offsets = [0, 21], sizes = [20, 1], strides = [1, 1]} : vector<20x64xi32> to vector<20x1xi32>
    %227 = vector.broadcast %226 : vector<20x1xi32> to vector<20x20xi32>
    %228 = vector.broadcast %17 : vector<1x20xi32> to vector<20x20xi32>
    %229 = arith.cmpi eq, %227, %228 : vector<20x20xi32>
    %230 = vector.extract_strided_slice %13 {offsets = [0, 21], sizes = [20, 1], strides = [1, 1]} : vector<20x64xf32> to vector<20x1xf32>
    %cst_35 = arith.constant 0.000000e+00 : f32
    %231 = vector.shape_cast %230 : vector<20x1xf32> to vector<20x1xf32>
    %232 = vector.broadcast %231 : vector<20x1xf32> to vector<20x20xf32>
    %233 = vector.broadcast %cst_35 : f32 to vector<20x20xf32>
    %234 = arith.select %229, %232, %233 : vector<20x20xi1>, vector<20x20xf32>
    %235 = vector.extract_strided_slice %11 {offsets = [0, 22], sizes = [20, 1], strides = [1, 1]} : vector<20x64xi32> to vector<20x1xi32>
    %236 = vector.broadcast %235 : vector<20x1xi32> to vector<20x20xi32>
    %237 = vector.broadcast %17 : vector<1x20xi32> to vector<20x20xi32>
    %238 = arith.cmpi eq, %236, %237 : vector<20x20xi32>
    %239 = vector.extract_strided_slice %13 {offsets = [0, 22], sizes = [20, 1], strides = [1, 1]} : vector<20x64xf32> to vector<20x1xf32>
    %cst_36 = arith.constant 0.000000e+00 : f32
    %240 = vector.shape_cast %239 : vector<20x1xf32> to vector<20x1xf32>
    %241 = vector.broadcast %240 : vector<20x1xf32> to vector<20x20xf32>
    %242 = vector.broadcast %cst_36 : f32 to vector<20x20xf32>
    %243 = arith.select %238, %241, %242 : vector<20x20xi1>, vector<20x20xf32>
    %244 = vector.extract_strided_slice %11 {offsets = [0, 23], sizes = [20, 1], strides = [1, 1]} : vector<20x64xi32> to vector<20x1xi32>
    %245 = vector.broadcast %244 : vector<20x1xi32> to vector<20x20xi32>
    %246 = vector.broadcast %17 : vector<1x20xi32> to vector<20x20xi32>
    %247 = arith.cmpi eq, %245, %246 : vector<20x20xi32>
    %248 = vector.extract_strided_slice %13 {offsets = [0, 23], sizes = [20, 1], strides = [1, 1]} : vector<20x64xf32> to vector<20x1xf32>
    %cst_37 = arith.constant 0.000000e+00 : f32
    %249 = vector.shape_cast %248 : vector<20x1xf32> to vector<20x1xf32>
    %250 = vector.broadcast %249 : vector<20x1xf32> to vector<20x20xf32>
    %251 = vector.broadcast %cst_37 : f32 to vector<20x20xf32>
    %252 = arith.select %247, %250, %251 : vector<20x20xi1>, vector<20x20xf32>
    %253 = vector.extract_strided_slice %11 {offsets = [0, 24], sizes = [20, 1], strides = [1, 1]} : vector<20x64xi32> to vector<20x1xi32>
    %254 = vector.broadcast %253 : vector<20x1xi32> to vector<20x20xi32>
    %255 = vector.broadcast %17 : vector<1x20xi32> to vector<20x20xi32>
    %256 = arith.cmpi eq, %254, %255 : vector<20x20xi32>
    %257 = vector.extract_strided_slice %13 {offsets = [0, 24], sizes = [20, 1], strides = [1, 1]} : vector<20x64xf32> to vector<20x1xf32>
    %cst_38 = arith.constant 0.000000e+00 : f32
    %258 = vector.shape_cast %257 : vector<20x1xf32> to vector<20x1xf32>
    %259 = vector.broadcast %258 : vector<20x1xf32> to vector<20x20xf32>
    %260 = vector.broadcast %cst_38 : f32 to vector<20x20xf32>
    %261 = arith.select %256, %259, %260 : vector<20x20xi1>, vector<20x20xf32>
    %262 = vector.extract_strided_slice %11 {offsets = [0, 25], sizes = [20, 1], strides = [1, 1]} : vector<20x64xi32> to vector<20x1xi32>
    %263 = vector.broadcast %262 : vector<20x1xi32> to vector<20x20xi32>
    %264 = vector.broadcast %17 : vector<1x20xi32> to vector<20x20xi32>
    %265 = arith.cmpi eq, %263, %264 : vector<20x20xi32>
    %266 = vector.extract_strided_slice %13 {offsets = [0, 25], sizes = [20, 1], strides = [1, 1]} : vector<20x64xf32> to vector<20x1xf32>
    %cst_39 = arith.constant 0.000000e+00 : f32
    %267 = vector.shape_cast %266 : vector<20x1xf32> to vector<20x1xf32>
    %268 = vector.broadcast %267 : vector<20x1xf32> to vector<20x20xf32>
    %269 = vector.broadcast %cst_39 : f32 to vector<20x20xf32>
    %270 = arith.select %265, %268, %269 : vector<20x20xi1>, vector<20x20xf32>
    %271 = vector.extract_strided_slice %11 {offsets = [0, 26], sizes = [20, 1], strides = [1, 1]} : vector<20x64xi32> to vector<20x1xi32>
    %272 = vector.broadcast %271 : vector<20x1xi32> to vector<20x20xi32>
    %273 = vector.broadcast %17 : vector<1x20xi32> to vector<20x20xi32>
    %274 = arith.cmpi eq, %272, %273 : vector<20x20xi32>
    %275 = vector.extract_strided_slice %13 {offsets = [0, 26], sizes = [20, 1], strides = [1, 1]} : vector<20x64xf32> to vector<20x1xf32>
    %cst_40 = arith.constant 0.000000e+00 : f32
    %276 = vector.shape_cast %275 : vector<20x1xf32> to vector<20x1xf32>
    %277 = vector.broadcast %276 : vector<20x1xf32> to vector<20x20xf32>
    %278 = vector.broadcast %cst_40 : f32 to vector<20x20xf32>
    %279 = arith.select %274, %277, %278 : vector<20x20xi1>, vector<20x20xf32>
    %280 = vector.extract_strided_slice %11 {offsets = [0, 27], sizes = [20, 1], strides = [1, 1]} : vector<20x64xi32> to vector<20x1xi32>
    %281 = vector.broadcast %280 : vector<20x1xi32> to vector<20x20xi32>
    %282 = vector.broadcast %17 : vector<1x20xi32> to vector<20x20xi32>
    %283 = arith.cmpi eq, %281, %282 : vector<20x20xi32>
    %284 = vector.extract_strided_slice %13 {offsets = [0, 27], sizes = [20, 1], strides = [1, 1]} : vector<20x64xf32> to vector<20x1xf32>
    %cst_41 = arith.constant 0.000000e+00 : f32
    %285 = vector.shape_cast %284 : vector<20x1xf32> to vector<20x1xf32>
    %286 = vector.broadcast %285 : vector<20x1xf32> to vector<20x20xf32>
    %287 = vector.broadcast %cst_41 : f32 to vector<20x20xf32>
    %288 = arith.select %283, %286, %287 : vector<20x20xi1>, vector<20x20xf32>
    %289 = vector.extract_strided_slice %11 {offsets = [0, 28], sizes = [20, 1], strides = [1, 1]} : vector<20x64xi32> to vector<20x1xi32>
    %290 = vector.broadcast %289 : vector<20x1xi32> to vector<20x20xi32>
    %291 = vector.broadcast %17 : vector<1x20xi32> to vector<20x20xi32>
    %292 = arith.cmpi eq, %290, %291 : vector<20x20xi32>
    %293 = vector.extract_strided_slice %13 {offsets = [0, 28], sizes = [20, 1], strides = [1, 1]} : vector<20x64xf32> to vector<20x1xf32>
    %cst_42 = arith.constant 0.000000e+00 : f32
    %294 = vector.shape_cast %293 : vector<20x1xf32> to vector<20x1xf32>
    %295 = vector.broadcast %294 : vector<20x1xf32> to vector<20x20xf32>
    %296 = vector.broadcast %cst_42 : f32 to vector<20x20xf32>
    %297 = arith.select %292, %295, %296 : vector<20x20xi1>, vector<20x20xf32>
    %298 = vector.extract_strided_slice %11 {offsets = [0, 29], sizes = [20, 1], strides = [1, 1]} : vector<20x64xi32> to vector<20x1xi32>
    %299 = vector.broadcast %298 : vector<20x1xi32> to vector<20x20xi32>
    %300 = vector.broadcast %17 : vector<1x20xi32> to vector<20x20xi32>
    %301 = arith.cmpi eq, %299, %300 : vector<20x20xi32>
    %302 = vector.extract_strided_slice %13 {offsets = [0, 29], sizes = [20, 1], strides = [1, 1]} : vector<20x64xf32> to vector<20x1xf32>
    %cst_43 = arith.constant 0.000000e+00 : f32
    %303 = vector.shape_cast %302 : vector<20x1xf32> to vector<20x1xf32>
    %304 = vector.broadcast %303 : vector<20x1xf32> to vector<20x20xf32>
    %305 = vector.broadcast %cst_43 : f32 to vector<20x20xf32>
    %306 = arith.select %301, %304, %305 : vector<20x20xi1>, vector<20x20xf32>
    %307 = vector.extract_strided_slice %11 {offsets = [0, 30], sizes = [20, 1], strides = [1, 1]} : vector<20x64xi32> to vector<20x1xi32>
    %308 = vector.broadcast %307 : vector<20x1xi32> to vector<20x20xi32>
    %309 = vector.broadcast %17 : vector<1x20xi32> to vector<20x20xi32>
    %310 = arith.cmpi eq, %308, %309 : vector<20x20xi32>
    %311 = vector.extract_strided_slice %13 {offsets = [0, 30], sizes = [20, 1], strides = [1, 1]} : vector<20x64xf32> to vector<20x1xf32>
    %cst_44 = arith.constant 0.000000e+00 : f32
    %312 = vector.shape_cast %311 : vector<20x1xf32> to vector<20x1xf32>
    %313 = vector.broadcast %312 : vector<20x1xf32> to vector<20x20xf32>
    %314 = vector.broadcast %cst_44 : f32 to vector<20x20xf32>
    %315 = arith.select %310, %313, %314 : vector<20x20xi1>, vector<20x20xf32>
    %316 = vector.extract_strided_slice %11 {offsets = [0, 31], sizes = [20, 1], strides = [1, 1]} : vector<20x64xi32> to vector<20x1xi32>
    %317 = vector.broadcast %316 : vector<20x1xi32> to vector<20x20xi32>
    %318 = vector.broadcast %17 : vector<1x20xi32> to vector<20x20xi32>
    %319 = arith.cmpi eq, %317, %318 : vector<20x20xi32>
    %320 = vector.extract_strided_slice %13 {offsets = [0, 31], sizes = [20, 1], strides = [1, 1]} : vector<20x64xf32> to vector<20x1xf32>
    %cst_45 = arith.constant 0.000000e+00 : f32
    %321 = vector.shape_cast %320 : vector<20x1xf32> to vector<20x1xf32>
    %322 = vector.broadcast %321 : vector<20x1xf32> to vector<20x20xf32>
    %323 = vector.broadcast %cst_45 : f32 to vector<20x20xf32>
    %324 = arith.select %319, %322, %323 : vector<20x20xi1>, vector<20x20xf32>
    %325 = arith.addf %189, %198 : vector<20x20xf32>
    %326 = arith.addf %207, %216 : vector<20x20xf32>
    %327 = arith.addf %225, %234 : vector<20x20xf32>
    %328 = arith.addf %243, %252 : vector<20x20xf32>
    %329 = arith.addf %261, %270 : vector<20x20xf32>
    %330 = arith.addf %279, %288 : vector<20x20xf32>
    %331 = arith.addf %297, %306 : vector<20x20xf32>
    %332 = arith.addf %315, %324 : vector<20x20xf32>
    %333 = arith.addf %325, %326 : vector<20x20xf32>
    %334 = arith.addf %327, %328 : vector<20x20xf32>
    %335 = arith.addf %329, %330 : vector<20x20xf32>
    %336 = arith.addf %331, %332 : vector<20x20xf32>
    %337 = arith.addf %333, %334 : vector<20x20xf32>
    %338 = arith.addf %335, %336 : vector<20x20xf32>
    %339 = arith.addf %337, %338 : vector<20x20xf32>
    %340 = vector.extract_strided_slice %9 {offsets = [0, 8], sizes = [20, 8], strides = [1, 1]} : vector<20x32xf32> to vector<20x8xf32>
    %341 = arith.truncf %339 : vector<20x20xf32> to vector<20x20xbf16>
    %342 = arith.truncf %340 : vector<20x8xf32> to vector<20x8xbf16>
    %cst_46 = arith.constant dense<0.000000e+00> : vector<20x8xf32>
    %343 = tpu.matmul %341, %342, %cst_46 {dimension_numbers = #tpu.dot_dimension_numbers<[1], [0], [0], [1], [0, 0, 1, 1], [], []>} : vector<20x20xbf16>, vector<20x8xbf16>, vector<20x8xf32> -> vector<20x8xf32>
    %344 = vector.extract_strided_slice %11 {offsets = [0, 32], sizes = [20, 1], strides = [1, 1]} : vector<20x64xi32> to vector<20x1xi32>
    %345 = vector.broadcast %344 : vector<20x1xi32> to vector<20x20xi32>
    %346 = vector.broadcast %17 : vector<1x20xi32> to vector<20x20xi32>
    %347 = arith.cmpi eq, %345, %346 : vector<20x20xi32>
    %348 = vector.extract_strided_slice %13 {offsets = [0, 32], sizes = [20, 1], strides = [1, 1]} : vector<20x64xf32> to vector<20x1xf32>
    %cst_47 = arith.constant 0.000000e+00 : f32
    %349 = vector.shape_cast %348 : vector<20x1xf32> to vector<20x1xf32>
    %350 = vector.broadcast %349 : vector<20x1xf32> to vector<20x20xf32>
    %351 = vector.broadcast %cst_47 : f32 to vector<20x20xf32>
    %352 = arith.select %347, %350, %351 : vector<20x20xi1>, vector<20x20xf32>
    %353 = vector.extract_strided_slice %11 {offsets = [0, 33], sizes = [20, 1], strides = [1, 1]} : vector<20x64xi32> to vector<20x1xi32>
    %354 = vector.broadcast %353 : vector<20x1xi32> to vector<20x20xi32>
    %355 = vector.broadcast %17 : vector<1x20xi32> to vector<20x20xi32>
    %356 = arith.cmpi eq, %354, %355 : vector<20x20xi32>
    %357 = vector.extract_strided_slice %13 {offsets = [0, 33], sizes = [20, 1], strides = [1, 1]} : vector<20x64xf32> to vector<20x1xf32>
    %cst_48 = arith.constant 0.000000e+00 : f32
    %358 = vector.shape_cast %357 : vector<20x1xf32> to vector<20x1xf32>
    %359 = vector.broadcast %358 : vector<20x1xf32> to vector<20x20xf32>
    %360 = vector.broadcast %cst_48 : f32 to vector<20x20xf32>
    %361 = arith.select %356, %359, %360 : vector<20x20xi1>, vector<20x20xf32>
    %362 = vector.extract_strided_slice %11 {offsets = [0, 34], sizes = [20, 1], strides = [1, 1]} : vector<20x64xi32> to vector<20x1xi32>
    %363 = vector.broadcast %362 : vector<20x1xi32> to vector<20x20xi32>
    %364 = vector.broadcast %17 : vector<1x20xi32> to vector<20x20xi32>
    %365 = arith.cmpi eq, %363, %364 : vector<20x20xi32>
    %366 = vector.extract_strided_slice %13 {offsets = [0, 34], sizes = [20, 1], strides = [1, 1]} : vector<20x64xf32> to vector<20x1xf32>
    %cst_49 = arith.constant 0.000000e+00 : f32
    %367 = vector.shape_cast %366 : vector<20x1xf32> to vector<20x1xf32>
    %368 = vector.broadcast %367 : vector<20x1xf32> to vector<20x20xf32>
    %369 = vector.broadcast %cst_49 : f32 to vector<20x20xf32>
    %370 = arith.select %365, %368, %369 : vector<20x20xi1>, vector<20x20xf32>
    %371 = vector.extract_strided_slice %11 {offsets = [0, 35], sizes = [20, 1], strides = [1, 1]} : vector<20x64xi32> to vector<20x1xi32>
    %372 = vector.broadcast %371 : vector<20x1xi32> to vector<20x20xi32>
    %373 = vector.broadcast %17 : vector<1x20xi32> to vector<20x20xi32>
    %374 = arith.cmpi eq, %372, %373 : vector<20x20xi32>
    %375 = vector.extract_strided_slice %13 {offsets = [0, 35], sizes = [20, 1], strides = [1, 1]} : vector<20x64xf32> to vector<20x1xf32>
    %cst_50 = arith.constant 0.000000e+00 : f32
    %376 = vector.shape_cast %375 : vector<20x1xf32> to vector<20x1xf32>
    %377 = vector.broadcast %376 : vector<20x1xf32> to vector<20x20xf32>
    %378 = vector.broadcast %cst_50 : f32 to vector<20x20xf32>
    %379 = arith.select %374, %377, %378 : vector<20x20xi1>, vector<20x20xf32>
    %380 = vector.extract_strided_slice %11 {offsets = [0, 36], sizes = [20, 1], strides = [1, 1]} : vector<20x64xi32> to vector<20x1xi32>
    %381 = vector.broadcast %380 : vector<20x1xi32> to vector<20x20xi32>
    %382 = vector.broadcast %17 : vector<1x20xi32> to vector<20x20xi32>
    %383 = arith.cmpi eq, %381, %382 : vector<20x20xi32>
    %384 = vector.extract_strided_slice %13 {offsets = [0, 36], sizes = [20, 1], strides = [1, 1]} : vector<20x64xf32> to vector<20x1xf32>
    %cst_51 = arith.constant 0.000000e+00 : f32
    %385 = vector.shape_cast %384 : vector<20x1xf32> to vector<20x1xf32>
    %386 = vector.broadcast %385 : vector<20x1xf32> to vector<20x20xf32>
    %387 = vector.broadcast %cst_51 : f32 to vector<20x20xf32>
    %388 = arith.select %383, %386, %387 : vector<20x20xi1>, vector<20x20xf32>
    %389 = vector.extract_strided_slice %11 {offsets = [0, 37], sizes = [20, 1], strides = [1, 1]} : vector<20x64xi32> to vector<20x1xi32>
    %390 = vector.broadcast %389 : vector<20x1xi32> to vector<20x20xi32>
    %391 = vector.broadcast %17 : vector<1x20xi32> to vector<20x20xi32>
    %392 = arith.cmpi eq, %390, %391 : vector<20x20xi32>
    %393 = vector.extract_strided_slice %13 {offsets = [0, 37], sizes = [20, 1], strides = [1, 1]} : vector<20x64xf32> to vector<20x1xf32>
    %cst_52 = arith.constant 0.000000e+00 : f32
    %394 = vector.shape_cast %393 : vector<20x1xf32> to vector<20x1xf32>
    %395 = vector.broadcast %394 : vector<20x1xf32> to vector<20x20xf32>
    %396 = vector.broadcast %cst_52 : f32 to vector<20x20xf32>
    %397 = arith.select %392, %395, %396 : vector<20x20xi1>, vector<20x20xf32>
    %398 = vector.extract_strided_slice %11 {offsets = [0, 38], sizes = [20, 1], strides = [1, 1]} : vector<20x64xi32> to vector<20x1xi32>
    %399 = vector.broadcast %398 : vector<20x1xi32> to vector<20x20xi32>
    %400 = vector.broadcast %17 : vector<1x20xi32> to vector<20x20xi32>
    %401 = arith.cmpi eq, %399, %400 : vector<20x20xi32>
    %402 = vector.extract_strided_slice %13 {offsets = [0, 38], sizes = [20, 1], strides = [1, 1]} : vector<20x64xf32> to vector<20x1xf32>
    %cst_53 = arith.constant 0.000000e+00 : f32
    %403 = vector.shape_cast %402 : vector<20x1xf32> to vector<20x1xf32>
    %404 = vector.broadcast %403 : vector<20x1xf32> to vector<20x20xf32>
    %405 = vector.broadcast %cst_53 : f32 to vector<20x20xf32>
    %406 = arith.select %401, %404, %405 : vector<20x20xi1>, vector<20x20xf32>
    %407 = vector.extract_strided_slice %11 {offsets = [0, 39], sizes = [20, 1], strides = [1, 1]} : vector<20x64xi32> to vector<20x1xi32>
    %408 = vector.broadcast %407 : vector<20x1xi32> to vector<20x20xi32>
    %409 = vector.broadcast %17 : vector<1x20xi32> to vector<20x20xi32>
    %410 = arith.cmpi eq, %408, %409 : vector<20x20xi32>
    %411 = vector.extract_strided_slice %13 {offsets = [0, 39], sizes = [20, 1], strides = [1, 1]} : vector<20x64xf32> to vector<20x1xf32>
    %cst_54 = arith.constant 0.000000e+00 : f32
    %412 = vector.shape_cast %411 : vector<20x1xf32> to vector<20x1xf32>
    %413 = vector.broadcast %412 : vector<20x1xf32> to vector<20x20xf32>
    %414 = vector.broadcast %cst_54 : f32 to vector<20x20xf32>
    %415 = arith.select %410, %413, %414 : vector<20x20xi1>, vector<20x20xf32>
    %416 = vector.extract_strided_slice %11 {offsets = [0, 40], sizes = [20, 1], strides = [1, 1]} : vector<20x64xi32> to vector<20x1xi32>
    %417 = vector.broadcast %416 : vector<20x1xi32> to vector<20x20xi32>
    %418 = vector.broadcast %17 : vector<1x20xi32> to vector<20x20xi32>
    %419 = arith.cmpi eq, %417, %418 : vector<20x20xi32>
    %420 = vector.extract_strided_slice %13 {offsets = [0, 40], sizes = [20, 1], strides = [1, 1]} : vector<20x64xf32> to vector<20x1xf32>
    %cst_55 = arith.constant 0.000000e+00 : f32
    %421 = vector.shape_cast %420 : vector<20x1xf32> to vector<20x1xf32>
    %422 = vector.broadcast %421 : vector<20x1xf32> to vector<20x20xf32>
    %423 = vector.broadcast %cst_55 : f32 to vector<20x20xf32>
    %424 = arith.select %419, %422, %423 : vector<20x20xi1>, vector<20x20xf32>
    %425 = vector.extract_strided_slice %11 {offsets = [0, 41], sizes = [20, 1], strides = [1, 1]} : vector<20x64xi32> to vector<20x1xi32>
    %426 = vector.broadcast %425 : vector<20x1xi32> to vector<20x20xi32>
    %427 = vector.broadcast %17 : vector<1x20xi32> to vector<20x20xi32>
    %428 = arith.cmpi eq, %426, %427 : vector<20x20xi32>
    %429 = vector.extract_strided_slice %13 {offsets = [0, 41], sizes = [20, 1], strides = [1, 1]} : vector<20x64xf32> to vector<20x1xf32>
    %cst_56 = arith.constant 0.000000e+00 : f32
    %430 = vector.shape_cast %429 : vector<20x1xf32> to vector<20x1xf32>
    %431 = vector.broadcast %430 : vector<20x1xf32> to vector<20x20xf32>
    %432 = vector.broadcast %cst_56 : f32 to vector<20x20xf32>
    %433 = arith.select %428, %431, %432 : vector<20x20xi1>, vector<20x20xf32>
    %434 = vector.extract_strided_slice %11 {offsets = [0, 42], sizes = [20, 1], strides = [1, 1]} : vector<20x64xi32> to vector<20x1xi32>
    %435 = vector.broadcast %434 : vector<20x1xi32> to vector<20x20xi32>
    %436 = vector.broadcast %17 : vector<1x20xi32> to vector<20x20xi32>
    %437 = arith.cmpi eq, %435, %436 : vector<20x20xi32>
    %438 = vector.extract_strided_slice %13 {offsets = [0, 42], sizes = [20, 1], strides = [1, 1]} : vector<20x64xf32> to vector<20x1xf32>
    %cst_57 = arith.constant 0.000000e+00 : f32
    %439 = vector.shape_cast %438 : vector<20x1xf32> to vector<20x1xf32>
    %440 = vector.broadcast %439 : vector<20x1xf32> to vector<20x20xf32>
    %441 = vector.broadcast %cst_57 : f32 to vector<20x20xf32>
    %442 = arith.select %437, %440, %441 : vector<20x20xi1>, vector<20x20xf32>
    %443 = vector.extract_strided_slice %11 {offsets = [0, 43], sizes = [20, 1], strides = [1, 1]} : vector<20x64xi32> to vector<20x1xi32>
    %444 = vector.broadcast %443 : vector<20x1xi32> to vector<20x20xi32>
    %445 = vector.broadcast %17 : vector<1x20xi32> to vector<20x20xi32>
    %446 = arith.cmpi eq, %444, %445 : vector<20x20xi32>
    %447 = vector.extract_strided_slice %13 {offsets = [0, 43], sizes = [20, 1], strides = [1, 1]} : vector<20x64xf32> to vector<20x1xf32>
    %cst_58 = arith.constant 0.000000e+00 : f32
    %448 = vector.shape_cast %447 : vector<20x1xf32> to vector<20x1xf32>
    %449 = vector.broadcast %448 : vector<20x1xf32> to vector<20x20xf32>
    %450 = vector.broadcast %cst_58 : f32 to vector<20x20xf32>
    %451 = arith.select %446, %449, %450 : vector<20x20xi1>, vector<20x20xf32>
    %452 = vector.extract_strided_slice %11 {offsets = [0, 44], sizes = [20, 1], strides = [1, 1]} : vector<20x64xi32> to vector<20x1xi32>
    %453 = vector.broadcast %452 : vector<20x1xi32> to vector<20x20xi32>
    %454 = vector.broadcast %17 : vector<1x20xi32> to vector<20x20xi32>
    %455 = arith.cmpi eq, %453, %454 : vector<20x20xi32>
    %456 = vector.extract_strided_slice %13 {offsets = [0, 44], sizes = [20, 1], strides = [1, 1]} : vector<20x64xf32> to vector<20x1xf32>
    %cst_59 = arith.constant 0.000000e+00 : f32
    %457 = vector.shape_cast %456 : vector<20x1xf32> to vector<20x1xf32>
    %458 = vector.broadcast %457 : vector<20x1xf32> to vector<20x20xf32>
    %459 = vector.broadcast %cst_59 : f32 to vector<20x20xf32>
    %460 = arith.select %455, %458, %459 : vector<20x20xi1>, vector<20x20xf32>
    %461 = vector.extract_strided_slice %11 {offsets = [0, 45], sizes = [20, 1], strides = [1, 1]} : vector<20x64xi32> to vector<20x1xi32>
    %462 = vector.broadcast %461 : vector<20x1xi32> to vector<20x20xi32>
    %463 = vector.broadcast %17 : vector<1x20xi32> to vector<20x20xi32>
    %464 = arith.cmpi eq, %462, %463 : vector<20x20xi32>
    %465 = vector.extract_strided_slice %13 {offsets = [0, 45], sizes = [20, 1], strides = [1, 1]} : vector<20x64xf32> to vector<20x1xf32>
    %cst_60 = arith.constant 0.000000e+00 : f32
    %466 = vector.shape_cast %465 : vector<20x1xf32> to vector<20x1xf32>
    %467 = vector.broadcast %466 : vector<20x1xf32> to vector<20x20xf32>
    %468 = vector.broadcast %cst_60 : f32 to vector<20x20xf32>
    %469 = arith.select %464, %467, %468 : vector<20x20xi1>, vector<20x20xf32>
    %470 = vector.extract_strided_slice %11 {offsets = [0, 46], sizes = [20, 1], strides = [1, 1]} : vector<20x64xi32> to vector<20x1xi32>
    %471 = vector.broadcast %470 : vector<20x1xi32> to vector<20x20xi32>
    %472 = vector.broadcast %17 : vector<1x20xi32> to vector<20x20xi32>
    %473 = arith.cmpi eq, %471, %472 : vector<20x20xi32>
    %474 = vector.extract_strided_slice %13 {offsets = [0, 46], sizes = [20, 1], strides = [1, 1]} : vector<20x64xf32> to vector<20x1xf32>
    %cst_61 = arith.constant 0.000000e+00 : f32
    %475 = vector.shape_cast %474 : vector<20x1xf32> to vector<20x1xf32>
    %476 = vector.broadcast %475 : vector<20x1xf32> to vector<20x20xf32>
    %477 = vector.broadcast %cst_61 : f32 to vector<20x20xf32>
    %478 = arith.select %473, %476, %477 : vector<20x20xi1>, vector<20x20xf32>
    %479 = vector.extract_strided_slice %11 {offsets = [0, 47], sizes = [20, 1], strides = [1, 1]} : vector<20x64xi32> to vector<20x1xi32>
    %480 = vector.broadcast %479 : vector<20x1xi32> to vector<20x20xi32>
    %481 = vector.broadcast %17 : vector<1x20xi32> to vector<20x20xi32>
    %482 = arith.cmpi eq, %480, %481 : vector<20x20xi32>
    %483 = vector.extract_strided_slice %13 {offsets = [0, 47], sizes = [20, 1], strides = [1, 1]} : vector<20x64xf32> to vector<20x1xf32>
    %cst_62 = arith.constant 0.000000e+00 : f32
    %484 = vector.shape_cast %483 : vector<20x1xf32> to vector<20x1xf32>
    %485 = vector.broadcast %484 : vector<20x1xf32> to vector<20x20xf32>
    %486 = vector.broadcast %cst_62 : f32 to vector<20x20xf32>
    %487 = arith.select %482, %485, %486 : vector<20x20xi1>, vector<20x20xf32>
    %488 = arith.addf %352, %361 : vector<20x20xf32>
    %489 = arith.addf %370, %379 : vector<20x20xf32>
    %490 = arith.addf %388, %397 : vector<20x20xf32>
    %491 = arith.addf %406, %415 : vector<20x20xf32>
    %492 = arith.addf %424, %433 : vector<20x20xf32>
    %493 = arith.addf %442, %451 : vector<20x20xf32>
    %494 = arith.addf %460, %469 : vector<20x20xf32>
    %495 = arith.addf %478, %487 : vector<20x20xf32>
    %496 = arith.addf %488, %489 : vector<20x20xf32>
    %497 = arith.addf %490, %491 : vector<20x20xf32>
    %498 = arith.addf %492, %493 : vector<20x20xf32>
    %499 = arith.addf %494, %495 : vector<20x20xf32>
    %500 = arith.addf %496, %497 : vector<20x20xf32>
    %501 = arith.addf %498, %499 : vector<20x20xf32>
    %502 = arith.addf %500, %501 : vector<20x20xf32>
    %503 = vector.extract_strided_slice %9 {offsets = [0, 16], sizes = [20, 8], strides = [1, 1]} : vector<20x32xf32> to vector<20x8xf32>
    %504 = arith.truncf %502 : vector<20x20xf32> to vector<20x20xbf16>
    %505 = arith.truncf %503 : vector<20x8xf32> to vector<20x8xbf16>
    %cst_63 = arith.constant dense<0.000000e+00> : vector<20x8xf32>
    %506 = tpu.matmul %504, %505, %cst_63 {dimension_numbers = #tpu.dot_dimension_numbers<[1], [0], [0], [1], [0, 0, 1, 1], [], []>} : vector<20x20xbf16>, vector<20x8xbf16>, vector<20x8xf32> -> vector<20x8xf32>
    %507 = vector.extract_strided_slice %11 {offsets = [0, 48], sizes = [20, 1], strides = [1, 1]} : vector<20x64xi32> to vector<20x1xi32>
    %508 = vector.broadcast %507 : vector<20x1xi32> to vector<20x20xi32>
    %509 = vector.broadcast %17 : vector<1x20xi32> to vector<20x20xi32>
    %510 = arith.cmpi eq, %508, %509 : vector<20x20xi32>
    %511 = vector.extract_strided_slice %13 {offsets = [0, 48], sizes = [20, 1], strides = [1, 1]} : vector<20x64xf32> to vector<20x1xf32>
    %cst_64 = arith.constant 0.000000e+00 : f32
    %512 = vector.shape_cast %511 : vector<20x1xf32> to vector<20x1xf32>
    %513 = vector.broadcast %512 : vector<20x1xf32> to vector<20x20xf32>
    %514 = vector.broadcast %cst_64 : f32 to vector<20x20xf32>
    %515 = arith.select %510, %513, %514 : vector<20x20xi1>, vector<20x20xf32>
    %516 = vector.extract_strided_slice %11 {offsets = [0, 49], sizes = [20, 1], strides = [1, 1]} : vector<20x64xi32> to vector<20x1xi32>
    %517 = vector.broadcast %516 : vector<20x1xi32> to vector<20x20xi32>
    %518 = vector.broadcast %17 : vector<1x20xi32> to vector<20x20xi32>
    %519 = arith.cmpi eq, %517, %518 : vector<20x20xi32>
    %520 = vector.extract_strided_slice %13 {offsets = [0, 49], sizes = [20, 1], strides = [1, 1]} : vector<20x64xf32> to vector<20x1xf32>
    %cst_65 = arith.constant 0.000000e+00 : f32
    %521 = vector.shape_cast %520 : vector<20x1xf32> to vector<20x1xf32>
    %522 = vector.broadcast %521 : vector<20x1xf32> to vector<20x20xf32>
    %523 = vector.broadcast %cst_65 : f32 to vector<20x20xf32>
    %524 = arith.select %519, %522, %523 : vector<20x20xi1>, vector<20x20xf32>
    %525 = vector.extract_strided_slice %11 {offsets = [0, 50], sizes = [20, 1], strides = [1, 1]} : vector<20x64xi32> to vector<20x1xi32>
    %526 = vector.broadcast %525 : vector<20x1xi32> to vector<20x20xi32>
    %527 = vector.broadcast %17 : vector<1x20xi32> to vector<20x20xi32>
    %528 = arith.cmpi eq, %526, %527 : vector<20x20xi32>
    %529 = vector.extract_strided_slice %13 {offsets = [0, 50], sizes = [20, 1], strides = [1, 1]} : vector<20x64xf32> to vector<20x1xf32>
    %cst_66 = arith.constant 0.000000e+00 : f32
    %530 = vector.shape_cast %529 : vector<20x1xf32> to vector<20x1xf32>
    %531 = vector.broadcast %530 : vector<20x1xf32> to vector<20x20xf32>
    %532 = vector.broadcast %cst_66 : f32 to vector<20x20xf32>
    %533 = arith.select %528, %531, %532 : vector<20x20xi1>, vector<20x20xf32>
    %534 = vector.extract_strided_slice %11 {offsets = [0, 51], sizes = [20, 1], strides = [1, 1]} : vector<20x64xi32> to vector<20x1xi32>
    %535 = vector.broadcast %534 : vector<20x1xi32> to vector<20x20xi32>
    %536 = vector.broadcast %17 : vector<1x20xi32> to vector<20x20xi32>
    %537 = arith.cmpi eq, %535, %536 : vector<20x20xi32>
    %538 = vector.extract_strided_slice %13 {offsets = [0, 51], sizes = [20, 1], strides = [1, 1]} : vector<20x64xf32> to vector<20x1xf32>
    %cst_67 = arith.constant 0.000000e+00 : f32
    %539 = vector.shape_cast %538 : vector<20x1xf32> to vector<20x1xf32>
    %540 = vector.broadcast %539 : vector<20x1xf32> to vector<20x20xf32>
    %541 = vector.broadcast %cst_67 : f32 to vector<20x20xf32>
    %542 = arith.select %537, %540, %541 : vector<20x20xi1>, vector<20x20xf32>
    %543 = vector.extract_strided_slice %11 {offsets = [0, 52], sizes = [20, 1], strides = [1, 1]} : vector<20x64xi32> to vector<20x1xi32>
    %544 = vector.broadcast %543 : vector<20x1xi32> to vector<20x20xi32>
    %545 = vector.broadcast %17 : vector<1x20xi32> to vector<20x20xi32>
    %546 = arith.cmpi eq, %544, %545 : vector<20x20xi32>
    %547 = vector.extract_strided_slice %13 {offsets = [0, 52], sizes = [20, 1], strides = [1, 1]} : vector<20x64xf32> to vector<20x1xf32>
    %cst_68 = arith.constant 0.000000e+00 : f32
    %548 = vector.shape_cast %547 : vector<20x1xf32> to vector<20x1xf32>
    %549 = vector.broadcast %548 : vector<20x1xf32> to vector<20x20xf32>
    %550 = vector.broadcast %cst_68 : f32 to vector<20x20xf32>
    %551 = arith.select %546, %549, %550 : vector<20x20xi1>, vector<20x20xf32>
    %552 = vector.extract_strided_slice %11 {offsets = [0, 53], sizes = [20, 1], strides = [1, 1]} : vector<20x64xi32> to vector<20x1xi32>
    %553 = vector.broadcast %552 : vector<20x1xi32> to vector<20x20xi32>
    %554 = vector.broadcast %17 : vector<1x20xi32> to vector<20x20xi32>
    %555 = arith.cmpi eq, %553, %554 : vector<20x20xi32>
    %556 = vector.extract_strided_slice %13 {offsets = [0, 53], sizes = [20, 1], strides = [1, 1]} : vector<20x64xf32> to vector<20x1xf32>
    %cst_69 = arith.constant 0.000000e+00 : f32
    %557 = vector.shape_cast %556 : vector<20x1xf32> to vector<20x1xf32>
    %558 = vector.broadcast %557 : vector<20x1xf32> to vector<20x20xf32>
    %559 = vector.broadcast %cst_69 : f32 to vector<20x20xf32>
    %560 = arith.select %555, %558, %559 : vector<20x20xi1>, vector<20x20xf32>
    %561 = vector.extract_strided_slice %11 {offsets = [0, 54], sizes = [20, 1], strides = [1, 1]} : vector<20x64xi32> to vector<20x1xi32>
    %562 = vector.broadcast %561 : vector<20x1xi32> to vector<20x20xi32>
    %563 = vector.broadcast %17 : vector<1x20xi32> to vector<20x20xi32>
    %564 = arith.cmpi eq, %562, %563 : vector<20x20xi32>
    %565 = vector.extract_strided_slice %13 {offsets = [0, 54], sizes = [20, 1], strides = [1, 1]} : vector<20x64xf32> to vector<20x1xf32>
    %cst_70 = arith.constant 0.000000e+00 : f32
    %566 = vector.shape_cast %565 : vector<20x1xf32> to vector<20x1xf32>
    %567 = vector.broadcast %566 : vector<20x1xf32> to vector<20x20xf32>
    %568 = vector.broadcast %cst_70 : f32 to vector<20x20xf32>
    %569 = arith.select %564, %567, %568 : vector<20x20xi1>, vector<20x20xf32>
    %570 = vector.extract_strided_slice %11 {offsets = [0, 55], sizes = [20, 1], strides = [1, 1]} : vector<20x64xi32> to vector<20x1xi32>
    %571 = vector.broadcast %570 : vector<20x1xi32> to vector<20x20xi32>
    %572 = vector.broadcast %17 : vector<1x20xi32> to vector<20x20xi32>
    %573 = arith.cmpi eq, %571, %572 : vector<20x20xi32>
    %574 = vector.extract_strided_slice %13 {offsets = [0, 55], sizes = [20, 1], strides = [1, 1]} : vector<20x64xf32> to vector<20x1xf32>
    %cst_71 = arith.constant 0.000000e+00 : f32
    %575 = vector.shape_cast %574 : vector<20x1xf32> to vector<20x1xf32>
    %576 = vector.broadcast %575 : vector<20x1xf32> to vector<20x20xf32>
    %577 = vector.broadcast %cst_71 : f32 to vector<20x20xf32>
    %578 = arith.select %573, %576, %577 : vector<20x20xi1>, vector<20x20xf32>
    %579 = vector.extract_strided_slice %11 {offsets = [0, 56], sizes = [20, 1], strides = [1, 1]} : vector<20x64xi32> to vector<20x1xi32>
    %580 = vector.broadcast %579 : vector<20x1xi32> to vector<20x20xi32>
    %581 = vector.broadcast %17 : vector<1x20xi32> to vector<20x20xi32>
    %582 = arith.cmpi eq, %580, %581 : vector<20x20xi32>
    %583 = vector.extract_strided_slice %13 {offsets = [0, 56], sizes = [20, 1], strides = [1, 1]} : vector<20x64xf32> to vector<20x1xf32>
    %cst_72 = arith.constant 0.000000e+00 : f32
    %584 = vector.shape_cast %583 : vector<20x1xf32> to vector<20x1xf32>
    %585 = vector.broadcast %584 : vector<20x1xf32> to vector<20x20xf32>
    %586 = vector.broadcast %cst_72 : f32 to vector<20x20xf32>
    %587 = arith.select %582, %585, %586 : vector<20x20xi1>, vector<20x20xf32>
    %588 = vector.extract_strided_slice %11 {offsets = [0, 57], sizes = [20, 1], strides = [1, 1]} : vector<20x64xi32> to vector<20x1xi32>
    %589 = vector.broadcast %588 : vector<20x1xi32> to vector<20x20xi32>
    %590 = vector.broadcast %17 : vector<1x20xi32> to vector<20x20xi32>
    %591 = arith.cmpi eq, %589, %590 : vector<20x20xi32>
    %592 = vector.extract_strided_slice %13 {offsets = [0, 57], sizes = [20, 1], strides = [1, 1]} : vector<20x64xf32> to vector<20x1xf32>
    %cst_73 = arith.constant 0.000000e+00 : f32
    %593 = vector.shape_cast %592 : vector<20x1xf32> to vector<20x1xf32>
    %594 = vector.broadcast %593 : vector<20x1xf32> to vector<20x20xf32>
    %595 = vector.broadcast %cst_73 : f32 to vector<20x20xf32>
    %596 = arith.select %591, %594, %595 : vector<20x20xi1>, vector<20x20xf32>
    %597 = vector.extract_strided_slice %11 {offsets = [0, 58], sizes = [20, 1], strides = [1, 1]} : vector<20x64xi32> to vector<20x1xi32>
    %598 = vector.broadcast %597 : vector<20x1xi32> to vector<20x20xi32>
    %599 = vector.broadcast %17 : vector<1x20xi32> to vector<20x20xi32>
    %600 = arith.cmpi eq, %598, %599 : vector<20x20xi32>
    %601 = vector.extract_strided_slice %13 {offsets = [0, 58], sizes = [20, 1], strides = [1, 1]} : vector<20x64xf32> to vector<20x1xf32>
    %cst_74 = arith.constant 0.000000e+00 : f32
    %602 = vector.shape_cast %601 : vector<20x1xf32> to vector<20x1xf32>
    %603 = vector.broadcast %602 : vector<20x1xf32> to vector<20x20xf32>
    %604 = vector.broadcast %cst_74 : f32 to vector<20x20xf32>
    %605 = arith.select %600, %603, %604 : vector<20x20xi1>, vector<20x20xf32>
    %606 = vector.extract_strided_slice %11 {offsets = [0, 59], sizes = [20, 1], strides = [1, 1]} : vector<20x64xi32> to vector<20x1xi32>
    %607 = vector.broadcast %606 : vector<20x1xi32> to vector<20x20xi32>
    %608 = vector.broadcast %17 : vector<1x20xi32> to vector<20x20xi32>
    %609 = arith.cmpi eq, %607, %608 : vector<20x20xi32>
    %610 = vector.extract_strided_slice %13 {offsets = [0, 59], sizes = [20, 1], strides = [1, 1]} : vector<20x64xf32> to vector<20x1xf32>
    %cst_75 = arith.constant 0.000000e+00 : f32
    %611 = vector.shape_cast %610 : vector<20x1xf32> to vector<20x1xf32>
    %612 = vector.broadcast %611 : vector<20x1xf32> to vector<20x20xf32>
    %613 = vector.broadcast %cst_75 : f32 to vector<20x20xf32>
    %614 = arith.select %609, %612, %613 : vector<20x20xi1>, vector<20x20xf32>
    %615 = vector.extract_strided_slice %11 {offsets = [0, 60], sizes = [20, 1], strides = [1, 1]} : vector<20x64xi32> to vector<20x1xi32>
    %616 = vector.broadcast %615 : vector<20x1xi32> to vector<20x20xi32>
    %617 = vector.broadcast %17 : vector<1x20xi32> to vector<20x20xi32>
    %618 = arith.cmpi eq, %616, %617 : vector<20x20xi32>
    %619 = vector.extract_strided_slice %13 {offsets = [0, 60], sizes = [20, 1], strides = [1, 1]} : vector<20x64xf32> to vector<20x1xf32>
    %cst_76 = arith.constant 0.000000e+00 : f32
    %620 = vector.shape_cast %619 : vector<20x1xf32> to vector<20x1xf32>
    %621 = vector.broadcast %620 : vector<20x1xf32> to vector<20x20xf32>
    %622 = vector.broadcast %cst_76 : f32 to vector<20x20xf32>
    %623 = arith.select %618, %621, %622 : vector<20x20xi1>, vector<20x20xf32>
    %624 = vector.extract_strided_slice %11 {offsets = [0, 61], sizes = [20, 1], strides = [1, 1]} : vector<20x64xi32> to vector<20x1xi32>
    %625 = vector.broadcast %624 : vector<20x1xi32> to vector<20x20xi32>
    %626 = vector.broadcast %17 : vector<1x20xi32> to vector<20x20xi32>
    %627 = arith.cmpi eq, %625, %626 : vector<20x20xi32>
    %628 = vector.extract_strided_slice %13 {offsets = [0, 61], sizes = [20, 1], strides = [1, 1]} : vector<20x64xf32> to vector<20x1xf32>
    %cst_77 = arith.constant 0.000000e+00 : f32
    %629 = vector.shape_cast %628 : vector<20x1xf32> to vector<20x1xf32>
    %630 = vector.broadcast %629 : vector<20x1xf32> to vector<20x20xf32>
    %631 = vector.broadcast %cst_77 : f32 to vector<20x20xf32>
    %632 = arith.select %627, %630, %631 : vector<20x20xi1>, vector<20x20xf32>
    %633 = vector.extract_strided_slice %11 {offsets = [0, 62], sizes = [20, 1], strides = [1, 1]} : vector<20x64xi32> to vector<20x1xi32>
    %634 = vector.broadcast %633 : vector<20x1xi32> to vector<20x20xi32>
    %635 = vector.broadcast %17 : vector<1x20xi32> to vector<20x20xi32>
    %636 = arith.cmpi eq, %634, %635 : vector<20x20xi32>
    %637 = vector.extract_strided_slice %13 {offsets = [0, 62], sizes = [20, 1], strides = [1, 1]} : vector<20x64xf32> to vector<20x1xf32>
    %cst_78 = arith.constant 0.000000e+00 : f32
    %638 = vector.shape_cast %637 : vector<20x1xf32> to vector<20x1xf32>
    %639 = vector.broadcast %638 : vector<20x1xf32> to vector<20x20xf32>
    %640 = vector.broadcast %cst_78 : f32 to vector<20x20xf32>
    %641 = arith.select %636, %639, %640 : vector<20x20xi1>, vector<20x20xf32>
    %642 = vector.extract_strided_slice %11 {offsets = [0, 63], sizes = [20, 1], strides = [1, 1]} : vector<20x64xi32> to vector<20x1xi32>
    %643 = vector.broadcast %642 : vector<20x1xi32> to vector<20x20xi32>
    %644 = vector.broadcast %17 : vector<1x20xi32> to vector<20x20xi32>
    %645 = arith.cmpi eq, %643, %644 : vector<20x20xi32>
    %646 = vector.extract_strided_slice %13 {offsets = [0, 63], sizes = [20, 1], strides = [1, 1]} : vector<20x64xf32> to vector<20x1xf32>
    %cst_79 = arith.constant 0.000000e+00 : f32
    %647 = vector.shape_cast %646 : vector<20x1xf32> to vector<20x1xf32>
    %648 = vector.broadcast %647 : vector<20x1xf32> to vector<20x20xf32>
    %649 = vector.broadcast %cst_79 : f32 to vector<20x20xf32>
    %650 = arith.select %645, %648, %649 : vector<20x20xi1>, vector<20x20xf32>
    %651 = arith.addf %515, %524 : vector<20x20xf32>
    %652 = arith.addf %533, %542 : vector<20x20xf32>
    %653 = arith.addf %551, %560 : vector<20x20xf32>
    %654 = arith.addf %569, %578 : vector<20x20xf32>
    %655 = arith.addf %587, %596 : vector<20x20xf32>
    %656 = arith.addf %605, %614 : vector<20x20xf32>
    %657 = arith.addf %623, %632 : vector<20x20xf32>
    %658 = arith.addf %641, %650 : vector<20x20xf32>
    %659 = arith.addf %651, %652 : vector<20x20xf32>
    %660 = arith.addf %653, %654 : vector<20x20xf32>
    %661 = arith.addf %655, %656 : vector<20x20xf32>
    %662 = arith.addf %657, %658 : vector<20x20xf32>
    %663 = arith.addf %659, %660 : vector<20x20xf32>
    %664 = arith.addf %661, %662 : vector<20x20xf32>
    %665 = arith.addf %663, %664 : vector<20x20xf32>
    %666 = vector.extract_strided_slice %9 {offsets = [0, 24], sizes = [20, 8], strides = [1, 1]} : vector<20x32xf32> to vector<20x8xf32>
    %667 = arith.truncf %665 : vector<20x20xf32> to vector<20x20xbf16>
    %668 = arith.truncf %666 : vector<20x8xf32> to vector<20x8xbf16>
    %cst_80 = arith.constant dense<0.000000e+00> : vector<20x8xf32>
    %669 = tpu.matmul %667, %668, %cst_80 {dimension_numbers = #tpu.dot_dimension_numbers<[1], [0], [0], [1], [0, 0, 1, 1], [], []>} : vector<20x20xbf16>, vector<20x8xbf16>, vector<20x8xf32> -> vector<20x8xf32>
    %c0_81 = arith.constant 0 : index
    %c0_82 = arith.constant 0 : index
    %670 = vector.load %arg14[%c0_81, %c0_82] : memref<20x32xf32, #tpu.memory_space<vmem>>, vector<20x32xf32>
    %671 = tpu.concatenate %180, %343, %506, %669 in 1 : vector<20x8xf32>, vector<20x8xf32>, vector<20x8xf32>, vector<20x8xf32> -> vector<20x32xf32>
    %672 = arith.addf %670, %671 : vector<20x32xf32>
    %c0_83 = arith.constant 0 : index
    %c0_84 = arith.constant 0 : index
    %673 = vector.load %arg14[%c0_83, %c0_84] : memref<20x32xf32, #tpu.memory_space<vmem>>, vector<20x32xf32>
    tpu.vector_store %arg14[%c0_83, %c0_84], %672 {strides = array<i32>} : memref<20x32xf32, #tpu.memory_space<vmem>>, vector<20x32xf32>,
    %c0_i32_85 = arith.constant 0 : i32
    %674 = arith.cmpi eq, %arg2, %c0_i32_85 : i32
    %675 = arith.extui %674 : i1 to i32
    %c0_i32_86 = arith.constant 0 : i32
    %676 = arith.cmpi ne, %675, %c0_i32_86 : i32
    scf.if %676 {
      %c0_87 = arith.constant 0 : index
      %c0_88 = arith.constant 0 : index
      %677 = vector.load %arg14[%c0_87, %c0_88] : memref<20x32xf32, #tpu.memory_space<vmem>>, vector<20x32xf32>
      %678 = arith.truncf %677 : vector<20x32xf32> to vector<20x32xbf16>
      %c0_89 = arith.constant 0 : index
      %c0_90 = arith.constant 0 : index
      %679 = vector.load %arg9[%c0_89, %c0_90] : memref<32x32xbf16, #tpu.memory_space<vmem>>, vector<32x32xbf16>
      %cst_91 = arith.constant dense<0.000000e+00> : vector<20x32xf32>
      %680 = tpu.matmul %678, %679, %cst_91 {dimension_numbers = #tpu.dot_dimension_numbers<[1], [0], [0], [1], [0, 0, 1, 1], [], []>} : vector<20x32xbf16>, vector<32x32xbf16>, vector<20x32xf32> -> vector<20x32xf32>
      %c0_92 = arith.constant 0 : index
      %c0_93 = arith.constant 0 : index
      %681 = vector.load %arg10[%c0_92, %c0_93] : memref<1x32xf32, #tpu.memory_space<vmem>>, vector<1x32xf32>
      %682 = vector.broadcast %681 : vector<1x32xf32> to vector<20x32xf32>
      %683 = arith.addf %680, %682 : vector<20x32xf32>
      %c0_94 = arith.constant 0 : index
      %c0_95 = arith.constant 0 : index
      %c0_96 = arith.constant 0 : index
      %684 = vector.load %arg6[%c0_94, %c0_95, %c0_96] : memref<1x20x32xf32, #tpu.memory_space<vmem>>, vector<1x20x32xf32>
      %685 = vector.shape_cast %684 : vector<1x20x32xf32> to vector<20x32xf32>
      %686 = arith.addf %685, %683 : vector<20x32xf32>
      %cst_97 = arith.constant dense<0.000000e+00> : vector<20xf32>
      %687 = vector.multi_reduction <add>, %686, %cst_97 [1] : vector<20x32xf32> to vector<20xf32>
      %688 = vector.shape_cast %687 : vector<20xf32> to vector<20x1xf32>
      %cst_98 = arith.constant 3.200000e+01 : f32
      %689 = vector.broadcast %cst_98 : f32 to vector<20x1xf32>
      %690 = arith.divf %688, %689 : vector<20x1xf32>
      %691 = vector.broadcast %690 : vector<20x1xf32> to vector<20x32xf32>
      %692 = arith.subf %686, %691 : vector<20x32xf32>
      %693 = arith.mulf %692, %692 : vector<20x32xf32>
      %cst_99 = arith.constant dense<0.000000e+00> : vector<20xf32>
      %694 = vector.multi_reduction <add>, %693, %cst_99 [1] : vector<20x32xf32> to vector<20xf32>
      %695 = vector.shape_cast %694 : vector<20xf32> to vector<20x1xf32>
      %cst_100 = arith.constant 3.200000e+01 : f32
      %696 = vector.broadcast %cst_100 : f32 to vector<20x1xf32>
      %697 = arith.divf %695, %696 : vector<20x1xf32>
      %698 = vector.broadcast %690 : vector<20x1xf32> to vector<20x32xf32>
      %699 = arith.subf %686, %698 : vector<20x32xf32>
      %cst_101 = arith.constant 9.99999974E-6 : f32
      %700 = vector.broadcast %cst_101 : f32 to vector<20x1xf32>
      %701 = arith.addf %697, %700 : vector<20x1xf32>
      %702 = math.rsqrt %701 : vector<20x1xf32>
      %703 = vector.broadcast %702 : vector<20x1xf32> to vector<20x32xf32>
      %704 = arith.mulf %699, %703 : vector<20x32xf32>
      %c0_102 = arith.constant 0 : index
      %c0_103 = arith.constant 0 : index
      %705 = vector.load %arg11[%c0_102, %c0_103] : memref<1x32xf32, #tpu.memory_space<vmem>>, vector<1x32xf32>
      %706 = vector.broadcast %705 : vector<1x32xf32> to vector<20x32xf32>
      %707 = arith.mulf %704, %706 : vector<20x32xf32>
      %c0_104 = arith.constant 0 : index
      %c0_105 = arith.constant 0 : index
      %708 = vector.load %arg12[%c0_104, %c0_105] : memref<1x32xf32, #tpu.memory_space<vmem>>, vector<1x32xf32>
      %709 = vector.broadcast %708 : vector<1x32xf32> to vector<20x32xf32>
      %710 = arith.addf %707, %709 : vector<20x32xf32>
      %c0_106 = arith.constant 0 : index
      %c0_107 = arith.constant 0 : index
      %c0_108 = arith.constant 0 : index
      %711 = vector.load %arg13[%c0_106, %c0_107, %c0_108] : memref<1x20x32xf32, #tpu.memory_space<vmem>>, vector<1x20x32xf32>
      %712 = vector.shape_cast %711 : vector<1x20x32xf32> to vector<20x32xf32>
      %713 = vector.shape_cast %710 : vector<20x32xf32> to vector<1x20x32xf32>
      tpu.vector_store %arg13[%c0_106, %c0_107, %c0_108], %713 {strides = array<i32>} : memref<1x20x32xf32, #tpu.memory_space<vmem>>, vector<1x20x32xf32>,
    } else {
    }
    return
  }
  func.func @transform_0(%arg0: i32, %arg1: i32, %arg2: i32) -> (i32, i32, i32) {
    %c0_i32 = arith.constant 0 : i32
    %c0_i32_0 = arith.constant 0 : i32
    return %arg0, %arg1, %c0_i32 : i32, i32, i32
  }
  func.func @transform_1(%arg0: i32, %arg1: i32, %arg2: i32) -> (i32, i32, i32) {
    %c0_i32 = arith.constant 0 : i32
    %c0_i32_0 = arith.constant 0 : i32
    return %arg0, %arg1, %c0_i32 : i32, i32, i32
  }
  func.func @transform_2(%arg0: i32, %arg1: i32, %arg2: i32) -> (i32, i32, i32) {
    %c0_i32 = arith.constant 0 : i32
    %c0_i32_0 = arith.constant 0 : i32
    return %arg0, %arg2, %c0_i32 : i32, i32, i32
  }
  func.func @transform_3(%arg0: i32, %arg1: i32, %arg2: i32) -> (i32, i32, i32) {
    %c0_i32 = arith.constant 0 : i32
    %c0_i32_0 = arith.constant 0 : i32
    return %arg0, %arg1, %c0_i32 : i32, i32, i32
  }
  func.func @transform_4(%arg0: i32, %arg1: i32, %arg2: i32) -> (i32, i32) {
    %c0_i32 = arith.constant 0 : i32
    %c0_i32_0 = arith.constant 0 : i32
    %c0_i32_1 = arith.constant 0 : i32
    return %c0_i32, %c0_i32_0 : i32, i32
  }
  func.func @transform_5(%arg0: i32, %arg1: i32, %arg2: i32) -> (i32, i32) {
    %c0_i32 = arith.constant 0 : i32
    %c0_i32_0 = arith.constant 0 : i32
    %c0_i32_1 = arith.constant 0 : i32
    return %c0_i32, %c0_i32_0 : i32, i32
  }
  func.func @transform_6(%arg0: i32, %arg1: i32, %arg2: i32) -> (i32, i32) {
    %c0_i32 = arith.constant 0 : i32
    %c0_i32_0 = arith.constant 0 : i32
    %c0_i32_1 = arith.constant 0 : i32
    return %c0_i32, %c0_i32_0 : i32, i32
  }
  func.func @transform_7(%arg0: i32, %arg1: i32, %arg2: i32) -> (i32, i32) {
    %c0_i32 = arith.constant 0 : i32
    %c0_i32_0 = arith.constant 0 : i32
    %c0_i32_1 = arith.constant 0 : i32
    return %c0_i32, %c0_i32_0 : i32, i32
  }
  func.func @transform_8(%arg0: i32, %arg1: i32, %arg2: i32) -> (i32, i32) {
    %c0_i32 = arith.constant 0 : i32
    %c0_i32_0 = arith.constant 0 : i32
    %c0_i32_1 = arith.constant 0 : i32
    return %c0_i32, %c0_i32_0 : i32, i32
  }
  func.func @transform_9(%arg0: i32, %arg1: i32, %arg2: i32) -> (i32, i32) {
    %c0_i32 = arith.constant 0 : i32
    %c0_i32_0 = arith.constant 0 : i32
    %c0_i32_1 = arith.constant 0 : i32
    return %c0_i32, %c0_i32_0 : i32, i32
  }
  func.func @transform_10(%arg0: i32, %arg1: i32, %arg2: i32) -> (i32, i32, i32) {
    %c0_i32 = arith.constant 0 : i32
    %c0_i32_0 = arith.constant 0 : i32
    return %arg0, %arg1, %c0_i32 : i32, i32, i32
  }
}

module attributes {stable_mosaic.version = 11 : i64} {
  func.func @kernel(%arg0: i32, %arg1: i32, %arg2: i32, %arg3: memref<1x20x64xi32, #tpu.memory_space<vmem>>, %arg4: memref<1x20x64xf32, #tpu.memory_space<vmem>>, %arg5: memref<1x80x32xbf16, #tpu.memory_space<vmem>>, %arg6: memref<1x20x32xf32, #tpu.memory_space<vmem>>, %arg7: memref<32x32xbf16, #tpu.memory_space<vmem>>, %arg8: memref<1x32xf32, #tpu.memory_space<vmem>>, %arg9: memref<32x32xbf16, #tpu.memory_space<vmem>>, %arg10: memref<1x32xf32, #tpu.memory_space<vmem>>, %arg11: memref<1x32xf32, #tpu.memory_space<vmem>>, %arg12: memref<1x32xf32, #tpu.memory_space<vmem>>, %arg13: memref<1x20x32xf32, #tpu.memory_space<vmem>>, %arg14: memref<20x32xf32, #tpu.memory_space<vmem>>) attributes {dimension_semantics = [#tpu.dimension_semantics<parallel>, #tpu.dimension_semantics<parallel>, #tpu.dimension_semantics<arbitrary>], iteration_bounds = array<i64: 2, 1, 1>, scalar_prefetch = 0 : i64, scratch_operands = 1 : i64, tpu.core_type = #tpu.core_type<tc>, window_params = [{transform_indices = @transform_0, window_bounds = array<i64: 1, 20, 64>}, {transform_indices = @transform_1, window_bounds = array<i64: 1, 20, 64>}, {transform_indices = @transform_2, window_bounds = array<i64: 1, 80, 32>}, {transform_indices = @transform_3, window_bounds = array<i64: 1, 20, 32>}, {pipeline_mode = #tpu.pipeline_mode<synchronous>, transform_indices = @transform_4, window_bounds = array<i64: 32, 32>}, {pipeline_mode = #tpu.pipeline_mode<synchronous>, transform_indices = @transform_5, window_bounds = array<i64: 1, 32>}, {pipeline_mode = #tpu.pipeline_mode<synchronous>, transform_indices = @transform_6, window_bounds = array<i64: 32, 32>}, {pipeline_mode = #tpu.pipeline_mode<synchronous>, transform_indices = @transform_7, window_bounds = array<i64: 1, 32>}, {pipeline_mode = #tpu.pipeline_mode<synchronous>, transform_indices = @transform_8, window_bounds = array<i64: 1, 32>}, {pipeline_mode = #tpu.pipeline_mode<synchronous>, transform_indices = @transform_9, window_bounds = array<i64: 1, 32>}, {transform_indices = @transform_10, window_bounds = array<i64: 1, 20, 32>}]} {
    %c0_i32 = arith.constant 0 : i32
    %0 = arith.cmpi eq, %arg2, %c0_i32 : i32
    %1 = arith.extui %0 : i1 to i32
    %c0_i32_0 = arith.constant 0 : i32
    %2 = arith.cmpi ne, %1, %c0_i32_0 : i32
    scf.if %2 {
      %cst_87 = arith.constant 0.000000e+00 : f32
      %677 = vector.broadcast %cst_87 : f32 to vector<20x32xf32>
      %c0_88 = arith.constant 0 : index
      %c0_89 = arith.constant 0 : index
      %678 = vector.load %arg14[%c0_88, %c0_89] : memref<20x32xf32, #tpu.memory_space<vmem>>, vector<20x32xf32>
      tpu.vector_store %arg14[%c0_88, %c0_89], %677 {strides = array<i32>} : memref<20x32xf32, #tpu.memory_space<vmem>>, vector<20x32xf32>,
    } else {
    }
    %c0 = arith.constant 0 : index
    %c0_1 = arith.constant 0 : index
    %c0_2 = arith.constant 0 : index
    %3 = vector.load %arg5[%c0, %c0_1, %c0_2] : memref<1x80x32xbf16, #tpu.memory_space<vmem>>, vector<1x80x32xbf16>
    %4 = vector.shape_cast %3 : vector<1x80x32xbf16> to vector<80x32xbf16>
    %c0_3 = arith.constant 0 : index
    %c0_4 = arith.constant 0 : index
    %5 = vector.load %arg7[%c0_3, %c0_4] : memref<32x32xbf16, #tpu.memory_space<vmem>>, vector<32x32xbf16>
    %cst = arith.constant dense<0.000000e+00> : vector<80x32xf32>
    %6 = tpu.matmul %4, %5, %cst {dimension_numbers = #tpu.dot_dimension_numbers<[1], [0], [0], [1], [0, 0, 1, 1], [], []>} : vector<80x32xbf16>, vector<32x32xbf16>, vector<80x32xf32> -> vector<80x32xf32>
    %c0_5 = arith.constant 0 : index
    %c0_6 = arith.constant 0 : index
    %7 = vector.load %arg8[%c0_5, %c0_6] : memref<1x32xf32, #tpu.memory_space<vmem>>, vector<1x32xf32>
    %8 = vector.broadcast %7 : vector<1x32xf32> to vector<80x32xf32>
    %9 = arith.addf %6, %8 : vector<80x32xf32>
    %c0_7 = arith.constant 0 : index
    %c0_8 = arith.constant 0 : index
    %c0_9 = arith.constant 0 : index
    %10 = vector.load %arg3[%c0_7, %c0_8, %c0_9] : memref<1x20x64xi32, #tpu.memory_space<vmem>>, vector<1x20x64xi32>
    %11 = vector.shape_cast %10 : vector<1x20x64xi32> to vector<20x64xi32>
    %c0_10 = arith.constant 0 : index
    %c0_11 = arith.constant 0 : index
    %c0_12 = arith.constant 0 : index
    %12 = vector.load %arg4[%c0_10, %c0_11, %c0_12] : memref<1x20x64xf32, #tpu.memory_space<vmem>>, vector<1x20x64xf32>
    %13 = vector.shape_cast %12 : vector<1x20x64xf32> to vector<20x64xf32>
    %c80_i32 = arith.constant 80 : i32
    %14 = arith.muli %arg2, %c80_i32 : i32
    %15 = tpu.iota {dimensions = array<i32: 1>} : vector<1x80xi32>
    %16 = vector.broadcast %14 : i32 to vector<1x80xi32>
    %17 = arith.addi %16, %15 : vector<1x80xi32>
    %18 = vector.extract_strided_slice %11 {offsets = [0, 0], sizes = [20, 1], strides = [1, 1]} : vector<20x64xi32> to vector<20x1xi32>
    %19 = vector.broadcast %18 : vector<20x1xi32> to vector<20x80xi32>
    %20 = vector.broadcast %17 : vector<1x80xi32> to vector<20x80xi32>
    %21 = arith.cmpi eq, %19, %20 : vector<20x80xi32>
    %22 = vector.extract_strided_slice %13 {offsets = [0, 0], sizes = [20, 1], strides = [1, 1]} : vector<20x64xf32> to vector<20x1xf32>
    %cst_13 = arith.constant 0.000000e+00 : f32
    %23 = vector.shape_cast %22 : vector<20x1xf32> to vector<20x1xf32>
    %24 = vector.broadcast %23 : vector<20x1xf32> to vector<20x80xf32>
    %25 = vector.broadcast %cst_13 : f32 to vector<20x80xf32>
    %26 = arith.select %21, %24, %25 : vector<20x80xi1>, vector<20x80xf32>
    %27 = vector.extract_strided_slice %11 {offsets = [0, 1], sizes = [20, 1], strides = [1, 1]} : vector<20x64xi32> to vector<20x1xi32>
    %28 = vector.broadcast %27 : vector<20x1xi32> to vector<20x80xi32>
    %29 = vector.broadcast %17 : vector<1x80xi32> to vector<20x80xi32>
    %30 = arith.cmpi eq, %28, %29 : vector<20x80xi32>
    %31 = vector.extract_strided_slice %13 {offsets = [0, 1], sizes = [20, 1], strides = [1, 1]} : vector<20x64xf32> to vector<20x1xf32>
    %cst_14 = arith.constant 0.000000e+00 : f32
    %32 = vector.shape_cast %31 : vector<20x1xf32> to vector<20x1xf32>
    %33 = vector.broadcast %32 : vector<20x1xf32> to vector<20x80xf32>
    %34 = vector.broadcast %cst_14 : f32 to vector<20x80xf32>
    %35 = arith.select %30, %33, %34 : vector<20x80xi1>, vector<20x80xf32>
    %36 = vector.extract_strided_slice %11 {offsets = [0, 2], sizes = [20, 1], strides = [1, 1]} : vector<20x64xi32> to vector<20x1xi32>
    %37 = vector.broadcast %36 : vector<20x1xi32> to vector<20x80xi32>
    %38 = vector.broadcast %17 : vector<1x80xi32> to vector<20x80xi32>
    %39 = arith.cmpi eq, %37, %38 : vector<20x80xi32>
    %40 = vector.extract_strided_slice %13 {offsets = [0, 2], sizes = [20, 1], strides = [1, 1]} : vector<20x64xf32> to vector<20x1xf32>
    %cst_15 = arith.constant 0.000000e+00 : f32
    %41 = vector.shape_cast %40 : vector<20x1xf32> to vector<20x1xf32>
    %42 = vector.broadcast %41 : vector<20x1xf32> to vector<20x80xf32>
    %43 = vector.broadcast %cst_15 : f32 to vector<20x80xf32>
    %44 = arith.select %39, %42, %43 : vector<20x80xi1>, vector<20x80xf32>
    %45 = vector.extract_strided_slice %11 {offsets = [0, 3], sizes = [20, 1], strides = [1, 1]} : vector<20x64xi32> to vector<20x1xi32>
    %46 = vector.broadcast %45 : vector<20x1xi32> to vector<20x80xi32>
    %47 = vector.broadcast %17 : vector<1x80xi32> to vector<20x80xi32>
    %48 = arith.cmpi eq, %46, %47 : vector<20x80xi32>
    %49 = vector.extract_strided_slice %13 {offsets = [0, 3], sizes = [20, 1], strides = [1, 1]} : vector<20x64xf32> to vector<20x1xf32>
    %cst_16 = arith.constant 0.000000e+00 : f32
    %50 = vector.shape_cast %49 : vector<20x1xf32> to vector<20x1xf32>
    %51 = vector.broadcast %50 : vector<20x1xf32> to vector<20x80xf32>
    %52 = vector.broadcast %cst_16 : f32 to vector<20x80xf32>
    %53 = arith.select %48, %51, %52 : vector<20x80xi1>, vector<20x80xf32>
    %54 = vector.extract_strided_slice %11 {offsets = [0, 4], sizes = [20, 1], strides = [1, 1]} : vector<20x64xi32> to vector<20x1xi32>
    %55 = vector.broadcast %54 : vector<20x1xi32> to vector<20x80xi32>
    %56 = vector.broadcast %17 : vector<1x80xi32> to vector<20x80xi32>
    %57 = arith.cmpi eq, %55, %56 : vector<20x80xi32>
    %58 = vector.extract_strided_slice %13 {offsets = [0, 4], sizes = [20, 1], strides = [1, 1]} : vector<20x64xf32> to vector<20x1xf32>
    %cst_17 = arith.constant 0.000000e+00 : f32
    %59 = vector.shape_cast %58 : vector<20x1xf32> to vector<20x1xf32>
    %60 = vector.broadcast %59 : vector<20x1xf32> to vector<20x80xf32>
    %61 = vector.broadcast %cst_17 : f32 to vector<20x80xf32>
    %62 = arith.select %57, %60, %61 : vector<20x80xi1>, vector<20x80xf32>
    %63 = vector.extract_strided_slice %11 {offsets = [0, 5], sizes = [20, 1], strides = [1, 1]} : vector<20x64xi32> to vector<20x1xi32>
    %64 = vector.broadcast %63 : vector<20x1xi32> to vector<20x80xi32>
    %65 = vector.broadcast %17 : vector<1x80xi32> to vector<20x80xi32>
    %66 = arith.cmpi eq, %64, %65 : vector<20x80xi32>
    %67 = vector.extract_strided_slice %13 {offsets = [0, 5], sizes = [20, 1], strides = [1, 1]} : vector<20x64xf32> to vector<20x1xf32>
    %cst_18 = arith.constant 0.000000e+00 : f32
    %68 = vector.shape_cast %67 : vector<20x1xf32> to vector<20x1xf32>
    %69 = vector.broadcast %68 : vector<20x1xf32> to vector<20x80xf32>
    %70 = vector.broadcast %cst_18 : f32 to vector<20x80xf32>
    %71 = arith.select %66, %69, %70 : vector<20x80xi1>, vector<20x80xf32>
    %72 = vector.extract_strided_slice %11 {offsets = [0, 6], sizes = [20, 1], strides = [1, 1]} : vector<20x64xi32> to vector<20x1xi32>
    %73 = vector.broadcast %72 : vector<20x1xi32> to vector<20x80xi32>
    %74 = vector.broadcast %17 : vector<1x80xi32> to vector<20x80xi32>
    %75 = arith.cmpi eq, %73, %74 : vector<20x80xi32>
    %76 = vector.extract_strided_slice %13 {offsets = [0, 6], sizes = [20, 1], strides = [1, 1]} : vector<20x64xf32> to vector<20x1xf32>
    %cst_19 = arith.constant 0.000000e+00 : f32
    %77 = vector.shape_cast %76 : vector<20x1xf32> to vector<20x1xf32>
    %78 = vector.broadcast %77 : vector<20x1xf32> to vector<20x80xf32>
    %79 = vector.broadcast %cst_19 : f32 to vector<20x80xf32>
    %80 = arith.select %75, %78, %79 : vector<20x80xi1>, vector<20x80xf32>
    %81 = vector.extract_strided_slice %11 {offsets = [0, 7], sizes = [20, 1], strides = [1, 1]} : vector<20x64xi32> to vector<20x1xi32>
    %82 = vector.broadcast %81 : vector<20x1xi32> to vector<20x80xi32>
    %83 = vector.broadcast %17 : vector<1x80xi32> to vector<20x80xi32>
    %84 = arith.cmpi eq, %82, %83 : vector<20x80xi32>
    %85 = vector.extract_strided_slice %13 {offsets = [0, 7], sizes = [20, 1], strides = [1, 1]} : vector<20x64xf32> to vector<20x1xf32>
    %cst_20 = arith.constant 0.000000e+00 : f32
    %86 = vector.shape_cast %85 : vector<20x1xf32> to vector<20x1xf32>
    %87 = vector.broadcast %86 : vector<20x1xf32> to vector<20x80xf32>
    %88 = vector.broadcast %cst_20 : f32 to vector<20x80xf32>
    %89 = arith.select %84, %87, %88 : vector<20x80xi1>, vector<20x80xf32>
    %90 = vector.extract_strided_slice %11 {offsets = [0, 8], sizes = [20, 1], strides = [1, 1]} : vector<20x64xi32> to vector<20x1xi32>
    %91 = vector.broadcast %90 : vector<20x1xi32> to vector<20x80xi32>
    %92 = vector.broadcast %17 : vector<1x80xi32> to vector<20x80xi32>
    %93 = arith.cmpi eq, %91, %92 : vector<20x80xi32>
    %94 = vector.extract_strided_slice %13 {offsets = [0, 8], sizes = [20, 1], strides = [1, 1]} : vector<20x64xf32> to vector<20x1xf32>
    %cst_21 = arith.constant 0.000000e+00 : f32
    %95 = vector.shape_cast %94 : vector<20x1xf32> to vector<20x1xf32>
    %96 = vector.broadcast %95 : vector<20x1xf32> to vector<20x80xf32>
    %97 = vector.broadcast %cst_21 : f32 to vector<20x80xf32>
    %98 = arith.select %93, %96, %97 : vector<20x80xi1>, vector<20x80xf32>
    %99 = vector.extract_strided_slice %11 {offsets = [0, 9], sizes = [20, 1], strides = [1, 1]} : vector<20x64xi32> to vector<20x1xi32>
    %100 = vector.broadcast %99 : vector<20x1xi32> to vector<20x80xi32>
    %101 = vector.broadcast %17 : vector<1x80xi32> to vector<20x80xi32>
    %102 = arith.cmpi eq, %100, %101 : vector<20x80xi32>
    %103 = vector.extract_strided_slice %13 {offsets = [0, 9], sizes = [20, 1], strides = [1, 1]} : vector<20x64xf32> to vector<20x1xf32>
    %cst_22 = arith.constant 0.000000e+00 : f32
    %104 = vector.shape_cast %103 : vector<20x1xf32> to vector<20x1xf32>
    %105 = vector.broadcast %104 : vector<20x1xf32> to vector<20x80xf32>
    %106 = vector.broadcast %cst_22 : f32 to vector<20x80xf32>
    %107 = arith.select %102, %105, %106 : vector<20x80xi1>, vector<20x80xf32>
    %108 = vector.extract_strided_slice %11 {offsets = [0, 10], sizes = [20, 1], strides = [1, 1]} : vector<20x64xi32> to vector<20x1xi32>
    %109 = vector.broadcast %108 : vector<20x1xi32> to vector<20x80xi32>
    %110 = vector.broadcast %17 : vector<1x80xi32> to vector<20x80xi32>
    %111 = arith.cmpi eq, %109, %110 : vector<20x80xi32>
    %112 = vector.extract_strided_slice %13 {offsets = [0, 10], sizes = [20, 1], strides = [1, 1]} : vector<20x64xf32> to vector<20x1xf32>
    %cst_23 = arith.constant 0.000000e+00 : f32
    %113 = vector.shape_cast %112 : vector<20x1xf32> to vector<20x1xf32>
    %114 = vector.broadcast %113 : vector<20x1xf32> to vector<20x80xf32>
    %115 = vector.broadcast %cst_23 : f32 to vector<20x80xf32>
    %116 = arith.select %111, %114, %115 : vector<20x80xi1>, vector<20x80xf32>
    %117 = vector.extract_strided_slice %11 {offsets = [0, 11], sizes = [20, 1], strides = [1, 1]} : vector<20x64xi32> to vector<20x1xi32>
    %118 = vector.broadcast %117 : vector<20x1xi32> to vector<20x80xi32>
    %119 = vector.broadcast %17 : vector<1x80xi32> to vector<20x80xi32>
    %120 = arith.cmpi eq, %118, %119 : vector<20x80xi32>
    %121 = vector.extract_strided_slice %13 {offsets = [0, 11], sizes = [20, 1], strides = [1, 1]} : vector<20x64xf32> to vector<20x1xf32>
    %cst_24 = arith.constant 0.000000e+00 : f32
    %122 = vector.shape_cast %121 : vector<20x1xf32> to vector<20x1xf32>
    %123 = vector.broadcast %122 : vector<20x1xf32> to vector<20x80xf32>
    %124 = vector.broadcast %cst_24 : f32 to vector<20x80xf32>
    %125 = arith.select %120, %123, %124 : vector<20x80xi1>, vector<20x80xf32>
    %126 = vector.extract_strided_slice %11 {offsets = [0, 12], sizes = [20, 1], strides = [1, 1]} : vector<20x64xi32> to vector<20x1xi32>
    %127 = vector.broadcast %126 : vector<20x1xi32> to vector<20x80xi32>
    %128 = vector.broadcast %17 : vector<1x80xi32> to vector<20x80xi32>
    %129 = arith.cmpi eq, %127, %128 : vector<20x80xi32>
    %130 = vector.extract_strided_slice %13 {offsets = [0, 12], sizes = [20, 1], strides = [1, 1]} : vector<20x64xf32> to vector<20x1xf32>
    %cst_25 = arith.constant 0.000000e+00 : f32
    %131 = vector.shape_cast %130 : vector<20x1xf32> to vector<20x1xf32>
    %132 = vector.broadcast %131 : vector<20x1xf32> to vector<20x80xf32>
    %133 = vector.broadcast %cst_25 : f32 to vector<20x80xf32>
    %134 = arith.select %129, %132, %133 : vector<20x80xi1>, vector<20x80xf32>
    %135 = vector.extract_strided_slice %11 {offsets = [0, 13], sizes = [20, 1], strides = [1, 1]} : vector<20x64xi32> to vector<20x1xi32>
    %136 = vector.broadcast %135 : vector<20x1xi32> to vector<20x80xi32>
    %137 = vector.broadcast %17 : vector<1x80xi32> to vector<20x80xi32>
    %138 = arith.cmpi eq, %136, %137 : vector<20x80xi32>
    %139 = vector.extract_strided_slice %13 {offsets = [0, 13], sizes = [20, 1], strides = [1, 1]} : vector<20x64xf32> to vector<20x1xf32>
    %cst_26 = arith.constant 0.000000e+00 : f32
    %140 = vector.shape_cast %139 : vector<20x1xf32> to vector<20x1xf32>
    %141 = vector.broadcast %140 : vector<20x1xf32> to vector<20x80xf32>
    %142 = vector.broadcast %cst_26 : f32 to vector<20x80xf32>
    %143 = arith.select %138, %141, %142 : vector<20x80xi1>, vector<20x80xf32>
    %144 = vector.extract_strided_slice %11 {offsets = [0, 14], sizes = [20, 1], strides = [1, 1]} : vector<20x64xi32> to vector<20x1xi32>
    %145 = vector.broadcast %144 : vector<20x1xi32> to vector<20x80xi32>
    %146 = vector.broadcast %17 : vector<1x80xi32> to vector<20x80xi32>
    %147 = arith.cmpi eq, %145, %146 : vector<20x80xi32>
    %148 = vector.extract_strided_slice %13 {offsets = [0, 14], sizes = [20, 1], strides = [1, 1]} : vector<20x64xf32> to vector<20x1xf32>
    %cst_27 = arith.constant 0.000000e+00 : f32
    %149 = vector.shape_cast %148 : vector<20x1xf32> to vector<20x1xf32>
    %150 = vector.broadcast %149 : vector<20x1xf32> to vector<20x80xf32>
    %151 = vector.broadcast %cst_27 : f32 to vector<20x80xf32>
    %152 = arith.select %147, %150, %151 : vector<20x80xi1>, vector<20x80xf32>
    %153 = vector.extract_strided_slice %11 {offsets = [0, 15], sizes = [20, 1], strides = [1, 1]} : vector<20x64xi32> to vector<20x1xi32>
    %154 = vector.broadcast %153 : vector<20x1xi32> to vector<20x80xi32>
    %155 = vector.broadcast %17 : vector<1x80xi32> to vector<20x80xi32>
    %156 = arith.cmpi eq, %154, %155 : vector<20x80xi32>
    %157 = vector.extract_strided_slice %13 {offsets = [0, 15], sizes = [20, 1], strides = [1, 1]} : vector<20x64xf32> to vector<20x1xf32>
    %cst_28 = arith.constant 0.000000e+00 : f32
    %158 = vector.shape_cast %157 : vector<20x1xf32> to vector<20x1xf32>
    %159 = vector.broadcast %158 : vector<20x1xf32> to vector<20x80xf32>
    %160 = vector.broadcast %cst_28 : f32 to vector<20x80xf32>
    %161 = arith.select %156, %159, %160 : vector<20x80xi1>, vector<20x80xf32>
    %162 = arith.addf %26, %35 : vector<20x80xf32>
    %163 = arith.addf %44, %53 : vector<20x80xf32>
    %164 = arith.addf %62, %71 : vector<20x80xf32>
    %165 = arith.addf %80, %89 : vector<20x80xf32>
    %166 = arith.addf %98, %107 : vector<20x80xf32>
    %167 = arith.addf %116, %125 : vector<20x80xf32>
    %168 = arith.addf %134, %143 : vector<20x80xf32>
    %169 = arith.addf %152, %161 : vector<20x80xf32>
    %170 = arith.addf %162, %163 : vector<20x80xf32>
    %171 = arith.addf %164, %165 : vector<20x80xf32>
    %172 = arith.addf %166, %167 : vector<20x80xf32>
    %173 = arith.addf %168, %169 : vector<20x80xf32>
    %174 = arith.addf %170, %171 : vector<20x80xf32>
    %175 = arith.addf %172, %173 : vector<20x80xf32>
    %176 = arith.addf %174, %175 : vector<20x80xf32>
    %177 = vector.extract_strided_slice %9 {offsets = [0, 0], sizes = [80, 8], strides = [1, 1]} : vector<80x32xf32> to vector<80x8xf32>
    %178 = arith.truncf %176 : vector<20x80xf32> to vector<20x80xbf16>
    %179 = arith.truncf %177 : vector<80x8xf32> to vector<80x8xbf16>
    %cst_29 = arith.constant dense<0.000000e+00> : vector<20x8xf32>
    %180 = tpu.matmul %178, %179, %cst_29 {dimension_numbers = #tpu.dot_dimension_numbers<[1], [0], [0], [1], [0, 0, 1, 1], [], []>} : vector<20x80xbf16>, vector<80x8xbf16>, vector<20x8xf32> -> vector<20x8xf32>
    %181 = vector.extract_strided_slice %11 {offsets = [0, 16], sizes = [20, 1], strides = [1, 1]} : vector<20x64xi32> to vector<20x1xi32>
    %182 = vector.broadcast %181 : vector<20x1xi32> to vector<20x80xi32>
    %183 = vector.broadcast %17 : vector<1x80xi32> to vector<20x80xi32>
    %184 = arith.cmpi eq, %182, %183 : vector<20x80xi32>
    %185 = vector.extract_strided_slice %13 {offsets = [0, 16], sizes = [20, 1], strides = [1, 1]} : vector<20x64xf32> to vector<20x1xf32>
    %cst_30 = arith.constant 0.000000e+00 : f32
    %186 = vector.shape_cast %185 : vector<20x1xf32> to vector<20x1xf32>
    %187 = vector.broadcast %186 : vector<20x1xf32> to vector<20x80xf32>
    %188 = vector.broadcast %cst_30 : f32 to vector<20x80xf32>
    %189 = arith.select %184, %187, %188 : vector<20x80xi1>, vector<20x80xf32>
    %190 = vector.extract_strided_slice %11 {offsets = [0, 17], sizes = [20, 1], strides = [1, 1]} : vector<20x64xi32> to vector<20x1xi32>
    %191 = vector.broadcast %190 : vector<20x1xi32> to vector<20x80xi32>
    %192 = vector.broadcast %17 : vector<1x80xi32> to vector<20x80xi32>
    %193 = arith.cmpi eq, %191, %192 : vector<20x80xi32>
    %194 = vector.extract_strided_slice %13 {offsets = [0, 17], sizes = [20, 1], strides = [1, 1]} : vector<20x64xf32> to vector<20x1xf32>
    %cst_31 = arith.constant 0.000000e+00 : f32
    %195 = vector.shape_cast %194 : vector<20x1xf32> to vector<20x1xf32>
    %196 = vector.broadcast %195 : vector<20x1xf32> to vector<20x80xf32>
    %197 = vector.broadcast %cst_31 : f32 to vector<20x80xf32>
    %198 = arith.select %193, %196, %197 : vector<20x80xi1>, vector<20x80xf32>
    %199 = vector.extract_strided_slice %11 {offsets = [0, 18], sizes = [20, 1], strides = [1, 1]} : vector<20x64xi32> to vector<20x1xi32>
    %200 = vector.broadcast %199 : vector<20x1xi32> to vector<20x80xi32>
    %201 = vector.broadcast %17 : vector<1x80xi32> to vector<20x80xi32>
    %202 = arith.cmpi eq, %200, %201 : vector<20x80xi32>
    %203 = vector.extract_strided_slice %13 {offsets = [0, 18], sizes = [20, 1], strides = [1, 1]} : vector<20x64xf32> to vector<20x1xf32>
    %cst_32 = arith.constant 0.000000e+00 : f32
    %204 = vector.shape_cast %203 : vector<20x1xf32> to vector<20x1xf32>
    %205 = vector.broadcast %204 : vector<20x1xf32> to vector<20x80xf32>
    %206 = vector.broadcast %cst_32 : f32 to vector<20x80xf32>
    %207 = arith.select %202, %205, %206 : vector<20x80xi1>, vector<20x80xf32>
    %208 = vector.extract_strided_slice %11 {offsets = [0, 19], sizes = [20, 1], strides = [1, 1]} : vector<20x64xi32> to vector<20x1xi32>
    %209 = vector.broadcast %208 : vector<20x1xi32> to vector<20x80xi32>
    %210 = vector.broadcast %17 : vector<1x80xi32> to vector<20x80xi32>
    %211 = arith.cmpi eq, %209, %210 : vector<20x80xi32>
    %212 = vector.extract_strided_slice %13 {offsets = [0, 19], sizes = [20, 1], strides = [1, 1]} : vector<20x64xf32> to vector<20x1xf32>
    %cst_33 = arith.constant 0.000000e+00 : f32
    %213 = vector.shape_cast %212 : vector<20x1xf32> to vector<20x1xf32>
    %214 = vector.broadcast %213 : vector<20x1xf32> to vector<20x80xf32>
    %215 = vector.broadcast %cst_33 : f32 to vector<20x80xf32>
    %216 = arith.select %211, %214, %215 : vector<20x80xi1>, vector<20x80xf32>
    %217 = vector.extract_strided_slice %11 {offsets = [0, 20], sizes = [20, 1], strides = [1, 1]} : vector<20x64xi32> to vector<20x1xi32>
    %218 = vector.broadcast %217 : vector<20x1xi32> to vector<20x80xi32>
    %219 = vector.broadcast %17 : vector<1x80xi32> to vector<20x80xi32>
    %220 = arith.cmpi eq, %218, %219 : vector<20x80xi32>
    %221 = vector.extract_strided_slice %13 {offsets = [0, 20], sizes = [20, 1], strides = [1, 1]} : vector<20x64xf32> to vector<20x1xf32>
    %cst_34 = arith.constant 0.000000e+00 : f32
    %222 = vector.shape_cast %221 : vector<20x1xf32> to vector<20x1xf32>
    %223 = vector.broadcast %222 : vector<20x1xf32> to vector<20x80xf32>
    %224 = vector.broadcast %cst_34 : f32 to vector<20x80xf32>
    %225 = arith.select %220, %223, %224 : vector<20x80xi1>, vector<20x80xf32>
    %226 = vector.extract_strided_slice %11 {offsets = [0, 21], sizes = [20, 1], strides = [1, 1]} : vector<20x64xi32> to vector<20x1xi32>
    %227 = vector.broadcast %226 : vector<20x1xi32> to vector<20x80xi32>
    %228 = vector.broadcast %17 : vector<1x80xi32> to vector<20x80xi32>
    %229 = arith.cmpi eq, %227, %228 : vector<20x80xi32>
    %230 = vector.extract_strided_slice %13 {offsets = [0, 21], sizes = [20, 1], strides = [1, 1]} : vector<20x64xf32> to vector<20x1xf32>
    %cst_35 = arith.constant 0.000000e+00 : f32
    %231 = vector.shape_cast %230 : vector<20x1xf32> to vector<20x1xf32>
    %232 = vector.broadcast %231 : vector<20x1xf32> to vector<20x80xf32>
    %233 = vector.broadcast %cst_35 : f32 to vector<20x80xf32>
    %234 = arith.select %229, %232, %233 : vector<20x80xi1>, vector<20x80xf32>
    %235 = vector.extract_strided_slice %11 {offsets = [0, 22], sizes = [20, 1], strides = [1, 1]} : vector<20x64xi32> to vector<20x1xi32>
    %236 = vector.broadcast %235 : vector<20x1xi32> to vector<20x80xi32>
    %237 = vector.broadcast %17 : vector<1x80xi32> to vector<20x80xi32>
    %238 = arith.cmpi eq, %236, %237 : vector<20x80xi32>
    %239 = vector.extract_strided_slice %13 {offsets = [0, 22], sizes = [20, 1], strides = [1, 1]} : vector<20x64xf32> to vector<20x1xf32>
    %cst_36 = arith.constant 0.000000e+00 : f32
    %240 = vector.shape_cast %239 : vector<20x1xf32> to vector<20x1xf32>
    %241 = vector.broadcast %240 : vector<20x1xf32> to vector<20x80xf32>
    %242 = vector.broadcast %cst_36 : f32 to vector<20x80xf32>
    %243 = arith.select %238, %241, %242 : vector<20x80xi1>, vector<20x80xf32>
    %244 = vector.extract_strided_slice %11 {offsets = [0, 23], sizes = [20, 1], strides = [1, 1]} : vector<20x64xi32> to vector<20x1xi32>
    %245 = vector.broadcast %244 : vector<20x1xi32> to vector<20x80xi32>
    %246 = vector.broadcast %17 : vector<1x80xi32> to vector<20x80xi32>
    %247 = arith.cmpi eq, %245, %246 : vector<20x80xi32>
    %248 = vector.extract_strided_slice %13 {offsets = [0, 23], sizes = [20, 1], strides = [1, 1]} : vector<20x64xf32> to vector<20x1xf32>
    %cst_37 = arith.constant 0.000000e+00 : f32
    %249 = vector.shape_cast %248 : vector<20x1xf32> to vector<20x1xf32>
    %250 = vector.broadcast %249 : vector<20x1xf32> to vector<20x80xf32>
    %251 = vector.broadcast %cst_37 : f32 to vector<20x80xf32>
    %252 = arith.select %247, %250, %251 : vector<20x80xi1>, vector<20x80xf32>
    %253 = vector.extract_strided_slice %11 {offsets = [0, 24], sizes = [20, 1], strides = [1, 1]} : vector<20x64xi32> to vector<20x1xi32>
    %254 = vector.broadcast %253 : vector<20x1xi32> to vector<20x80xi32>
    %255 = vector.broadcast %17 : vector<1x80xi32> to vector<20x80xi32>
    %256 = arith.cmpi eq, %254, %255 : vector<20x80xi32>
    %257 = vector.extract_strided_slice %13 {offsets = [0, 24], sizes = [20, 1], strides = [1, 1]} : vector<20x64xf32> to vector<20x1xf32>
    %cst_38 = arith.constant 0.000000e+00 : f32
    %258 = vector.shape_cast %257 : vector<20x1xf32> to vector<20x1xf32>
    %259 = vector.broadcast %258 : vector<20x1xf32> to vector<20x80xf32>
    %260 = vector.broadcast %cst_38 : f32 to vector<20x80xf32>
    %261 = arith.select %256, %259, %260 : vector<20x80xi1>, vector<20x80xf32>
    %262 = vector.extract_strided_slice %11 {offsets = [0, 25], sizes = [20, 1], strides = [1, 1]} : vector<20x64xi32> to vector<20x1xi32>
    %263 = vector.broadcast %262 : vector<20x1xi32> to vector<20x80xi32>
    %264 = vector.broadcast %17 : vector<1x80xi32> to vector<20x80xi32>
    %265 = arith.cmpi eq, %263, %264 : vector<20x80xi32>
    %266 = vector.extract_strided_slice %13 {offsets = [0, 25], sizes = [20, 1], strides = [1, 1]} : vector<20x64xf32> to vector<20x1xf32>
    %cst_39 = arith.constant 0.000000e+00 : f32
    %267 = vector.shape_cast %266 : vector<20x1xf32> to vector<20x1xf32>
    %268 = vector.broadcast %267 : vector<20x1xf32> to vector<20x80xf32>
    %269 = vector.broadcast %cst_39 : f32 to vector<20x80xf32>
    %270 = arith.select %265, %268, %269 : vector<20x80xi1>, vector<20x80xf32>
    %271 = vector.extract_strided_slice %11 {offsets = [0, 26], sizes = [20, 1], strides = [1, 1]} : vector<20x64xi32> to vector<20x1xi32>
    %272 = vector.broadcast %271 : vector<20x1xi32> to vector<20x80xi32>
    %273 = vector.broadcast %17 : vector<1x80xi32> to vector<20x80xi32>
    %274 = arith.cmpi eq, %272, %273 : vector<20x80xi32>
    %275 = vector.extract_strided_slice %13 {offsets = [0, 26], sizes = [20, 1], strides = [1, 1]} : vector<20x64xf32> to vector<20x1xf32>
    %cst_40 = arith.constant 0.000000e+00 : f32
    %276 = vector.shape_cast %275 : vector<20x1xf32> to vector<20x1xf32>
    %277 = vector.broadcast %276 : vector<20x1xf32> to vector<20x80xf32>
    %278 = vector.broadcast %cst_40 : f32 to vector<20x80xf32>
    %279 = arith.select %274, %277, %278 : vector<20x80xi1>, vector<20x80xf32>
    %280 = vector.extract_strided_slice %11 {offsets = [0, 27], sizes = [20, 1], strides = [1, 1]} : vector<20x64xi32> to vector<20x1xi32>
    %281 = vector.broadcast %280 : vector<20x1xi32> to vector<20x80xi32>
    %282 = vector.broadcast %17 : vector<1x80xi32> to vector<20x80xi32>
    %283 = arith.cmpi eq, %281, %282 : vector<20x80xi32>
    %284 = vector.extract_strided_slice %13 {offsets = [0, 27], sizes = [20, 1], strides = [1, 1]} : vector<20x64xf32> to vector<20x1xf32>
    %cst_41 = arith.constant 0.000000e+00 : f32
    %285 = vector.shape_cast %284 : vector<20x1xf32> to vector<20x1xf32>
    %286 = vector.broadcast %285 : vector<20x1xf32> to vector<20x80xf32>
    %287 = vector.broadcast %cst_41 : f32 to vector<20x80xf32>
    %288 = arith.select %283, %286, %287 : vector<20x80xi1>, vector<20x80xf32>
    %289 = vector.extract_strided_slice %11 {offsets = [0, 28], sizes = [20, 1], strides = [1, 1]} : vector<20x64xi32> to vector<20x1xi32>
    %290 = vector.broadcast %289 : vector<20x1xi32> to vector<20x80xi32>
    %291 = vector.broadcast %17 : vector<1x80xi32> to vector<20x80xi32>
    %292 = arith.cmpi eq, %290, %291 : vector<20x80xi32>
    %293 = vector.extract_strided_slice %13 {offsets = [0, 28], sizes = [20, 1], strides = [1, 1]} : vector<20x64xf32> to vector<20x1xf32>
    %cst_42 = arith.constant 0.000000e+00 : f32
    %294 = vector.shape_cast %293 : vector<20x1xf32> to vector<20x1xf32>
    %295 = vector.broadcast %294 : vector<20x1xf32> to vector<20x80xf32>
    %296 = vector.broadcast %cst_42 : f32 to vector<20x80xf32>
    %297 = arith.select %292, %295, %296 : vector<20x80xi1>, vector<20x80xf32>
    %298 = vector.extract_strided_slice %11 {offsets = [0, 29], sizes = [20, 1], strides = [1, 1]} : vector<20x64xi32> to vector<20x1xi32>
    %299 = vector.broadcast %298 : vector<20x1xi32> to vector<20x80xi32>
    %300 = vector.broadcast %17 : vector<1x80xi32> to vector<20x80xi32>
    %301 = arith.cmpi eq, %299, %300 : vector<20x80xi32>
    %302 = vector.extract_strided_slice %13 {offsets = [0, 29], sizes = [20, 1], strides = [1, 1]} : vector<20x64xf32> to vector<20x1xf32>
    %cst_43 = arith.constant 0.000000e+00 : f32
    %303 = vector.shape_cast %302 : vector<20x1xf32> to vector<20x1xf32>
    %304 = vector.broadcast %303 : vector<20x1xf32> to vector<20x80xf32>
    %305 = vector.broadcast %cst_43 : f32 to vector<20x80xf32>
    %306 = arith.select %301, %304, %305 : vector<20x80xi1>, vector<20x80xf32>
    %307 = vector.extract_strided_slice %11 {offsets = [0, 30], sizes = [20, 1], strides = [1, 1]} : vector<20x64xi32> to vector<20x1xi32>
    %308 = vector.broadcast %307 : vector<20x1xi32> to vector<20x80xi32>
    %309 = vector.broadcast %17 : vector<1x80xi32> to vector<20x80xi32>
    %310 = arith.cmpi eq, %308, %309 : vector<20x80xi32>
    %311 = vector.extract_strided_slice %13 {offsets = [0, 30], sizes = [20, 1], strides = [1, 1]} : vector<20x64xf32> to vector<20x1xf32>
    %cst_44 = arith.constant 0.000000e+00 : f32
    %312 = vector.shape_cast %311 : vector<20x1xf32> to vector<20x1xf32>
    %313 = vector.broadcast %312 : vector<20x1xf32> to vector<20x80xf32>
    %314 = vector.broadcast %cst_44 : f32 to vector<20x80xf32>
    %315 = arith.select %310, %313, %314 : vector<20x80xi1>, vector<20x80xf32>
    %316 = vector.extract_strided_slice %11 {offsets = [0, 31], sizes = [20, 1], strides = [1, 1]} : vector<20x64xi32> to vector<20x1xi32>
    %317 = vector.broadcast %316 : vector<20x1xi32> to vector<20x80xi32>
    %318 = vector.broadcast %17 : vector<1x80xi32> to vector<20x80xi32>
    %319 = arith.cmpi eq, %317, %318 : vector<20x80xi32>
    %320 = vector.extract_strided_slice %13 {offsets = [0, 31], sizes = [20, 1], strides = [1, 1]} : vector<20x64xf32> to vector<20x1xf32>
    %cst_45 = arith.constant 0.000000e+00 : f32
    %321 = vector.shape_cast %320 : vector<20x1xf32> to vector<20x1xf32>
    %322 = vector.broadcast %321 : vector<20x1xf32> to vector<20x80xf32>
    %323 = vector.broadcast %cst_45 : f32 to vector<20x80xf32>
    %324 = arith.select %319, %322, %323 : vector<20x80xi1>, vector<20x80xf32>
    %325 = arith.addf %189, %198 : vector<20x80xf32>
    %326 = arith.addf %207, %216 : vector<20x80xf32>
    %327 = arith.addf %225, %234 : vector<20x80xf32>
    %328 = arith.addf %243, %252 : vector<20x80xf32>
    %329 = arith.addf %261, %270 : vector<20x80xf32>
    %330 = arith.addf %279, %288 : vector<20x80xf32>
    %331 = arith.addf %297, %306 : vector<20x80xf32>
    %332 = arith.addf %315, %324 : vector<20x80xf32>
    %333 = arith.addf %325, %326 : vector<20x80xf32>
    %334 = arith.addf %327, %328 : vector<20x80xf32>
    %335 = arith.addf %329, %330 : vector<20x80xf32>
    %336 = arith.addf %331, %332 : vector<20x80xf32>
    %337 = arith.addf %333, %334 : vector<20x80xf32>
    %338 = arith.addf %335, %336 : vector<20x80xf32>
    %339 = arith.addf %337, %338 : vector<20x80xf32>
    %340 = vector.extract_strided_slice %9 {offsets = [0, 8], sizes = [80, 8], strides = [1, 1]} : vector<80x32xf32> to vector<80x8xf32>
    %341 = arith.truncf %339 : vector<20x80xf32> to vector<20x80xbf16>
    %342 = arith.truncf %340 : vector<80x8xf32> to vector<80x8xbf16>
    %cst_46 = arith.constant dense<0.000000e+00> : vector<20x8xf32>
    %343 = tpu.matmul %341, %342, %cst_46 {dimension_numbers = #tpu.dot_dimension_numbers<[1], [0], [0], [1], [0, 0, 1, 1], [], []>} : vector<20x80xbf16>, vector<80x8xbf16>, vector<20x8xf32> -> vector<20x8xf32>
    %344 = vector.extract_strided_slice %11 {offsets = [0, 32], sizes = [20, 1], strides = [1, 1]} : vector<20x64xi32> to vector<20x1xi32>
    %345 = vector.broadcast %344 : vector<20x1xi32> to vector<20x80xi32>
    %346 = vector.broadcast %17 : vector<1x80xi32> to vector<20x80xi32>
    %347 = arith.cmpi eq, %345, %346 : vector<20x80xi32>
    %348 = vector.extract_strided_slice %13 {offsets = [0, 32], sizes = [20, 1], strides = [1, 1]} : vector<20x64xf32> to vector<20x1xf32>
    %cst_47 = arith.constant 0.000000e+00 : f32
    %349 = vector.shape_cast %348 : vector<20x1xf32> to vector<20x1xf32>
    %350 = vector.broadcast %349 : vector<20x1xf32> to vector<20x80xf32>
    %351 = vector.broadcast %cst_47 : f32 to vector<20x80xf32>
    %352 = arith.select %347, %350, %351 : vector<20x80xi1>, vector<20x80xf32>
    %353 = vector.extract_strided_slice %11 {offsets = [0, 33], sizes = [20, 1], strides = [1, 1]} : vector<20x64xi32> to vector<20x1xi32>
    %354 = vector.broadcast %353 : vector<20x1xi32> to vector<20x80xi32>
    %355 = vector.broadcast %17 : vector<1x80xi32> to vector<20x80xi32>
    %356 = arith.cmpi eq, %354, %355 : vector<20x80xi32>
    %357 = vector.extract_strided_slice %13 {offsets = [0, 33], sizes = [20, 1], strides = [1, 1]} : vector<20x64xf32> to vector<20x1xf32>
    %cst_48 = arith.constant 0.000000e+00 : f32
    %358 = vector.shape_cast %357 : vector<20x1xf32> to vector<20x1xf32>
    %359 = vector.broadcast %358 : vector<20x1xf32> to vector<20x80xf32>
    %360 = vector.broadcast %cst_48 : f32 to vector<20x80xf32>
    %361 = arith.select %356, %359, %360 : vector<20x80xi1>, vector<20x80xf32>
    %362 = vector.extract_strided_slice %11 {offsets = [0, 34], sizes = [20, 1], strides = [1, 1]} : vector<20x64xi32> to vector<20x1xi32>
    %363 = vector.broadcast %362 : vector<20x1xi32> to vector<20x80xi32>
    %364 = vector.broadcast %17 : vector<1x80xi32> to vector<20x80xi32>
    %365 = arith.cmpi eq, %363, %364 : vector<20x80xi32>
    %366 = vector.extract_strided_slice %13 {offsets = [0, 34], sizes = [20, 1], strides = [1, 1]} : vector<20x64xf32> to vector<20x1xf32>
    %cst_49 = arith.constant 0.000000e+00 : f32
    %367 = vector.shape_cast %366 : vector<20x1xf32> to vector<20x1xf32>
    %368 = vector.broadcast %367 : vector<20x1xf32> to vector<20x80xf32>
    %369 = vector.broadcast %cst_49 : f32 to vector<20x80xf32>
    %370 = arith.select %365, %368, %369 : vector<20x80xi1>, vector<20x80xf32>
    %371 = vector.extract_strided_slice %11 {offsets = [0, 35], sizes = [20, 1], strides = [1, 1]} : vector<20x64xi32> to vector<20x1xi32>
    %372 = vector.broadcast %371 : vector<20x1xi32> to vector<20x80xi32>
    %373 = vector.broadcast %17 : vector<1x80xi32> to vector<20x80xi32>
    %374 = arith.cmpi eq, %372, %373 : vector<20x80xi32>
    %375 = vector.extract_strided_slice %13 {offsets = [0, 35], sizes = [20, 1], strides = [1, 1]} : vector<20x64xf32> to vector<20x1xf32>
    %cst_50 = arith.constant 0.000000e+00 : f32
    %376 = vector.shape_cast %375 : vector<20x1xf32> to vector<20x1xf32>
    %377 = vector.broadcast %376 : vector<20x1xf32> to vector<20x80xf32>
    %378 = vector.broadcast %cst_50 : f32 to vector<20x80xf32>
    %379 = arith.select %374, %377, %378 : vector<20x80xi1>, vector<20x80xf32>
    %380 = vector.extract_strided_slice %11 {offsets = [0, 36], sizes = [20, 1], strides = [1, 1]} : vector<20x64xi32> to vector<20x1xi32>
    %381 = vector.broadcast %380 : vector<20x1xi32> to vector<20x80xi32>
    %382 = vector.broadcast %17 : vector<1x80xi32> to vector<20x80xi32>
    %383 = arith.cmpi eq, %381, %382 : vector<20x80xi32>
    %384 = vector.extract_strided_slice %13 {offsets = [0, 36], sizes = [20, 1], strides = [1, 1]} : vector<20x64xf32> to vector<20x1xf32>
    %cst_51 = arith.constant 0.000000e+00 : f32
    %385 = vector.shape_cast %384 : vector<20x1xf32> to vector<20x1xf32>
    %386 = vector.broadcast %385 : vector<20x1xf32> to vector<20x80xf32>
    %387 = vector.broadcast %cst_51 : f32 to vector<20x80xf32>
    %388 = arith.select %383, %386, %387 : vector<20x80xi1>, vector<20x80xf32>
    %389 = vector.extract_strided_slice %11 {offsets = [0, 37], sizes = [20, 1], strides = [1, 1]} : vector<20x64xi32> to vector<20x1xi32>
    %390 = vector.broadcast %389 : vector<20x1xi32> to vector<20x80xi32>
    %391 = vector.broadcast %17 : vector<1x80xi32> to vector<20x80xi32>
    %392 = arith.cmpi eq, %390, %391 : vector<20x80xi32>
    %393 = vector.extract_strided_slice %13 {offsets = [0, 37], sizes = [20, 1], strides = [1, 1]} : vector<20x64xf32> to vector<20x1xf32>
    %cst_52 = arith.constant 0.000000e+00 : f32
    %394 = vector.shape_cast %393 : vector<20x1xf32> to vector<20x1xf32>
    %395 = vector.broadcast %394 : vector<20x1xf32> to vector<20x80xf32>
    %396 = vector.broadcast %cst_52 : f32 to vector<20x80xf32>
    %397 = arith.select %392, %395, %396 : vector<20x80xi1>, vector<20x80xf32>
    %398 = vector.extract_strided_slice %11 {offsets = [0, 38], sizes = [20, 1], strides = [1, 1]} : vector<20x64xi32> to vector<20x1xi32>
    %399 = vector.broadcast %398 : vector<20x1xi32> to vector<20x80xi32>
    %400 = vector.broadcast %17 : vector<1x80xi32> to vector<20x80xi32>
    %401 = arith.cmpi eq, %399, %400 : vector<20x80xi32>
    %402 = vector.extract_strided_slice %13 {offsets = [0, 38], sizes = [20, 1], strides = [1, 1]} : vector<20x64xf32> to vector<20x1xf32>
    %cst_53 = arith.constant 0.000000e+00 : f32
    %403 = vector.shape_cast %402 : vector<20x1xf32> to vector<20x1xf32>
    %404 = vector.broadcast %403 : vector<20x1xf32> to vector<20x80xf32>
    %405 = vector.broadcast %cst_53 : f32 to vector<20x80xf32>
    %406 = arith.select %401, %404, %405 : vector<20x80xi1>, vector<20x80xf32>
    %407 = vector.extract_strided_slice %11 {offsets = [0, 39], sizes = [20, 1], strides = [1, 1]} : vector<20x64xi32> to vector<20x1xi32>
    %408 = vector.broadcast %407 : vector<20x1xi32> to vector<20x80xi32>
    %409 = vector.broadcast %17 : vector<1x80xi32> to vector<20x80xi32>
    %410 = arith.cmpi eq, %408, %409 : vector<20x80xi32>
    %411 = vector.extract_strided_slice %13 {offsets = [0, 39], sizes = [20, 1], strides = [1, 1]} : vector<20x64xf32> to vector<20x1xf32>
    %cst_54 = arith.constant 0.000000e+00 : f32
    %412 = vector.shape_cast %411 : vector<20x1xf32> to vector<20x1xf32>
    %413 = vector.broadcast %412 : vector<20x1xf32> to vector<20x80xf32>
    %414 = vector.broadcast %cst_54 : f32 to vector<20x80xf32>
    %415 = arith.select %410, %413, %414 : vector<20x80xi1>, vector<20x80xf32>
    %416 = vector.extract_strided_slice %11 {offsets = [0, 40], sizes = [20, 1], strides = [1, 1]} : vector<20x64xi32> to vector<20x1xi32>
    %417 = vector.broadcast %416 : vector<20x1xi32> to vector<20x80xi32>
    %418 = vector.broadcast %17 : vector<1x80xi32> to vector<20x80xi32>
    %419 = arith.cmpi eq, %417, %418 : vector<20x80xi32>
    %420 = vector.extract_strided_slice %13 {offsets = [0, 40], sizes = [20, 1], strides = [1, 1]} : vector<20x64xf32> to vector<20x1xf32>
    %cst_55 = arith.constant 0.000000e+00 : f32
    %421 = vector.shape_cast %420 : vector<20x1xf32> to vector<20x1xf32>
    %422 = vector.broadcast %421 : vector<20x1xf32> to vector<20x80xf32>
    %423 = vector.broadcast %cst_55 : f32 to vector<20x80xf32>
    %424 = arith.select %419, %422, %423 : vector<20x80xi1>, vector<20x80xf32>
    %425 = vector.extract_strided_slice %11 {offsets = [0, 41], sizes = [20, 1], strides = [1, 1]} : vector<20x64xi32> to vector<20x1xi32>
    %426 = vector.broadcast %425 : vector<20x1xi32> to vector<20x80xi32>
    %427 = vector.broadcast %17 : vector<1x80xi32> to vector<20x80xi32>
    %428 = arith.cmpi eq, %426, %427 : vector<20x80xi32>
    %429 = vector.extract_strided_slice %13 {offsets = [0, 41], sizes = [20, 1], strides = [1, 1]} : vector<20x64xf32> to vector<20x1xf32>
    %cst_56 = arith.constant 0.000000e+00 : f32
    %430 = vector.shape_cast %429 : vector<20x1xf32> to vector<20x1xf32>
    %431 = vector.broadcast %430 : vector<20x1xf32> to vector<20x80xf32>
    %432 = vector.broadcast %cst_56 : f32 to vector<20x80xf32>
    %433 = arith.select %428, %431, %432 : vector<20x80xi1>, vector<20x80xf32>
    %434 = vector.extract_strided_slice %11 {offsets = [0, 42], sizes = [20, 1], strides = [1, 1]} : vector<20x64xi32> to vector<20x1xi32>
    %435 = vector.broadcast %434 : vector<20x1xi32> to vector<20x80xi32>
    %436 = vector.broadcast %17 : vector<1x80xi32> to vector<20x80xi32>
    %437 = arith.cmpi eq, %435, %436 : vector<20x80xi32>
    %438 = vector.extract_strided_slice %13 {offsets = [0, 42], sizes = [20, 1], strides = [1, 1]} : vector<20x64xf32> to vector<20x1xf32>
    %cst_57 = arith.constant 0.000000e+00 : f32
    %439 = vector.shape_cast %438 : vector<20x1xf32> to vector<20x1xf32>
    %440 = vector.broadcast %439 : vector<20x1xf32> to vector<20x80xf32>
    %441 = vector.broadcast %cst_57 : f32 to vector<20x80xf32>
    %442 = arith.select %437, %440, %441 : vector<20x80xi1>, vector<20x80xf32>
    %443 = vector.extract_strided_slice %11 {offsets = [0, 43], sizes = [20, 1], strides = [1, 1]} : vector<20x64xi32> to vector<20x1xi32>
    %444 = vector.broadcast %443 : vector<20x1xi32> to vector<20x80xi32>
    %445 = vector.broadcast %17 : vector<1x80xi32> to vector<20x80xi32>
    %446 = arith.cmpi eq, %444, %445 : vector<20x80xi32>
    %447 = vector.extract_strided_slice %13 {offsets = [0, 43], sizes = [20, 1], strides = [1, 1]} : vector<20x64xf32> to vector<20x1xf32>
    %cst_58 = arith.constant 0.000000e+00 : f32
    %448 = vector.shape_cast %447 : vector<20x1xf32> to vector<20x1xf32>
    %449 = vector.broadcast %448 : vector<20x1xf32> to vector<20x80xf32>
    %450 = vector.broadcast %cst_58 : f32 to vector<20x80xf32>
    %451 = arith.select %446, %449, %450 : vector<20x80xi1>, vector<20x80xf32>
    %452 = vector.extract_strided_slice %11 {offsets = [0, 44], sizes = [20, 1], strides = [1, 1]} : vector<20x64xi32> to vector<20x1xi32>
    %453 = vector.broadcast %452 : vector<20x1xi32> to vector<20x80xi32>
    %454 = vector.broadcast %17 : vector<1x80xi32> to vector<20x80xi32>
    %455 = arith.cmpi eq, %453, %454 : vector<20x80xi32>
    %456 = vector.extract_strided_slice %13 {offsets = [0, 44], sizes = [20, 1], strides = [1, 1]} : vector<20x64xf32> to vector<20x1xf32>
    %cst_59 = arith.constant 0.000000e+00 : f32
    %457 = vector.shape_cast %456 : vector<20x1xf32> to vector<20x1xf32>
    %458 = vector.broadcast %457 : vector<20x1xf32> to vector<20x80xf32>
    %459 = vector.broadcast %cst_59 : f32 to vector<20x80xf32>
    %460 = arith.select %455, %458, %459 : vector<20x80xi1>, vector<20x80xf32>
    %461 = vector.extract_strided_slice %11 {offsets = [0, 45], sizes = [20, 1], strides = [1, 1]} : vector<20x64xi32> to vector<20x1xi32>
    %462 = vector.broadcast %461 : vector<20x1xi32> to vector<20x80xi32>
    %463 = vector.broadcast %17 : vector<1x80xi32> to vector<20x80xi32>
    %464 = arith.cmpi eq, %462, %463 : vector<20x80xi32>
    %465 = vector.extract_strided_slice %13 {offsets = [0, 45], sizes = [20, 1], strides = [1, 1]} : vector<20x64xf32> to vector<20x1xf32>
    %cst_60 = arith.constant 0.000000e+00 : f32
    %466 = vector.shape_cast %465 : vector<20x1xf32> to vector<20x1xf32>
    %467 = vector.broadcast %466 : vector<20x1xf32> to vector<20x80xf32>
    %468 = vector.broadcast %cst_60 : f32 to vector<20x80xf32>
    %469 = arith.select %464, %467, %468 : vector<20x80xi1>, vector<20x80xf32>
    %470 = vector.extract_strided_slice %11 {offsets = [0, 46], sizes = [20, 1], strides = [1, 1]} : vector<20x64xi32> to vector<20x1xi32>
    %471 = vector.broadcast %470 : vector<20x1xi32> to vector<20x80xi32>
    %472 = vector.broadcast %17 : vector<1x80xi32> to vector<20x80xi32>
    %473 = arith.cmpi eq, %471, %472 : vector<20x80xi32>
    %474 = vector.extract_strided_slice %13 {offsets = [0, 46], sizes = [20, 1], strides = [1, 1]} : vector<20x64xf32> to vector<20x1xf32>
    %cst_61 = arith.constant 0.000000e+00 : f32
    %475 = vector.shape_cast %474 : vector<20x1xf32> to vector<20x1xf32>
    %476 = vector.broadcast %475 : vector<20x1xf32> to vector<20x80xf32>
    %477 = vector.broadcast %cst_61 : f32 to vector<20x80xf32>
    %478 = arith.select %473, %476, %477 : vector<20x80xi1>, vector<20x80xf32>
    %479 = vector.extract_strided_slice %11 {offsets = [0, 47], sizes = [20, 1], strides = [1, 1]} : vector<20x64xi32> to vector<20x1xi32>
    %480 = vector.broadcast %479 : vector<20x1xi32> to vector<20x80xi32>
    %481 = vector.broadcast %17 : vector<1x80xi32> to vector<20x80xi32>
    %482 = arith.cmpi eq, %480, %481 : vector<20x80xi32>
    %483 = vector.extract_strided_slice %13 {offsets = [0, 47], sizes = [20, 1], strides = [1, 1]} : vector<20x64xf32> to vector<20x1xf32>
    %cst_62 = arith.constant 0.000000e+00 : f32
    %484 = vector.shape_cast %483 : vector<20x1xf32> to vector<20x1xf32>
    %485 = vector.broadcast %484 : vector<20x1xf32> to vector<20x80xf32>
    %486 = vector.broadcast %cst_62 : f32 to vector<20x80xf32>
    %487 = arith.select %482, %485, %486 : vector<20x80xi1>, vector<20x80xf32>
    %488 = arith.addf %352, %361 : vector<20x80xf32>
    %489 = arith.addf %370, %379 : vector<20x80xf32>
    %490 = arith.addf %388, %397 : vector<20x80xf32>
    %491 = arith.addf %406, %415 : vector<20x80xf32>
    %492 = arith.addf %424, %433 : vector<20x80xf32>
    %493 = arith.addf %442, %451 : vector<20x80xf32>
    %494 = arith.addf %460, %469 : vector<20x80xf32>
    %495 = arith.addf %478, %487 : vector<20x80xf32>
    %496 = arith.addf %488, %489 : vector<20x80xf32>
    %497 = arith.addf %490, %491 : vector<20x80xf32>
    %498 = arith.addf %492, %493 : vector<20x80xf32>
    %499 = arith.addf %494, %495 : vector<20x80xf32>
    %500 = arith.addf %496, %497 : vector<20x80xf32>
    %501 = arith.addf %498, %499 : vector<20x80xf32>
    %502 = arith.addf %500, %501 : vector<20x80xf32>
    %503 = vector.extract_strided_slice %9 {offsets = [0, 16], sizes = [80, 8], strides = [1, 1]} : vector<80x32xf32> to vector<80x8xf32>
    %504 = arith.truncf %502 : vector<20x80xf32> to vector<20x80xbf16>
    %505 = arith.truncf %503 : vector<80x8xf32> to vector<80x8xbf16>
    %cst_63 = arith.constant dense<0.000000e+00> : vector<20x8xf32>
    %506 = tpu.matmul %504, %505, %cst_63 {dimension_numbers = #tpu.dot_dimension_numbers<[1], [0], [0], [1], [0, 0, 1, 1], [], []>} : vector<20x80xbf16>, vector<80x8xbf16>, vector<20x8xf32> -> vector<20x8xf32>
    %507 = vector.extract_strided_slice %11 {offsets = [0, 48], sizes = [20, 1], strides = [1, 1]} : vector<20x64xi32> to vector<20x1xi32>
    %508 = vector.broadcast %507 : vector<20x1xi32> to vector<20x80xi32>
    %509 = vector.broadcast %17 : vector<1x80xi32> to vector<20x80xi32>
    %510 = arith.cmpi eq, %508, %509 : vector<20x80xi32>
    %511 = vector.extract_strided_slice %13 {offsets = [0, 48], sizes = [20, 1], strides = [1, 1]} : vector<20x64xf32> to vector<20x1xf32>
    %cst_64 = arith.constant 0.000000e+00 : f32
    %512 = vector.shape_cast %511 : vector<20x1xf32> to vector<20x1xf32>
    %513 = vector.broadcast %512 : vector<20x1xf32> to vector<20x80xf32>
    %514 = vector.broadcast %cst_64 : f32 to vector<20x80xf32>
    %515 = arith.select %510, %513, %514 : vector<20x80xi1>, vector<20x80xf32>
    %516 = vector.extract_strided_slice %11 {offsets = [0, 49], sizes = [20, 1], strides = [1, 1]} : vector<20x64xi32> to vector<20x1xi32>
    %517 = vector.broadcast %516 : vector<20x1xi32> to vector<20x80xi32>
    %518 = vector.broadcast %17 : vector<1x80xi32> to vector<20x80xi32>
    %519 = arith.cmpi eq, %517, %518 : vector<20x80xi32>
    %520 = vector.extract_strided_slice %13 {offsets = [0, 49], sizes = [20, 1], strides = [1, 1]} : vector<20x64xf32> to vector<20x1xf32>
    %cst_65 = arith.constant 0.000000e+00 : f32
    %521 = vector.shape_cast %520 : vector<20x1xf32> to vector<20x1xf32>
    %522 = vector.broadcast %521 : vector<20x1xf32> to vector<20x80xf32>
    %523 = vector.broadcast %cst_65 : f32 to vector<20x80xf32>
    %524 = arith.select %519, %522, %523 : vector<20x80xi1>, vector<20x80xf32>
    %525 = vector.extract_strided_slice %11 {offsets = [0, 50], sizes = [20, 1], strides = [1, 1]} : vector<20x64xi32> to vector<20x1xi32>
    %526 = vector.broadcast %525 : vector<20x1xi32> to vector<20x80xi32>
    %527 = vector.broadcast %17 : vector<1x80xi32> to vector<20x80xi32>
    %528 = arith.cmpi eq, %526, %527 : vector<20x80xi32>
    %529 = vector.extract_strided_slice %13 {offsets = [0, 50], sizes = [20, 1], strides = [1, 1]} : vector<20x64xf32> to vector<20x1xf32>
    %cst_66 = arith.constant 0.000000e+00 : f32
    %530 = vector.shape_cast %529 : vector<20x1xf32> to vector<20x1xf32>
    %531 = vector.broadcast %530 : vector<20x1xf32> to vector<20x80xf32>
    %532 = vector.broadcast %cst_66 : f32 to vector<20x80xf32>
    %533 = arith.select %528, %531, %532 : vector<20x80xi1>, vector<20x80xf32>
    %534 = vector.extract_strided_slice %11 {offsets = [0, 51], sizes = [20, 1], strides = [1, 1]} : vector<20x64xi32> to vector<20x1xi32>
    %535 = vector.broadcast %534 : vector<20x1xi32> to vector<20x80xi32>
    %536 = vector.broadcast %17 : vector<1x80xi32> to vector<20x80xi32>
    %537 = arith.cmpi eq, %535, %536 : vector<20x80xi32>
    %538 = vector.extract_strided_slice %13 {offsets = [0, 51], sizes = [20, 1], strides = [1, 1]} : vector<20x64xf32> to vector<20x1xf32>
    %cst_67 = arith.constant 0.000000e+00 : f32
    %539 = vector.shape_cast %538 : vector<20x1xf32> to vector<20x1xf32>
    %540 = vector.broadcast %539 : vector<20x1xf32> to vector<20x80xf32>
    %541 = vector.broadcast %cst_67 : f32 to vector<20x80xf32>
    %542 = arith.select %537, %540, %541 : vector<20x80xi1>, vector<20x80xf32>
    %543 = vector.extract_strided_slice %11 {offsets = [0, 52], sizes = [20, 1], strides = [1, 1]} : vector<20x64xi32> to vector<20x1xi32>
    %544 = vector.broadcast %543 : vector<20x1xi32> to vector<20x80xi32>
    %545 = vector.broadcast %17 : vector<1x80xi32> to vector<20x80xi32>
    %546 = arith.cmpi eq, %544, %545 : vector<20x80xi32>
    %547 = vector.extract_strided_slice %13 {offsets = [0, 52], sizes = [20, 1], strides = [1, 1]} : vector<20x64xf32> to vector<20x1xf32>
    %cst_68 = arith.constant 0.000000e+00 : f32
    %548 = vector.shape_cast %547 : vector<20x1xf32> to vector<20x1xf32>
    %549 = vector.broadcast %548 : vector<20x1xf32> to vector<20x80xf32>
    %550 = vector.broadcast %cst_68 : f32 to vector<20x80xf32>
    %551 = arith.select %546, %549, %550 : vector<20x80xi1>, vector<20x80xf32>
    %552 = vector.extract_strided_slice %11 {offsets = [0, 53], sizes = [20, 1], strides = [1, 1]} : vector<20x64xi32> to vector<20x1xi32>
    %553 = vector.broadcast %552 : vector<20x1xi32> to vector<20x80xi32>
    %554 = vector.broadcast %17 : vector<1x80xi32> to vector<20x80xi32>
    %555 = arith.cmpi eq, %553, %554 : vector<20x80xi32>
    %556 = vector.extract_strided_slice %13 {offsets = [0, 53], sizes = [20, 1], strides = [1, 1]} : vector<20x64xf32> to vector<20x1xf32>
    %cst_69 = arith.constant 0.000000e+00 : f32
    %557 = vector.shape_cast %556 : vector<20x1xf32> to vector<20x1xf32>
    %558 = vector.broadcast %557 : vector<20x1xf32> to vector<20x80xf32>
    %559 = vector.broadcast %cst_69 : f32 to vector<20x80xf32>
    %560 = arith.select %555, %558, %559 : vector<20x80xi1>, vector<20x80xf32>
    %561 = vector.extract_strided_slice %11 {offsets = [0, 54], sizes = [20, 1], strides = [1, 1]} : vector<20x64xi32> to vector<20x1xi32>
    %562 = vector.broadcast %561 : vector<20x1xi32> to vector<20x80xi32>
    %563 = vector.broadcast %17 : vector<1x80xi32> to vector<20x80xi32>
    %564 = arith.cmpi eq, %562, %563 : vector<20x80xi32>
    %565 = vector.extract_strided_slice %13 {offsets = [0, 54], sizes = [20, 1], strides = [1, 1]} : vector<20x64xf32> to vector<20x1xf32>
    %cst_70 = arith.constant 0.000000e+00 : f32
    %566 = vector.shape_cast %565 : vector<20x1xf32> to vector<20x1xf32>
    %567 = vector.broadcast %566 : vector<20x1xf32> to vector<20x80xf32>
    %568 = vector.broadcast %cst_70 : f32 to vector<20x80xf32>
    %569 = arith.select %564, %567, %568 : vector<20x80xi1>, vector<20x80xf32>
    %570 = vector.extract_strided_slice %11 {offsets = [0, 55], sizes = [20, 1], strides = [1, 1]} : vector<20x64xi32> to vector<20x1xi32>
    %571 = vector.broadcast %570 : vector<20x1xi32> to vector<20x80xi32>
    %572 = vector.broadcast %17 : vector<1x80xi32> to vector<20x80xi32>
    %573 = arith.cmpi eq, %571, %572 : vector<20x80xi32>
    %574 = vector.extract_strided_slice %13 {offsets = [0, 55], sizes = [20, 1], strides = [1, 1]} : vector<20x64xf32> to vector<20x1xf32>
    %cst_71 = arith.constant 0.000000e+00 : f32
    %575 = vector.shape_cast %574 : vector<20x1xf32> to vector<20x1xf32>
    %576 = vector.broadcast %575 : vector<20x1xf32> to vector<20x80xf32>
    %577 = vector.broadcast %cst_71 : f32 to vector<20x80xf32>
    %578 = arith.select %573, %576, %577 : vector<20x80xi1>, vector<20x80xf32>
    %579 = vector.extract_strided_slice %11 {offsets = [0, 56], sizes = [20, 1], strides = [1, 1]} : vector<20x64xi32> to vector<20x1xi32>
    %580 = vector.broadcast %579 : vector<20x1xi32> to vector<20x80xi32>
    %581 = vector.broadcast %17 : vector<1x80xi32> to vector<20x80xi32>
    %582 = arith.cmpi eq, %580, %581 : vector<20x80xi32>
    %583 = vector.extract_strided_slice %13 {offsets = [0, 56], sizes = [20, 1], strides = [1, 1]} : vector<20x64xf32> to vector<20x1xf32>
    %cst_72 = arith.constant 0.000000e+00 : f32
    %584 = vector.shape_cast %583 : vector<20x1xf32> to vector<20x1xf32>
    %585 = vector.broadcast %584 : vector<20x1xf32> to vector<20x80xf32>
    %586 = vector.broadcast %cst_72 : f32 to vector<20x80xf32>
    %587 = arith.select %582, %585, %586 : vector<20x80xi1>, vector<20x80xf32>
    %588 = vector.extract_strided_slice %11 {offsets = [0, 57], sizes = [20, 1], strides = [1, 1]} : vector<20x64xi32> to vector<20x1xi32>
    %589 = vector.broadcast %588 : vector<20x1xi32> to vector<20x80xi32>
    %590 = vector.broadcast %17 : vector<1x80xi32> to vector<20x80xi32>
    %591 = arith.cmpi eq, %589, %590 : vector<20x80xi32>
    %592 = vector.extract_strided_slice %13 {offsets = [0, 57], sizes = [20, 1], strides = [1, 1]} : vector<20x64xf32> to vector<20x1xf32>
    %cst_73 = arith.constant 0.000000e+00 : f32
    %593 = vector.shape_cast %592 : vector<20x1xf32> to vector<20x1xf32>
    %594 = vector.broadcast %593 : vector<20x1xf32> to vector<20x80xf32>
    %595 = vector.broadcast %cst_73 : f32 to vector<20x80xf32>
    %596 = arith.select %591, %594, %595 : vector<20x80xi1>, vector<20x80xf32>
    %597 = vector.extract_strided_slice %11 {offsets = [0, 58], sizes = [20, 1], strides = [1, 1]} : vector<20x64xi32> to vector<20x1xi32>
    %598 = vector.broadcast %597 : vector<20x1xi32> to vector<20x80xi32>
    %599 = vector.broadcast %17 : vector<1x80xi32> to vector<20x80xi32>
    %600 = arith.cmpi eq, %598, %599 : vector<20x80xi32>
    %601 = vector.extract_strided_slice %13 {offsets = [0, 58], sizes = [20, 1], strides = [1, 1]} : vector<20x64xf32> to vector<20x1xf32>
    %cst_74 = arith.constant 0.000000e+00 : f32
    %602 = vector.shape_cast %601 : vector<20x1xf32> to vector<20x1xf32>
    %603 = vector.broadcast %602 : vector<20x1xf32> to vector<20x80xf32>
    %604 = vector.broadcast %cst_74 : f32 to vector<20x80xf32>
    %605 = arith.select %600, %603, %604 : vector<20x80xi1>, vector<20x80xf32>
    %606 = vector.extract_strided_slice %11 {offsets = [0, 59], sizes = [20, 1], strides = [1, 1]} : vector<20x64xi32> to vector<20x1xi32>
    %607 = vector.broadcast %606 : vector<20x1xi32> to vector<20x80xi32>
    %608 = vector.broadcast %17 : vector<1x80xi32> to vector<20x80xi32>
    %609 = arith.cmpi eq, %607, %608 : vector<20x80xi32>
    %610 = vector.extract_strided_slice %13 {offsets = [0, 59], sizes = [20, 1], strides = [1, 1]} : vector<20x64xf32> to vector<20x1xf32>
    %cst_75 = arith.constant 0.000000e+00 : f32
    %611 = vector.shape_cast %610 : vector<20x1xf32> to vector<20x1xf32>
    %612 = vector.broadcast %611 : vector<20x1xf32> to vector<20x80xf32>
    %613 = vector.broadcast %cst_75 : f32 to vector<20x80xf32>
    %614 = arith.select %609, %612, %613 : vector<20x80xi1>, vector<20x80xf32>
    %615 = vector.extract_strided_slice %11 {offsets = [0, 60], sizes = [20, 1], strides = [1, 1]} : vector<20x64xi32> to vector<20x1xi32>
    %616 = vector.broadcast %615 : vector<20x1xi32> to vector<20x80xi32>
    %617 = vector.broadcast %17 : vector<1x80xi32> to vector<20x80xi32>
    %618 = arith.cmpi eq, %616, %617 : vector<20x80xi32>
    %619 = vector.extract_strided_slice %13 {offsets = [0, 60], sizes = [20, 1], strides = [1, 1]} : vector<20x64xf32> to vector<20x1xf32>
    %cst_76 = arith.constant 0.000000e+00 : f32
    %620 = vector.shape_cast %619 : vector<20x1xf32> to vector<20x1xf32>
    %621 = vector.broadcast %620 : vector<20x1xf32> to vector<20x80xf32>
    %622 = vector.broadcast %cst_76 : f32 to vector<20x80xf32>
    %623 = arith.select %618, %621, %622 : vector<20x80xi1>, vector<20x80xf32>
    %624 = vector.extract_strided_slice %11 {offsets = [0, 61], sizes = [20, 1], strides = [1, 1]} : vector<20x64xi32> to vector<20x1xi32>
    %625 = vector.broadcast %624 : vector<20x1xi32> to vector<20x80xi32>
    %626 = vector.broadcast %17 : vector<1x80xi32> to vector<20x80xi32>
    %627 = arith.cmpi eq, %625, %626 : vector<20x80xi32>
    %628 = vector.extract_strided_slice %13 {offsets = [0, 61], sizes = [20, 1], strides = [1, 1]} : vector<20x64xf32> to vector<20x1xf32>
    %cst_77 = arith.constant 0.000000e+00 : f32
    %629 = vector.shape_cast %628 : vector<20x1xf32> to vector<20x1xf32>
    %630 = vector.broadcast %629 : vector<20x1xf32> to vector<20x80xf32>
    %631 = vector.broadcast %cst_77 : f32 to vector<20x80xf32>
    %632 = arith.select %627, %630, %631 : vector<20x80xi1>, vector<20x80xf32>
    %633 = vector.extract_strided_slice %11 {offsets = [0, 62], sizes = [20, 1], strides = [1, 1]} : vector<20x64xi32> to vector<20x1xi32>
    %634 = vector.broadcast %633 : vector<20x1xi32> to vector<20x80xi32>
    %635 = vector.broadcast %17 : vector<1x80xi32> to vector<20x80xi32>
    %636 = arith.cmpi eq, %634, %635 : vector<20x80xi32>
    %637 = vector.extract_strided_slice %13 {offsets = [0, 62], sizes = [20, 1], strides = [1, 1]} : vector<20x64xf32> to vector<20x1xf32>
    %cst_78 = arith.constant 0.000000e+00 : f32
    %638 = vector.shape_cast %637 : vector<20x1xf32> to vector<20x1xf32>
    %639 = vector.broadcast %638 : vector<20x1xf32> to vector<20x80xf32>
    %640 = vector.broadcast %cst_78 : f32 to vector<20x80xf32>
    %641 = arith.select %636, %639, %640 : vector<20x80xi1>, vector<20x80xf32>
    %642 = vector.extract_strided_slice %11 {offsets = [0, 63], sizes = [20, 1], strides = [1, 1]} : vector<20x64xi32> to vector<20x1xi32>
    %643 = vector.broadcast %642 : vector<20x1xi32> to vector<20x80xi32>
    %644 = vector.broadcast %17 : vector<1x80xi32> to vector<20x80xi32>
    %645 = arith.cmpi eq, %643, %644 : vector<20x80xi32>
    %646 = vector.extract_strided_slice %13 {offsets = [0, 63], sizes = [20, 1], strides = [1, 1]} : vector<20x64xf32> to vector<20x1xf32>
    %cst_79 = arith.constant 0.000000e+00 : f32
    %647 = vector.shape_cast %646 : vector<20x1xf32> to vector<20x1xf32>
    %648 = vector.broadcast %647 : vector<20x1xf32> to vector<20x80xf32>
    %649 = vector.broadcast %cst_79 : f32 to vector<20x80xf32>
    %650 = arith.select %645, %648, %649 : vector<20x80xi1>, vector<20x80xf32>
    %651 = arith.addf %515, %524 : vector<20x80xf32>
    %652 = arith.addf %533, %542 : vector<20x80xf32>
    %653 = arith.addf %551, %560 : vector<20x80xf32>
    %654 = arith.addf %569, %578 : vector<20x80xf32>
    %655 = arith.addf %587, %596 : vector<20x80xf32>
    %656 = arith.addf %605, %614 : vector<20x80xf32>
    %657 = arith.addf %623, %632 : vector<20x80xf32>
    %658 = arith.addf %641, %650 : vector<20x80xf32>
    %659 = arith.addf %651, %652 : vector<20x80xf32>
    %660 = arith.addf %653, %654 : vector<20x80xf32>
    %661 = arith.addf %655, %656 : vector<20x80xf32>
    %662 = arith.addf %657, %658 : vector<20x80xf32>
    %663 = arith.addf %659, %660 : vector<20x80xf32>
    %664 = arith.addf %661, %662 : vector<20x80xf32>
    %665 = arith.addf %663, %664 : vector<20x80xf32>
    %666 = vector.extract_strided_slice %9 {offsets = [0, 24], sizes = [80, 8], strides = [1, 1]} : vector<80x32xf32> to vector<80x8xf32>
    %667 = arith.truncf %665 : vector<20x80xf32> to vector<20x80xbf16>
    %668 = arith.truncf %666 : vector<80x8xf32> to vector<80x8xbf16>
    %cst_80 = arith.constant dense<0.000000e+00> : vector<20x8xf32>
    %669 = tpu.matmul %667, %668, %cst_80 {dimension_numbers = #tpu.dot_dimension_numbers<[1], [0], [0], [1], [0, 0, 1, 1], [], []>} : vector<20x80xbf16>, vector<80x8xbf16>, vector<20x8xf32> -> vector<20x8xf32>
    %c0_81 = arith.constant 0 : index
    %c0_82 = arith.constant 0 : index
    %670 = vector.load %arg14[%c0_81, %c0_82] : memref<20x32xf32, #tpu.memory_space<vmem>>, vector<20x32xf32>
    %671 = tpu.concatenate %180, %343, %506, %669 in 1 : vector<20x8xf32>, vector<20x8xf32>, vector<20x8xf32>, vector<20x8xf32> -> vector<20x32xf32>
    %672 = arith.addf %670, %671 : vector<20x32xf32>
    %c0_83 = arith.constant 0 : index
    %c0_84 = arith.constant 0 : index
    %673 = vector.load %arg14[%c0_83, %c0_84] : memref<20x32xf32, #tpu.memory_space<vmem>>, vector<20x32xf32>
    tpu.vector_store %arg14[%c0_83, %c0_84], %672 {strides = array<i32>} : memref<20x32xf32, #tpu.memory_space<vmem>>, vector<20x32xf32>,
    %c0_i32_85 = arith.constant 0 : i32
    %674 = arith.cmpi eq, %arg2, %c0_i32_85 : i32
    %675 = arith.extui %674 : i1 to i32
    %c0_i32_86 = arith.constant 0 : i32
    %676 = arith.cmpi ne, %675, %c0_i32_86 : i32
    scf.if %676 {
      %c0_87 = arith.constant 0 : index
      %c0_88 = arith.constant 0 : index
      %677 = vector.load %arg14[%c0_87, %c0_88] : memref<20x32xf32, #tpu.memory_space<vmem>>, vector<20x32xf32>
      %678 = arith.truncf %677 : vector<20x32xf32> to vector<20x32xbf16>
      %c0_89 = arith.constant 0 : index
      %c0_90 = arith.constant 0 : index
      %679 = vector.load %arg9[%c0_89, %c0_90] : memref<32x32xbf16, #tpu.memory_space<vmem>>, vector<32x32xbf16>
      %cst_91 = arith.constant dense<0.000000e+00> : vector<20x32xf32>
      %680 = tpu.matmul %678, %679, %cst_91 {dimension_numbers = #tpu.dot_dimension_numbers<[1], [0], [0], [1], [0, 0, 1, 1], [], []>} : vector<20x32xbf16>, vector<32x32xbf16>, vector<20x32xf32> -> vector<20x32xf32>
      %c0_92 = arith.constant 0 : index
      %c0_93 = arith.constant 0 : index
      %681 = vector.load %arg10[%c0_92, %c0_93] : memref<1x32xf32, #tpu.memory_space<vmem>>, vector<1x32xf32>
      %682 = vector.broadcast %681 : vector<1x32xf32> to vector<20x32xf32>
      %683 = arith.addf %680, %682 : vector<20x32xf32>
      %c0_94 = arith.constant 0 : index
      %c0_95 = arith.constant 0 : index
      %c0_96 = arith.constant 0 : index
      %684 = vector.load %arg6[%c0_94, %c0_95, %c0_96] : memref<1x20x32xf32, #tpu.memory_space<vmem>>, vector<1x20x32xf32>
      %685 = vector.shape_cast %684 : vector<1x20x32xf32> to vector<20x32xf32>
      %686 = arith.addf %685, %683 : vector<20x32xf32>
      %cst_97 = arith.constant dense<0.000000e+00> : vector<20xf32>
      %687 = vector.multi_reduction <add>, %686, %cst_97 [1] : vector<20x32xf32> to vector<20xf32>
      %688 = vector.shape_cast %687 : vector<20xf32> to vector<20x1xf32>
      %cst_98 = arith.constant 3.200000e+01 : f32
      %689 = vector.broadcast %cst_98 : f32 to vector<20x1xf32>
      %690 = arith.divf %688, %689 : vector<20x1xf32>
      %691 = vector.broadcast %690 : vector<20x1xf32> to vector<20x32xf32>
      %692 = arith.subf %686, %691 : vector<20x32xf32>
      %693 = arith.mulf %692, %692 : vector<20x32xf32>
      %cst_99 = arith.constant dense<0.000000e+00> : vector<20xf32>
      %694 = vector.multi_reduction <add>, %693, %cst_99 [1] : vector<20x32xf32> to vector<20xf32>
      %695 = vector.shape_cast %694 : vector<20xf32> to vector<20x1xf32>
      %cst_100 = arith.constant 3.200000e+01 : f32
      %696 = vector.broadcast %cst_100 : f32 to vector<20x1xf32>
      %697 = arith.divf %695, %696 : vector<20x1xf32>
      %698 = vector.broadcast %690 : vector<20x1xf32> to vector<20x32xf32>
      %699 = arith.subf %686, %698 : vector<20x32xf32>
      %cst_101 = arith.constant 9.99999974E-6 : f32
      %700 = vector.broadcast %cst_101 : f32 to vector<20x1xf32>
      %701 = arith.addf %697, %700 : vector<20x1xf32>
      %702 = math.rsqrt %701 : vector<20x1xf32>
      %703 = vector.broadcast %702 : vector<20x1xf32> to vector<20x32xf32>
      %704 = arith.mulf %699, %703 : vector<20x32xf32>
      %c0_102 = arith.constant 0 : index
      %c0_103 = arith.constant 0 : index
      %705 = vector.load %arg11[%c0_102, %c0_103] : memref<1x32xf32, #tpu.memory_space<vmem>>, vector<1x32xf32>
      %706 = vector.broadcast %705 : vector<1x32xf32> to vector<20x32xf32>
      %707 = arith.mulf %704, %706 : vector<20x32xf32>
      %c0_104 = arith.constant 0 : index
      %c0_105 = arith.constant 0 : index
      %708 = vector.load %arg12[%c0_104, %c0_105] : memref<1x32xf32, #tpu.memory_space<vmem>>, vector<1x32xf32>
      %709 = vector.broadcast %708 : vector<1x32xf32> to vector<20x32xf32>
      %710 = arith.addf %707, %709 : vector<20x32xf32>
      %c0_106 = arith.constant 0 : index
      %c0_107 = arith.constant 0 : index
      %c0_108 = arith.constant 0 : index
      %711 = vector.load %arg13[%c0_106, %c0_107, %c0_108] : memref<1x20x32xf32, #tpu.memory_space<vmem>>, vector<1x20x32xf32>
      %712 = vector.shape_cast %711 : vector<1x20x32xf32> to vector<20x32xf32>
      %713 = vector.shape_cast %710 : vector<20x32xf32> to vector<1x20x32xf32>
      tpu.vector_store %arg13[%c0_106, %c0_107, %c0_108], %713 {strides = array<i32>} : memref<1x20x32xf32, #tpu.memory_space<vmem>>, vector<1x20x32xf32>,
    } else {
    }
    return
  }
  func.func @transform_0(%arg0: i32, %arg1: i32, %arg2: i32) -> (i32, i32, i32) {
    %c0_i32 = arith.constant 0 : i32
    %c0_i32_0 = arith.constant 0 : i32
    return %arg0, %arg1, %c0_i32 : i32, i32, i32
  }
  func.func @transform_1(%arg0: i32, %arg1: i32, %arg2: i32) -> (i32, i32, i32) {
    %c0_i32 = arith.constant 0 : i32
    %c0_i32_0 = arith.constant 0 : i32
    return %arg0, %arg1, %c0_i32 : i32, i32, i32
  }
  func.func @transform_2(%arg0: i32, %arg1: i32, %arg2: i32) -> (i32, i32, i32) {
    %c0_i32 = arith.constant 0 : i32
    %c0_i32_0 = arith.constant 0 : i32
    return %arg0, %arg2, %c0_i32 : i32, i32, i32
  }
  func.func @transform_3(%arg0: i32, %arg1: i32, %arg2: i32) -> (i32, i32, i32) {
    %c0_i32 = arith.constant 0 : i32
    %c0_i32_0 = arith.constant 0 : i32
    return %arg0, %arg1, %c0_i32 : i32, i32, i32
  }
  func.func @transform_4(%arg0: i32, %arg1: i32, %arg2: i32) -> (i32, i32) {
    %c0_i32 = arith.constant 0 : i32
    %c0_i32_0 = arith.constant 0 : i32
    %c0_i32_1 = arith.constant 0 : i32
    return %c0_i32, %c0_i32_0 : i32, i32
  }
  func.func @transform_5(%arg0: i32, %arg1: i32, %arg2: i32) -> (i32, i32) {
    %c0_i32 = arith.constant 0 : i32
    %c0_i32_0 = arith.constant 0 : i32
    %c0_i32_1 = arith.constant 0 : i32
    return %c0_i32, %c0_i32_0 : i32, i32
  }
  func.func @transform_6(%arg0: i32, %arg1: i32, %arg2: i32) -> (i32, i32) {
    %c0_i32 = arith.constant 0 : i32
    %c0_i32_0 = arith.constant 0 : i32
    %c0_i32_1 = arith.constant 0 : i32
    return %c0_i32, %c0_i32_0 : i32, i32
  }
  func.func @transform_7(%arg0: i32, %arg1: i32, %arg2: i32) -> (i32, i32) {
    %c0_i32 = arith.constant 0 : i32
    %c0_i32_0 = arith.constant 0 : i32
    %c0_i32_1 = arith.constant 0 : i32
    return %c0_i32, %c0_i32_0 : i32, i32
  }
  func.func @transform_8(%arg0: i32, %arg1: i32, %arg2: i32) -> (i32, i32) {
    %c0_i32 = arith.constant 0 : i32
    %c0_i32_0 = arith.constant 0 : i32
    %c0_i32_1 = arith.constant 0 : i32
    return %c0_i32, %c0_i32_0 : i32, i32
  }
  func.func @transform_9(%arg0: i32, %arg1: i32, %arg2: i32) -> (i32, i32) {
    %c0_i32 = arith.constant 0 : i32
    %c0_i32_0 = arith.constant 0 : i32
    %c0_i32_1 = arith.constant 0 : i32
    return %c0_i32, %c0_i32_0 : i32, i32
  }
  func.func @transform_10(%arg0: i32, %arg1: i32, %arg2: i32) -> (i32, i32, i32) {
    %c0_i32 = arith.constant 0 : i32
    %c0_i32_0 = arith.constant 0 : i32
    return %arg0, %arg1, %c0_i32 : i32, i32, i32
  }
}

module attributes {stable_mosaic.version = 11 : i64} {
  func.func @kernel(%arg0: i32, %arg1: memref<40x32xf32, #tpu.memory_space<vmem>>, %arg2: memref<32x64xbf16, #tpu.memory_space<vmem>>, %arg3: memref<1x64xf32, #tpu.memory_space<vmem>>, %arg4: memref<64x32xbf16, #tpu.memory_space<vmem>>, %arg5: memref<1x32xf32, #tpu.memory_space<vmem>>, %arg6: memref<1x32xf32, #tpu.memory_space<vmem>>, %arg7: memref<1x32xf32, #tpu.memory_space<vmem>>, %arg8: memref<40x32xf32, #tpu.memory_space<vmem>>) attributes {dimension_semantics = [#tpu.dimension_semantics<parallel>], iteration_bounds = array<i64: 1>, scalar_prefetch = 0 : i64, scratch_operands = 0 : i64, tpu.core_type = #tpu.core_type<tc>, window_params = [{transform_indices = @transform_0, window_bounds = array<i64: 40, 32>}, {pipeline_mode = #tpu.pipeline_mode<synchronous>, transform_indices = @transform_1, window_bounds = array<i64: 32, 64>}, {pipeline_mode = #tpu.pipeline_mode<synchronous>, transform_indices = @transform_2, window_bounds = array<i64: 1, 64>}, {pipeline_mode = #tpu.pipeline_mode<synchronous>, transform_indices = @transform_3, window_bounds = array<i64: 64, 32>}, {pipeline_mode = #tpu.pipeline_mode<synchronous>, transform_indices = @transform_4, window_bounds = array<i64: 1, 32>}, {pipeline_mode = #tpu.pipeline_mode<synchronous>, transform_indices = @transform_5, window_bounds = array<i64: 1, 32>}, {pipeline_mode = #tpu.pipeline_mode<synchronous>, transform_indices = @transform_6, window_bounds = array<i64: 1, 32>}, {transform_indices = @transform_7, window_bounds = array<i64: 40, 32>}]} {
    %c0 = arith.constant 0 : index
    %c0_0 = arith.constant 0 : index
    %0 = vector.load %arg1[%c0, %c0_0] : memref<40x32xf32, #tpu.memory_space<vmem>>, vector<40x32xf32>
    %1 = arith.truncf %0 : vector<40x32xf32> to vector<40x32xbf16>
    %c0_1 = arith.constant 0 : index
    %c0_2 = arith.constant 0 : index
    %2 = vector.load %arg2[%c0_1, %c0_2] : memref<32x64xbf16, #tpu.memory_space<vmem>>, vector<32x64xbf16>
    %cst = arith.constant dense<0.000000e+00> : vector<40x64xf32>
    %3 = tpu.matmul %1, %2, %cst {dimension_numbers = #tpu.dot_dimension_numbers<[1], [0], [0], [1], [0, 0, 1, 1], [], []>} : vector<40x32xbf16>, vector<32x64xbf16>, vector<40x64xf32> -> vector<40x64xf32>
    %c0_3 = arith.constant 0 : index
    %c0_4 = arith.constant 0 : index
    %4 = vector.load %arg3[%c0_3, %c0_4] : memref<1x64xf32, #tpu.memory_space<vmem>>, vector<1x64xf32>
    %5 = vector.broadcast %4 : vector<1x64xf32> to vector<40x64xf32>
    %6 = arith.addf %3, %5 : vector<40x64xf32>
    %cst_5 = arith.constant 0.000000e+00 : f32
    %7 = vector.broadcast %cst_5 : f32 to vector<40x64xf32>
    %8 = arith.maximumf %6, %7 : vector<40x64xf32>
    %9 = arith.truncf %8 : vector<40x64xf32> to vector<40x64xbf16>
    %c0_6 = arith.constant 0 : index
    %c0_7 = arith.constant 0 : index
    %10 = vector.load %arg4[%c0_6, %c0_7] : memref<64x32xbf16, #tpu.memory_space<vmem>>, vector<64x32xbf16>
    %cst_8 = arith.constant dense<0.000000e+00> : vector<40x32xf32>
    %11 = tpu.matmul %9, %10, %cst_8 {dimension_numbers = #tpu.dot_dimension_numbers<[1], [0], [0], [1], [0, 0, 1, 1], [], []>} : vector<40x64xbf16>, vector<64x32xbf16>, vector<40x32xf32> -> vector<40x32xf32>
    %c0_9 = arith.constant 0 : index
    %c0_10 = arith.constant 0 : index
    %12 = vector.load %arg5[%c0_9, %c0_10] : memref<1x32xf32, #tpu.memory_space<vmem>>, vector<1x32xf32>
    %13 = vector.broadcast %12 : vector<1x32xf32> to vector<40x32xf32>
    %14 = arith.addf %11, %13 : vector<40x32xf32>
    %15 = arith.addf %0, %14 : vector<40x32xf32>
    %cst_11 = arith.constant dense<0.000000e+00> : vector<40xf32>
    %16 = vector.multi_reduction <add>, %15, %cst_11 [1] : vector<40x32xf32> to vector<40xf32>
    %17 = vector.shape_cast %16 : vector<40xf32> to vector<40x1xf32>
    %cst_12 = arith.constant 3.200000e+01 : f32
    %18 = vector.broadcast %cst_12 : f32 to vector<40x1xf32>
    %19 = arith.divf %17, %18 : vector<40x1xf32>
    %20 = vector.broadcast %19 : vector<40x1xf32> to vector<40x32xf32>
    %21 = arith.subf %15, %20 : vector<40x32xf32>
    %22 = arith.mulf %21, %21 : vector<40x32xf32>
    %cst_13 = arith.constant dense<0.000000e+00> : vector<40xf32>
    %23 = vector.multi_reduction <add>, %22, %cst_13 [1] : vector<40x32xf32> to vector<40xf32>
    %24 = vector.shape_cast %23 : vector<40xf32> to vector<40x1xf32>
    %cst_14 = arith.constant 3.200000e+01 : f32
    %25 = vector.broadcast %cst_14 : f32 to vector<40x1xf32>
    %26 = arith.divf %24, %25 : vector<40x1xf32>
    %27 = vector.broadcast %19 : vector<40x1xf32> to vector<40x32xf32>
    %28 = arith.subf %15, %27 : vector<40x32xf32>
    %cst_15 = arith.constant 9.99999974E-6 : f32
    %29 = vector.broadcast %cst_15 : f32 to vector<40x1xf32>
    %30 = arith.addf %26, %29 : vector<40x1xf32>
    %31 = math.rsqrt %30 : vector<40x1xf32>
    %32 = vector.broadcast %31 : vector<40x1xf32> to vector<40x32xf32>
    %33 = arith.mulf %28, %32 : vector<40x32xf32>
    %c0_16 = arith.constant 0 : index
    %c0_17 = arith.constant 0 : index
    %34 = vector.load %arg6[%c0_16, %c0_17] : memref<1x32xf32, #tpu.memory_space<vmem>>, vector<1x32xf32>
    %35 = vector.broadcast %34 : vector<1x32xf32> to vector<40x32xf32>
    %36 = arith.mulf %33, %35 : vector<40x32xf32>
    %c0_18 = arith.constant 0 : index
    %c0_19 = arith.constant 0 : index
    %37 = vector.load %arg7[%c0_18, %c0_19] : memref<1x32xf32, #tpu.memory_space<vmem>>, vector<1x32xf32>
    %38 = vector.broadcast %37 : vector<1x32xf32> to vector<40x32xf32>
    %39 = arith.addf %36, %38 : vector<40x32xf32>
    %c0_20 = arith.constant 0 : index
    %c0_21 = arith.constant 0 : index
    %40 = vector.load %arg8[%c0_20, %c0_21] : memref<40x32xf32, #tpu.memory_space<vmem>>, vector<40x32xf32>
    tpu.vector_store %arg8[%c0_20, %c0_21], %39 {strides = array<i32>} : memref<40x32xf32, #tpu.memory_space<vmem>>, vector<40x32xf32>,
    return
  }
  func.func @transform_0(%arg0: i32) -> (i32, i32) {
    %c0_i32 = arith.constant 0 : i32
    %c0_i32_0 = arith.constant 0 : i32
    return %arg0, %c0_i32 : i32, i32
  }
  func.func @transform_1(%arg0: i32) -> (i32, i32) {
    %c0_i32 = arith.constant 0 : i32
    %c0_i32_0 = arith.constant 0 : i32
    %c0_i32_1 = arith.constant 0 : i32
    return %c0_i32, %c0_i32_0 : i32, i32
  }
  func.func @transform_2(%arg0: i32) -> (i32, i32) {
    %c0_i32 = arith.constant 0 : i32
    %c0_i32_0 = arith.constant 0 : i32
    %c0_i32_1 = arith.constant 0 : i32
    return %c0_i32, %c0_i32_0 : i32, i32
  }
  func.func @transform_3(%arg0: i32) -> (i32, i32) {
    %c0_i32 = arith.constant 0 : i32
    %c0_i32_0 = arith.constant 0 : i32
    %c0_i32_1 = arith.constant 0 : i32
    return %c0_i32, %c0_i32_0 : i32, i32
  }
  func.func @transform_4(%arg0: i32) -> (i32, i32) {
    %c0_i32 = arith.constant 0 : i32
    %c0_i32_0 = arith.constant 0 : i32
    %c0_i32_1 = arith.constant 0 : i32
    return %c0_i32, %c0_i32_0 : i32, i32
  }
  func.func @transform_5(%arg0: i32) -> (i32, i32) {
    %c0_i32 = arith.constant 0 : i32
    %c0_i32_0 = arith.constant 0 : i32
    %c0_i32_1 = arith.constant 0 : i32
    return %c0_i32, %c0_i32_0 : i32, i32
  }
  func.func @transform_6(%arg0: i32) -> (i32, i32) {
    %c0_i32 = arith.constant 0 : i32
    %c0_i32_0 = arith.constant 0 : i32
    %c0_i32_1 = arith.constant 0 : i32
    return %c0_i32, %c0_i32_0 : i32, i32
  }
  func.func @transform_7(%arg0: i32) -> (i32, i32) {
    %c0_i32 = arith.constant 0 : i32
    %c0_i32_0 = arith.constant 0 : i32
    return %arg0, %c0_i32 : i32, i32
  }
}

</mosaic_0001>

<bundles_post_ra>
// kernel: deform_transformer_decoder.10
= control target key start
LH: loop header
LB: loop body
LE: loop exit
PB: predicated region body
PF: predicated region fallthrough
CT: control target
= control target key end

     0   :  { %v667_v0 = vmov 0.0   ;;  %vm668_vm0 = vmmov 0   ;;  %vm61_vm1 = vcmask 261120   ;;  %vm132_vm2 = vcmask 294144   ;;  %s670_s25 = smov 92   ;;  %s671_s26 = smov 88   ;;  %s1018_s2 = inlined_call_operand.vmem [shape: bf16[32,48], index: 2, kind: input, shape index: {}]   ;;  %s1019_s0 = inlined_call_operand.vmem [shape: f32[40,32], index: 0, kind: input, shape index: {}]   ;;  %s1020_s1 = inlined_call_operand.vmem [shape: f32[40,32], index: 1, kind: input, shape index: {}]   ;;  %s1021_s3 = inlined_call_operand.vmem [shape: f32[1,48], index: 3, kind: input, shape index: {}]   ;;  %s1022_s4 = inlined_call_operand.vmem [shape: f32[40,32], index: 4, kind: output, shape index: {0}]   ;;  %s1023_s5 = inlined_call_operand.vmem [shape: f32[40,16], index: 5, kind: output, shape index: {1}]  }
   0x1   :  { %559 = vmatprep.subr.bf16.mxu0 %v667_v0  ;;  %575 = vmatprep.subr.bf16.mxu1 %v667_v0  ;;  %v585_v1 = vld [vmem:[%s1018_s2 + $0x8] sm:$0xff]   ;;  %v586_v2 = vld [vmem:[%s1018_s2] sm:$0xff]   ;;  %v22_v8 = vld [vmem:[%s1019_s0 + $0x10] sm:$0xff]  ;;  %vm209_vm3 = vcmask 326944   ;;  %vm285_vm4 = vcmask 359744   ;;  %vm361_vm5 = vcmask 392544  }
   0x2   :  { %563 = vmatprep.mubr.msk.bf16.mxu0 %vm668_vm0, %v667_v0  ;;  %567 = vmatprep.mubr.msk.bf16.mxu1 %vm668_vm0, %v667_v0  ;;  %v20_v3 = vld [vmem:[%s1019_s0] sm:$0xff]  ;;  %v21_v4 = vld [vmem:[%s1019_s0 + $0x8] sm:$0xff]  ;;  %v23_v9 = vld [vmem:[%s1019_s0 + $0x18] sm:$0xff]  ;;  %s672_s27 = smov 84   ;;  %vm183_vm6 = vcmask 31744   ;;  %vm522_vm7 = vcmask 64512  }
   0x3   :  { %560 = vmatpush3.bf16.msra.mxu0 %v585_v1  ;;  %577 = vmatpush3.bf16.msra.mxu1 %v585_v1  ;;  %v25_v5 = vld [vmem:[%s1020_s1] sm:$0xff]  ;;  %v26_v6 = vld [vmem:[%s1020_s1 + $0x8] sm:$0xff]  ;;  %v27_v11 = vld [vmem:[%s1020_s1 + $0x10] sm:$0xff]  ;;  %vm528_vm8 = vcmask 97280   ;;  %vm534_vm9 = vcmask 130048  }
   0x4   :  { %561 = vmatprep.subr.bf16.mxu0 %v667_v0  ;;  %576 = vmatprep.subr.bf16.mxu1 %v667_v0  ;;  %v30_v7 = vadd.f32 %v25_v5, %v20_v3  ;;  %v31_v10 = vadd.f32 %v26_v6, %v21_v4  ;;  %v28_v12 = vld [vmem:[%s1020_s1 + $0x18] sm:$0xff]  ;;  %v32_v13 = vadd.f32 %v27_v11, %v22_v8  ;;  %v24_v16 = vld [vmem:[%s1019_s0 + $0x20] sm:$0xff] }
   0x5   :  { %v33_v14 = vadd.f32 %v28_v12, %v23_v9  ;;  %v29_v17 = vld [vmem:[%s1020_s1 + $0x20] sm:$0xff] }
   0x6   :  { %v35_v15 = vpack.c.bf16 %v31_v10, %v30_v7  ;;  %v34_v19 = vadd.f32 %v29_v17, %v24_v16  ;;  %v548_v21 = vld [vmem:[%s1021_s3] ss:$0 sm:$0xff] }
   0x7   :  { %562 = vmatpush3.bf16.msra.mxu0 %v586_v2  ;;  %578 = vmatpush3.bf16.msra.mxu1 %v586_v2  ;;  %v36_v18 = vpack.c.bf16 %v33_v14, %v32_v13 }
   0x8   :  { %v37_v20 = vpack.c.bf16 %v34_v19, %v34_v19 }
   0xa   :  { %564 = vmatmul.mubr.msk.bf16.vlgmr.msra.gmra.mxu0 %vm61_vm1, %v35_v15  ;;  %568 = vmatmul.mubr.msk.bf16.vlgmr.msra.gmra.mxu1 %vm61_vm1, %v36_v18 }
   0xb   :  { %571 = vmatprep.mubr.msk.bf16.mxu1 %vm668_vm0, %v667_v0 }
  0x12   :  { %572 = vmatmul.mubr.msk.bf16.gmra.mxu1 %vm61_vm1, %v37_v20 }
  0xca   :  { %v105_v22 = vpop.f32.mrf.mxu0  ;;  %v113_v23 = vpop.f32.mrf.mxu1 }
  0xcb   :  { %v748_v24 = vadd.f32 %v548_v21, %v105_v22  ;;  %v750_v25 = vadd.f32 %v548_v21, %v113_v23 }
  0xcc   :  { %v565_v26 = vpop.f32.mrf.mxu0  ;;  %v569_v27 = vpop.f32.mrf.mxu1 }
  0xcd   :  { %127 = vst.msk [vmem:[%s1022_s4] sm:$0xff] %vm61_vm1, %v748_v24  ;;  %129 = vst.msk [vmem:[%s1022_s4 + $0x10] sm:$0xff] %vm61_vm1, %v750_v25  ;;  %v139_v28 = vsel %vm132_vm2, %v750_v25, -inf  ;;  %v133_v29 = vsel %vm132_vm2, %v748_v24, -inf  ;;  %v210_v36 = vsel %vm209_vm3, %v748_v24, -inf  ;;  %v286_v37 = vsel %vm285_vm4, %v748_v24, -inf }
  0xce   :  { %140 = vmax.xlane.f32.xlu1 %v139_v28  ;;  %v116_v30 = vpop.f32.mrf.mxu1  ;;  %134 = vmax.xlane.f32.xlu0 %v133_v29  ;;  %v108_v31 = vpop.f32.mrf.mxu0  ;;  %v216_v41 = vsel %vm209_vm3, %v750_v25, -inf  ;;  %v292_v42 = vsel %vm285_vm4, %v750_v25, -inf  ;;  %v362_v45 = vsel %vm361_vm5, %v748_v24, -inf  ;;  %v368_v47 = vsel %vm361_vm5, %v750_v25, -inf }
  0xcf   :  { %v766_v32 = vadd.f32 %v548_v21, %v116_v30  ;;  %v768_v33 = vadd.f32 %v548_v21, %v108_v31 }
  0xd0   :  { %v566_v34 = vpop.f32.mrf.mxu0  ;;  %v570_v35 = vpop.f32.mrf.mxu1 }
  0xd1   :  { %130 = vst.msk [vmem:[%s1022_s4 + $0x18] sm:$0xff] %vm61_vm1, %v766_v32  ;;  %128 = vst.msk [vmem:[%s1022_s4 + $0x8] sm:$0xff] %vm61_vm1, %v768_v33  ;;  %v136_v46 = vsel %vm132_vm2, %v768_v33, -inf  ;;  %v213_v48 = vsel %vm209_vm3, %v768_v33, -inf  ;;  %v142_v49 = vsel %vm132_vm2, %v766_v32, -inf  ;;  %v219_v50 = vsel %vm209_vm3, %v766_v32, -inf }
  0xd2   :  { %211 = vmax.xlane.f32.xlu1 %v210_v36  ;;  %287 = vmax.xlane.f32.xlu0 %v286_v37  ;;  %v121_v38 = vpop.f32.mrf.mxu1  ;;  %v289_v51 = vsel %vm285_vm4, %v768_v33, -inf  ;;  %v365_v52 = vsel %vm361_vm5, %v768_v33, -inf  ;;  %v295_v54 = vsel %vm285_vm4, %v766_v32, -inf  ;;  %v371_v58 = vsel %vm361_vm5, %v766_v32, -inf }
  0xd3   :  { %v784_v39 = vadd.f32 %v548_v21, %v121_v38 }
  0xd4   :  { %v573_v40 = vpop.f32.mrf.mxu1 }
  0xd5   :  { %131 = vst.msk [vmem:[%s1022_s4 + $0x20] sm:$0xff] %vm61_vm1, %v784_v39  ;;  %v145_v53 = vsel %vm132_vm2, %v784_v39, -inf  ;;  %v222_v55 = vsel %vm209_vm3, %v784_v39, -inf  ;;  %v298_v56 = vsel %vm285_vm4, %v784_v39, -inf  ;;  %v374_v57 = vsel %vm361_vm5, %v784_v39, -inf  ;;  %s669_s4 = smov 96  }
  0xd6   :  { %217 = vmax.xlane.f32.xlu1 %v216_v41  ;;  %293 = vmax.xlane.f32.xlu0 %v292_v42  ;;  %v124_v43 = vpop.f32.mrf.mxu1 }
  0xd8   :  { %v574_v44 = vpop.f32.mrf.mxu1 }
  0xda   :  { %363 = vmax.xlane.f32.xlu1 %v362_v45  ;;  %137 = vmax.xlane.f32.xlu0 %v136_v46 }
  0xde   :  { %369 = vmax.xlane.f32.xlu1 %v368_v47  ;;  %214 = vmax.xlane.f32.xlu0 %v213_v48 }
  0xe2   :  { %143 = vmax.xlane.f32.xlu1 %v142_v49  ;;  %220 = vmax.xlane.f32.xlu0 %v219_v50 }
  0xe6   :  { %290 = vmax.xlane.f32.xlu1 %v289_v51  ;;  %366 = vmax.xlane.f32.xlu0 %v365_v52 }
  0xea   :  { %296 = vmax.xlane.f32.xlu1 %v295_v54  ;;  %146 = vmax.xlane.f32.xlu0 %v145_v53 }
  0xee   :  { %223 = vmax.xlane.f32.xlu1 %v222_v55  ;;  %299 = vmax.xlane.f32.xlu0 %v298_v56 }
  0xf2   :  { %375 = vmax.xlane.f32.xlu1 %v374_v57  ;;  %372 = vmax.xlane.f32.xlu0 %v371_v58 }
 0x157   :  { %v141_v59 = vpop.xlane.xlu1 %140  ;;  %v135_v60 = vpop.xlane.xlu0 %134 }
 0x158   :  { %v150_v61 = vsub.f32 %v750_v25, %v141_v59  ;;  %v148_v62 = vsub.f32 %v748_v24, %v135_v60 }
 0x15a   :  { %v157_v63 = vmul.f32 1.442695, %v150_v61  ;;  %v153_v0 = vmul.f32 1.442695, %v148_v62 }
 0x15b   :  { %v212_v1 = vpop.xlane.xlu1 %211  ;;  %v288_v2 = vpop.xlane.xlu0 %287 }
 0x15c   :  { %587 = vpow2.f32 %v157_v63  ;;  %v225_v3 = vsub.f32 %v748_v24, %v212_v1  ;;  %v301_v4 = vsub.f32 %v748_v24, %v288_v2 }
 0x15d   :  { %589 = vpow2.f32 %v153_v0 }
 0x15e   :  { %v230_v5 = vmul.f32 1.442695, %v225_v3  ;;  %v306_v6 = vmul.f32 1.442695, %v301_v4 }
 0x15f   :  { %v218_v7 = vpop.xlane.xlu1 %217  ;;  %v294_v8 = vpop.xlane.xlu0 %293 }
 0x160   :  { %591 = vpow2.f32 %v230_v5  ;;  %v227_v9 = vsub.f32 %v750_v25, %v218_v7  ;;  %v303_v10 = vsub.f32 %v750_v25, %v294_v8 }
 0x161   :  { %593 = vpow2.f32 %v306_v6 }
 0x162   :  { %v234_v11 = vmul.f32 1.442695, %v227_v9  ;;  %v310_v12 = vmul.f32 1.442695, %v303_v10 }
 0x163   :  { %v364_v13 = vpop.xlane.xlu1 %363  ;;  %v138_v14 = vpop.xlane.xlu0 %137 }
 0x164   :  { %595 = vpow2.f32 %v234_v11  ;;  %v377_v15 = vsub.f32 %v748_v24, %v364_v13  ;;  %v149_v19 = vsub.f32 %v768_v33, %v138_v14 }
 0x165   :  { %597 = vpow2.f32 %v310_v12 }
 0x166   :  { %v382_v16 = vmul.f32 1.442695, %v377_v15  ;;  %v155_v29 = vmul.f32 1.442695, %v149_v19 }
 0x167   :  { %v370_v17 = vpop.xlane.xlu1 %369  ;;  %v215_v18 = vpop.xlane.xlu0 %214 }
 0x168   :  { %599 = vpow2.f32 %v382_v16  ;;  %v379_v20 = vsub.f32 %v750_v25, %v370_v17  ;;  %v226_v21 = vsub.f32 %v768_v33, %v215_v18 }
 0x169   :  { %v833_v22 = vpop.eup %587 }
 0x16a   :  { %v835_v23 = vpop.eup %589  ;;  %v386_v26 = vmul.f32 1.442695, %v379_v20  ;;  %v232_v27 = vmul.f32 1.442695, %v226_v21  ;;  %172 = vrot.lane.b32.xlu1 %v833_v22, %s669_s4 }
 0x16b   :  { %168 = vrot.lane.b32.xlu0 %v835_v23, %s669_s4  ;;  %v144_v24 = vpop.xlane.xlu1 %143  ;;  %v221_v28 = vpop.xlane.xlu0 %220 }
 0x16c   :  { %601 = vpow2.f32 %v386_v26  ;;  %v151_v25 = vsub.f32 %v766_v32, %v144_v24  ;;  %v228_v30 = vsub.f32 %v766_v32, %v221_v28 }
 0x16d   :  { %v843_v31 = vpop.eup %591  ;;  %603 = vpow2.f32 %v232_v27 }
 0x16e   :  { %v845_v34 = vpop.eup %593  ;;  %v236_v35 = vmul.f32 1.442695, %v228_v30  ;;  %245 = vrot.lane.b32.xlu1 %v843_v31, %s670_s25  ;;  %605 = vpow2.f32 %v155_v29  ;;  %v159_v38 = vmul.f32 1.442695, %v151_v25 }
 0x16f   :  { %321 = vrot.lane.b32.xlu0 %v845_v34, %s671_s26  ;;  %v291_v36 = vpop.xlane.xlu1 %290  ;;  %v367_v37 = vpop.xlane.xlu0 %366 }
 0x170   :  { %v302_v40 = vsub.f32 %v768_v33, %v291_v36  ;;  %v378_v41 = vsub.f32 %v768_v33, %v367_v37  ;;  %607 = vpow2.f32 %v236_v35 }
 0x171   :  { %v853_v42 = vpop.eup %595  ;;  %609 = vpow2.f32 %v159_v38 }
 0x172   :  { %v855_v43 = vpop.eup %597  ;;  %v384_v44 = vmul.f32 1.442695, %v378_v41  ;;  %249 = vrot.lane.b32.xlu1 %v853_v42, %s670_s25  ;;  %v308_v47 = vmul.f32 1.442695, %v302_v40 }
 0x173   :  { %325 = vrot.lane.b32.xlu0 %v855_v43, %s671_s26  ;;  %v297_v45 = vpop.xlane.xlu1 %296  ;;  %v147_v46 = vpop.xlane.xlu0 %146 }
 0x174   :  { %v304_v48 = vsub.f32 %v766_v32, %v297_v45  ;;  %611 = vpow2.f32 %v384_v44  ;;  %v152_v61 = vsub.f32 %v784_v39, %v147_v46 }
 0x175   :  { %v862_v49 = vpop.eup %599  ;;  %613 = vpow2.f32 %v308_v47 }
 0x176   :  { %397 = vrot.lane.b32.xlu1 %v862_v49, %s672_s27  ;;  %v312_v51 = vmul.f32 1.442695, %v304_v48  ;;  %v161_v2 = vmul.f32 1.442695, %v152_v61 }
 0x177   :  { %v224_v33 = vpop.xlane.xlu1 %223  ;;  %v300_v50 = vpop.xlane.xlu0 %299 }
 0x178   :  { %v229_v52 = vsub.f32 %v784_v39, %v224_v33  ;;  %615 = vpow2.f32 %v312_v51 }
 0x179   :  { %v867_v53 = vpop.eup %601 }
 0x17a   :  { %v869_v54 = vpop.eup %603  ;;  %401 = vrot.lane.b32.xlu1 %v867_v53, %s672_s27  ;;  %v238_v57 = vmul.f32 1.442695, %v229_v52 }
 0x17b   :  { %247 = vrot.lane.b32.xlu0 %v869_v54, %s670_s25  ;;  %v376_v55 = vpop.xlane.xlu1 %375  ;;  %v373_v56 = vpop.xlane.xlu0 %372 }
 0x17c   :  { %v381_v58 = vsub.f32 %v784_v39, %v376_v55  ;;  %v380_v59 = vsub.f32 %v766_v32, %v373_v56  ;;  %v877_v60 = vpop.eup %605  ;;  %617 = vpow2.f32 %v238_v57  ;;  %v305_v32 = vsub.f32 %v784_v39, %v300_v50 }
 0x17d   :  { %v880_v62 = vpop.eup %607 }
 0x17e   :  { %v388_v63 = vmul.f32 1.442695, %v380_v59  ;;  %170 = vrot.lane.b32.xlu1 %v877_v60, %s669_s4  ;;  %v390_v0 = vmul.f32 1.442695, %v381_v58  ;;  %v886_v1 = vpop.eup %609  ;;  %v314_v5 = vmul.f32 1.442695, %v305_v32 }
 0x17f   :  { %251 = vrot.lane.b32.xlu0 %v880_v62, %s670_s25 }
 0x180   :  { %619 = vpow2.f32 %v388_v63 }
 0x181   :  { %v889_v3 = vpop.eup %611  ;;  %621 = vpow2.f32 %v390_v0 }
 0x182   :  { %174 = vrot.lane.b32.xlu1 %v886_v1, %s669_s4  ;;  %v895_v4 = vpop.eup %613  ;;  %623 = vpow2.f32 %v161_v2 }
 0x183   :  { %399 = vrot.lane.b32.xlu0 %v889_v3, %s672_s27  ;;  %625 = vpow2.f32 %v314_v5 }
 0x185   :  { %v899_v6 = vpop.eup %615 }
 0x186   :  { %323 = vrot.lane.b32.xlu1 %v895_v4, %s671_s26 }
 0x189   :  { %v903_v39 = vpop.eup %617 }
 0x18a   :  { %327 = vrot.lane.b32.xlu1 %v899_v6, %s671_s26 }
 0x18d   :  { %v905_v7 = vpop.eup %619 }
 0x18e   :  { %253 = vrot.lane.b32.xlu1 %v903_v39, %s670_s25  ;;  %403 = vrot.lane.b32.xlu0 %v905_v7, %s672_s27  ;;  %v911_v8 = vpop.eup %621 }
 0x18f   :  { %v913_v9 = vpop.eup %623 }
 0x190   :  { %v919_v10 = vpop.eup %625 }
 0x192   :  { %405 = vrot.lane.b32.xlu1 %v911_v8, %s672_s27  ;;  %176 = vrot.lane.b32.xlu0 %v913_v9, %s669_s4 }
 0x196   :  { %329 = vrot.lane.b32.xlu0 %v919_v10, %s671_s26 }
 0x1dc   :  { %v173_v11 = vpop.permute.xlu1 %172 }
 0x1dd   :  { %v169_v12 = vpop.permute.xlu0 %168  ;;  %v190_v17 = vsel %vm183_vm6, %v173_v11, 0.0 }
 0x1de   :  { %v184_v13 = vsel %vm183_vm6, %v169_v12, 0.0 }
 0x1df   :  { %185 = vadd.xlane.f32.xlu0 %v184_v13 }
 0x1e0   :  { %v246_v14 = vpop.permute.xlu1 %245 }
 0x1e1   :  { %v322_v15 = vpop.permute.xlu0 %321  ;;  %v260_v16 = vsel %vm183_vm6, %v246_v14, 0.0 }
 0x1e2   :  { %261 = vadd.xlane.f32.xlu1 %v260_v16  ;;  %v336_v20 = vsel %vm183_vm6, %v322_v15, 0.0 }
 0x1e3   :  { %191 = vadd.xlane.f32.xlu0 %v190_v17 }
 0x1e4   :  { %v250_v18 = vpop.permute.xlu1 %249 }
 0x1e5   :  { %v266_v19 = vsel %vm183_vm6, %v250_v18, 0.0  ;;  %v326_v21 = vpop.permute.xlu0 %325 }
 0x1e6   :  { %267 = vadd.xlane.f32.xlu1 %v266_v19  ;;  %v342_v24 = vsel %vm183_vm6, %v326_v21, 0.0 }
 0x1e7   :  { %337 = vadd.xlane.f32.xlu0 %v336_v20 }
 0x1e8   :  { %v398_v26 = vpop.permute.xlu1 %397 }
 0x1e9   :  { %v412_v27 = vsel %vm183_vm6, %v398_v26, 0.0 }
 0x1ea   :  { %413 = vadd.xlane.f32.xlu1 %v412_v27 }
 0x1eb   :  { %343 = vadd.xlane.f32.xlu0 %v342_v24 }
 0x1ec   :  { %v402_v28 = vpop.permute.xlu1 %401 }
 0x1ed   :  { %v418_v29 = vsel %vm183_vm6, %v402_v28, 0.0  ;;  %v248_v30 = vpop.permute.xlu0 %247 }
 0x1ee   :  { %419 = vadd.xlane.f32.xlu1 %v418_v29  ;;  %v263_v44 = vsel %vm183_vm6, %v248_v30, 0.0 }
 0x1f0   :  { %v171_v25 = vpop.permute.xlu1 %170 }
 0x1f1   :  { %v187_v35 = vsel %vm183_vm6, %v171_v25, 0.0  ;;  %v252_v38 = vpop.permute.xlu0 %251 }
 0x1f2   :  { %188 = vadd.xlane.f32.xlu1 %v187_v35  ;;  %v269_v48 = vsel %vm183_vm6, %v252_v38, 0.0 }
 0x1f4   :  { %v175_v36 = vpop.permute.xlu1 %174 }
 0x1f5   :  { %v193_v37 = vsel %vm183_vm6, %v175_v36, 0.0  ;;  %v400_v46 = vpop.permute.xlu0 %399 }
 0x1f6   :  { %194 = vadd.xlane.f32.xlu0 %v193_v37  ;;  %v415_v52 = vsel %vm183_vm6, %v400_v46, 0.0 }
 0x1f8   :  { %v324_v40 = vpop.permute.xlu1 %323 }
 0x1f9   :  { %v339_v41 = vsel %vm183_vm6, %v324_v40, 0.0 }
 0x1fa   :  { %340 = vadd.xlane.f32.xlu1 %v339_v41  ;;  %264 = vadd.xlane.f32.xlu0 %v263_v44 }
 0x1fc   :  { %v328_v45 = vpop.permute.xlu1 %327 }
 0x1fd   :  { %v345_v47 = vsel %vm183_vm6, %v328_v45, 0.0 }
 0x1fe   :  { %346 = vadd.xlane.f32.xlu1 %v345_v47  ;;  %270 = vadd.xlane.f32.xlu0 %v269_v48 }
 0x200   :  { %v254_v33 = vpop.permute.xlu1 %253  ;;  %v404_v50 = vpop.permute.xlu0 %403 }
 0x201   :  { %v272_v51 = vsel %vm183_vm6, %v254_v33, 0.0  ;;  %v421_v63 = vsel %vm183_vm6, %v404_v50, 0.0 }
 0x202   :  { %273 = vadd.xlane.f32.xlu1 %v272_v51  ;;  %416 = vadd.xlane.f32.xlu0 %v415_v52 }
 0x204   :  { %v406_v55 = vpop.permute.xlu1 %405  ;;  %v177_v56 = vpop.permute.xlu0 %176 }
 0x205   :  { %v424_v57 = vsel %vm183_vm6, %v406_v55, 0.0  ;;  %v196_v58 = vsel %vm183_vm6, %v177_v56, 0.0 }
 0x206   :  { %425 = vadd.xlane.f32.xlu1 %v424_v57  ;;  %197 = vadd.xlane.f32.xlu0 %v196_v58 }
 0x208   :  { %v330_v59 = vpop.permute.xlu0 %329 }
 0x209   :  { %v348_v61 = vsel %vm183_vm6, %v330_v59, 0.0 }
 0x20a   :  { %349 = vadd.xlane.f32.xlu0 %v348_v61 }
 0x20e   :  { %422 = vadd.xlane.f32.xlu0 %v421_v63 }
 0x268   :  { %v186_v0 = vpop.xlane.xlu0 %185 }
 0x269   :  { %627 = vrcp.f32 %v186_v0 }
 0x26b   :  { %v262_v2 = vpop.xlane.xlu1 %261 }
 0x26c   :  { %v192_v32 = vpop.xlane.xlu0 %191 }
 0x26d   :  { %629 = vrcp.f32 %v192_v32 }
 0x26e   :  { %631 = vrcp.f32 %v262_v2 }
 0x26f   :  { %v268_v5 = vpop.xlane.xlu1 %267 }
 0x270   :  { %v338_v11 = vpop.xlane.xlu0 %337 }
 0x271   :  { %633 = vrcp.f32 %v338_v11 }
 0x272   :  { %635 = vrcp.f32 %v268_v5 }
 0x273   :  { %v414_v12 = vpop.xlane.xlu1 %413 }
 0x274   :  { %v344_v13 = vpop.xlane.xlu0 %343 }
 0x275   :  { %637 = vrcp.f32 %v344_v13 }
 0x276   :  { %v628_v14 = vpop.eup %627  ;;  %639 = vrcp.f32 %v414_v12 }
 0x277   :  { %v420_v15 = vpop.xlane.xlu1 %419  ;;  %v200_v16 = vmul.f32 %v628_v14, %v835_v23 }
 0x278   :  { %641 = vrcp.f32 %v420_v15 }
 0x279   :  { %442 = vrot.lane.b32.xlu0 %v200_v16, %s669_s4 }
 0x27a   :  { %v630_v17 = vpop.eup %629 }
 0x27b   :  { %v204_v18 = vmul.f32 %v630_v17, %v833_v22  ;;  %v632_v19 = vpop.eup %631  ;;  %v189_v20 = vpop.xlane.xlu1 %188 }
 0x27c   :  { %643 = vrcp.f32 %v189_v20  ;;  %v276_v27 = vmul.f32 %v632_v19, %v843_v31 }
 0x27d   :  { %446 = vrot.lane.b32.xlu1 %v204_v18, %s669_s4 }
 0x27e   :  { %v634_v21 = vpop.eup %633 }
 0x27f   :  { %v195_v26 = vpop.xlane.xlu0 %194  ;;  %v352_v24 = vmul.f32 %v634_v21, %v845_v34  ;;  %v636_v28 = vpop.eup %635 }
 0x280   :  { %645 = vrcp.f32 %v195_v26  ;;  %v280_v25 = vmul.f32 %v636_v28, %v853_v42 }
 0x281   :  { %462 = vrot.lane.b32.xlu1 %v276_v27, %s669_s4  ;;  %482 = vrot.lane.b32.xlu0 %v352_v24, %s669_s4 }
 0x282   :  { %v638_v23 = vpop.eup %637 }
 0x283   :  { %v341_v29 = vpop.xlane.xlu1 %340  ;;  %v265_v22 = vpop.xlane.xlu0 %264  ;;  %v356_v30 = vmul.f32 %v638_v23, %v855_v43 }
 0x284   :  { %v640_v35 = vpop.eup %639  ;;  %647 = vrcp.f32 %v265_v22 }
 0x285   :  { %466 = vrot.lane.b32.xlu1 %v280_v25, %s669_s4  ;;  %486 = vrot.lane.b32.xlu0 %v356_v30, %s669_s4  ;;  %649 = vrcp.f32 %v341_v29  ;;  %v428_v36 = vmul.f32 %v640_v35, %v862_v49  ;;  %v642_v37 = vpop.eup %641 }
 0x286   :  { %v432_v43 = vmul.f32 %v642_v37, %v867_v53 }
 0x287   :  { %v347_v31 = vpop.xlane.xlu1 %346  ;;  %v271_v34 = vpop.xlane.xlu0 %270 }
 0x288   :  { %651 = vrcp.f32 %v271_v34 }
 0x289   :  { %502 = vrot.lane.b32.xlu1 %v428_v36, %s669_s4  ;;  %653 = vrcp.f32 %v347_v31  ;;  %v644_v40 = vpop.eup %643 }
 0x28a   :  { %v202_v41 = vmul.f32 %v644_v40, %v877_v60 }
 0x28b   :  { %v274_v38 = vpop.xlane.xlu1 %273  ;;  %v417_v42 = vpop.xlane.xlu0 %416 }
 0x28c   :  { %655 = vrcp.f32 %v417_v42 }
 0x28d   :  { %506 = vrot.lane.b32.xlu1 %v432_v43, %s669_s4  ;;  %657 = vrcp.f32 %v274_v38  ;;  %v646_v44 = vpop.eup %645 }
 0x28e   :  { %v206_v47 = vmul.f32 %v646_v44, %v886_v1 }
 0x28f   :  { %v426_v45 = vpop.xlane.xlu1 %425  ;;  %v198_v46 = vpop.xlane.xlu0 %197 }
 0x290   :  { %659 = vrcp.f32 %v198_v46 }
 0x291   :  { %444 = vrot.lane.b32.xlu1 %v202_v41, %s669_s4  ;;  %v648_v49 = vpop.eup %647  ;;  %661 = vrcp.f32 %v426_v45 }
 0x292   :  { %v278_v48 = vmul.f32 %v648_v49, %v869_v54  ;;  %v650_v53 = vpop.eup %649 }
 0x293   :  { %v350_v33 = vpop.xlane.xlu0 %349  ;;  %v354_v50 = vmul.f32 %v650_v53, %v895_v4 }
 0x294   :  { %663 = vrcp.f32 %v350_v33  ;;  %464 = vrot.lane.b32.xlu0 %v278_v48, %s669_s4 }
 0x295   :  { %448 = vrot.lane.b32.xlu1 %v206_v47, %s669_s4  ;;  %v652_v60 = vpop.eup %651 }
 0x296   :  { %v282_v51 = vmul.f32 %v652_v60, %v880_v62  ;;  %v654_v52 = vpop.eup %653 }
 0x297   :  { %v423_v55 = vpop.xlane.xlu0 %422  ;;  %v358_v1 = vmul.f32 %v654_v52, %v899_v6 }
 0x298   :  { %665 = vrcp.f32 %v423_v55  ;;  %468 = vrot.lane.b32.xlu0 %v282_v51, %s669_s4 }
 0x299   :  { %484 = vrot.lane.b32.xlu1 %v354_v50, %s669_s4  ;;  %v656_v54 = vpop.eup %655 }
 0x29a   :  { %v430_v56 = vmul.f32 %v656_v54, %v889_v3  ;;  %v658_v57 = vpop.eup %657 }
 0x29b   :  { %v284_v62 = vmul.f32 %v658_v57, %v903_v39 }
 0x29c   :  { %504 = vrot.lane.b32.xlu0 %v430_v56, %s669_s4 }
 0x29d   :  { %488 = vrot.lane.b32.xlu1 %v358_v1, %s669_s4  ;;  %v660_v4 = vpop.eup %659 }
 0x29e   :  { %v208_v58 = vmul.f32 %v660_v4, %v913_v9  ;;  %v662_v59 = vpop.eup %661 }
 0x29f   :  { %v436_v6 = vmul.f32 %v662_v59, %v911_v8 }
 0x2a0   :  { %450 = vrot.lane.b32.xlu0 %v208_v58, %s669_s4 }
 0x2a1   :  { %470 = vrot.lane.b32.xlu1 %v284_v62, %s669_s4  ;;  %v664_v61 = vpop.eup %663 }
 0x2a2   :  { %v360_v3 = vmul.f32 %v664_v61, %v919_v10 }
 0x2a4   :  { %490 = vrot.lane.b32.xlu0 %v360_v3, %s669_s4 }
 0x2a5   :  { %510 = vrot.lane.b32.xlu1 %v436_v6, %s669_s4  ;;  %v666_v63 = vpop.eup %665 }
 0x2a6   :  { %v434_v0 = vmul.f32 %v666_v63, %v905_v7 }
 0x2a8   :  { %508 = vrot.lane.b32.xlu0 %v434_v0, %s669_s4 }
 0x2eb   :  { %v443_v9 = vpop.permute.xlu0 %442 }
 0x2ef   :  { %v447_v39 = vpop.permute.xlu1 %446 }
 0x2f3   :  { %v463_v2 = vpop.permute.xlu1 %462  ;;  %v483_v32 = vpop.permute.xlu0 %482 }
 0x2f4   :  { %v517_v11 = vsel %vm183_vm6, %v443_v9, %v463_v2 }
 0x2f5   :  { %v523_v8 = vsel %vm522_vm7, %v517_v11, %v483_v32 }
 0x2f7   :  { %v467_v5 = vpop.permute.xlu1 %466  ;;  %v487_v13 = vpop.permute.xlu0 %486 }
 0x2f8   :  { %v519_v12 = vsel %vm183_vm6, %v447_v39, %v467_v5 }
 0x2f9   :  { %v525_v14 = vsel %vm522_vm7, %v519_v12, %v487_v13 }
 0x2fb   :  { %v503_v10 = vpop.permute.xlu1 %502 }
 0x2fc   :  { %v529_v7 = vsel %vm528_vm8, %v523_v8, %v503_v10 }
 0x2fd   :  { %535 = vst.msk [vmem:[%s1023_s5] sm:$0xff] %vm534_vm9, %v529_v7 }
 0x2ff   :  { %v507_v15 = vpop.permute.xlu1 %506 }
 0x300   :  { %v531_v16 = vsel %vm528_vm8, %v525_v14, %v507_v15 }
 0x301   :  { %537 = vst.msk [vmem:[%s1023_s5 + $0x10] sm:$0xff] %vm534_vm9, %v531_v16 }
 0x303   :  { %v445_v17 = vpop.permute.xlu1 %444 }
 0x306   :  { %v465_v19 = vpop.permute.xlu0 %464 }
 0x307   :  { %v449_v18 = vpop.permute.xlu1 %448  ;;  %v518_v26 = vsel %vm183_vm6, %v445_v17, %v465_v19 }
 0x30a   :  { %v469_v21 = vpop.permute.xlu0 %468 }
 0x30b   :  { %v485_v20 = vpop.permute.xlu1 %484  ;;  %v520_v36 = vsel %vm183_vm6, %v449_v18, %v469_v21 }
 0x30c   :  { %v524_v27 = vsel %vm522_vm7, %v518_v26, %v485_v20 }
 0x30e   :  { %v505_v28 = vpop.permute.xlu0 %504 }
 0x30f   :  { %v489_v24 = vpop.permute.xlu1 %488  ;;  %v530_v23 = vsel %vm528_vm8, %v524_v27, %v505_v28 }
 0x310   :  { %536 = vst.msk [vmem:[%s1023_s5 + $0x8] sm:$0xff] %vm534_vm9, %v530_v23  ;;  %v526_v37 = vsel %vm522_vm7, %v520_v36, %v489_v24 }
 0x312   :  { %v451_v22 = vpop.permute.xlu0 %450 }
 0x313   :  { %v471_v29 = vpop.permute.xlu1 %470 }
 0x314   :  { %v521_v25 = vsel %vm183_vm6, %v451_v22, %v471_v29 }
 0x316   :  { %v491_v35 = vpop.permute.xlu0 %490 }
 0x317   :  { %v511_v30 = vpop.permute.xlu1 %510  ;;  %v527_v31 = vsel %vm522_vm7, %v521_v25, %v491_v35 }
 0x318   :  { %v533_v34 = vsel %vm528_vm8, %v527_v31, %v511_v30 }
 0x319   :  { %539 = vst.msk [vmem:[%s1023_s5 + $0x20] sm:$0xff] %vm534_vm9, %v533_v34 }
 0x31a   :  { %v509_v38 = vpop.permute.xlu0 %508 }
 0x31b   :  { %v532_v42 = vsel %vm528_vm8, %v526_v37, %v509_v38 }
 0x31c   :  { %538 = vst.msk [vmem:[%s1023_s5 + $0x18] sm:$0xff] %vm534_vm9, %v532_v42 }

// kernel: deform_transformer_decoder.14
= control target key start
LH: loop header
LB: loop body
LE: loop exit
PB: predicated region body
PF: predicated region fallthrough
CT: control target
= control target key end

     0   :  { %v423_v0 = vmov 0.0   ;;  %vm424_vm0 = vmmov 0   ;;  %vm58_vm1 = vcmask 261120   ;;  %vm171_vm2 = vcmask 523264   ;;  %s585_s1 = inlined_call_operand.vmem [shape: bf16[32,64], index: 1, kind: input, shape index: {}]   ;;  %s586_s0 = inlined_call_operand.vmem [shape: f32[40,32], index: 0, kind: input, shape index: {}]   ;;  %s587_s3 = inlined_call_operand.vmem [shape: bf16[64,32], index: 3, kind: input, shape index: {}]   ;;  %s588_s2 = inlined_call_operand.vmem [shape: f32[1,64], index: 2, kind: input, shape index: {}]   ;;  %s589_s4 = inlined_call_operand.vmem [shape: f32[1,32], index: 4, kind: input, shape index: {}]   ;;  %s590_s5 = inlined_call_operand.vmem [shape: f32[1,32], index: 5, kind: input, shape index: {}]   ;;  %s591_s6 = inlined_call_operand.vmem [shape: f32[1,32], index: 6, kind: input, shape index: {}]   ;;  %s592_s7 = inlined_call_operand.vmem [shape: f32[40,32], index: 7, kind: output, shape index: {}]  }
   0x1   :  { %369 = vmatprep.subr.bf16.mxu0 %v423_v0  ;;  %v407_v1 = vld [vmem:[%s585_s1 + $0x8] sm:$0xff]   ;;  %373 = vmatprep.mubr.msk.bf16.mxu0 %vm424_vm0, %v423_v0  ;;  %v408_v2 = vld [vmem:[%s585_s1] sm:$0xff]   ;;  %v409_v5 = vld [vmem:[%s587_s3 + $0x18] sm:$0xff]  }
   0x2   :  { %385 = vmatprep.subr.bf16.mxu1 %v423_v0  ;;  %393 = vmatprep.mubr.msk.bf16.mxu1 %vm424_vm0, %v423_v0  ;;  %v480_v3 = vld [vmem:[%s586_s0] sm:$0xff]  ;;  %v485_v4 = vld [vmem:[%s586_s0 + $0x8] sm:$0xff]  ;;  %v500_v7 = vld [vmem:[%s586_s0 + $0x10] sm:$0xff] }
   0x3   :  { %370 = vmatpush3.bf16.msra.mxu0 %v407_v1  ;;  %v32_v6 = vpack.c.bf16 %v485_v4, %v480_v3  ;;  %386 = vmatpush3.bf16.msra.mxu1 %v409_v5  ;;  %v505_v8 = vld [vmem:[%s586_s0 + $0x18] sm:$0xff]  ;;  %v515_v10 = vld [vmem:[%s586_s0 + $0x20] sm:$0xff]  ;;  %v410_v12 = vld [vmem:[%s587_s3 + $0x10] sm:$0xff]  }
   0x4   :  { %371 = vmatprep.subr.bf16.mxu0 %v423_v0  ;;  %387 = vmatprep.subr.bf16.mxu1 %v423_v0  ;;  %v33_v9 = vpack.c.bf16 %v505_v8, %v500_v7  ;;  %v34_v11 = vpack.c.bf16 %v515_v10, %v515_v10  ;;  %v411_v13 = vld [vmem:[%s587_s3 + $0x8] sm:$0xff]   ;;  %v412_v14 = vld [vmem:[%s587_s3] sm:$0xff]  }
   0x5   :  { %v341_v15 = vld [vmem:[%s588_s2] ss:$0 sm:$0xff] }
   0x6   :  { %v347_v41 = vld [vmem:[%s589_s4] ss:$0 sm:$0xff] }
   0x7   :  { %372 = vmatpush3.bf16.msra.mxu0 %v408_v2  ;;  %388 = vmatpush3.bf16.msra.mxu1 %v410_v12 }
   0x8   :  { %389 = vmatprep.subr.bf16.mxu1 %v423_v0 }
   0xa   :  { %374 = vmatmul.mubr.msk.bf16.vlgmr.msra.gmra.mxu0 %vm58_vm1, %v32_v6 }
   0xb   :  { %377 = vmatprep.mubr.msk.bf16.mxu0 %vm424_vm0, %v423_v0  ;;  %390 = vmatpush3.bf16.msra.mxu1 %v411_v13 }
   0xc   :  { %391 = vmatprep.subr.bf16.mxu1 %v423_v0 }
   0xf   :  { %392 = vmatpush3.bf16.msra.mxu1 %v412_v14 }
  0x12   :  { %378 = vmatmul.mubr.msk.bf16.gmra.mxu0 %vm58_vm1, %v33_v9 }
  0x13   :  { %381 = vmatprep.mubr.msk.bf16.mxu0 %vm424_vm0, %v423_v0 }
  0x1a   :  { %382 = vmatmul.mubr.msk.bf16.gmra.mxu0 %vm58_vm1, %v34_v11 }
  0xca   :  { %v102_v16 = vpop.f32.mrf.mxu0 }
  0xcb   :  { %v103_v18 = vadd.f32 %v341_v15, %v102_v16 }
  0xcc   :  { %v375_v17 = vpop.f32.mrf.mxu0 }
  0xcd   :  { %v124_v22 = vmax.f32 %v103_v18, 0.0 }
  0xce   :  { %v105_v19 = vpop.f32.mrf.mxu0 }
  0xcf   :  { %v106_v20 = vadd.f32 %v341_v15, %v105_v19 }
  0xd0   :  { %v376_v21 = vpop.f32.mrf.mxu0 }
  0xd1   :  { %v125_v23 = vmax.f32 %v106_v20, 0.0 }
  0xd2   :  { %v110_v24 = vpop.f32.mrf.mxu0 }
  0xd3   :  { %v129_v25 = vpack.c.bf16 %v125_v23, %v124_v22  ;;  %v111_v27 = vadd.f32 %v341_v15, %v110_v24 }
  0xd4   :  { %v379_v26 = vpop.f32.mrf.mxu0 }
  0xd5   :  { %394 = vmatmul.mubr.msk.bf16.vlgmr.msra.gmra.mxu1 %vm171_vm2, %v129_v25  ;;  %v126_v31 = vmax.f32 %v111_v27, 0.0 }
  0xd6   :  { %v113_v28 = vpop.f32.mrf.mxu0  ;;  %397 = vmatprep.mubr.msk.bf16.mxu1 %vm424_vm0, %v423_v0 }
  0xd7   :  { %v114_v29 = vadd.f32 %v341_v15, %v113_v28 }
  0xd8   :  { %v380_v30 = vpop.f32.mrf.mxu0 }
  0xd9   :  { %v127_v32 = vmax.f32 %v114_v29, 0.0 }
  0xda   :  { %v118_v33 = vpop.f32.mrf.mxu0 }
  0xdb   :  { %v130_v34 = vpack.c.bf16 %v127_v32, %v126_v31  ;;  %v119_v35 = vadd.f32 %v341_v15, %v118_v33 }
  0xdc   :  { %v383_v36 = vpop.f32.mrf.mxu0 }
  0xdd   :  { %v128_v37 = vmax.f32 %v119_v35, 0.0  ;;  %398 = vmatmul.mubr.msk.bf16.gmra.mxu1 %vm171_vm2, %v130_v34 }
  0xde   :  { %v121_v38 = vpop.f32.mrf.mxu0  ;;  %401 = vmatprep.mubr.msk.bf16.mxu1 %vm424_vm0, %v423_v0 }
  0xdf   :  { %v131_v40 = vpack.c.bf16 %v128_v37, %v128_v37 }
  0xe0   :  { %v384_v39 = vpop.f32.mrf.mxu0 }
  0xe5   :  { %402 = vmatmul.mubr.msk.bf16.gmra.mxu1 %vm171_vm2, %v131_v40 }
 0x195   :  { %v215_v42 = vpop.f32.mrf.mxu1 }
 0x196   :  { %v216_v43 = vadd.f32 %v347_v41, %v215_v42 }
 0x197   :  { %v395_v44 = vpop.f32.mrf.mxu1 }
 0x198   :  { %v237_v45 = vadd.f32 %v216_v43, %v480_v3 }
 0x199   :  { %v218_v46 = vpop.f32.mrf.mxu1 }
 0x19a   :  { %v219_v47 = vadd.f32 %v347_v41, %v218_v46  ;;  %v242_v48 = vsel %vm58_vm1, %v237_v45, 0.0 }
 0x19b   :  { %243 = vadd.xlane.f32.xlu0 %v242_v48  ;;  %v396_v49 = vpop.f32.mrf.mxu1  ;;  %v356_v48 = vld [vmem:[%s591_s6] ss:$0 sm:$0xff] }
 0x19c   :  { %v238_v50 = vadd.f32 %v219_v47, %v485_v4 }
 0x19d   :  { %v223_v51 = vpop.f32.mrf.mxu1 }
 0x19e   :  { %v224_v52 = vadd.f32 %v347_v41, %v223_v51  ;;  %v245_v53 = vsel %vm58_vm1, %v238_v50, 0.0 }
 0x19f   :  { %246 = vadd.xlane.f32.xlu0 %v245_v53  ;;  %v399_v54 = vpop.f32.mrf.mxu1 }
 0x1a0   :  { %v239_v55 = vadd.f32 %v224_v52, %v500_v7 }
 0x1a1   :  { %v226_v56 = vpop.f32.mrf.mxu1 }
 0x1a2   :  { %v227_v57 = vadd.f32 %v347_v41, %v226_v56  ;;  %v248_v58 = vsel %vm58_vm1, %v239_v55, 0.0 }
 0x1a3   :  { %249 = vadd.xlane.f32.xlu1 %v248_v58  ;;  %v400_v59 = vpop.f32.mrf.mxu1 }
 0x1a4   :  { %v240_v60 = vadd.f32 %v227_v57, %v505_v8 }
 0x1a5   :  { %v231_v61 = vpop.f32.mrf.mxu1 }
 0x1a6   :  { %v232_v62 = vadd.f32 %v347_v41, %v231_v61  ;;  %v251_v63 = vsel %vm58_vm1, %v240_v60, 0.0 }
 0x1a7   :  { %252 = vadd.xlane.f32.xlu1 %v251_v63  ;;  %v403_v0 = vpop.f32.mrf.mxu1 }
 0x1a8   :  { %v241_v1 = vadd.f32 %v232_v62, %v515_v10 }
 0x1a9   :  { %v234_v2 = vpop.f32.mrf.mxu1 }
 0x1aa   :  { %v254_v3 = vsel %vm58_vm1, %v241_v1, 0.0 }
 0x1ab   :  { %255 = vadd.xlane.f32.xlu0 %v254_v3  ;;  %v404_v4 = vpop.f32.mrf.mxu1 }
 0x224   :  { %v244_v5 = vpop.xlane.xlu0 %243 }
 0x225   :  { %v258_v6 = vmul.f32 0.03125, %v244_v5 }
 0x227   :  { %v263_v7 = vsub.f32 %v237_v45, %v258_v6  ;;  %v355_v45 = vld [vmem:[%s590_s5] ss:$0 sm:$0xff] }
 0x228   :  { %v247_v9 = vpop.xlane.xlu0 %246 }
 0x229   :  { %v259_v11 = vmul.f32 0.03125, %v247_v9  ;;  %v268_v12 = vmul.f32 %v263_v7, %v263_v7 }
 0x22b   :  { %v264_v8 = vsub.f32 %v238_v50, %v259_v11  ;;  %v273_v13 = vsel %vm58_vm1, %v268_v12, 0.0 }
 0x22c   :  { %v250_v14 = vpop.xlane.xlu1 %249  ;;  %274 = vadd.xlane.f32.xlu1 %v273_v13 }
 0x22d   :  { %v260_v15 = vmul.f32 0.03125, %v250_v14  ;;  %v269_v16 = vmul.f32 %v264_v8, %v264_v8 }
 0x22f   :  { %v265_v17 = vsub.f32 %v239_v55, %v260_v15  ;;  %v276_v10 = vsel %vm58_vm1, %v269_v16, 0.0 }
 0x230   :  { %v253_v18 = vpop.xlane.xlu1 %252  ;;  %277 = vadd.xlane.f32.xlu0 %v276_v10 }
 0x231   :  { %v261_v19 = vmul.f32 0.03125, %v253_v18  ;;  %v270_v20 = vmul.f32 %v265_v17, %v265_v17 }
 0x233   :  { %v266_v21 = vsub.f32 %v240_v60, %v261_v19  ;;  %v279_v22 = vsel %vm58_vm1, %v270_v20, 0.0 }
 0x234   :  { %280 = vadd.xlane.f32.xlu1 %v279_v22  ;;  %v256_v23 = vpop.xlane.xlu0 %255 }
 0x235   :  { %v262_v24 = vmul.f32 0.03125, %v256_v23  ;;  %v271_v25 = vmul.f32 %v266_v21, %v266_v21 }
 0x237   :  { %v267_v26 = vsub.f32 %v241_v1, %v262_v24  ;;  %v282_v27 = vsel %vm58_vm1, %v271_v25, 0.0 }
 0x238   :  { %283 = vadd.xlane.f32.xlu0 %v282_v27 }
 0x239   :  { %v272_v28 = vmul.f32 %v267_v26, %v267_v26 }
 0x23b   :  { %v285_v29 = vsel %vm58_vm1, %v272_v28, 0.0 }
 0x23c   :  { %286 = vadd.xlane.f32.xlu1 %v285_v29 }
 0x2b5   :  { %v275_v30 = vpop.xlane.xlu1 %274 }
 0x2b6   :  { %v288_v31 = vmul.f32 0.03125, %v275_v30 }
 0x2b8   :  { %v293_v32 = vadd.f32 1e-05, %v288_v31 }
 0x2b9   :  { %v278_v33 = vpop.xlane.xlu0 %277 }
 0x2ba   :  { %413 = vrsqrt.f32 %v293_v32  ;;  %v289_v34 = vmul.f32 0.03125, %v278_v33 }
 0x2bc   :  { %v294_v35 = vadd.f32 1e-05, %v289_v34 }
 0x2bd   :  { %v281_v36 = vpop.xlane.xlu1 %280 }
 0x2be   :  { %415 = vrsqrt.f32 %v294_v35  ;;  %v290_v37 = vmul.f32 0.03125, %v281_v36 }
 0x2c0   :  { %v295_v38 = vadd.f32 1e-05, %v290_v37 }
 0x2c1   :  { %v284_v39 = vpop.xlane.xlu0 %283 }
 0x2c2   :  { %417 = vrsqrt.f32 %v295_v38  ;;  %v291_v40 = vmul.f32 0.03125, %v284_v39 }
 0x2c4   :  { %v296_v41 = vadd.f32 1e-05, %v291_v40 }
 0x2c5   :  { %v287_v42 = vpop.xlane.xlu1 %286 }
 0x2c6   :  { %419 = vrsqrt.f32 %v296_v41  ;;  %v292_v43 = vmul.f32 0.03125, %v287_v42 }
 0x2c7   :  { %v414_v44 = vpop.eup %413 }
 0x2c8   :  { %v303_v46 = vmul.f32 %v414_v44, %v263_v7  ;;  %v297_v47 = vadd.f32 1e-05, %v292_v43 }
 0x2ca   :  { %v315_v49 = vmul.f32 %v355_v45, %v303_v46  ;;  %421 = vrsqrt.f32 %v297_v47 }
 0x2cb   :  { %v416_v50 = vpop.eup %415 }
 0x2cc   :  { %v327_v51 = vadd.f32 %v356_v48, %v315_v49  ;;  %v304_v52 = vmul.f32 %v416_v50, %v264_v8 }
 0x2ce   :  { %332 = vst.msk [vmem:[%s592_s7] sm:$0xff] %vm58_vm1, %v327_v51  ;;  %v316_v53 = vmul.f32 %v355_v45, %v304_v52 }
 0x2cf   :  { %v418_v54 = vpop.eup %417 }
 0x2d0   :  { %v328_v55 = vadd.f32 %v356_v48, %v316_v53  ;;  %v305_v56 = vmul.f32 %v418_v54, %v265_v17 }
 0x2d2   :  { %333 = vst.msk [vmem:[%s592_s7 + $0x8] sm:$0xff] %vm58_vm1, %v328_v55  ;;  %v317_v57 = vmul.f32 %v355_v45, %v305_v56 }
 0x2d3   :  { %v420_v58 = vpop.eup %419 }
 0x2d4   :  { %v329_v59 = vadd.f32 %v356_v48, %v317_v57  ;;  %v306_v60 = vmul.f32 %v420_v58, %v266_v21 }
 0x2d6   :  { %334 = vst.msk [vmem:[%s592_s7 + $0x10] sm:$0xff] %vm58_vm1, %v329_v59  ;;  %v318_v61 = vmul.f32 %v355_v45, %v306_v60 }
 0x2d7   :  { %v422_v62 = vpop.eup %421 }
 0x2d8   :  { %v330_v63 = vadd.f32 %v356_v48, %v318_v61  ;;  %v307_v0 = vmul.f32 %v422_v62, %v267_v26 }
 0x2da   :  { %335 = vst.msk [vmem:[%s592_s7 + $0x18] sm:$0xff] %vm58_vm1, %v330_v63  ;;  %v319_v1 = vmul.f32 %v355_v45, %v307_v0 }
 0x2dc   :  { %v331_v2 = vadd.f32 %v356_v48, %v319_v1 }
 0x2de   :  { %336 = vst.msk [vmem:[%s592_s7 + $0x20] sm:$0xff] %vm58_vm1, %v331_v2 }

// kernel: deform_transformer_decoder.11
= control target key start
LH: loop header
LB: loop body
LE: loop exit
PB: predicated region body
PF: predicated region fallthrough
CT: control target
= control target key end

     0   :  { %s3705_s13 = smov 0   ;;  %s3707_s14 = smov 0   ;;  %s5771_s0 = inlined_call_operand.vmem [shape: s32[2,20,64], index: 0, kind: input, shape index: {}]   ;;  %s5772_s1 = inlined_call_operand.vmem [shape: f32[2,20,64], index: 1, kind: input, shape index: {}]   ;;  %s5773_s2 = inlined_call_operand.vmem [shape: bf16[2,20,32], index: 2, kind: input, shape index: {}]   ;;  %s5774_s3 = inlined_call_operand.vmem [shape: f32[2,20,32], index: 3, kind: input, shape index: {}]   ;;  %s5775_s4 = inlined_call_operand.vmem [shape: bf16[32,32], index: 4, kind: input, shape index: {}]   ;;  %s5776_s5 = inlined_call_operand.vmem [shape: f32[1,32], index: 5, kind: input, shape index: {}]   ;;  %s5777_s6 = inlined_call_operand.vmem [shape: bf16[32,32], index: 6, kind: input, shape index: {}]   ;;  %s5778_s7 = inlined_call_operand.vmem [shape: f32[1,32], index: 7, kind: input, shape index: {}]   ;;  %s5779_s8 = inlined_call_operand.vmem [shape: f32[1,32], index: 8, kind: input, shape index: {}]   ;;  %s5780_s9 = inlined_call_operand.vmem [shape: f32[1,32], index: 9, kind: input, shape index: {}]   ;;  %s5781_s10 = inlined_call_operand.vmem [shape: f32[2,20,32], index: 10, kind: output, shape index: {}]  }
   0x1   :  { %s3709_s15 = smov 0  }
   0x2 LB: > { %s39_s16 = sadd.s32 1, %s3573_s14  ;;  %p3152_p0 = scmp.ge.s32.totalorder %s3577_s15, 1  ;;  %s3577_s15 = sphi %s3709_s15, %s20_s15   ;;  %s3573_s14 = sphi %s3707_s14, %s6232_s14   ;;  %s3569_s13 = sphi %s3705_s13, %s6231_s13  }
   0x3   : > { %p41_p1 = scmp.ge.s32.totalorder %s39_s16, 2  ;;  %p391_p2 = scmp.lt.s32.totalorder %s3577_s15, 3 }
   0x5   : > { %s6234_s16 = smov (%p41_p1, %s39_s16), 0  ;;  %p392_p3 = pnand %p3152_p0, %p391_p2 }
   0x7   : > { %395 = sbr.rel (%p392_p3) target bundleno = 2060 (0x80c), region = 60 }
   0xc   : > { %p465_p4 = scmp.lt.s32.totalorder %s3569_s13, 1  ;;  %v3579_v0 = vmov 0   ;;  %v3580_v7 = vmov 1   ;;  %v3531_v8 = vld [vmem:[%s5775_s4 + $0x8] sm:$0xff]   ;;  %v3532_v9 = vld [vmem:[%s5775_s4] sm:$0xff]   ;;  %v3581_v10 = vmov 2  }
   0xd   : > { %3356 = vset.pattern.permute.xlu1 %v3579_v0  ;;  %3355 = vset.pattern.permute.xlu0 %v3579_v0  ;;  %vm519_vm0 = vcmask 261120   ;;  %v3582_v13 = vmov 3   ;;  %v3583_v14 = vmov 4   ;;  %v3584_v15 = vmov 5   ;;  %s3611_s18 = smov 120   ;;  %s3644_s19 = smov 104  }
   0xe   : > { %s6236_s13 = smov (!%p465_p4, %s3569_s13), 1  ;;  %3206 = vmatprep.subr.bf16.mxu0 %v3531_v8  ;;  %v3585_v16 = vmov 6   ;;  %v3586_v17 = vmov 7   ;;  %v3587_v18 = vmov 8   ;;  %v3588_v19 = vmov 9   ;;  %s3646_s21 = smov 112  }
   0xf   : > { %s3726_s17 = smul.u32 24, %s6236_s13  ;;  %3207 = vmatpush3.bf16.msra.mxu0 %v3531_v8  ;;  %v3589_v20 = vmov 10   ;;  %v3590_v21 = vmov 11   ;;  %v3591_v28 = vmov 12   ;;  %v3592_v34 = vmov 13   ;;  %s3648_s22 = smov 16  }
  0x10   : > { %s3259_s28 = smul.u32 12, %s6236_s13  ;;  %3208 = vmatprep.subr.bf16.mxu0 %v3532_v9  ;;  %v3593_v41 = vmov 14   ;;  %v3594_v46 = vmov 15   ;;  %v5785_v53 = vmov 16   ;;  %v5784_v58 = vmov 17   ;;  %s3649_s27 = smov 24  }
  0x11   : > { %s3732_s20 = scalar_lea.vmem %s5771_s0, %s3726_s17  ;;  %s3738_s23 = scalar_lea.vmem %s5772_s1, %s3726_s17  ;;  %vm1115_vm1 = vcmask 1041408  }
  0x12   : > { %v3741_v1 = vld [vmem:[%s3732_s20 + $0x10] sm:$0xf]  ;;  %v3744_v2 = vld [vmem:[%s3732_s20] sm:$0xff]  ;;  %v3752_v4 = vld [vmem:[%s3732_s20 + $0x8] sm:$0xff]  ;;  %s492_s11 = scalar_lea.vmem %s5773_s2, %s3259_s28  ;;  %s502_s12 = scalar_lea.vmem %s5774_s3, %s3726_s17 }
  0x13   : > { %631 = vperm.xlu1 %3356, %v3741_v1   ;;  %625 = vperm.xlu0 %3355, %v3744_v2   ;;  %v3749_v3 = vld [vmem:[%s3738_s23] sm:$0xff]  ;;  %v3757_v5 = vld [vmem:[%s3738_s23 + $0x10] sm:$0xf]  ;;  %v3760_v6 = vld [vmem:[%s3738_s23 + $0x8] sm:$0xff] }
  0x14   : > { %3209 = vmatpush3.bf16.msra.mxu0 %v3532_v9  ;;  %v3533_v11 = vld [vmem:[%s492_s11] sm:$0xff]   ;;  %v3534_v12 = vld [vmem:[%s492_s11 + $0x8] ss:$0 sps:$4 sm:$0x33]  }
  0x15   : > { %3210 = vmatprep.mubr.msk.bf16.mxu0 %vm519_vm0, %v3533_v11 }
  0x17   : > { %638 = vperm.xlu1 %3356, %v3749_v3   ;;  %628 = vperm.xlu0 %3355, %v3752_v4  }
  0x18   : > { %3211 = vmatmul.mubr.msk.bf16.vlgmr.msra.gmra.mxu0 %vm519_vm0, %v3534_v12  ;;  %v5782_v12 = vmov 19  }
  0x1b   : > { %648 = vperm.xlu1 %3356, %v3757_v5   ;;  %643 = vperm.xlu0 %3355, %v3760_v6  }
  0x1f   : > { %3358 = vset.pattern.permute.xlu1 %v3580_v7  ;;  %3357 = vset.pattern.permute.xlu0 %v3580_v7  ;;  %v5783_v7 = vmov 18  }
  0x20   : > { %658 = vperm.xlu1 %3358, %v3752_v4   ;;  %655 = vperm.xlu0 %3357, %v3744_v2  }
  0x24   : > { %661 = vperm.xlu1 %3358, %v3741_v1   ;;  %667 = vperm.xlu0 %3357, %v3749_v3  }
  0x28   : > { %671 = vperm.xlu1 %3358, %v3760_v6   ;;  %675 = vperm.xlu0 %3357, %v3757_v5  }
  0x2c   : > { %3359 = vset.pattern.permute.xlu1 %v3581_v10  ;;  %3360 = vset.pattern.permute.xlu0 %v3581_v10 }
  0x2d   : > { %682 = vperm.xlu1 %3359, %v3744_v2   ;;  %685 = vperm.xlu0 %3360, %v3752_v4  }
  0x31   : > { %688 = vperm.xlu1 %3359, %v3741_v1   ;;  %698 = vperm.xlu0 %3360, %v3760_v6  }
  0x35   : > { %694 = vperm.xlu1 %3359, %v3749_v3   ;;  %3361 = vset.pattern.permute.xlu0 %v3582_v13 }
  0x36   : > { %709 = vperm.xlu0 %3361, %v3744_v2  }
  0x39   : > { %702 = vperm.xlu1 %3359, %v3757_v5  }
  0x3a   : > { %721 = vperm.xlu0 %3361, %v3749_v3  }
  0x3d   : > { %3362 = vset.pattern.permute.xlu1 %v3582_v13 }
  0x3e   : > { %712 = vperm.xlu1 %3362, %v3752_v4   ;;  %729 = vperm.xlu0 %3361, %v3757_v5  }
  0x42   : > { %715 = vperm.xlu1 %3362, %v3741_v1   ;;  %3364 = vset.pattern.permute.xlu0 %v3583_v14 }
  0x43   : > { %739 = vperm.xlu0 %3364, %v3752_v4  }
  0x46   : > { %725 = vperm.xlu1 %3362, %v3760_v6  }
  0x47   : > { %752 = vperm.xlu0 %3364, %v3760_v6  }
  0x4a   : > { %3363 = vset.pattern.permute.xlu1 %v3583_v14 }
  0x4b   : > { %736 = vperm.xlu1 %3363, %v3744_v2   ;;  %3365 = vset.pattern.permute.xlu0 %v3584_v15 }
  0x4c   : > { %763 = vperm.xlu0 %3365, %v3744_v2  }
  0x4f   : > { %742 = vperm.xlu1 %3363, %v3741_v1  }
  0x50   : > { %775 = vperm.xlu0 %3365, %v3749_v3  }
  0x53   : > { %748 = vperm.xlu1 %3363, %v3749_v3  }
  0x54   : > { %783 = vperm.xlu0 %3365, %v3757_v5  }
  0x57   : > { %756 = vperm.xlu1 %3363, %v3757_v5  }
  0x58   : > { %3368 = vset.pattern.permute.xlu0 %v3585_v16 }
  0x59   : > { %793 = vperm.xlu0 %3368, %v3752_v4  }
  0x5b   : > { %3366 = vset.pattern.permute.xlu1 %v3584_v15 }
  0x5c   : > { %766 = vperm.xlu1 %3366, %v3752_v4  }
  0x5d   : > { %806 = vperm.xlu0 %3368, %v3760_v6  }
  0x60   : > { %769 = vperm.xlu1 %3366, %v3741_v1  }
  0x61   : > { %3369 = vset.pattern.permute.xlu0 %v3586_v17 }
  0x62   : > { %817 = vperm.xlu0 %3369, %v3744_v2  }
  0x64   : > { %779 = vperm.xlu1 %3366, %v3760_v6  }
  0x66   : > { %829 = vperm.xlu0 %3369, %v3749_v3  }
  0x68   : > { %3367 = vset.pattern.permute.xlu1 %v3585_v16 }
  0x69   : > { %790 = vperm.xlu1 %3367, %v3744_v2  }
  0x6a   : > { %837 = vperm.xlu0 %3369, %v3757_v5  }
  0x6d   : > { %796 = vperm.xlu1 %3367, %v3741_v1  }
  0x6e   : > { %3372 = vset.pattern.permute.xlu0 %v3587_v18 }
  0x6f   : > { %847 = vperm.xlu0 %3372, %v3752_v4  }
  0x71   : > { %802 = vperm.xlu1 %3367, %v3749_v3  }
  0x73   : > { %860 = vperm.xlu0 %3372, %v3760_v6  }
  0x75   : > { %810 = vperm.xlu1 %3367, %v3757_v5  }
  0x77   : > { %3373 = vset.pattern.permute.xlu0 %v3588_v19 }
  0x78   : > { %871 = vperm.xlu0 %3373, %v3744_v2  }
  0x79   : > { %3370 = vset.pattern.permute.xlu1 %v3586_v17 }
  0x7a   : > { %820 = vperm.xlu1 %3370, %v3752_v4  }
  0x7c   : > { %883 = vperm.xlu0 %3373, %v3749_v3  }
  0x7e   : > { %823 = vperm.xlu1 %3370, %v3741_v1  }
  0x80   : > { %891 = vperm.xlu0 %3373, %v3757_v5  }
  0x82   : > { %833 = vperm.xlu1 %3370, %v3760_v6  }
  0x84   : > { %3376 = vset.pattern.permute.xlu0 %v3589_v20 }
  0x85   : > { %901 = vperm.xlu0 %3376, %v3752_v4  }
  0x86   : > { %3371 = vset.pattern.permute.xlu1 %v3587_v18 }
  0x87   : > { %844 = vperm.xlu1 %3371, %v3744_v2  }
  0x89   : > { %914 = vperm.xlu0 %3376, %v3760_v6  }
  0x8b   : > { %850 = vperm.xlu1 %3371, %v3741_v1  }
  0x8d   : > { %3377 = vset.pattern.permute.xlu0 %v3590_v21 }
  0x8e   : > { %v3827_v22 = vpop.permute.xlu1 %631  ;;  %925 = vperm.xlu0 %3377, %v3744_v2   ;;  %v3830_v23 = vpop.permute.xlu0 %625 }
  0x8f   : > { %856 = vperm.xlu1 %3371, %v3749_v3  }
  0x92   : > { %v3833_v24 = vpop.permute.xlu1 %638  ;;  %937 = vperm.xlu0 %3377, %v3749_v3   ;;  %v3836_v25 = vpop.permute.xlu0 %628 }
  0x93   : > { %864 = vperm.xlu1 %3371, %v3757_v5  }
  0x96   : > { %v3839_v26 = vpop.permute.xlu1 %648  ;;  %945 = vperm.xlu0 %3377, %v3757_v5   ;;  %v3842_v27 = vpop.permute.xlu0 %643 }
  0x97   : > { %3374 = vset.pattern.permute.xlu1 %v3588_v19  ;;  %v3158_v19 = vld [vmem:[%s5776_s5] ss:$0 sm:$0xff] }
  0x98   : > { %874 = vperm.xlu1 %3374, %v3752_v4  }
  0x9a   : > { %3380 = vset.pattern.permute.xlu0 %v3591_v28 }
  0x9b   : > { %v3845_v29 = vpop.permute.xlu1 %658  ;;  %955 = vperm.xlu0 %3380, %v3752_v4   ;;  %v3848_v30 = vpop.permute.xlu0 %655 }
  0x9c   : > { %877 = vperm.xlu1 %3374, %v3741_v1  }
  0x9f   : > { %v3851_v31 = vpop.permute.xlu1 %661  ;;  %968 = vperm.xlu0 %3380, %v3760_v6   ;;  %v3854_v32 = vpop.permute.xlu0 %667 }
  0xa0   : > { %887 = vperm.xlu1 %3374, %v3760_v6  }
  0xa3   : > { %v3857_v33 = vpop.permute.xlu1 %671  ;;  %3381 = vset.pattern.permute.xlu0 %v3592_v34  ;;  %v3859_v35 = vpop.permute.xlu0 %675 }
  0xa4   : > { %3375 = vset.pattern.permute.xlu1 %v3589_v20  ;;  %979 = vperm.xlu0 %3381, %v3744_v2   ;;  %v5786_v20 = vmov 20  }
  0xa5   : > { %898 = vperm.xlu1 %3375, %v3744_v2  }
  0xa8   : > { %v3863_v36 = vpop.permute.xlu1 %682  ;;  %991 = vperm.xlu0 %3381, %v3749_v3   ;;  %v3866_v37 = vpop.permute.xlu0 %685 }
  0xa9   : > { %904 = vperm.xlu1 %3375, %v3741_v1  }
  0xac   : > { %v3869_v38 = vpop.permute.xlu1 %688  ;;  %999 = vperm.xlu0 %3381, %v3757_v5   ;;  %v3872_v39 = vpop.permute.xlu0 %698 }
  0xad   : > { %910 = vperm.xlu1 %3375, %v3749_v3  }
  0xb0   : > { %v3875_v40 = vpop.permute.xlu1 %694  ;;  %3384 = vset.pattern.permute.xlu0 %v3593_v41 }
  0xb1   : > { %918 = vperm.xlu1 %3375, %v3757_v5   ;;  %1009 = vperm.xlu0 %3384, %v3752_v4   ;;  %v3879_v42 = vpop.permute.xlu0 %709 }
  0xb4   : > { %v3881_v43 = vpop.permute.xlu1 %702 }
  0xb5   : > { %3378 = vset.pattern.permute.xlu1 %v3590_v21  ;;  %1022 = vperm.xlu0 %3384, %v3760_v6   ;;  %v3884_v44 = vpop.permute.xlu0 %721 }
  0xb6   : > { %928 = vperm.xlu1 %3378, %v3752_v4  }
  0xb9   : > { %v3887_v45 = vpop.permute.xlu1 %712  ;;  %3385 = vset.pattern.permute.xlu0 %v3594_v46  ;;  %v3890_v47 = vpop.permute.xlu0 %729 }
  0xba   : > { %931 = vperm.xlu1 %3378, %v3741_v1   ;;  %1033 = vperm.xlu0 %3385, %v3744_v2  }
  0xbd   : > { %v3894_v48 = vpop.permute.xlu1 %715 }
  0xbe   : > { %941 = vperm.xlu1 %3378, %v3760_v6   ;;  %1045 = vperm.xlu0 %3385, %v3749_v3   ;;  %v3898_v49 = vpop.permute.xlu0 %739 }
  0xc1   : > { %v3900_v50 = vpop.permute.xlu1 %725 }
  0xc2   : > { %3379 = vset.pattern.permute.xlu1 %v3591_v28  ;;  %1053 = vperm.xlu0 %3385, %v3757_v5   ;;  %v3903_v51 = vpop.permute.xlu0 %752 }
  0xc3   : > { %952 = vperm.xlu1 %3379, %v3744_v2  }
  0xc6   : > { %v3906_v52 = vpop.permute.xlu1 %736  ;;  %3388 = vset.pattern.permute.xlu0 %v5785_v53 }
  0xc7   : > { %958 = vperm.xlu1 %3379, %v3741_v1   ;;  %1171 = vperm.xlu0 %3388, %v3752_v4   ;;  %v3911_v54 = vpop.permute.xlu0 %763 }
  0xca   : > { %v3913_v55 = vpop.permute.xlu1 %742 }
  0xcb   : > { %964 = vperm.xlu1 %3379, %v3749_v3   ;;  %1184 = vperm.xlu0 %3388, %v3760_v6   ;;  %v3917_v56 = vpop.permute.xlu0 %775 }
  0xce   : > { %v3919_v57 = vpop.permute.xlu1 %748 }
  0xcf   : > { %972 = vperm.xlu1 %3379, %v3757_v5   ;;  %3389 = vset.pattern.permute.xlu0 %v5784_v58  ;;  %v3923_v59 = vpop.permute.xlu0 %783 }
  0xd0   : > { %1195 = vperm.xlu0 %3389, %v3744_v2  }
  0xd2   : > { %v3926_v60 = vpop.permute.xlu1 %756 }
  0xd3   : > { %5881 = vst [vmem:[#allocation3_spill] sm:$0xff] %v3926_v60  ;;  %3382 = vset.pattern.permute.xlu1 %v3592_v34 }
  0xd4   : > { %982 = vperm.xlu1 %3382, %v3752_v4   ;;  %1207 = vperm.xlu0 %3389, %v3749_v3   ;;  %v3930_v61 = vpop.permute.xlu0 %793 }
  0xd7   : > { %v3932_v62 = vpop.permute.xlu1 %766 }
  0xd8   : > { %985 = vperm.xlu1 %3382, %v3741_v1   ;;  %1215 = vperm.xlu0 %3389, %v3757_v5   ;;  %v3936_v63 = vpop.permute.xlu0 %806  ;;  %v3212_v28 = vpop.f32.mrf.mxu0 }
  0xd9   : > { %v608_v34 = vadd.f32 %v3212_v28, %v3158_v19 }
  0xdb   : > { %v3938_v0 = vpop.permute.xlu1 %769  ;;  %v3987_v58 = vpack.c.bf16 %v608_v34, %v608_v34 }
  0xdc   : > { %995 = vperm.xlu1 %3382, %v3760_v6   ;;  %3392 = vset.pattern.permute.xlu0 %v5783_v7 }
  0xdd   : > { %1225 = vperm.xlu0 %3392, %v3752_v4   ;;  %v3943_v8 = vpop.permute.xlu0 %817  ;;  %5885 = vst [vmem:[#allocation7_spill] sm:$0xff] %v3987_v58  ;;  %3254 = vmatprep.subr.msk.bf16.mxu1 %vm1115_vm1, %v3987_v58  ;;  %v1117_v60 = vsel %vm1115_vm1, %v3987_v58, 0 }
  0xde   : > { %3215 = vmatpush3.bf16.msra.mxu1 %v1117_v60 }
  0xdf   : > { %v3945_v9 = vpop.permute.xlu1 %779 }
  0xe0   : > { %3383 = vset.pattern.permute.xlu1 %v3593_v41 }
  0xe1   : > { %1006 = vperm.xlu1 %3383, %v3744_v2   ;;  %1238 = vperm.xlu0 %3392, %v3760_v6   ;;  %v3949_v10 = vpop.permute.xlu0 %829 }
  0xe4   : > { %v3951_v11 = vpop.permute.xlu1 %790 }
  0xe5   : > { %1012 = vperm.xlu1 %3383, %v3741_v1   ;;  %3393 = vset.pattern.permute.xlu0 %v5782_v12  ;;  %v3955_v13 = vpop.permute.xlu0 %837  ;;  %v599_v12 = vpop.f32.mrf.mxu0 }
  0xe6   : > { %1249 = vperm.xlu0 %3393, %v3744_v2   ;;  %v600_v53 = vadd.f32 %v3158_v19, %v599_v12 }
  0xe7   : > { %v3213_v7 = vpop.f32.mrf.mxu0 }
  0xe8   : > { %v3958_v14 = vpop.permute.xlu1 %796 }
  0xe9   : > { %1018 = vperm.xlu1 %3383, %v3749_v3  }
  0xea   : > { %1261 = vperm.xlu0 %3393, %v3749_v3   ;;  %v3962_v15 = vpop.permute.xlu0 %847 }
  0xec   : > { %v3964_v16 = vpop.permute.xlu1 %802 }
  0xed   : > { %1026 = vperm.xlu1 %3383, %v3757_v5  }
  0xee   : > { %1269 = vperm.xlu0 %3393, %v3757_v5   ;;  %v3968_v17 = vpop.permute.xlu0 %860 }
  0xef   : > { %5882 = vst [vmem:[#allocation4_spill] sm:$0xff] %v3968_v17  ;;  %v602_v17 = vpop.f32.mrf.mxu0 }
  0xf0   : > { %v3970_v18 = vpop.permute.xlu1 %810  ;;  %v603_v28 = vadd.f32 %v3158_v19, %v602_v17 }
  0xf1   : > { %3386 = vset.pattern.permute.xlu1 %v3594_v46 }
  0xf2   : > { %1036 = vperm.xlu1 %3386, %v3752_v4   ;;  %3396 = vset.pattern.permute.xlu0 %v5786_v20  ;;  %v4000_v12 = vpack.c.bf16 %v603_v28, %v600_v53 }
  0xf3   : > { %1279 = vperm.xlu0 %3396, %v3752_v4   ;;  %v3979_v21 = vpop.permute.xlu0 %871 }
  0xf4   : > { %5883 = vst [vmem:[#allocation5_spill] sm:$0xff] %v3979_v21  ;;  %v5787_v21 = vmov 21   ;;  %5887 = vst [vmem:[#allocation9_spill] sm:$0xff] %v4000_v12  ;;  %3216 = vmatprep.subr.bf16.mxu1 %v4000_v12 }
  0xf5   : > { %v3981_v41 = vpop.permute.xlu1 %820  ;;  %3217 = vmatpush3.bf16.msra.mxu1 %v4000_v12 }
  0xf6   : > { %1039 = vperm.xlu1 %3386, %v3741_v1  }
  0xf7   : > { %1292 = vperm.xlu0 %3396, %v3760_v6   ;;  %v3985_v46 = vpop.permute.xlu0 %883 }
  0xf8   : > { %5884 = vst [vmem:[#allocation6_spill] sm:$0xff] %v3985_v46  ;;  %v5888_v46 = vmov 16  }
  0xf9   : > { %v3989_v20 = vpop.permute.xlu1 %823 }
  0xfa   : > { %1049 = vperm.xlu1 %3386, %v3760_v6  }
  0xfb   : > { %3397 = vset.pattern.permute.xlu0 %v5787_v21  ;;  %v3997_v7 = vpop.permute.xlu0 %891 }
  0xfc   : > { %5886 = vst [vmem:[#allocation8_spill] sm:$0xff] %v3997_v7  ;;  %1303 = vperm.xlu0 %3397, %v3744_v2  }
  0xfd   : > { %v4002_v34 = vpop.permute.xlu1 %833 }
  0xfe   : > { %3387 = vset.pattern.permute.xlu1 %v5888_v46  ;;  %v5792_v46 = vmov 22  }
  0xff   : > { %1168 = vperm.xlu1 %3387, %v3744_v2  }
 0x100   : > { %1315 = vperm.xlu0 %3397, %v3749_v3   ;;  %v4009_v17 = vpop.permute.xlu0 %901 }
 0x102   : > { %v4011_v19 = vpop.permute.xlu1 %844 }
 0x103   : > { %5889 = vst [vmem:[#allocation10_spill] sm:$0xff] %v4011_v19  ;;  %1174 = vperm.xlu1 %3387, %v3741_v1  }
 0x104   : > { %1323 = vperm.xlu0 %3397, %v3757_v5   ;;  %v4015_v53 = vpop.permute.xlu0 %914 }
 0x105   : > { %5890 = vst [vmem:[#allocation11_spill] sm:$0xff] %v4015_v53  ;;  %v5896_v53 = vmov 17  }
 0x106   : > { %v4017_v60 = vpop.permute.xlu1 %850 }
 0x107   : > { %5891 = vst [vmem:[#allocation12_spill] sm:$0xff] %v4017_v60  ;;  %1180 = vperm.xlu1 %3387, %v3749_v3   ;;  %v5793_v60 = vmov 23  }
 0x108   : > { %3400 = vset.pattern.permute.xlu0 %v5792_v46 }
 0x109   : > { %1333 = vperm.xlu0 %3400, %v3752_v4   ;;  %v4022_v28 = vpop.permute.xlu0 %925 }
 0x10a   : > { %5892 = vst [vmem:[#allocation13_spill] sm:$0xff] %v4022_v28  ;;  %v4024_v21 = vpop.permute.xlu1 %856 }
 0x10b   : > { %5893 = vst [vmem:[#allocation14_spill] sm:$0xff] %v4024_v21  ;;  %1188 = vperm.xlu1 %3387, %v3757_v5  }
 0x10d   : > { %1346 = vperm.xlu0 %3400, %v3760_v6   ;;  %v4028_v12 = vpop.permute.xlu0 %937 }
 0x10e   : > { %5894 = vst [vmem:[#allocation15_spill] sm:$0xff] %v4028_v12  ;;  %v4030_v58 = vpop.permute.xlu1 %864 }
 0x10f   : > { %5895 = vst [vmem:[#allocation16_spill] sm:$0xff] %v4030_v58  ;;  %3390 = vset.pattern.permute.xlu1 %v5896_v53 }
 0x110   : > { %1198 = vperm.xlu1 %3390, %v3752_v4  }
 0x111   : > { %3401 = vset.pattern.permute.xlu0 %v5793_v60  ;;  %v4035_v46 = vpop.permute.xlu0 %945 }
 0x112   : > { %5897 = vst [vmem:[#allocation17_spill] sm:$0xff] %v4035_v46  ;;  %1357 = vperm.xlu0 %3401, %v3744_v2   ;;  %v5902_v46 = vmov 18  }
 0x113   : > { %v4038_v21 = vpop.permute.xlu1 %874 }
 0x114   : > { %5898 = vst [vmem:[#allocation18_spill] sm:$0xff] %v4038_v21  ;;  %1201 = vperm.xlu1 %3390, %v3741_v1   ;;  %v5795_v21 = vmov 24  }
 0x116   : > { %1369 = vperm.xlu0 %3401, %v3749_v3   ;;  %v4042_v12 = vpop.permute.xlu0 %955 }
 0x117   : > { %5899 = vst [vmem:[#allocation19_spill] sm:$0xff] %v4042_v12  ;;  %v4044_v58 = vpop.permute.xlu1 %877 }
 0x118   : > { %1211 = vperm.xlu1 %3390, %v3760_v6  }
 0x11a   : > { %1377 = vperm.xlu0 %3401, %v3757_v5   ;;  %v4048_v53 = vpop.permute.xlu0 %968 }
 0x11b   : > { %5900 = vst [vmem:[#allocation20_spill] sm:$0xff] %v4048_v53  ;;  %v4050_v60 = vpop.permute.xlu1 %887 }
 0x11c   : > { %5901 = vst [vmem:[#allocation21_spill] sm:$0xff] %v4050_v60  ;;  %3391 = vset.pattern.permute.xlu1 %v5902_v46  ;;  %v5797_v46 = vmov 25  }
 0x11d   : > { %1222 = vperm.xlu1 %3391, %v3744_v2  }
 0x11e   : > { %3404 = vset.pattern.permute.xlu0 %v5795_v21 }
 0x11f   : > { %1387 = vperm.xlu0 %3404, %v3752_v4   ;;  %v4056_v12 = vpop.permute.xlu0 %979 }
 0x120   : > { %5903 = vst [vmem:[#allocation22_spill] sm:$0xff] %v4056_v12  ;;  %v4058_v7 = vpop.permute.xlu1 %898 }
 0x121   : > { %5904 = vst [vmem:[#allocation23_spill] sm:$0xff] %v4058_v7  ;;  %1228 = vperm.xlu1 %3391, %v3741_v1   ;;  %v5800_v7 = vmov 27  }
 0x123   : > { %1400 = vperm.xlu0 %3404, %v3760_v6   ;;  %v4062_v53 = vpop.permute.xlu0 %991 }
 0x124   : > { %5905 = vst [vmem:[#allocation24_spill] sm:$0xff] %v4062_v53  ;;  %v4064_v60 = vpop.permute.xlu1 %904 }
 0x125   : > { %5906 = vst [vmem:[#allocation25_spill] sm:$0xff] %v4064_v60  ;;  %1234 = vperm.xlu1 %3391, %v3749_v3   ;;  %v5911_v60 = vmov 19  }
 0x127   : > { %3405 = vset.pattern.permute.xlu0 %v5797_v46  ;;  %v4068_v21 = vpop.permute.xlu0 %999 }
 0x128   : > { %5907 = vst [vmem:[#allocation26_spill] sm:$0xff] %v4068_v21  ;;  %v4070_v19 = vpop.permute.xlu1 %910  ;;  %1411 = vperm.xlu0 %3405, %v3744_v2  }
 0x129   : > { %5908 = vst [vmem:[#allocation27_spill] sm:$0xff] %v4070_v19  ;;  %1242 = vperm.xlu1 %3391, %v3757_v5   ;;  %v5799_v19 = vmov 26  }
 0x12c   : > { %v4074_v12 = vpop.permute.xlu1 %918  ;;  %1423 = vperm.xlu0 %3405, %v3749_v3   ;;  %v4077_v53 = vpop.permute.xlu0 %1009 }
 0x12d   : > { %5909 = vst [vmem:[#allocation28_spill] sm:$0xff] %v4074_v12  ;;  %5910 = vst [vmem:[#allocation29_spill] sm:$0xff] %v4077_v53  ;;  %3394 = vset.pattern.permute.xlu1 %v5911_v60 }
 0x12e   : > { %1252 = vperm.xlu1 %3394, %v3752_v4  }
 0x130   : > { %1431 = vperm.xlu0 %3405, %v3757_v5   ;;  %v4082_v46 = vpop.permute.xlu0 %1022 }
 0x131   : > { %5912 = vst [vmem:[#allocation30_spill] sm:$0xff] %v4082_v46  ;;  %v4084_v21 = vpop.permute.xlu1 %928 }
 0x132   : > { %5913 = vst [vmem:[#allocation31_spill] sm:$0xff] %v4084_v21  ;;  %1255 = vperm.xlu1 %3394, %v3741_v1   ;;  %v5918_v21 = vmov 20  }
 0x134   : > { %3408 = vset.pattern.permute.xlu0 %v5799_v19 }
 0x135   : > { %v4088_v12 = vpop.permute.xlu1 %931  ;;  %1441 = vperm.xlu0 %3408, %v3752_v4   ;;  %v4091_v53 = vpop.permute.xlu0 %1033 }
 0x136   : > { %5914 = vst [vmem:[#allocation32_spill] sm:$0xff] %v4088_v12  ;;  %5915 = vst [vmem:[#allocation33_spill] sm:$0xff] %v4091_v53  ;;  %1265 = vperm.xlu1 %3394, %v3760_v6  }
 0x139   : > { %v4094_v60 = vpop.permute.xlu1 %941  ;;  %1454 = vperm.xlu0 %3408, %v3760_v6   ;;  %v4097_v46 = vpop.permute.xlu0 %1045 }
 0x13a   : > { %5916 = vst [vmem:[#allocation34_spill] sm:$0xff] %v4094_v60  ;;  %5917 = vst [vmem:[#allocation35_spill] sm:$0xff] %v4097_v46  ;;  %3395 = vset.pattern.permute.xlu1 %v5918_v21 }
 0x13b   : > { %1276 = vperm.xlu1 %3395, %v3744_v2  }
 0x13d   : > { %3409 = vset.pattern.permute.xlu0 %v5800_v7  ;;  %v4102_v19 = vpop.permute.xlu0 %1053 }
 0x13e   : > { %5919 = vst [vmem:[#allocation36_spill] sm:$0xff] %v4102_v19  ;;  %v4104_v12 = vpop.permute.xlu1 %952  ;;  %1465 = vperm.xlu0 %3409, %v3744_v2  }
 0x13f   : > { %5920 = vst [vmem:[#allocation37_spill] sm:$0xff] %v4104_v12  ;;  %1282 = vperm.xlu1 %3395, %v3741_v1   ;;  %v5801_v12 = vmov 28  }
 0x142   : > { %v4108_v60 = vpop.permute.xlu1 %958  ;;  %1477 = vperm.xlu0 %3409, %v3749_v3   ;;  %v4111_v46 = vpop.permute.xlu0 %1171 }
 0x143   : > { %5921 = vst [vmem:[#allocation38_spill] sm:$0xff] %v4108_v60  ;;  %5922 = vst [vmem:[#allocation39_spill] sm:$0xff] %v4111_v46  ;;  %1288 = vperm.xlu1 %3395, %v3749_v3   ;;  %v5926_v60 = vmov 21  }
 0x146   : > { %v4114_v21 = vpop.permute.xlu1 %964  ;;  %1485 = vperm.xlu0 %3409, %v3757_v5   ;;  %v4117_v7 = vpop.permute.xlu0 %1184 }
 0x147   : > { %5923 = vst [vmem:[#allocation40_spill] sm:$0xff] %v4114_v21  ;;  %5924 = vst [vmem:[#allocation41_spill] sm:$0xff] %v4117_v7  ;;  %1296 = vperm.xlu1 %3395, %v3757_v5   ;;  %v620_v21 = vlaneseq }
 0x14a   : > { %v4120_v19 = vpop.permute.xlu1 %972  ;;  %3412 = vset.pattern.permute.xlu0 %v5801_v12 }
 0x14b   : > { %5925 = vst [vmem:[#allocation42_spill] sm:$0xff] %v4120_v19  ;;  %3398 = vset.pattern.permute.xlu1 %v5926_v60  ;;  %1495 = vperm.xlu0 %3412, %v3752_v4   ;;  %v4125_v46 = vpop.permute.xlu0 %1195  ;;  %v4134_v19 = vand.u32 127, %v620_v21  ;;  %v5803_v60 = vmov 29  }
 0x14c   : > { %1306 = vperm.xlu1 %3398, %v3752_v4  }
 0x14d   : > { %vm663_vm2 = vcmp.eq.s32.totalorder %v3848_v30, %v4134_v19  ;;  %vm634_vm3 = vcmp.eq.s32.totalorder %v3836_v25, %v4134_v19  ;;  %vm633_vm4 = vcmp.eq.s32.totalorder %v3830_v23, %v4134_v19  ;;  %vm664_vm5 = vcmp.eq.s32.totalorder %v3845_v29, %v4134_v19 }
 0x14e   : > { %v678_v21 = vsel %vm663_vm2, %v3854_v32, 0.0  ;;  %v679_v30 = vsel %vm664_vm5, %v3857_v33, 0.0  ;;  %vm717_vm6 = vcmp.eq.s32.totalorder %v3879_v42, %v4134_v19  ;;  %vm719_vm7 = vcmp.eq.s32.totalorder %v3894_v48, %v4134_v19 }
 0x14f   : > { %v4128_v53 = vpop.permute.xlu1 %982  ;;  %1508 = vperm.xlu0 %3412, %v3760_v6   ;;  %v4131_v7 = vpop.permute.xlu0 %1207  ;;  %v5928_v25 = vmov 22   ;;  %vm635_vm8 = vcmp.eq.s32.totalorder %v3827_v22, %v4134_v19  ;;  %v651_v29 = vsel %vm633_vm4, %v3833_v24, 0.0  ;;  %vm665_vm9 = vcmp.eq.s32.totalorder %v3851_v31, %v4134_v19 }
 0x150   : > { %1309 = vperm.xlu1 %3398, %v3741_v1   ;;  %vm691_vm10 = vcmp.eq.s32.totalorder %v3866_v37, %v4134_v19  ;;  %v4173_v32 = vadd.f32 %v678_v21, %v651_v29  ;;  %v680_v33 = vsel %vm665_vm9, %v3859_v35, 0.0  ;;  %v732_v22 = vsel %vm717_vm6, %v3884_v44, 0.0  ;;  %v5932_v21 = vld [vmem:[#allocation6_spill] sm:$0xff] }
 0x151   : > { %vm718_vm11 = vcmp.eq.s32.totalorder %v3887_v45, %v4134_v19  ;;  %v734_v24 = vsel %vm719_vm7, %v3890_v47, 0.0  ;;  %vm690_vm12 = vcmp.eq.s32.totalorder %v3863_v36, %v4134_v19  ;;  %vm692_vm13 = vcmp.eq.s32.totalorder %v3869_v38, %v4134_v19 }
 0x152   : > { %v733_v31 = vsel %vm718_vm11, %v3900_v50, 0.0  ;;  %v705_v44 = vsel %vm690_vm12, %v3875_v40, 0.0  ;;  %v707_v45 = vsel %vm692_vm13, %v3881_v43, 0.0  ;;  %vm745_vm14 = vcmp.eq.s32.totalorder %v3898_v49, %v4134_v19 }
 0x153   : > { %v4136_v12 = vpop.permute.xlu1 %985  ;;  %3413 = vset.pattern.permute.xlu0 %v5803_v60  ;;  %v4139_v28 = vpop.permute.xlu0 %1215  ;;  %v4200_v38 = vadd.f32 %v732_v22, %v705_v44  ;;  %vm825_vm15 = vcmp.eq.s32.totalorder %v3943_v8, %v4134_v19  ;;  %vm771_vm2 = vcmp.eq.s32.totalorder %v3911_v54, %v4134_v19  ;;  %vm827_vm4 = vcmp.eq.s32.totalorder %v3989_v20, %v4134_v19  ;;  %v5931_v20 = vld [vmem:[#allocation4_spill] sm:$0xff]  ;;  %v5938_v44 = vld [vmem:[#allocation11_spill] sm:$0xff] }
 0x154   : > { %5927 = vst [vmem:[#allocation43_spill] sm:$0xff] %v4139_v28  ;;  %1319 = vperm.xlu1 %3398, %v3760_v6   ;;  %1519 = vperm.xlu0 %3413, %v3744_v2   ;;  %v652_v28 = vsel %vm634_vm3, %v3842_v27, 0.0  ;;  %v653_v27 = vsel %vm635_vm8, %v3839_v26, 0.0  ;;  %v706_v26 = vsel %vm691_vm10, %v3872_v39, 0.0  ;;  %v4202_v39 = vadd.f32 %v734_v24, %v707_v45 }
 0x155   : > { %v4176_v42 = vadd.f32 %v679_v30, %v652_v28  ;;  %v4198_v36 = vadd.f32 %v680_v33, %v653_v27  ;;  %v4206_v47 = vadd.f32 %v733_v31, %v706_v26  ;;  %vm799_vm3 = vcmp.eq.s32.totalorder %v3930_v61, %v4134_v19  ;;  %v5934_v27 = vld [vmem:[#allocation10_spill] sm:$0xff]  ;;  %v5935_v33 = vld [vmem:[#allocation8_spill] sm:$0xff] }
 0x156   : > { %vm744_vm5 = vcmp.eq.s32.totalorder %v3906_v52, %v4134_v19  ;;  %v760_v40 = vsel %vm745_vm14, %v3903_v51, 0.0  ;;  %vm773_vm6 = vcmp.eq.s32.totalorder %v3938_v0, %v4134_v19  ;;  %vm798_vm7 = vcmp.eq.s32.totalorder %v3951_v11, %v4134_v19  ;;  %v5937_v31 = vld [vmem:[#allocation12_spill] sm:$0xff] }
 0x157   : > { %v4152_v60 = vpop.permute.xlu1 %995  ;;  %v3609_v48 = vmov 30   ;;  %vm746_vm8 = vcmp.eq.s32.totalorder %v3913_v55, %v4134_v19  ;;  %v813_v49 = vsel %vm798_vm7, %v3964_v16, 0.0  ;;  %v840_v50 = vsel %vm825_vm15, %v3949_v10, 0.0 }
 0x158   : > { %3399 = vset.pattern.permute.xlu1 %v5928_v25  ;;  %1531 = vperm.xlu0 %3413, %v3749_v3   ;;  %v4162_v23 = vpop.permute.xlu0 %1225  ;;  %vm826_vm9 = vcmp.eq.s32.totalorder %v3981_v41, %v4134_v19  ;;  %v786_v8 = vsel %vm771_vm2, %v3917_v56, 0.0  ;;  %v814_v11 = vsel %vm799_vm3, %v3936_v63, 0.0  ;;  %v842_v10 = vsel %vm827_vm4, %v3955_v13, 0.0  ;;  %v5933_v25 = vld [vmem:[#allocation13_spill] sm:$0xff] }
 0x159   : > { %1330 = vperm.xlu1 %3399, %v3744_v2   ;;  %v841_v16 = vsel %vm826_vm9, %v4002_v34, 0.0  ;;  %v759_v41 = vsel %vm744_vm5, %v3919_v57, 0.0  ;;  %vm772_vm10 = vcmp.eq.s32.totalorder %v3932_v62, %v4134_v19  ;;  %v788_v54 = vsel %vm773_vm6, %v3923_v59, 0.0  ;;  %v5929_v62 = vld [vmem:[#allocation5_spill] sm:$0xff] }
 0x15a   : > { %vm800_vm11 = vcmp.eq.s32.totalorder %v3958_v14, %v4134_v19  ;;  %v787_v56 = vsel %vm772_vm10, %v3945_v9, 0.0  ;;  %v1068_v61 = vadd.f32 %v840_v50, %v813_v49  ;;  %vm853_vm12 = vcmp.eq.s32.totalorder %v3962_v15, %v4134_v19  ;;  %v5930_v9 = vld [vmem:[#allocation3_spill] sm:$0xff]  ;;  %v5941_v50 = vld [vmem:[#allocation14_spill] sm:$0xff] }
 0x15b   : > { %v815_v63 = vsel %vm800_vm11, %v3970_v18, 0.0  ;;  %v1069_v13 = vadd.f32 %v841_v16, %v814_v11  ;;  %vm879_vm13 = vcmp.eq.s32.totalorder %v5929_v62, %v4134_v19  ;;  %v1065_v0 = vadd.f32 %v786_v8, %v759_v41  ;;  %v5940_v49 = vld [vmem:[#allocation19_spill] sm:$0xff]  ;;  %v5942_v11 = vld [vmem:[#allocation16_spill] sm:$0xff] }
 0x15c   : > { %v4188_v35 = vpop.permute.xlu1 %1006  ;;  %1539 = vperm.xlu0 %3413, %v3757_v5   ;;  %v4191_v37 = vpop.permute.xlu0 %1238  ;;  %v1070_v57 = vadd.f32 %v842_v10, %v815_v63  ;;  %v761_v14 = vsel %vm746_vm8, %v5930_v9, 0.0  ;;  %vm881_vm14 = vcmp.eq.s32.totalorder %v4044_v58, %v4134_v19  ;;  %v1066_v18 = vadd.f32 %v787_v56, %v760_v40  ;;  %v5939_v40 = vld [vmem:[#allocation32_spill] sm:$0xff]  ;;  %v5943_v16 = vld [vmem:[#allocation15_spill] sm:$0xff]  ;;  %v5945_v56 = vld [vmem:[#allocation18_spill] sm:$0xff] }
 0x15d   : > { %1336 = vperm.xlu1 %3399, %v3741_v1   ;;  %v1067_v15 = vadd.f32 %v788_v54, %v761_v14  ;;  %v4276_v34 = vsel %vm853_vm12, %v5931_v20, 0.0  ;;  %vm907_vm15 = vcmp.eq.s32.totalorder %v4009_v17, %v4134_v19  ;;  %v4280_v28 = vadd.f32 %v1068_v61, %v1065_v0  ;;  %v5944_v54 = vld [vmem:[#allocation33_spill] sm:$0xff]  ;;  %v5948_v63 = vld [vmem:[#allocation27_spill] sm:$0xff]  ;;  %v5950_v0 = vld [vmem:[#allocation20_spill] sm:$0xff] }
 0x15e   : > { %v4283_v30 = vsel %vm879_vm13, %v5932_v21, 0.0  ;;  %vm933_vm2 = vcmp.eq.s32.totalorder %v5933_v25, %v4134_v19  ;;  %v4289_v58 = vadd.f32 %v1069_v13, %v1066_v18  ;;  %vm852_vm3 = vcmp.eq.s32.totalorder %v5934_v27, %v4134_v19  ;;  %v5949_v13 = vld [vmem:[#allocation17_spill] sm:$0xff]  ;;  %v5952_v20 = vld [vmem:[#allocation35_spill] sm:$0xff] }
 0x15f   : > { %v4287_v29 = vadd.f32 %v1070_v57, %v1067_v15  ;;  %v896_v22 = vsel %vm881_vm14, %v5935_v33, 0.0  ;;  %v5936_v24 = vmov 23   ;;  %v5820_v17 = vmov 31   ;;  %v5951_v15 = vld [vmem:[#allocation37_spill] sm:$0xff] }
 0x160   : > { %v4221_v43 = vpop.permute.xlu1 %1012  ;;  %3416 = vset.pattern.permute.xlu0 %v3609_v48  ;;  %vm854_vm4 = vcmp.eq.s32.totalorder %v5937_v31, %v4134_v19  ;;  %v922_v45 = vsel %vm907_vm15, %v5938_v44, 0.0  ;;  %vm935_vm5 = vcmp.eq.s32.totalorder %v5939_v40, %v4134_v19  ;;  %vm961_vm6 = vcmp.eq.s32.totalorder %v5940_v49, %v4134_v19  ;;  %v5953_v27 = vld [vmem:[#allocation21_spill] sm:$0xff]  ;;  %v5956_v31 = vld [vmem:[#allocation24_spill] sm:$0xff]  ;;  %v5958_v40 = vld [vmem:[#allocation31_spill] sm:$0xff] }
 0x161   : > { %1342 = vperm.xlu1 %3399, %v3749_v3   ;;  %1549 = vperm.xlu0 %3416, %v3752_v4   ;;  %v4232_v51 = vpop.permute.xlu0 %1249  ;;  %v867_v8 = vsel %vm852_vm3, %v5941_v50, 0.0  ;;  %v869_v10 = vsel %vm854_vm4, %v5942_v11, 0.0  ;;  %v948_v41 = vsel %vm933_vm2, %v5943_v16, 0.0  ;;  %vm1041_vm7 = vcmp.eq.s32.totalorder %v5944_v54, %v4134_v19  ;;  %v5954_v33 = vld [vmem:[#allocation25_spill] sm:$0xff]  ;;  %v5957_v44 = vld [vmem:[#allocation28_spill] sm:$0xff]  ;;  %v5960_v11 = vld [vmem:[#allocation38_spill] sm:$0xff] }
 0x162   : > { %vm880_vm8 = vcmp.eq.s32.totalorder %v5945_v56, %v4134_v19  ;;  %v1073_v61 = vadd.f32 %v896_v22, %v869_v10  ;;  %v950_v62 = vsel %vm935_vm5, %v5949_v13, 0.0  ;;  %v976_v9 = vsel %vm961_vm6, %v5950_v0, 0.0  ;;  %v5955_v22 = vld [vmem:[#allocation40_spill] sm:$0xff]  ;;  %v5959_v49 = vld [vmem:[#allocation29_spill] sm:$0xff]  ;;  %v5961_v10 = vld [vmem:[#allocation26_spill] sm:$0xff] }
 0x163   : > { %vm1014_vm11 = vcmp.eq.s32.totalorder %v4188_v35, %v4134_v19  ;;  %vm960_vm12 = vcmp.eq.s32.totalorder %v5951_v15, %v4134_v19  ;;  %vm989_vm13 = vcmp.eq.s32.totalorder %v4136_v12, %v4134_v19  ;;  %v1056_v21 = vsel %vm1041_vm7, %v5952_v20, 0.0 }
 0x164   : > { %v1019_v52 = vpop.permute.xlu1 %1018  ;;  %v895_v35 = vsel %vm880_vm8, %v5953_v27, 0.0  ;;  %vm908_vm14 = vcmp.eq.s32.totalorder %v5954_v33, %v4134_v19  ;;  %vm934_vm15 = vcmp.eq.s32.totalorder %v5958_v40, %v4134_v19  ;;  %vm1015_vm2 = vcmp.eq.s32.totalorder %v5959_v49, %v4134_v19 }
 0x165   : > { %1350 = vperm.xlu1 %3399, %v3757_v5   ;;  %1562 = vperm.xlu0 %3416, %v3760_v6   ;;  %v4267_v59 = vpop.permute.xlu0 %1261  ;;  %v1029_v18 = vsel %vm1014_vm11, %v1019_v52, 0.0  ;;  %vm962_vm3 = vcmp.eq.s32.totalorder %v5960_v11, %v4134_v19  ;;  %v1004_v16 = vsel %vm989_vm13, %v5961_v10, 0.0  ;;  %vm1016_vm4 = vcmp.eq.s32.totalorder %v4221_v43, %v4134_v19  ;;  %v5965_v43 = vld [vmem:[#allocation30_spill] sm:$0xff]  ;;  %v4397_v11 = vld [vmem:[%s3732_s20 + $0x8] sm:$0xff] }
 0x166   : > { %v1080_v54 = vadd.f32 %v1056_v21, %v1029_v18  ;;  %vm988_vm6 = vcmp.eq.s32.totalorder %v4128_v53, %v4134_v19  ;;  %vm1108_vm8 = vcmask 162816   ;;  %vm1231_vm11 = vcmp.eq.s32.totalorder %v4162_v23, %v4134_v19 }
 0x167   : > { %v1003_v18 = vsel %vm988_vm6, %v4152_v60, 0.0  ;;  %v5966_v60 = vmov 24  }
 0x168   : > { %v1027_v55 = vpop.permute.xlu1 %1026 }
 0x169   : > { %3402 = vset.pattern.permute.xlu1 %v5936_v24  ;;  %3417 = vset.pattern.permute.xlu0 %v5820_v17  ;;  %v4296_v26 = vpop.permute.xlu0 %1269  ;;  %v975_v24 = vsel %vm960_vm12, %v5955_v22, 0.0  ;;  %v1031_v12 = vsel %vm1016_vm4, %v1027_v55, 0.0  ;;  %v1072_v55 = vadd.f32 %v895_v35, %v4276_v34  ;;  %vm1257_vm12 = vcmp.eq.s32.totalorder %v4232_v51, %v4134_v19  ;;  %v6038_v51 = vld [vmem:[#allocation41_spill] sm:$0xff] }
 0x16a   : > { %1360 = vperm.xlu1 %3402, %v3752_v4   ;;  %1573 = vperm.xlu0 %3417, %v3744_v2   ;;  %v5946_v4 = vld [vmem:[#allocation23_spill] sm:$0xff]  ;;  %v5947_v2 = vld [vmem:[#allocation22_spill] sm:$0xff] }
 0x16b   : > { %vm906_vm9 = vcmp.eq.s32.totalorder %v5946_v4, %v4134_v19  ;;  %vm987_vm10 = vcmp.eq.s32.totalorder %v5947_v2, %v4134_v19 }
 0x16c   : > { %v921_v57 = vsel %vm906_vm9, %v5948_v63, 0.0  ;;  %v1002_v52 = vsel %vm987_vm10, %v5956_v31, 0.0  ;;  %v5967_v31 = vld [vmem:[#allocation7_spill] sm:$0xff]  ;;  %vm1203_vm9 = vcmp.eq.s32.totalorder %v4125_v46, %v4134_v19 }
 0x16d   : > { %v1037_v14 = vpop.permute.xlu1 %1036  ;;  %v1077_v2 = vadd.f32 %v1002_v52, %v975_v24  ;;  %v1218_v46 = vsel %vm1203_vm9, %v4131_v7, 0.0  ;;  %v6039_v7 = vld [vmem:[#allocation43_spill] sm:$0xff] }
 0x16e   : > { %1363 = vperm.xlu1 %3402, %v3741_v1   ;;  %1585 = vperm.xlu0 %3417, %v3749_v3   ;;  %v4333_v25 = vpop.permute.xlu0 %1279  ;;  %v1074_v1 = vadd.f32 %v948_v41, %v921_v57  ;;  %v923_v3 = vsel %vm908_vm14, %v5957_v44, 0.0  ;;  %v5962_v41 = vld [vmem:[#allocation34_spill] sm:$0xff]  ;;  %vm1042_vm7 = vcmp.eq.s32.totalorder %v1037_v14, %v4134_v19  ;;  %v1078_v44 = vadd.f32 %v1003_v18, %v976_v9 }
 0x16f   : > { %v1076_v50 = vadd.f32 %v950_v62, %v923_v3  ;;  %v949_v4 = vsel %vm934_vm15, %v5962_v41, 0.0  ;;  %v5963_v57 = vld [vmem:[#allocation42_spill] sm:$0xff]  ;;  %v5964_v62 = vld [vmem:[#allocation36_spill] sm:$0xff]  ;;  %v1092_v27 = vadd.f32 %v1080_v54, %v1077_v2  ;;  %v1085_v14 = vadd.f32 %v4202_v39, %v4198_v36  ;;  %v4411_v54 = vld [vmem:[%s3738_s23 + $0x8] sm:$0xff] }
 0x170   : > { %v977_v13 = vsel %vm962_vm3, %v5963_v57, 0.0  ;;  %v1075_v21 = vadd.f32 %v949_v4, %v922_v45  ;;  %v4381_v45 = vld [vmem:[%s3732_s20] sm:$0xff]  ;;  %v1084_v9 = vadd.f32 %v4206_v47, %v4176_v42  ;;  %v5816_v2 = vmov 33   ;;  %v4426_v57 = vld [vmem:[%s3738_s23 + $0x10] sm:$0xf] }
 0x171   : > { %v1040_v56 = vpop.permute.xlu1 %1039  ;;  %v1079_v15 = vadd.f32 %v1004_v16, %v977_v13  ;;  %v1091_v33 = vadd.f32 %v1076_v50, %v1073_v61  ;;  %v1083_v61 = vadd.f32 %v4200_v38, %v4173_v32  ;;  %v1097_v49 = vadd.f32 %v4287_v29, %v1085_v14  ;;  %v4401_v32 = vld [vmem:[%s3732_s20 + $0x10] sm:$0xf]  ;;  %5969 = vst [vmem:[#allocation3_spill] sm:$0xff] %v4426_v57 }
 0x172   : > { %vm1043_vm5 = vcmp.eq.s32.totalorder %v1040_v56, %v4134_v19  ;;  %1373 = vperm.xlu1 %3402, %v3760_v6   ;;  %1593 = vperm.xlu0 %3417, %v3757_v5   ;;  %v4363_v63 = vpop.permute.xlu0 %1292  ;;  %v1030_v6 = vsel %vm1015_vm2, %v5965_v43, 0.0  ;;  %v1071_v5 = vadd.f32 %v4283_v30, %v867_v8  ;;  %v5819_v8 = vmov 32   ;;  %5968 = vst [vmem:[#allocation5_spill] sm:$0xff] %v4401_v32  ;;  %v4415_v56 = vld [vmem:[%s3738_s23] sm:$0xff] }
 0x173   : > { %v1058_v0 = vsel %vm1043_vm5, %v5964_v62, 0.0  ;;  %v1095_v36 = vadd.f32 %v4280_v28, %v1083_v61  ;;  %v1096_v42 = vadd.f32 %v4289_v58, %v1084_v9  ;;  %v5970_v62 = vmov 25  }
 0x174   : > { %v1082_v20 = vadd.f32 %v1058_v0, %v1031_v12  ;;  %v1089_v52 = vadd.f32 %v1074_v1, %v1071_v5  ;;  %v1090_v1 = vadd.f32 %v1075_v21, %v1072_v55  ;;  %v5971_v21 = vmov 26  }
 0x175   : > { %v1050_v53 = vpop.permute.xlu1 %1049  ;;  %v5814_v55 = vmov 35   ;;  %v5810_v61 = vmov 36   ;;  %vm1285_vm15 = vcmp.eq.s32.totalorder %v4333_v25, %v4134_v19 }
 0x176   : > { %v1094_v22 = vadd.f32 %v1082_v20, %v1079_v15  ;;  %v1057_v24 = vsel %vm1042_vm7, %v1050_v53, 0.0  ;;  %3403 = vset.pattern.permute.xlu1 %v5966_v60  ;;  %1650 = vrot.lane.b32.xlu0 %v5967_v31, %s3611_s18  ;;  %v1098_v40 = vadd.f32 %v1092_v27, %v1089_v52 }
 0x177   : > { %v1081_v30 = vadd.f32 %v1057_v24, %v1030_v6  ;;  %1384 = vperm.xlu1 %3403, %v4381_v45   ;;  %3420 = vset.pattern.permute.xlu0 %v5819_v8  ;;  %v4385_v34 = vpop.permute.xlu0 %1303  ;;  %v5815_v6 = vmov 34  }
 0x178   : > { %v1100_v35 = vadd.f32 %v1094_v22, %v1091_v33  ;;  %v1101_v29 = vadd.f32 %v1098_v40, %v1095_v36  ;;  %v5974_v36 = vmov 28   ;;  %vm1311_vm2 = vcmp.eq.s32.totalorder %v4385_v34, %v4134_v19 }
 0x179   : > { %v1093_v3 = vadd.f32 %v1081_v30, %v1078_v44  ;;  %v5972_v30 = vmov 27   ;;  %v4773_v34 = vsel %vm1285_vm15, %v4363_v63, 0.0 }
 0x17a   : > { %v4394_v50 = vpop.permute.xlu1 %1168  ;;  %1714 = vperm.xlu0 %3420, %v4397_v11   ;;  %v1103_v47 = vadd.f32 %v1100_v35, %v1097_v49 }
 0x17b   : > { %1390 = vperm.xlu1 %3403, %v4401_v32   ;;  %v1099_v38 = vadd.f32 %v1093_v3, %v1090_v1  ;;  %v4406_v39 = vpop.permute.xlu0 %1315  ;;  %v5808_v3 = vmov 37   ;;  %vm1176_vm13 = vcmp.eq.s32.totalorder %v4394_v50, %v4134_v19  ;;  %v1246_v50 = vsel %vm1231_vm11, %v4191_v37, 0.0 }
 0x17c   : > { %v1105_v41 = vpack.c.bf16 %v1103_v47, %v1103_v47 }
 0x17d   : > { %v1102_v10 = vadd.f32 %v1099_v38, %v1096_v42  ;;  %v5804_v42 = vmov 39  }
 0x17e   : > { %v4408_v16 = vpop.permute.xlu1 %1174  ;;  %1727 = vperm.xlu0 %3420, %v4411_v54  }
 0x17f   : > { %1396 = vperm.xlu1 %3403, %v4415_v56   ;;  %v1104_v28 = vpack.c.bf16 %v1102_v10, %v1101_v29  ;;  %v4418_v58 = vpop.permute.xlu0 %1323  ;;  %vm1178_vm4 = vcmp.eq.s32.totalorder %v4408_v16, %v4134_v19 }
 0x181   : > { %3218 = vmatprep.mubr.msk.bf16.mxu1 %vm1108_vm8, %v1104_v28  ;;  %v5806_v28 = vmov 40  }
 0x182   : > { %v4421_v4 = vpop.permute.xlu1 %1180  ;;  %3421 = vset.pattern.permute.xlu0 %v5816_v2  ;;  %3219 = vmatmul.mubr.msk.bf16.vlgmr.msra.gmra.mxu1 %vm1108_vm8, %v1105_v41 }
 0x183   : > { %1404 = vperm.xlu1 %3403, %v4426_v57   ;;  %1738 = vperm.xlu0 %3421, %v4381_v45   ;;  %v1191_v23 = vsel %vm1176_vm13, %v4421_v4, 0.0  ;;  %v1326_v4 = vsel %vm1311_vm2, %v4406_v39, 0.0 }
 0x184   : > { %v4430_v13 = vpop.permute.xlu0 %1333 }
 0x185   : > { %vm1339_vm3 = vcmp.eq.s32.totalorder %v4430_v13, %v4134_v19 }
 0x186   : > { %v4432_v12 = vpop.permute.xlu1 %1188 }
 0x187   : > { %3406 = vset.pattern.permute.xlu1 %v5970_v62  ;;  %1750 = vperm.xlu0 %3421, %v4415_v56   ;;  %v1193_v13 = vsel %vm1178_vm4, %v4432_v12, 0.0 }
 0x188   : > { %1414 = vperm.xlu1 %3406, %v4397_v11   ;;  %v4437_v0 = vpop.permute.xlu0 %1346 }
 0x189   : > { %v4791_v63 = vsel %vm1339_vm3, %v4437_v0, 0.0 }
 0x18b   : > { %v4439_v15 = vpop.permute.xlu1 %1198  ;;  %1758 = vperm.xlu0 %3421, %v4426_v57  }
 0x18c   : > { %1417 = vperm.xlu1 %3406, %v4401_v32   ;;  %vm1204_vm5 = vcmp.eq.s32.totalorder %v4439_v15, %v4134_v19  ;;  %v6040_v15 = vmov 41  }
 0x18d   : > { %v4443_v18 = vpop.permute.xlu0 %1357 }
 0x18e   : > { %vm1365_vm9 = vcmp.eq.s32.totalorder %v4443_v18, %v4134_v19 }
 0x18f   : > { %v4445_v43 = vpop.permute.xlu1 %1201  ;;  %3424 = vset.pattern.permute.xlu0 %v5815_v6  ;;  %v5821_v6 = vmov 45  }
 0x190   : > { %1427 = vperm.xlu1 %3406, %v4411_v54   ;;  %1768 = vperm.xlu0 %3424, %v4397_v11   ;;  %vm1205_vm14 = vcmp.eq.s32.totalorder %v4445_v43, %v4134_v19 }
 0x191   : > { %v4450_v20 = vpop.permute.xlu0 %1369  ;;  %v1220_v25 = vsel %vm1205_vm14, %v6039_v7, 0.0 }
 0x192   : > { %v4795_v39 = vadd.f32 %v1220_v25, %v1193_v13 }
 0x193   : > { %v4452_v5 = vpop.permute.xlu1 %1211 }
 0x194   : > { %3407 = vset.pattern.permute.xlu1 %v5971_v21  ;;  %1781 = vperm.xlu0 %3424, %v4411_v54   ;;  %v5812_v21 = vmov 42   ;;  %v1219_v43 = vsel %vm1204_vm5, %v4452_v5, 0.0 }
 0x195   : > { %1438 = vperm.xlu1 %3407, %v4381_v45   ;;  %v4457_v27 = vpop.permute.xlu0 %1377 }
 0x198   : > { %v4459_v53 = vpop.permute.xlu1 %1222  ;;  %3425 = vset.pattern.permute.xlu0 %v5814_v55 }
 0x199   : > { %1444 = vperm.xlu1 %3407, %v4401_v32   ;;  %1792 = vperm.xlu0 %3425, %v4381_v45   ;;  %vm1230_vm7 = vcmp.eq.s32.totalorder %v4459_v53, %v4134_v19 }
 0x19a   : > { %v4464_v33 = vpop.permute.xlu0 %1387 }
 0x19b   : > { %vm1393_vm11 = vcmp.eq.s32.totalorder %v4464_v33, %v4134_v19  ;;  %v1380_v33 = vsel %vm1365_vm9, %v4450_v20, 0.0 }
 0x19c   : > { %v4466_v22 = vpop.permute.xlu1 %1228 }
 0x19d   : > { %1450 = vperm.xlu1 %3407, %v4415_v56   ;;  %1804 = vperm.xlu0 %3425, %v4415_v56   ;;  %vm1232_vm13 = vcmp.eq.s32.totalorder %v4466_v22, %v4134_v19 }
 0x19e   : > { %v4470_v24 = vpop.permute.xlu0 %1400 }
 0x1a0   : > { %v4472_v60 = vpop.permute.xlu1 %1234 }
 0x1a1   : > { %1458 = vperm.xlu1 %3407, %v4426_v57   ;;  %1812 = vperm.xlu0 %3425, %v4426_v57   ;;  %v1245_v12 = vsel %vm1230_vm7, %v4472_v60, 0.0 }
 0x1a3   : > { %v4476_v52 = vpop.permute.xlu0 %1411 }
 0x1a4   : > { %v4478_v44 = vpop.permute.xlu1 %1242 }
 0x1a5   : > { %3410 = vset.pattern.permute.xlu1 %v5972_v30  ;;  %3428 = vset.pattern.permute.xlu0 %v5810_v61  ;;  %v5817_v61 = vmov 43  }
 0x1a6   : > { %1468 = vperm.xlu1 %3410, %v4397_v11   ;;  %1822 = vperm.xlu0 %3428, %v4397_v11  }
 0x1a7   : > { %v4484_v14 = vpop.permute.xlu0 %1423 }
 0x1a9   : > { %v4486_v35 = vpop.permute.xlu1 %1252 }
 0x1aa   : > { %1471 = vperm.xlu1 %3410, %v4401_v32   ;;  %1831 = vperm.xlu0 %3428, %v4415_v56  }
 0x1ab   : > { %v4490_v9 = vpop.permute.xlu0 %1431 }
 0x1ac   : > { %5973 = vst [vmem:[#allocation4_spill] sm:$0xff] %v4490_v9  ;;  %v5825_v9 = vmov 38  }
 0x1ad   : > { %v4492_v1 = vpop.permute.xlu1 %1255 }
 0x1ae   : > { %1481 = vperm.xlu1 %3410, %v4411_v54   ;;  %3442 = vset.pattern.permute.xlu0 %v5808_v3  ;;  %vm1259_vm6 = vcmp.eq.s32.totalorder %v4492_v1, %v4134_v19 }
 0x1af   : > { %1858 = vperm.xlu0 %3442, %v4415_v56   ;;  %v1274_v0 = vsel %vm1259_vm6, %v4296_v26, 0.0 }
 0x1b0   : > { %v4497_v40 = vpop.permute.xlu0 %1441 }
 0x1b1   : > { %v4499_v49 = vpop.permute.xlu1 %1265  ;;  %vm1447_vm14 = vcmp.eq.s32.totalorder %v4497_v40, %v4134_v19  ;;  %v5862_v40 = vmov 61  }
 0x1b2   : > { %3411 = vset.pattern.permute.xlu1 %v5974_v36 }
 0x1b3   : > { %1492 = vperm.xlu1 %3411, %v4381_v45   ;;  %3443 = vset.pattern.permute.xlu0 %v5804_v42  ;;  %v5978_v42 = vmov 29  }
 0x1b4   : > { %1903 = vperm.xlu0 %3443, %v4397_v11   ;;  %v4505_v38 = vpop.permute.xlu0 %1454 }
 0x1b6   : > { %v4507_v47 = vpop.permute.xlu1 %1276 }
 0x1b7   : > { %1498 = vperm.xlu1 %3411, %v4401_v32   ;;  %vm1284_vm3 = vcmp.eq.s32.totalorder %v4507_v47, %v4134_v19 }
 0x1b8   : > { %1912 = vperm.xlu0 %3443, %v4415_v56  }
 0x1b9   : > { %v4511_v29 = vpop.permute.xlu0 %1465 }
 0x1ba   : > { %v4513_v10 = vpop.permute.xlu1 %1282  ;;  %vm1473_vm5 = vcmp.eq.s32.totalorder %v4511_v29, %v4134_v19 }
 0x1bb   : > { %1504 = vperm.xlu1 %3411, %v4415_v56   ;;  %vm1286_vm6 = vcmp.eq.s32.totalorder %v4513_v10, %v4134_v19 }
 0x1bc   : > { %3447 = vset.pattern.permute.xlu0 %v5806_v28 }
 0x1bd   : > { %1939 = vperm.xlu0 %3447, %v4415_v56   ;;  %v4518_v41 = vpop.permute.xlu0 %1477 }
 0x1be   : > { %5975 = vst [vmem:[#allocation6_spill] sm:$0xff] %v4518_v41  ;;  %v4520_v62 = vpop.permute.xlu1 %1288 }
 0x1bf   : > { %1512 = vperm.xlu1 %3411, %v4426_v57  }
 0x1c1   : > { %3448 = vset.pattern.permute.xlu0 %v5812_v21  ;;  %v4524_v30 = vpop.permute.xlu0 %1485 }
 0x1c2   : > { %5976 = vst [vmem:[#allocation13_spill] sm:$0xff] %v4524_v30  ;;  %v4526_v36 = vpop.permute.xlu1 %1296  ;;  %1984 = vperm.xlu0 %3448, %v4397_v11  }
 0x1c3   : > { %5977 = vst [vmem:[#allocation10_spill] sm:$0xff] %v4526_v36  ;;  %3414 = vset.pattern.permute.xlu1 %v5978_v42 }
 0x1c4   : > { %1522 = vperm.xlu1 %3414, %v4397_v11  }
 0x1c6   : > { %1993 = vperm.xlu0 %3448, %v4415_v56   ;;  %v4532_v28 = vpop.permute.xlu0 %1495 }
 0x1c7   : > { %v4534_v3 = vpop.permute.xlu1 %1306 }
 0x1c8   : > { %1525 = vperm.xlu1 %3414, %v4401_v32   ;;  %vm1312_vm7 = vcmp.eq.s32.totalorder %v4534_v3, %v4134_v19  ;;  %v5858_v3 = vmov 63  }
 0x1ca   : > { %3452 = vset.pattern.permute.xlu0 %v5817_v61  ;;  %v4538_v21 = vpop.permute.xlu0 %1508 }
 0x1cb   : > { %5979 = vst [vmem:[#allocation8_spill] sm:$0xff] %v4538_v21  ;;  %v4540_v55 = vpop.permute.xlu1 %1309  ;;  %2020 = vperm.xlu0 %3452, %v4415_v56  }
 0x1cc   : > { %1535 = vperm.xlu1 %3414, %v4411_v54   ;;  %vm1313_vm4 = vcmp.eq.s32.totalorder %v4540_v55, %v4134_v19 }
 0x1cf   : > { %v4544_v42 = vpop.permute.xlu1 %1319  ;;  %3453 = vset.pattern.permute.xlu0 %v5821_v6  ;;  %v4547_v2 = vpop.permute.xlu0 %1519  ;;  %v5823_v6 = vmov 46  }
 0x1d0   : > { %5980 = vst [vmem:[#allocation12_spill] sm:$0xff] %v4547_v2  ;;  %3415 = vset.pattern.permute.xlu1 %v3609_v48  ;;  %2065 = vperm.xlu0 %3453, %v4397_v11   ;;  %v5992_v2 = vmov 32  }
 0x1d1   : > { %1546 = vperm.xlu1 %3415, %v4381_v45  }
 0x1d2   : > { %v6049_v25 = vld [vmem:[#allocation8_spill] sm:$0xff] }
 0x1d3   : > { %v4552_v61 = vpop.permute.xlu0 %1531 }
 0x1d4   : > { %5981 = vst [vmem:[#allocation11_spill] sm:$0xff] %v4552_v61  ;;  %v4554_v8 = vpop.permute.xlu1 %1330  ;;  %2074 = vperm.xlu0 %3453, %v4415_v56  }
 0x1d5   : > { %1552 = vperm.xlu1 %3415, %v4401_v32   ;;  %vm1338_vm2 = vcmp.eq.s32.totalorder %v4554_v8, %v4134_v19  ;;  %v1299_v8 = vsel %vm1284_vm3, %v4520_v62, 0.0 }
 0x1d6   : > { %v1605_v62 = vadd.f32 %v1326_v4, %v1299_v8 }
 0x1d7   : > { %v4558_v17 = vpop.permute.xlu0 %1539 }
 0x1d8   : > { %5982 = vst [vmem:[#allocation32_spill] sm:$0xff] %v4558_v17  ;;  %v4560_v31 = vpop.permute.xlu1 %1336  ;;  %3457 = vset.pattern.permute.xlu0 %v5823_v6  ;;  %v5985_v6 = vmov 31  }
 0x1d9   : > { %1558 = vperm.xlu1 %3415, %v4415_v56   ;;  %2101 = vperm.xlu0 %3457, %v4415_v56   ;;  %vm1340_vm9 = vcmp.eq.s32.totalorder %v4560_v31, %v4134_v19  ;;  %v6044_v31 = vld [vmem:[#allocation10_spill] sm:$0xff] }
 0x1dc   : > { %v4565_v48 = vpop.permute.xlu1 %1342  ;;  %v4567_v30 = vpop.permute.xlu0 %1549 }
 0x1dd   : > { %5983 = vst [vmem:[#allocation19_spill] sm:$0xff] %v4567_v30  ;;  %1566 = vperm.xlu1 %3415, %v4426_v57   ;;  %3458 = vset.pattern.permute.xlu0 %v5825_v9 }
 0x1de   : > { %1873 = vperm.xlu0 %3458, %v4381_v45  }
 0x1e0   : > { %v4572_v17 = vpop.permute.xlu1 %1350  ;;  %v4574_v61 = vpop.permute.xlu0 %1562 }
 0x1e1   : > { %5984 = vst [vmem:[#allocation14_spill] sm:$0xff] %v4574_v61  ;;  %3418 = vset.pattern.permute.xlu1 %v5985_v6  ;;  %v5828_v61 = vmov 41   ;;  %v1355_v29 = vsel %vm1340_vm9, %v4572_v17, 0.0 }
 0x1e2   : > { %1576 = vperm.xlu1 %3418, %v4397_v11   ;;  %1885 = vperm.xlu0 %3458, %v4415_v56  }
 0x1e5   : > { %v4579_v21 = vpop.permute.xlu1 %1360  ;;  %v4581_v30 = vpop.permute.xlu0 %1573 }
 0x1e6   : > { %5986 = vst [vmem:[#allocation16_spill] sm:$0xff] %v4579_v21  ;;  %5987 = vst [vmem:[#allocation15_spill] sm:$0xff] %v4581_v30  ;;  %1579 = vperm.xlu1 %3418, %v4401_v32   ;;  %1893 = vperm.xlu0 %3458, %v4426_v57   ;;  %v5991_v30 = vld [vmem:[#allocation9_spill] sm:$0xff] }
 0x1e9   : > { %v4585_v9 = vpop.permute.xlu1 %1363  ;;  %v4587_v36 = vpop.permute.xlu0 %1585 }
 0x1ea   : > { %5988 = vst [vmem:[#allocation33_spill] sm:$0xff] %v4587_v36  ;;  %1589 = vperm.xlu1 %3418, %v4411_v54   ;;  %3478 = vset.pattern.permute.xlu0 %v5828_v61  ;;  %vm1367_vm15 = vcmp.eq.s32.totalorder %v4585_v9, %v4134_v19  ;;  %v6041_v9 = vmov 42  }
 0x1eb   : > { %1954 = vperm.xlu0 %3478, %v4381_v45  }
 0x1ed   : > { %v4592_v6 = vpop.permute.xlu1 %1373  ;;  %v4594_v21 = vpop.permute.xlu0 %1593  ;;  %v6047_v17 = vld [vmem:[#allocation15_spill] sm:$0xff] }
 0x1ee   : > { %5989 = vst [vmem:[#allocation18_spill] sm:$0xff] %v4592_v6  ;;  %5990 = vst [vmem:[#allocation23_spill] sm:$0xff] %v4594_v21  ;;  %1648 = vrot.lane.b32.xlu1 %v5991_v30, %s3611_s18  ;;  %v5830_v6 = vmov 44  }
 0x1ef   : > { %1966 = vperm.xlu0 %3478, %v4415_v56   ;;  %3419 = vset.pattern.permute.xlu1 %v5992_v2 }
 0x1f1   : > { %v1651_v41 = vpop.permute.xlu0 %1650  ;;  %v6054_v8 = vld [vmem:[#allocation33_spill] sm:$0xff] }
 0x1f2   : > { %1711 = vperm.xlu1 %3419, %v4381_v45   ;;  %v4601_v36 = vpop.permute.xlu1 %1384  ;;  %3255 = vmatprep.subr.msk.bf16.mxu0 %vm1115_vm1, %v1651_v41  ;;  %v1660_v61 = vsel %vm1115_vm1, %v1651_v41, 0 }
 0x1f3   : > { %5993 = vst [vmem:[#allocation22_spill] sm:$0xff] %v4601_v36  ;;  %1974 = vperm.xlu0 %3478, %v4426_v57   ;;  %3223 = vmatpush3.bf16.msra.mxu0 %v1660_v61 }
 0x1f5   : > { %v4606_v21 = vpop.permute.xlu0 %1714  ;;  %v6050_v13 = vld [vmem:[#allocation18_spill] sm:$0xff] }
 0x1f6   : > { %5994 = vst [vmem:[#allocation27_spill] sm:$0xff] %v4606_v21  ;;  %1717 = vperm.xlu1 %3419, %v4401_v32   ;;  %v4609_v30 = vpop.permute.xlu1 %1390  ;;  %v6000_v21 = vmov 33  }
 0x1f7   : > { %5995 = vst [vmem:[#allocation17_spill] sm:$0xff] %v4609_v30  ;;  %3481 = vset.pattern.permute.xlu0 %v5830_v6  ;;  %v5833_v30 = vmov 47  }
 0x1f8   : > { %2035 = vperm.xlu0 %3481, %v4381_v45  }
 0x1f9   : > { %v4613_v2 = vpop.permute.xlu0 %1727 }
 0x1fa   : > { %5996 = vst [vmem:[#allocation20_spill] sm:$0xff] %v4613_v2  ;;  %1723 = vperm.xlu1 %3419, %v4415_v56   ;;  %v4616_v36 = vpop.permute.xlu1 %1396 }
 0x1fb   : > { %5997 = vst [vmem:[#allocation37_spill] sm:$0xff] %v4616_v36 }
 0x1fc   : > { %2047 = vperm.xlu0 %3481, %v4415_v56  }
 0x1fe   : > { %1731 = vperm.xlu1 %3419, %v4426_v57   ;;  %v4620_v61 = vpop.permute.xlu1 %1404  ;;  %v4622_v41 = vpop.permute.xlu0 %1738 }
 0x1ff   : > { %5998 = vst [vmem:[#allocation35_spill] sm:$0xff] %v4620_v61  ;;  %5999 = vst [vmem:[#allocation21_spill] sm:$0xff] %v4622_v41  ;;  %v5835_v61 = vmov 48  }
 0x200   : > { %2055 = vperm.xlu0 %3481, %v4426_v57  }
 0x202   : > { %3422 = vset.pattern.permute.xlu1 %v6000_v21  ;;  %v4626_v6 = vpop.permute.xlu0 %1750 }
 0x203   : > { %6001 = vst [vmem:[#allocation25_spill] sm:$0xff] %v4626_v6  ;;  %1741 = vperm.xlu1 %3422, %v4397_v11   ;;  %v4629_v2 = vpop.permute.xlu1 %1414 }
 0x204   : > { %6002 = vst [vmem:[#allocation40_spill] sm:$0xff] %v4629_v2  ;;  %3484 = vset.pattern.permute.xlu0 %v5833_v30  ;;  %v6007_v2 = vmov 34  }
 0x205   : > { %2116 = vperm.xlu0 %3484, %v4381_v45  }
 0x206   : > { %v4633_v36 = vpop.permute.xlu0 %1758 }
 0x207   : > { %6003 = vst [vmem:[#allocation24_spill] sm:$0xff] %v4633_v36  ;;  %1744 = vperm.xlu1 %3422, %v4401_v32   ;;  %v4636_v41 = vpop.permute.xlu1 %1417 }
 0x208   : > { %6004 = vst [vmem:[#allocation28_spill] sm:$0xff] %v4636_v41  ;;  %v6015_v41 = vmov 35  }
 0x209   : > { %2128 = vperm.xlu0 %3484, %v4415_v56  }
 0x20b   : > { %1754 = vperm.xlu1 %3422, %v4411_v54   ;;  %v4640_v21 = vpop.permute.xlu1 %1427  ;;  %v4642_v6 = vpop.permute.xlu0 %1768 }
 0x20c   : > { %6005 = vst [vmem:[#allocation31_spill] sm:$0xff] %v4640_v21  ;;  %6006 = vst [vmem:[#allocation29_spill] sm:$0xff] %v4642_v6 }
 0x20d   : > { %2136 = vperm.xlu0 %3484, %v4426_v57  }
 0x20f   : > { %3423 = vset.pattern.permute.xlu1 %v6007_v2  ;;  %v4646_v30 = vpop.permute.xlu0 %1781 }
 0x210   : > { %6008 = vst [vmem:[#allocation38_spill] sm:$0xff] %v4646_v30  ;;  %1765 = vperm.xlu1 %3423, %v4381_v45   ;;  %v4649_v36 = vpop.permute.xlu1 %1438 }
 0x211   : > { %6009 = vst [vmem:[#allocation26_spill] sm:$0xff] %v4649_v36  ;;  %3487 = vset.pattern.permute.xlu0 %v5835_v61  ;;  %v5837_v36 = vmov 49  }
 0x212   : > { %2255 = vperm.xlu0 %3487, %v4397_v11  }
 0x214   : > { %1771 = vperm.xlu1 %3423, %v4401_v32   ;;  %v4654_v21 = vpop.permute.xlu1 %1444  ;;  %v4656_v6 = vpop.permute.xlu0 %1792 }
 0x215   : > { %6010 = vst [vmem:[#allocation34_spill] sm:$0xff] %v4654_v21  ;;  %6011 = vst [vmem:[#allocation42_spill] sm:$0xff] %v4656_v6  ;;  %v5841_v6 = vmov 51  }
 0x216   : > { %2268 = vperm.xlu0 %3487, %v4411_v54  }
 0x218   : > { %1777 = vperm.xlu1 %3423, %v4415_v56   ;;  %v4660_v2 = vpop.permute.xlu1 %1450  ;;  %v4662_v30 = vpop.permute.xlu0 %1804 }
 0x219   : > { %6012 = vst [vmem:[#allocation36_spill] sm:$0xff] %v4662_v30 }
 0x21a   : > { %3490 = vset.pattern.permute.xlu0 %v5837_v36 }
 0x21b   : > { %2295 = vperm.xlu0 %3490, %v4411_v54  }
 0x21c   : > { %1785 = vperm.xlu1 %3423, %v4426_v57   ;;  %v4667_v61 = vpop.permute.xlu1 %1458  ;;  %v4669_v21 = vpop.permute.xlu0 %1812  ;;  %v5846_v57 = vmov 52  }
 0x21d   : > { %6013 = vst [vmem:[#allocation30_spill] sm:$0xff] %v4667_v61  ;;  %6014 = vst [vmem:[#allocation44_spill] sm:$0xff] %v4669_v21  ;;  %v5853_v61 = vmov 57  }
 0x21f   : > { %3491 = vset.pattern.permute.xlu0 %v5841_v6 }
 0x220   : > { %3426 = vset.pattern.permute.xlu1 %v6015_v41  ;;  %2336 = vperm.xlu0 %3491, %v4397_v11  }
 0x221   : > { %1795 = vperm.xlu1 %3426, %v4397_v11   ;;  %v4675_v56 = vpop.permute.xlu1 %1468  ;;  %v4677_v36 = vpop.permute.xlu0 %1822 }
 0x222   : > { %6016 = vst [vmem:[#allocation45_spill] sm:$0xff] %v4675_v56  ;;  %6017 = vst [vmem:[#allocation46_spill] sm:$0xff] %v4677_v36  ;;  %v6021_v36 = vmov 36   ;;  %v5848_v56 = vmov 54  }
 0x224   : > { %2349 = vperm.xlu0 %3491, %v4411_v54  }
 0x225   : > { %1798 = vperm.xlu1 %3426, %v4401_v32   ;;  %v4681_v30 = vpop.permute.xlu1 %1471  ;;  %v4683_v21 = vpop.permute.xlu0 %1831 }
 0x226   : > { %6018 = vst [vmem:[#allocation47_spill] sm:$0xff] %v4683_v21  ;;  %v6024_v21 = vmov 37  }
 0x228   : > { %3495 = vset.pattern.permute.xlu0 %v5846_v57 }
 0x229   : > { %1808 = vperm.xlu1 %3426, %v4411_v54   ;;  %v4687_v41 = vpop.permute.xlu1 %1481  ;;  %2376 = vperm.xlu0 %3495, %v4411_v54  }
 0x22a   : > { %6019 = vst [vmem:[#allocation48_spill] sm:$0xff] %v4687_v41  ;;  %v4690_v6 = vpop.permute.xlu0 %1858 }
 0x22b   : > { %6020 = vst [vmem:[#allocation49_spill] sm:$0xff] %v4690_v6 }
 0x22d   : > { %3427 = vset.pattern.permute.xlu1 %v6021_v36  ;;  %3496 = vset.pattern.permute.xlu0 %v5848_v56  ;;  %v5851_v56 = vmov 55  }
 0x22e   : > { %1819 = vperm.xlu1 %3427, %v4381_v45   ;;  %v4695_v32 = vpop.permute.xlu1 %1492  ;;  %2417 = vperm.xlu0 %3496, %v4397_v11  }
 0x22f   : > { %6022 = vst [vmem:[#allocation50_spill] sm:$0xff] %v4695_v32  ;;  %v4698_v57 = vpop.permute.xlu0 %1903  ;;  %v5856_v32 = vmov 58  }
 0x230   : > { %6023 = vst [vmem:[#allocation51_spill] sm:$0xff] %v4698_v57 }
 0x232   : > { %3429 = vset.pattern.permute.xlu1 %v6024_v21  ;;  %v4701_v41 = vpop.permute.xlu1 %1498  ;;  %2430 = vperm.xlu0 %3496, %v4411_v54  }
 0x233   : > { %6025 = vst [vmem:[#allocation52_spill] sm:$0xff] %v4701_v41  ;;  %1846 = vperm.xlu1 %3429, %v4381_v45   ;;  %v4705_v6 = vpop.permute.xlu0 %1912  ;;  %v6030_v41 = vmov 38  }
 0x234   : > { %6026 = vst [vmem:[#allocation53_spill] sm:$0xff] %v4705_v6 }
 0x236   : > { %v4707_v36 = vpop.permute.xlu1 %1504  ;;  %3500 = vset.pattern.permute.xlu0 %v5851_v56 }
 0x237   : > { %6027 = vst [vmem:[#allocation54_spill] sm:$0xff] %v4707_v36  ;;  %1849 = vperm.xlu1 %3429, %v4397_v11   ;;  %2457 = vperm.xlu0 %3500, %v4411_v54   ;;  %v6032_v36 = vmov 39  }
 0x238   : > { %v4712_v57 = vpop.permute.xlu0 %1939 }
 0x239   : > { %6028 = vst [vmem:[#allocation55_spill] sm:$0xff] %v4712_v57 }
 0x23a   : > { %v4714_v21 = vpop.permute.xlu1 %1512 }
 0x23b   : > { %6029 = vst [vmem:[#allocation56_spill] sm:$0xff] %v4714_v21  ;;  %3430 = vset.pattern.permute.xlu1 %v6030_v41  ;;  %3501 = vset.pattern.permute.xlu0 %v5853_v61 }
 0x23c   : > { %1876 = vperm.xlu1 %3430, %v4397_v11   ;;  %2498 = vperm.xlu0 %3501, %v4397_v11  }
 0x23d   : > { %v4720_v6 = vpop.permute.xlu0 %1984 }
 0x23e   : > { %6031 = vst [vmem:[#allocation57_spill] sm:$0xff] %v4720_v6  ;;  %v6036_v6 = vmov 40  }
 0x23f   : > { %v4722_v56 = vpop.permute.xlu1 %1522 }
 0x240   : > { %3431 = vset.pattern.permute.xlu1 %v6032_v36  ;;  %2511 = vperm.xlu0 %3501, %v4411_v54  }
 0x241   : > { %1900 = vperm.xlu1 %3431, %v4381_v45   ;;  %v4727_v57 = vpop.permute.xlu0 %1993 }
 0x242   : > { %6033 = vst [vmem:[#allocation58_spill] sm:$0xff] %v4727_v57  ;;  %v4729_v41 = vpop.f32.mrf.mxu1 }
 0x243   : > { %6034 = vst [vmem:[#allocation59_spill] sm:$0xff] %v4729_v41  ;;  %v4731_v21 = vpop.permute.xlu1 %1525  ;;  %v6037_v41 = vld [vmem:[#allocation39_spill] sm:$0xff] }
 0x244   : > { %v4733_v61 = vpop.f32.mrf.mxu1  ;;  %3505 = vset.pattern.permute.xlu0 %v5856_v32  ;;  %vm1177_vm10 = vcmp.eq.s32.totalorder %v6037_v41, %v4134_v19  ;;  %vm1529_vm9 = vcmp.eq.s32.totalorder %v4731_v21, %v4134_v19 }
 0x245   : > { %6035 = vst [vmem:[#allocation60_spill] sm:$0xff] %v4733_v61  ;;  %3432 = vset.pattern.permute.xlu1 %v6036_v6  ;;  %2538 = vperm.xlu0 %3505, %v4411_v54   ;;  %v1192_v41 = vsel %vm1177_vm10, %v6038_v51, 0.0  ;;  %v1272_v61 = vsel %vm1257_vm12, %v4267_v59, 0.0  ;;  %v4778_v59 = vadd.f32 %v1218_v46, %v1191_v23  ;;  %vm1258_vm10 = vcmp.eq.s32.totalorder %v4486_v35, %v4134_v19  ;;  %v6043_v46 = vld [vmem:[#allocation12_spill] sm:$0xff] }
 0x246   : > { %1927 = vperm.xlu1 %3432, %v4381_v45   ;;  %v3221_v36 = vpop.f32.mrf.mxu1  ;;  %v4741_v57 = vpop.permute.xlu0 %2020  ;;  %v1273_v5 = vsel %vm1258_vm10, %v4499_v49, 0.0  ;;  %vm1419_vm12 = vcmp.eq.s32.totalorder %v4476_v52, %v4134_v19  ;;  %v4811_v53 = vadd.f32 %v1219_v43, %v1192_v41  ;;  %v4820_v60 = vadd.f32 %v1272_v61, %v1245_v12  ;;  %v6045_v51 = vld [vmem:[#allocation16_spill] sm:$0xff] }
 0x247   : > { %v4749_v32 = vpop.permute.xlu1 %1535  ;;  %v5864_v36 = vmov 60   ;;  %v1247_v52 = vsel %vm1232_vm13, %v4478_v44, 0.0  ;;  %v4824_v35 = vsel %vm1393_vm11, %v4470_v24, 0.0  ;;  %v4830_v22 = vadd.f32 %v1273_v5, %v1246_v50  ;;  %v6051_v5 = vld [vmem:[#allocation11_spill] sm:$0xff] }
 0x248   : > { %v4828_v1 = vadd.f32 %v1274_v0, %v1247_v52  ;;  %v4833_v20 = vsel %vm1419_vm12, %v4484_v14, 0.0  ;;  %v4843_v24 = vsel %vm1447_vm14, %v4505_v38, 0.0  ;;  %v1353_v44 = vsel %vm1338_vm2, %v4565_v48, 0.0  ;;  %v6042_v48 = vld [vmem:[#allocation6_spill] sm:$0xff] }
 0x249   : > { %3506 = vset.pattern.permute.xlu0 %v5864_v36  ;;  %v1382_v14 = vsel %vm1367_vm15, %v4457_v27, 0.0  ;;  %vm1501_vm10 = vcmp.eq.s32.totalorder %v4532_v28, %v4134_v19  ;;  %v1328_v38 = vsel %vm1313_vm4, %v4418_v58, 0.0  ;;  %v1327_v27 = vsel %vm1312_vm7, %v4544_v42, 0.0  ;;  %v6046_v58 = vld [vmem:[#allocation19_spill] sm:$0xff]  ;;  %v6053_v28 = vld [vmem:[#allocation14_spill] sm:$0xff] }
 0x24a   : > { %1930 = vperm.xlu1 %3432, %v4397_v11   ;;  %2579 = vperm.xlu0 %3506, %v4397_v11   ;;  %v1608_v47 = vadd.f32 %v1380_v33, %v1353_v44  ;;  %v1488_v61 = vsel %vm1473_vm5, %v6042_v48, 0.0  ;;  %v1610_v10 = vadd.f32 %v1382_v14, %v1355_v29  ;;  %vm1527_vm11 = vcmp.eq.s32.totalorder %v6043_v46, %v4134_v19  ;;  %v6052_v33 = vld [vmem:[#allocation28_spill] sm:$0xff]  ;;  %v6057_v29 = vld [vmem:[#allocation26_spill] sm:$0xff] }
 0x24b   : > { %v4776_v37 = vpop.permute.xlu0 %2065  ;;  %v1301_v23 = vsel %vm1286_vm6, %v6044_v31, 0.0  ;;  %vm1366_vm12 = vcmp.eq.s32.totalorder %v6045_v51, %v4134_v19  ;;  %vm1555_vm13 = vcmp.eq.s32.totalorder %v6046_v58, %v4134_v19  ;;  %vm1581_vm14 = vcmp.eq.s32.totalorder %v6047_v17, %v4134_v19  ;;  %v6061_v58 = vld [vmem:[#allocation50_spill] sm:$0xff] }
 0x24c   : > { %v4785_v16 = vpop.permute.xlu1 %1546  ;;  %v6048_v42 = vmov 43   ;;  %v1607_v50 = vadd.f32 %v1328_v38, %v1301_v23  ;;  %v4880_v7 = vadd.f32 %v1327_v27, %v4773_v34  ;;  %v4886_v4 = vsel %vm1501_vm10, %v6049_v25, 0.0  ;;  %v6055_v27 = vld [vmem:[#allocation22_spill] sm:$0xff]  ;;  %v6060_v23 = vld [vmem:[#allocation13_spill] sm:$0xff] }
 0x24d   : > { %v1381_v43 = vsel %vm1366_vm12, %v6050_v13, 0.0  ;;  %v4892_v0 = vadd.f32 %v1608_v47, %v1605_v62  ;;  %v1542_v34 = vsel %vm1527_vm11, %v6051_v5, 0.0  ;;  %vm1421_vm15 = vcmp.eq.s32.totalorder %v6052_v33, %v4134_v19  ;;  %v6056_v47 = vld [vmem:[#allocation17_spill] sm:$0xff]  ;;  %v6065_v13 = vld [vmem:[#allocation54_spill] sm:$0xff] }
 0x24e   : > { %3433 = vset.pattern.permute.xlu1 %v6040_v15  ;;  %2592 = vperm.xlu0 %3506, %v4411_v54   ;;  %v4900_v52 = vadd.f32 %v1610_v10, %v1607_v50  ;;  %v4903_v44 = vsel %vm1555_vm13, %v6053_v28, 0.0  ;;  %v1596_v14 = vsel %vm1581_vm14, %v6054_v8, 0.0  ;;  %vm1475_vm2 = vcmp.eq.s32.totalorder %v4681_v30, %v4134_v19  ;;  %v6058_v62 = vld [vmem:[#allocation37_spill] sm:$0xff]  ;;  %v6059_v10 = vld [vmem:[#allocation4_spill] sm:$0xff]  ;;  %v6062_v50 = vld [vmem:[#allocation35_spill] sm:$0xff] }
 0x24f   : > { %1957 = vperm.xlu1 %3433, %v4397_v11   ;;  %v4809_v18 = vpop.permute.xlu0 %2074  ;;  %v1609_v38 = vadd.f32 %v1381_v43, %v4791_v63  ;;  %vm1392_vm3 = vcmp.eq.s32.totalorder %v6055_v27, %v4134_v19  ;;  %vm1394_vm4 = vcmp.eq.s32.totalorder %v6056_v47, %v4134_v19  ;;  %vm1446_vm5 = vcmp.eq.s32.totalorder %v6057_v29, %v4134_v19  ;;  %v6066_v28 = vld [vmem:[#allocation30_spill] sm:$0xff]  ;;  %v6067_v27 = vld [vmem:[#allocation45_spill] sm:$0xff] }
 0x250   : > { %v4818_v26 = vpop.permute.xlu1 %1552  ;;  %v1407_v48 = vsel %vm1392_vm3, %v6058_v62, 0.0  ;;  %v1436_v46 = vsel %vm1421_vm15, %v6059_v10, 0.0  ;;  %v1461_v31 = vsel %vm1446_vm5, %v4660_v2, 0.0  ;;  %vm1554_vm6 = vcmp.eq.s32.totalorder %v4785_v16, %v4134_v19  ;;  %v6063_v2 = vld [vmem:[#allocation40_spill] sm:$0xff]  ;;  %v6064_v16 = vld [vmem:[#allocation34_spill] sm:$0xff] }
 0x251   : > { %v1490_v51 = vsel %vm1475_vm2, %v6060_v23, 0.0  ;;  %vm1500_vm7 = vcmp.eq.s32.totalorder %v6061_v58, %v4134_v19  ;;  %v1409_v25 = vsel %vm1394_vm4, %v6062_v50, 0.0  ;;  %vm1420_vm10 = vcmp.eq.s32.totalorder %v6063_v2, %v4134_v19  ;;  %v6069_v62 = vld [vmem:[#allocation32_spill] sm:$0xff] }
 0x252   : > { %3510 = vset.pattern.permute.xlu0 %v5862_v40  ;;  %vm1448_vm11 = vcmp.eq.s32.totalorder %v6064_v16, %v4134_v19  ;;  %v1515_v43 = vsel %vm1500_vm7, %v6065_v13, 0.0  ;;  %v1613_v5 = vadd.f32 %v1436_v46, %v1409_v25  ;;  %v1614_v33 = vadd.f32 %v1488_v61, %v1461_v31  ;;  %v6072_v46 = vld [vmem:[#allocation52_spill] sm:$0xff]  ;;  %v6074_v25 = vld [vmem:[#allocation23_spill] sm:$0xff] }
 0x253   : > { %3434 = vset.pattern.permute.xlu1 %v6041_v9  ;;  %2619 = vperm.xlu0 %3510, %v4411_v54   ;;  %v1463_v8 = vsel %vm1448_vm11, %v6066_v28, 0.0  ;;  %vm1474_vm12 = vcmp.eq.s32.totalorder %v6067_v27, %v4134_v19  ;;  %v5872_v47 = vmov 50   ;;  %v1544_v10 = vsel %vm1529_vm9, %v6069_v62, 0.0  ;;  %v6075_v13 = vld [vmem:[#allocation31_spill] sm:$0xff] }
 0x254   : > { %1981 = vperm.xlu1 %3434, %v4381_v45   ;;  %v1559_v49 = vpop.permute.xlu1 %1558  ;;  %v4853_v55 = vpop.permute.xlu0 %2101  ;;  %v1616_v21 = vadd.f32 %v1490_v51, %v1463_v8  ;;  %v6070_v58 = vmov 44   ;;  %vm1502_vm13 = vcmp.eq.s32.totalorder %v6072_v46, %v4134_v19  ;;  %v1617_v31 = vadd.f32 %v1542_v34, %v1515_v43  ;;  %v6073_v51 = vld [vmem:[#allocation56_spill] sm:$0xff] }
 0x255   : > { %v1569_v17 = vsel %vm1554_vm6, %v1559_v49, 0.0  ;;  %v6068_v49 = vld [vmem:[#allocation48_spill] sm:$0xff]  ;;  %vm1556_vm14 = vcmp.eq.s32.totalorder %v4818_v26, %v4134_v19  ;;  %vm1528_vm2 = vcmp.eq.s32.totalorder %v4722_v56, %v4134_v19  ;;  %v1435_v34 = vsel %vm1420_vm10, %v6075_v13, 0.0 }
 0x256   : > { %v1489_v29 = vsel %vm1474_vm12, %v6068_v49, 0.0  ;;  %v1620_v23 = vadd.f32 %v1596_v14, %v1569_v17  ;;  %v1517_v14 = vsel %vm1502_vm13, %v6073_v51, 0.0  ;;  %v1543_v26 = vsel %vm1528_vm2, %v4749_v32, 0.0 }
 0x257   : > { %3511 = vset.pattern.permute.xlu0 %v5858_v3  ;;  %v1619_v43 = vadd.f32 %v1544_v10, %v1517_v14  ;;  %v1611_v8 = vadd.f32 %v4833_v20, %v1407_v48  ;;  %v1615_v27 = vadd.f32 %v1489_v29, %v4843_v24  ;;  %v1631_v62 = vadd.f32 %v1616_v21, %v1613_v5 }
 0x258   : > { %3435 = vset.pattern.permute.xlu1 %v6048_v42  ;;  %v1567_v41 = vpop.permute.xlu1 %1566  ;;  %2660 = vperm.xlu0 %3511, %v4397_v11   ;;  %v1632_v49 = vadd.f32 %v1620_v23, %v1617_v31  ;;  %v6076_v46 = vmov 45   ;;  %v1612_v32 = vadd.f32 %v1435_v34, %v4824_v35  ;;  %v1618_v24 = vadd.f32 %v1543_v26, %v4886_v4  ;;  %v6077_v23 = vld [vmem:[#allocation3_spill] sm:$0xff] }
 0x259   : > { %2008 = vperm.xlu1 %3435, %v4381_v45   ;;  %v4890_v12 = vpop.permute.xlu0 %1873  ;;  %v1571_v17 = vsel %vm1556_vm14, %v1567_v41, 0.0  ;;  %v1627_v41 = vadd.f32 %v1609_v38, %v4880_v7  ;;  %v1629_v20 = vadd.f32 %v1614_v33, %v1611_v8  ;;  %v1625_v7 = vadd.f32 %v4828_v1, %v4795_v39 }
 0x25a   : > { %v1624_v5 = vadd.f32 %v4830_v22, %v4811_v53  ;;  %v1630_v21 = vadd.f32 %v1615_v27, %v1612_v32  ;;  %v6078_v39 = vmov 46   ;;  %v5870_v14 = vmov 53   ;;  %v6084_v27 = vld [vmem:[#allocation5_spill] sm:$0xff] }
 0x25b   : > { %v1638_v29 = vadd.f32 %v1632_v49, %v1629_v20  ;;  %v1637_v4 = vadd.f32 %v4900_v52, %v1625_v7  ;;  %v6081_v13 = vmov 47   ;;  %v5868_v49 = vmov 56  }
 0x25c   : > { %2673 = vperm.xlu0 %3511, %v4411_v54  }
 0x25d   : > { %2011 = vperm.xlu1 %3435, %v4397_v11   ;;  %v1577_v30 = vpop.permute.xlu1 %1576  ;;  %v4922_v63 = vpop.permute.xlu0 %1885 }
 0x25e   : > { %vm1582_vm3 = vcmp.eq.s32.totalorder %v1577_v30, %v4134_v19  ;;  %v1623_v30 = vadd.f32 %v4820_v60, %v4778_v59  ;;  %v1636_v60 = vadd.f32 %v1627_v41, %v1624_v5 }
 0x260   : > { %3514 = vset.pattern.permute.xlu0 %v5872_v47  ;;  %v1635_v59 = vadd.f32 %v4892_v0, %v1623_v30  ;;  %v6089_v30 = vmov 38  }
 0x261   : > { %3436 = vset.pattern.permute.xlu1 %v6070_v58  ;;  %v1580_v50 = vpop.permute.xlu1 %1579  ;;  %2306 = vperm.xlu0 %3514, %v4381_v45   ;;  %v4943_v61 = vpop.permute.xlu0 %1893 }
 0x262   : > { %6071 = vst [vmem:[#allocation39_spill] sm:$0xff] %v4943_v61  ;;  %vm1583_vm15 = vcmp.eq.s32.totalorder %v1580_v50, %v4134_v19  ;;  %2038 = vperm.xlu1 %3436, %v4397_v11   ;;  %v1641_v53 = vadd.f32 %v1638_v29, %v1635_v59  ;;  %v5053_v59 = vld [vmem:[%s3732_s20] sm:$0xff] }
 0x263   : > { %v1598_v16 = vsel %vm1583_vm15, %v6074_v25, 0.0 }
 0x264   : > { %v1622_v28 = vadd.f32 %v1598_v16, %v1571_v17 }
 0x265   : > { %v1590_v56 = vpop.permute.xlu1 %1589  ;;  %2322 = vperm.xlu0 %3514, %v4411_v54  }
 0x266   : > { %v1634_v50 = vadd.f32 %v1622_v28, %v1619_v43  ;;  %v1597_v2 = vsel %vm1582_vm3, %v1590_v56, 0.0  ;;  %3437 = vset.pattern.permute.xlu1 %v6076_v46  ;;  %v4966_v10 = vpop.permute.xlu0 %1954  ;;  %v6082_v28 = vmov 36  }
 0x267   : > { %v1621_v48 = vadd.f32 %v1597_v2, %v4903_v44  ;;  %2062 = vperm.xlu1 %3437, %v4381_v45  }
 0x268   : > { %v1640_v38 = vadd.f32 %v1634_v50, %v1631_v62  ;;  %v6086_v62 = vmov 37  }
 0x269   : > { %v1633_v35 = vadd.f32 %v1621_v48, %v1618_v24  ;;  %v1649_v33 = vpop.permute.xlu1 %1648  ;;  %2326 = vperm.xlu0 %3514, %v6077_v23   ;;  %v5866_v24 = vmov 59  }
 0x26a   : > { %3224 = vmatprep.subr.bf16.mxu0 %v1649_v33  ;;  %v4980_v44 = vpop.permute.xlu0 %1966  ;;  %v1643_v1 = vadd.f32 %v1640_v38, %v1637_v4  ;;  %v5049_v4 = vld [vmem:[%s3732_s20 + $0x10] sm:$0xf] }
 0x26b   : > { %v1639_v31 = vadd.f32 %v1633_v35, %v1630_v21  ;;  %3438 = vset.pattern.permute.xlu1 %v6078_v39  ;;  %3225 = vmatpush3.bf16.msra.mxu0 %v1649_v33  ;;  %v6091_v35 = vmov 39   ;;  %v5860_v33 = vmov 62   ;;  %6092 = vst [vmem:[#allocation15_spill] sm:$0xff] %v5049_v4 }
 0x26c   : > { %2089 = vperm.xlu1 %3438, %v4381_v45   ;;  %v1645_v17 = vpack.c.bf16 %v1643_v1, %v1643_v1 }
 0x26d   : > { %v1642_v22 = vadd.f32 %v1639_v31, %v1636_v60  ;;  %v4985_v51 = vpop.permute.xlu1 %1711  ;;  %3517 = vset.pattern.permute.xlu0 %v5870_v14 }
 0x26e   : > { %2387 = vperm.xlu0 %3517, %v4381_v45   ;;  %v4989_v52 = vpop.permute.xlu0 %1974 }
 0x26f   : > { %6079 = vst [vmem:[#allocation41_spill] sm:$0xff] %v4989_v52  ;;  %v1644_v0 = vpack.c.bf16 %v1642_v22, %v1641_v53 }
 0x270   : > { %2092 = vperm.xlu1 %3438, %v4397_v11  }
 0x271   : > { %v4992_v25 = vpop.permute.xlu1 %1717  ;;  %3226 = vmatprep.mubr.msk.bf16.mxu0 %vm1108_vm8, %v1644_v0 }
 0x272   : > { %6080 = vst [vmem:[#allocation43_spill] sm:$0xff] %v4992_v25  ;;  %3227 = vmatmul.mubr.msk.bf16.vlgmr.msra.gmra.mxu0 %vm1108_vm8, %v1645_v17  ;;  %2403 = vperm.xlu0 %3517, %v4411_v54   ;;  %v6107_v25 = vmov 48  }
 0x273   : > { %v2036_v16 = vpop.permute.xlu0 %2035 }
 0x274   : > { %3439 = vset.pattern.permute.xlu1 %v6081_v13  ;;  %vm2043_vm4 = vcmp.eq.s32.totalorder %v2036_v16, %v4134_v19  ;;  %v6095_v16 = vld [vmem:[#allocation7_spill] sm:$0xff] }
 0x275   : > { %2119 = vperm.xlu1 %3439, %v4397_v11   ;;  %v4999_v34 = vpop.permute.xlu1 %1723 }
 0x276   : > { %2407 = vperm.xlu0 %3517, %v6077_v23  }
 0x277   : > { %v2048_v43 = vpop.permute.xlu0 %2047 }
 0x278   : > { %v5003_v26 = vsel %vm2043_vm4, %v2048_v43, 0.0 }
 0x279   : > { %3440 = vset.pattern.permute.xlu1 %v6082_v28  ;;  %v5006_v8 = vpop.permute.xlu1 %1731 }
 0x27a   : > { %6083 = vst [vmem:[#allocation6_spill] sm:$0xff] %v5006_v8  ;;  %1825 = vperm.xlu1 %3440, %v6084_v27   ;;  %3520 = vset.pattern.permute.xlu0 %v5868_v49 }
 0x27b   : > { %2468 = vperm.xlu0 %3520, %v4381_v45   ;;  %v5011_v11 = vpop.permute.xlu0 %2055 }
 0x27c   : > { %6085 = vst [vmem:[#allocation12_spill] sm:$0xff] %v5011_v11 }
 0x27e   : > { %1835 = vperm.xlu1 %3440, %v4411_v54   ;;  %v5014_v56 = vpop.permute.xlu1 %1741 }
 0x27f   : > { %2484 = vperm.xlu0 %3520, %v4411_v54  }
 0x280   : > { %v2117_v41 = vpop.permute.xlu0 %2116 }
 0x281   : > { %vm2124_vm5 = vcmp.eq.s32.totalorder %v2117_v41, %v4134_v19 }
 0x282   : > { %3441 = vset.pattern.permute.xlu1 %v6086_v62  ;;  %v5018_v50 = vpop.permute.xlu1 %1744 }
 0x283   : > { %6087 = vst [vmem:[#allocation10_spill] sm:$0xff] %v5018_v50  ;;  %1852 = vperm.xlu1 %3441, %v6084_v27   ;;  %2488 = vperm.xlu0 %3520, %v6077_v23  }
 0x284   : > { %v2129_v2 = vpop.permute.xlu0 %2128 }
 0x285   : > { %v5023_v32 = vsel %vm2124_vm5, %v2129_v2, 0.0  ;;  %vm1881_vm5 = vcmp.eq.s32.totalorder %v4890_v12, %v4134_v19  ;;  %v6157_v12 = vld [vmem:[#allocation46_spill] sm:$0xff] }
 0x286   : > { %v5025_v20 = vpop.permute.xlu1 %1754 }
 0x287   : > { %1862 = vperm.xlu1 %3441, %v4411_v54   ;;  %3523 = vset.pattern.permute.xlu0 %v5866_v24 }
 0x288   : > { %2549 = vperm.xlu0 %3523, %v4381_v45   ;;  %v5030_v48 = vpop.permute.xlu0 %2136 }
 0x289   : > { %6088 = vst [vmem:[#allocation16_spill] sm:$0xff] %v5030_v48 }
 0x28b   : > { %3444 = vset.pattern.permute.xlu1 %v6089_v30  ;;  %v5033_v7 = vpop.permute.xlu1 %1765 }
 0x28c   : > { %1879 = vperm.xlu1 %3444, %v6084_v27   ;;  %2565 = vperm.xlu0 %3523, %v4411_v54  }
 0x28d   : > { %v2256_v38 = vpop.permute.xlu0 %2255 }
 0x28e   : > { %vm2261_vm6 = vcmp.eq.s32.totalorder %v2256_v38, %v4134_v19 }
 0x28f   : > { %v5037_v5 = vpop.permute.xlu1 %1771 }
 0x290   : > { %6090 = vst [vmem:[#allocation19_spill] sm:$0xff] %v5037_v5  ;;  %1889 = vperm.xlu1 %3444, %v4411_v54   ;;  %2569 = vperm.xlu0 %3523, %v6077_v23  }
 0x291   : > { %v2269_v45 = vpop.permute.xlu0 %2268 }
 0x292   : > { %v5042_v21 = vsel %vm2261_vm6, %v2269_v45, 0.0 }
 0x293   : > { %v5044_v29 = vpop.permute.xlu1 %1777 }
 0x294   : > { %3445 = vset.pattern.permute.xlu1 %v6091_v35  ;;  %3526 = vset.pattern.permute.xlu0 %v5860_v33 }
 0x295   : > { %1906 = vperm.xlu1 %3445, %v5049_v4   ;;  %2630 = vperm.xlu0 %3526, %v5053_v59  }
 0x296   : > { %v5056_v60 = vpop.permute.xlu0 %2295 }
 0x297   : > { %v5058_v31 = vpop.permute.xlu1 %1785 }
 0x298   : > { %6093 = vst [vmem:[#allocation8_spill] sm:$0xff] %v5058_v31 }
 0x299   : > { %1916 = vperm.xlu1 %3445, %v4411_v54   ;;  %2646 = vperm.xlu0 %3526, %v4411_v54   ;;  %v3551_v54 = vld [vmem:[%s3738_s23 + $0x8] sm:$0xff] }
 0x29b   : > { %v2337_v1 = vpop.permute.xlu0 %2336 }
 0x29c   : > { %v5062_v53 = vpop.permute.xlu1 %1795  ;;  %vm2342_vm7 = vcmp.eq.s32.totalorder %v2337_v1, %v4134_v19 }
 0x29d   : > { %3446 = vset.pattern.permute.xlu1 %v6036_v6  ;;  %2650 = vperm.xlu0 %3526, %v6077_v23   ;;  %v6097_v23 = vld [vmem:[#allocation9_spill] sm:$0xff] }
 0x29e   : > { %1933 = vperm.xlu1 %3446, %v5049_v4  }
 0x29f   : > { %v2350_v22 = vpop.permute.xlu0 %2349 }
 0x2a0   : > { %v5068_v0 = vpop.permute.xlu1 %1798  ;;  %v5070_v17 = vsel %vm2342_vm7, %v2350_v22, 0.0 }
 0x2a1   : > { %6094 = vst [vmem:[#allocation18_spill] sm:$0xff] %v5068_v0  ;;  %2732 = vrot.lane.b32.xlu0 %v6095_v16, %s3644_s19 }
 0x2a2   : > { %1943 = vperm.xlu1 %3446, %v3551_v54   ;;  %3530 = vset.pattern.permute.xlu0 %v5858_v3 }
 0x2a4   : > { %v5075_v43 = vpop.permute.xlu1 %1808  ;;  %v5077_v27 = vpop.permute.xlu0 %2376 }
 0x2a5   : > { %6096 = vst [vmem:[#allocation11_spill] sm:$0xff] %v5077_v27  ;;  %2730 = vrot.lane.b32.xlu0 %v6097_v23, %s3644_s19  ;;  %v6109_v23 = vmov 49   ;;  %v6142_v27 = vmov 61  }
 0x2a6   : > { %3449 = vset.pattern.permute.xlu1 %v6040_v15 }
 0x2a7   : > { %1960 = vperm.xlu1 %3449, %v5049_v4  }
 0x2a9   : > { %v5082_v41 = vpop.permute.xlu1 %1819  ;;  %v2418_v2 = vpop.permute.xlu0 %2417 }
 0x2aa   : > { %vm2423_vm9 = vcmp.eq.s32.totalorder %v2418_v2, %v4134_v19 }
 0x2ab   : > { %1970 = vperm.xlu1 %3449, %v3551_v54  }
 0x2ad   : > { %v2431_v30 = vpop.permute.xlu0 %2430 }
 0x2ae   : > { %v5085_v38 = vpop.permute.xlu1 %1846  ;;  %v5087_v45 = vsel %vm2423_vm9, %v2431_v30, 0.0  ;;  %vm1828_vm9 = vcmp.eq.s32.totalorder %v6157_v12, %v4134_v19 }
 0x2af   : > { %6098 = vst [vmem:[#allocation28_spill] sm:$0xff] %v5087_v45  ;;  %3450 = vset.pattern.permute.xlu1 %v6041_v9  ;;  %v6133_v45 = vmov 57  }
 0x2b0   : > { %1987 = vperm.xlu1 %3450, %v5049_v4  }
 0x2b2   : > { %v5091_v1 = vpop.permute.xlu1 %1849  ;;  %v5093_v15 = vpop.permute.xlu0 %2457 }
 0x2b3   : > { %6099 = vst [vmem:[#allocation14_spill] sm:$0xff] %v5093_v15 }
 0x2b4   : > { %1997 = vperm.xlu1 %3450, %v3551_v54  }
 0x2b7   : > { %v5095_v22 = vpop.permute.xlu1 %1876  ;;  %v2499_v3 = vpop.permute.xlu0 %2498 }
 0x2b8   : > { %3451 = vset.pattern.permute.xlu1 %v6048_v42  ;;  %vm2504_vm10 = vcmp.eq.s32.totalorder %v2499_v3, %v4134_v19 }
 0x2b9   : > { %2014 = vperm.xlu1 %3451, %v5049_v4  }
 0x2bb   : > { %v2512_v2 = vpop.permute.xlu0 %2511 }
 0x2bc   : > { %v5100_v30 = vpop.permute.xlu1 %1900  ;;  %v5102_v33 = vsel %vm2504_vm10, %v2512_v2, 0.0 }
 0x2bd   : > { %6100 = vst [vmem:[#allocation33_spill] sm:$0xff] %v5102_v33  ;;  %2024 = vperm.xlu1 %3451, %v3551_v54   ;;  %vm1908_vm6 = vcmp.eq.s32.totalorder %v5100_v30, %v4134_v19  ;;  %v6162_v30 = vld [vmem:[#allocation55_spill] sm:$0xff] }
 0x2c0   : > { %v5104_v40 = vpop.permute.xlu0 %2538 }
 0x2c1   : > { %6101 = vst [vmem:[#allocation22_spill] sm:$0xff] %v5104_v40  ;;  %3454 = vset.pattern.permute.xlu1 %v6070_v58  ;;  %v5107_v36 = vpop.permute.xlu1 %1927  ;;  %v6124_v40 = vmov 54  }
 0x2c2   : > { %2041 = vperm.xlu1 %3454, %v5049_v4  }
 0x2c5   : > { %v5110_v24 = vpop.permute.xlu1 %1930  ;;  %v2580_v49 = vpop.permute.xlu0 %2579 }
 0x2c6   : > { %2051 = vperm.xlu1 %3454, %v3551_v54   ;;  %vm2585_vm11 = vcmp.eq.s32.totalorder %v2580_v49, %v4134_v19 }
 0x2c9   : > { %v2593_v3 = vpop.permute.xlu0 %2592 }
 0x2ca   : > { %3455 = vset.pattern.permute.xlu1 %v6076_v46  ;;  %v5114_v2 = vpop.permute.xlu1 %1957  ;;  %v5116_v14 = vsel %vm2585_vm11, %v2593_v3, 0.0  ;;  %vm1719_vm11 = vcmp.eq.s32.totalorder %v4985_v51, %v4134_v19 }
 0x2cb   : > { %6102 = vst [vmem:[#allocation17_spill] sm:$0xff] %v5116_v14  ;;  %2068 = vperm.xlu1 %3455, %v5049_v4   ;;  %v6121_v14 = vmov 53  }
 0x2ce   : > { %v5119_v58 = vpop.permute.xlu0 %2619 }
 0x2cf   : > { %6103 = vst [vmem:[#allocation26_spill] sm:$0xff] %v5119_v58  ;;  %2078 = vperm.xlu1 %3455, %v3551_v54   ;;  %v5121_v47 = vpop.permute.xlu1 %1981 }
 0x2d3   : > { %3456 = vset.pattern.permute.xlu1 %v6078_v39  ;;  %v2661_v52 = vpop.permute.xlu0 %2660 }
 0x2d4   : > { %2095 = vperm.xlu1 %3456, %v5049_v4   ;;  %v5125_v49 = vpop.permute.xlu1 %2008  ;;  %vm2666_vm12 = vcmp.eq.s32.totalorder %v2661_v52, %v4134_v19 }
 0x2d7   : > { %v2674_v31 = vpop.permute.xlu0 %2673 }
 0x2d8   : > { %2105 = vperm.xlu1 %3456, %v3551_v54   ;;  %v5128_v3 = vpop.permute.xlu1 %2011  ;;  %v5130_v48 = vsel %vm2666_vm12, %v2674_v31, 0.0  ;;  %vm1854_vm12 = vcmp.eq.s32.totalorder %v5085_v38, %v4134_v19 }
 0x2d9   : > { %6104 = vst [vmem:[#allocation37_spill] sm:$0xff] %v5130_v48 }
 0x2dc   : > { %3459 = vset.pattern.permute.xlu1 %v6081_v13  ;;  %v5133_v11 = vpop.permute.xlu0 %2306 }
 0x2dd   : > { %6105 = vst [vmem:[#allocation4_spill] sm:$0xff] %v5133_v11  ;;  %2122 = vperm.xlu1 %3459, %v5049_v4   ;;  %v5136_v61 = vpop.permute.xlu1 %2038  ;;  %v5161_v11 = vld [vmem:[%s3732_s20 + $0x8] sm:$0xff]  ;;  %s3645_s20 = smov 8  }
 0x2e0   : > { %v5138_v5 = vpop.permute.xlu0 %2322 }
 0x2e1   : > { %2132 = vperm.xlu1 %3459, %v3551_v54  }
 0x2e2   : > { %v2063_v8 = vpop.permute.xlu1 %2062 }
 0x2e3   : > { %vm2070_vm13 = vcmp.eq.s32.totalorder %v2063_v8, %v4134_v19 }
 0x2e4   : > { %v5141_v52 = vpop.permute.xlu0 %2326  ;;  %v2085_v13 = vsel %vm2070_vm13, %v4809_v18, 0.0  ;;  %vm2016_vm13 = vcmp.eq.s32.totalorder %v5125_v49, %v4134_v19  ;;  %v6163_v49 = vld [vmem:[#allocation58_spill] sm:$0xff] }
 0x2e5   : > { %6106 = vst [vmem:[#allocation13_spill] sm:$0xff] %v5141_v52  ;;  %3460 = vset.pattern.permute.xlu1 %v6107_v25  ;;  %v2160_v54 = vadd.f32 %v2085_v13, %v5003_v26  ;;  %v6112_v26 = vmov 50   ;;  %v6115_v13 = vmov 51   ;;  %v2031_v38 = vsel %vm2016_vm13, %v4741_v57, 0.0 }
 0x2e6   : > { %2252 = vperm.xlu1 %3460, %v5053_v59   ;;  %vm1882_vm13 = vcmp.eq.s32.totalorder %v5095_v22, %v4134_v19 }
 0x2e7   : > { %v2090_v31 = vpop.permute.xlu1 %2089 }
 0x2e8   : > { %vm2097_vm14 = vcmp.eq.s32.totalorder %v2090_v31, %v4134_v19 }
 0x2e9   : > { %v2112_v0 = vsel %vm2097_vm14, %v4853_v55, 0.0  ;;  %v5148_v50 = vpop.permute.xlu0 %2387  ;;  %vm1962_vm14 = vcmp.eq.s32.totalorder %v4966_v10, %v4134_v19 }
 0x2ea   : > { %6108 = vst [vmem:[#allocation50_spill] sm:$0xff] %v5148_v50  ;;  %v2163_v8 = vadd.f32 %v5023_v32, %v2112_v0  ;;  %3461 = vset.pattern.permute.xlu1 %v6109_v23  ;;  %v6117_v50 = vmov 52  }
 0x2eb   : > { %2279 = vperm.xlu1 %3461, %v5053_v59   ;;  %v5154_v52 = vpop.permute.xlu1 %2092 }
 0x2ec   : > { %v5156_v16 = vadd.f32 %v2163_v8, %v2160_v54 }
 0x2ed   : > { %v5158_v18 = vpop.permute.xlu0 %2403 }
 0x2ee   : > { %6110 = vst [vmem:[#allocation35_spill] sm:$0xff] %v5158_v18 }
 0x2ef   : > { %2282 = vperm.xlu1 %3461, %v5161_v11  }
 0x2f0   : > { %v5164_v55 = vpop.permute.xlu1 %2119 }
 0x2f1   : > { %v5166_v31 = vpop.permute.xlu0 %2407 }
 0x2f2   : > { %6111 = vst [vmem:[#allocation40_spill] sm:$0xff] %v5166_v31 }
 0x2f3   : > { %3462 = vset.pattern.permute.xlu1 %v6112_v26  ;;  %v6154_v26 = vld [vmem:[#allocation36_spill] sm:$0xff] }
 0x2f4   : > { %2309 = vperm.xlu1 %3462, %v5161_v11  }
 0x2f5   : > { %v5170_v32 = vpop.permute.xlu1 %1825 }
 0x2f6   : > { %6113 = vst [vmem:[#allocation34_spill] sm:$0xff] %v5170_v32  ;;  %v5172_v0 = vpop.permute.xlu0 %2468 }
 0x2f7   : > { %6114 = vst [vmem:[#allocation54_spill] sm:$0xff] %v5172_v0 }
 0x2f8   : > { %3463 = vset.pattern.permute.xlu1 %v6115_v13  ;;  %v6153_v13 = vld [vmem:[#allocation38_spill] sm:$0xff] }
 0x2f9   : > { %2333 = vperm.xlu1 %3463, %v5053_v59   ;;  %v5176_v54 = vpop.permute.xlu1 %1835 }
 0x2fa   : > { %v5178_v8 = vpop.permute.xlu0 %2484 }
 0x2fb   : > { %6116 = vst [vmem:[#allocation30_spill] sm:$0xff] %v5178_v8 }
 0x2fd   : > { %3464 = vset.pattern.permute.xlu1 %v6117_v50 }
 0x2fe   : > { %2360 = vperm.xlu1 %3464, %v5053_v59   ;;  %v5182_v31 = vpop.permute.xlu1 %1852  ;;  %v5184_v48 = vpop.permute.xlu0 %2488 }
 0x2ff   : > { %6118 = vst [vmem:[#allocation45_spill] sm:$0xff] %v5182_v31  ;;  %6119 = vst [vmem:[#allocation48_spill] sm:$0xff] %v5184_v48  ;;  %v6126_v48 = vmov 55  }
 0x302   : > { %2363 = vperm.xlu1 %3464, %v5161_v11   ;;  %v5187_v32 = vpop.permute.xlu1 %1862 }
 0x303   : > { %v5189_v0 = vpop.permute.xlu0 %2549 }
 0x304   : > { %6120 = vst [vmem:[#allocation32_spill] sm:$0xff] %v5189_v0 }
 0x306   : > { %3465 = vset.pattern.permute.xlu1 %v6121_v14 }
 0x307   : > { %2390 = vperm.xlu1 %3465, %v5161_v11   ;;  %v5193_v33 = vpop.permute.xlu1 %1879  ;;  %v5195_v58 = vpop.permute.xlu0 %2565 }
 0x308   : > { %6122 = vst [vmem:[#allocation52_spill] sm:$0xff] %v5193_v33  ;;  %6123 = vst [vmem:[#allocation56_spill] sm:$0xff] %v5195_v58 }
 0x30b   : > { %3466 = vset.pattern.permute.xlu1 %v6124_v40  ;;  %v5198_v8 = vpop.permute.xlu1 %1889  ;;  %v5200_v31 = vpop.permute.xlu0 %2569  ;;  %v6131_v40 = vmov 56  }
 0x30c   : > { %6125 = vst [vmem:[#allocation23_spill] sm:$0xff] %v5200_v31  ;;  %2414 = vperm.xlu1 %3466, %v5053_v59  }
 0x310   : > { %3467 = vset.pattern.permute.xlu1 %v6126_v48  ;;  %v5204_v50 = vpop.permute.xlu1 %1906  ;;  %v5206_v0 = vpop.permute.xlu0 %2630 }
 0x311   : > { %6127 = vst [vmem:[#allocation31_spill] sm:$0xff] %v5204_v50  ;;  %6128 = vst [vmem:[#allocation3_spill] sm:$0xff] %v5206_v0  ;;  %2441 = vperm.xlu1 %3467, %v5053_v59  }
 0x314   : > { %v5209_v14 = vpop.permute.xlu1 %1916  ;;  %v5211_v33 = vpop.permute.xlu0 %2646 }
 0x315   : > { %6129 = vst [vmem:[#allocation5_spill] sm:$0xff] %v5211_v33  ;;  %2444 = vperm.xlu1 %3467, %v5161_v11  }
 0x318   : > { %v5214_v58 = vpop.permute.xlu0 %2650 }
 0x319   : > { %6130 = vst [vmem:[#allocation61_spill] sm:$0xff] %v5214_v58  ;;  %3468 = vset.pattern.permute.xlu1 %v6131_v40  ;;  %v5217_v31 = vpop.permute.xlu1 %1933 }
 0x31a   : > { %6132 = vst [vmem:[#allocation62_spill] sm:$0xff] %v5217_v31  ;;  %2471 = vperm.xlu1 %3468, %v5161_v11   ;;  %v6135_v31 = vmov 58  }
 0x31c   : > { %v2733_v48 = vpop.permute.xlu0 %2732 }
 0x31d   : > { %v2742_v50 = vsel %vm1115_vm1, %v2733_v48, 0  ;;  %v5221_v0 = vpop.permute.xlu1 %1943  ;;  %3257 = vmatprep.subr.msk.bf16.mxu0 %vm1115_vm1, %v2733_v48  ;;  %v6137_v48 = vmov 59  }
 0x31e   : > { %3469 = vset.pattern.permute.xlu1 %v6133_v45  ;;  %3239 = vmatpush3.bf16.msra.mxu0 %v2742_v50  ;;  %v6138_v45 = vmov 60  }
 0x31f   : > { %2495 = vperm.xlu1 %3469, %v5053_v59  }
 0x320   : > { %v2731_v33 = vpop.permute.xlu0 %2730 }
 0x321   : > { %3240 = vmatprep.subr.bf16.mxu0 %v2731_v33 }
 0x322   : > { %v5226_v58 = vpop.permute.xlu1 %1960  ;;  %3241 = vmatpush3.bf16.msra.mxu0 %v2731_v33 }
 0x323   : > { %6134 = vst [vmem:[#allocation63_spill] sm:$0xff] %v5226_v58  ;;  %3470 = vset.pattern.permute.xlu1 %v6135_v31 }
 0x324   : > { %2522 = vperm.xlu1 %3470, %v5053_v59  }
 0x326   : > { %v5230_v40 = vpop.permute.xlu1 %1970 }
 0x328   : > { %2525 = vperm.xlu1 %3470, %v5161_v11  }
 0x32b   : > { %v5233_v15 = vpop.permute.xlu1 %1987 }
 0x32c   : > { %6136 = vst [vmem:[#allocation64_spill] sm:$0xff] %v5233_v15  ;;  %3471 = vset.pattern.permute.xlu1 %v6137_v48 }
 0x32d   : > { %2552 = vperm.xlu1 %3471, %v5161_v11  }
 0x32f   : > { %v5237_v50 = vpop.permute.xlu1 %1997 }
 0x331   : > { %3472 = vset.pattern.permute.xlu1 %v6138_v45 }
 0x332   : > { %2576 = vperm.xlu1 %3472, %v5053_v59   ;;  %v5241_v33 = vpop.f32.mrf.mxu0 }
 0x333   : > { %6139 = vst [vmem:[#allocation65_spill] sm:$0xff] %v5241_v33  ;;  %v6144_v33 = vmov 62  }
 0x334   : > { %v5243_v58 = vpop.permute.xlu1 %2014  ;;  %v5245_v31 = vpop.f32.mrf.mxu0 }
 0x335   : > { %6140 = vst [vmem:[#allocation66_spill] sm:$0xff] %v5243_v58  ;;  %6141 = vst [vmem:[#allocation67_spill] sm:$0xff] %v5245_v31  ;;  %v6145_v31 = vmov 63  }
 0x336   : > { %3473 = vset.pattern.permute.xlu1 %v6142_v27  ;;  %v3229_v15 = vpop.f32.mrf.mxu0  ;;  %v5265_v27 = vld [vmem:[%s3738_s23 + $0x10] sm:$0xf] }
 0x337   : > { %2603 = vperm.xlu1 %3473, %v5053_v59  }
 0x338   : > { %v5249_v48 = vpop.permute.xlu1 %2024  ;;  %v1699_v18 = vpop.f32.mrf.mxu0 }
 0x339   : > { %2800 = vrot.lane.b32.xlu0 %v1699_v18, %s3645_s20 }
 0x33b   : > { %2606 = vperm.xlu1 %3473, %v5161_v11  }
 0x33d   : > { %v5253_v45 = vpop.permute.xlu1 %2041 }
 0x33e   : > { %6143 = vst [vmem:[#allocation68_spill] sm:$0xff] %v5253_v45  ;;  %v6147_v45 = vld [vmem:[#allocation27_spill] sm:$0xff] }
 0x33f   : > { %3474 = vset.pattern.permute.xlu1 %v6144_v33  ;;  %vm1720_vm15 = vcmp.eq.s32.totalorder %v6147_v45, %v4134_v19  ;;  %v6152_v45 = vld [vmem:[#allocation25_spill] sm:$0xff] }
 0x340   : > { %2633 = vperm.xlu1 %3474, %v5161_v11   ;;  %v6148_v11 = vld [vmem:[#allocation21_spill] sm:$0xff] }
 0x341   : > { %v5257_v58 = vpop.permute.xlu1 %2051  ;;  %vm1746_vm2 = vcmp.eq.s32.totalorder %v6148_v11, %v4134_v19 }
 0x342   : > { %v1761_v33 = vsel %vm1746_vm2, %v6152_v45, 0.0  ;;  %vm1827_vm2 = vcmp.eq.s32.totalorder %v5082_v41, %v4134_v19 }
 0x344   : > { %3475 = vset.pattern.permute.xlu1 %v6145_v31  ;;  %v6149_v31 = vld [vmem:[#allocation29_spill] sm:$0xff] }
 0x345   : > { %2657 = vperm.xlu1 %3475, %v5053_v59   ;;  %vm1774_vm3 = vcmp.eq.s32.totalorder %v6149_v31, %v4134_v19  ;;  %v6150_v59 = vld [vmem:[#allocation42_spill] sm:$0xff]  ;;  %v6155_v31 = vld [vmem:[#allocation51_spill] sm:$0xff] }
 0x346   : > { %v5261_v15 = vpop.permute.xlu1 %2068  ;;  %vm1800_vm4 = vcmp.eq.s32.totalorder %v6150_v59, %v4134_v19  ;;  %v1789_v11 = vsel %vm1774_vm3, %v6153_v13, 0.0  ;;  %vm1909_vm7 = vcmp.eq.s32.totalorder %v6155_v31, %v4134_v19  ;;  %v6159_v13 = vld [vmem:[#allocation53_spill] sm:$0xff]  ;;  %vm1935_vm3 = vcmp.eq.s32.totalorder %v5107_v36, %v4134_v19 }
 0x347   : > { %6146 = vst [vmem:[#allocation69_spill] sm:$0xff] %v5261_v15  ;;  %v1815_v23 = vsel %vm1800_vm4, %v6154_v26, 0.0  ;;  %v1734_v26 = vsel %vm1719_vm11, %v4999_v34, 0.0  ;;  %v1923_v51 = vsel %vm1908_vm6, %v6159_v13, 0.0  ;;  %vm1989_vm4 = vcmp.eq.s32.totalorder %v5121_v47, %v4134_v19  ;;  %v6160_v34 = vld [vmem:[#allocation49_spill] sm:$0xff] }
 0x348   : > { %vm1801_vm11 = vcmp.eq.s32.totalorder %v5062_v53, %v4134_v19  ;;  %vm2071_vm6 = vcmp.eq.s32.totalorder %v4776_v37, %v4134_v19  ;;  %v6161_v53 = vld [vmem:[#allocation47_spill] sm:$0xff]  ;;  %v2004_v45 = vsel %vm1989_vm4, %v6163_v49, 0.0  ;;  %v2142_v13 = vadd.f32 %v1761_v33, %v1734_v26 }
 0x349   : > { %3476 = vset.pattern.permute.xlu1 %v6082_v28  ;;  %v6151_v28 = vld [vmem:[#allocation20_spill] sm:$0xff]  ;;  %v1816_v47 = vsel %vm1801_vm11, %v5075_v43, 0.0  ;;  %v1842_v57 = vsel %vm1827_vm2, %v6161_v53, 0.0  ;;  %v1924_v10 = vsel %vm1909_vm7, %v5209_v14, 0.0  ;;  %v1897_v33 = vsel %vm1882_vm13, %v5198_v8, 0.0  ;;  %v6168_v49 = vld [vmem:[#allocation35_spill] sm:$0xff] }
 0x34a   : > { %1839 = vperm.xlu1 %3476, %v5265_v27   ;;  %v5268_v18 = vpop.permute.xlu1 %2078  ;;  %v1735_v15 = vsel %vm1720_vm15, %v6151_v28, 0.0  ;;  %v6158_v28 = vld [vmem:[#allocation57_spill] sm:$0xff]  ;;  %vm1747_vm15 = vcmp.eq.s32.totalorder %v5014_v56, %v4134_v19  ;;  %v1869_v56 = vsel %vm1854_vm12, %v6160_v34, 0.0  ;;  %v2146_v43 = vadd.f32 %v1816_v47, %v1789_v11  ;;  %v6164_v47 = vld [vmem:[#allocation15_spill] sm:$0xff] }
 0x34b   : > { %vm1990_vm10 = vcmp.eq.s32.totalorder %v6158_v28, %v4134_v19  ;;  %vm1855_vm12 = vcmp.eq.s32.totalorder %v5091_v1, %v4134_v19  ;;  %vm1963_vm7 = vcmp.eq.s32.totalorder %v5114_v2, %v4134_v19  ;;  %vm2044_vm2 = vcmp.eq.s32.totalorder %v5136_v61, %v4134_v19 }
 0x34c   : > { %v1870_v1 = vsel %vm1855_vm12, %v5187_v32, 0.0  ;;  %v1978_v32 = vsel %vm1963_vm7, %v5230_v40, 0.0  ;;  %v2005_v8 = vsel %vm1990_vm10, %v5237_v50, 0.0  ;;  %v2086_v2 = vsel %vm2071_vm6, %v5268_v18, 0.0 }
 0x34d   : > { %vm2125_vm4 = vcmp.eq.s32.totalorder %v5164_v55, %v4134_v19  ;;  %v2059_v50 = vsel %vm2044_vm2, %v5257_v58, 0.0  ;;  %v6165_v53 = vmov 49  }
 0x34e   : > { %3477 = vset.pattern.permute.xlu1 %v6086_v62  ;;  %v1896_v62 = vsel %vm1881_vm5, %v4922_v63, 0.0  ;;  %v1762_v63 = vsel %vm1747_vm15, %v5025_v20, 0.0  ;;  %vm1773_vm5 = vcmp.eq.s32.totalorder %v5033_v7, %v4134_v19  ;;  %v1977_v7 = vsel %vm1962_vm14, %v4980_v44, 0.0 }
 0x34f   : > { %1866 = vperm.xlu1 %3477, %v5265_v27   ;;  %v5290_v59 = vpop.permute.xlu1 %2095  ;;  %v1788_v36 = vsel %vm1773_vm5, %v5044_v29, 0.0  ;;  %v2151_v41 = vadd.f32 %v1923_v51, %v1896_v62  ;;  %v2143_v34 = vadd.f32 %v1762_v63, %v1735_v15  ;;  %v2157_v29 = vadd.f32 %v2031_v38, %v2004_v45 }
 0x350   : > { %6156 = vst [vmem:[#allocation27_spill] sm:$0xff] %v5290_v59  ;;  %v2148_v59 = vadd.f32 %v1869_v56, %v1842_v57  ;;  %v2145_v4 = vadd.f32 %v1815_v23, %v1788_v36  ;;  %vm2017_vm14 = vcmp.eq.s32.totalorder %v5128_v3, %v4134_v19  ;;  %vm1936_vm15 = vcmp.eq.s32.totalorder %v5110_v24, %v4134_v19 }
 0x351   : > { %v2032_v14 = vsel %vm2017_vm14, %v5249_v48, 0.0  ;;  %v1843_v3 = vsel %vm1828_vm9, %v5176_v54, 0.0  ;;  %v1951_v40 = vsel %vm1936_vm15, %v5221_v0, 0.0 }
 0x352   : > { %v2169_v44 = vadd.f32 %v2151_v41, %v2148_v59  ;;  %v2149_v61 = vadd.f32 %v1870_v1, %v1843_v3  ;;  %v2158_v54 = vadd.f32 %v2032_v14, %v2005_v8  ;;  %v2155_v18 = vadd.f32 %v1978_v32, %v1951_v40 }
 0x353   : > { %3479 = vset.pattern.permute.xlu1 %v6091_v35  ;;  %v2106_v20 = vpop.permute.xlu1 %2105  ;;  %v1950_v35 = vsel %vm1935_vm3, %v6162_v30, 0.0  ;;  %vm2098_vm3 = vcmp.eq.s32.totalorder %v5154_v52, %v4134_v19  ;;  %v2161_v52 = vadd.f32 %v2086_v2, %v2059_v50  ;;  %v2166_v55 = vadd.f32 %v2145_v4, %v2142_v13 }
 0x354   : > { %1920 = vperm.xlu1 %3479, %v5265_v27   ;;  %v2154_v62 = vadd.f32 %v1977_v7, %v1950_v35  ;;  %v2113_v15 = vsel %vm2098_vm3, %v2106_v20, 0.0  ;;  %v2167_v59 = vadd.f32 %v2146_v43, %v2143_v34  ;;  %v2173_v28 = vadd.f32 %v2158_v54, %v2155_v18  ;;  %v6169_v34 = vld [vmem:[#allocation11_spill] sm:$0xff]  ;;  %v6170_v43 = vld [vmem:[#allocation14_spill] sm:$0xff] }
 0x355   : > { %v2178_v0 = vadd.f32 %v2169_v44, %v2166_v55  ;;  %v6167_v30 = vmov 51   ;;  %v6172_v14 = vmov 52   ;;  %v6173_v32 = vmov 53   ;;  %v6179_v55 = vld [vmem:[#allocation22_spill] sm:$0xff] }
 0x356   : > { %v2172_v22 = vadd.f32 %v2157_v29, %v2154_v62  ;;  %v6171_v62 = vld [vmem:[#allocation28_spill] sm:$0xff]  ;;  %v6175_v40 = vmov 55   ;;  %v6177_v18 = vmov 56  }
 0x358   : > { %3480 = vset.pattern.permute.xlu1 %v6036_v6  ;;  %v5349_v23 = vpop.permute.xlu1 %2122  ;;  %v2152_v6 = vadd.f32 %v1924_v10, %v1897_v33  ;;  %v2181_v12 = vadd.f32 %v5156_v16, %v2172_v22 }
 0x359   : > { %1947 = vperm.xlu1 %3480, %v5265_v27  }
 0x35a   : > { %v2170_v37 = vadd.f32 %v2152_v6, %v2149_v61  ;;  %v2184_v63 = vadd.f32 %v2181_v12, %v2178_v0  ;;  %v6174_v61 = vmov 54   ;;  %v6180_v12 = vld [vmem:[#allocation26_spill] sm:$0xff] }
 0x35c   : > { %v2133_v48 = vpop.permute.xlu1 %2132  ;;  %v2179_v58 = vadd.f32 %v2170_v37, %v2167_v59 }
 0x35d   : > { %v2140_v11 = vsel %vm2125_vm4, %v2133_v48, 0.0  ;;  %3482 = vset.pattern.permute.xlu1 %v6041_v9 }
 0x35e   : > { %v2164_v31 = vadd.f32 %v2140_v11, %v2113_v15  ;;  %2001 = vperm.xlu1 %3482, %v5265_v27   ;;  %v6176_v11 = vld [vmem:[#allocation56_spill] sm:$0xff] }
 0x360   : > { %v2176_v26 = vadd.f32 %v2164_v31, %v2161_v52  ;;  %v6178_v52 = vld [vmem:[#allocation30_spill] sm:$0xff] }
 0x361   : > { %v5386_v24 = vpop.permute.xlu1 %2252 }
 0x362   : > { %v2182_v51 = vadd.f32 %v2176_v26, %v2173_v28  ;;  %3483 = vset.pattern.permute.xlu1 %v6048_v42  ;;  %vm2260_vm4 = vcmp.eq.s32.totalorder %v5386_v24, %v4134_v19 }
 0x363   : > { %2028 = vperm.xlu1 %3483, %v5265_v27  }
 0x364   : > { %v2185_v9 = vadd.f32 %v2182_v51, %v2179_v58  ;;  %v6181_v58 = vld [vmem:[#allocation5_spill] sm:$0xff] }
 0x366   : > { %v5390_v56 = vpop.permute.xlu1 %2279  ;;  %v2187_v38 = vpack.c.bf16 %v2185_v9, %v2184_v63  ;;  %v6182_v9 = vld [vmem:[#allocation33_spill] sm:$0xff] }
 0x367   : > { %3485 = vset.pattern.permute.xlu1 %v6076_v46  ;;  %vm2287_vm3 = vcmp.eq.s32.totalorder %v5390_v56, %v4134_v19 }
 0x368   : > { %2082 = vperm.xlu1 %3485, %v5265_v27   ;;  %3234 = vmatprep.mubr.msk.bf16.mxu1 %vm1108_vm8, %v2187_v38  ;;  %v6183_v38 = vld [vmem:[#allocation17_spill] sm:$0xff] }
 0x36a   : > { %v2283_v4 = vpop.permute.xlu1 %2282 }
 0x36b   : > { %vm2288_vm9 = vcmp.eq.s32.totalorder %v2283_v4, %v4134_v19 }
 0x36c   : > { %3486 = vset.pattern.permute.xlu1 %v6078_v39  ;;  %v2303_v42 = vsel %vm2288_vm9, %v5056_v60, 0.0  ;;  %v5408_v39 = vld [vmem:[%s3738_s23] sm:$0xff]  ;;  %s512_s23 = scalar_lea.vmem %s5781_s10, %s3726_s17 }
 0x36d   : > { %2109 = vperm.xlu1 %3486, %v5265_v27   ;;  %v2684_v46 = vadd.f32 %v2303_v42, %v5042_v21  ;;  %v6184_v42 = vld [vmem:[#allocation37_spill] sm:$0xff] }
 0x36f   : > { %v2310_v16 = vpop.permute.xlu1 %2309 }
 0x370   : > { %vm2315_vm10 = vcmp.eq.s32.totalorder %v2310_v16, %v4134_v19 }
 0x371   : > { %v2330_v20 = vsel %vm2315_vm10, %v5138_v5, 0.0  ;;  %3488 = vset.pattern.permute.xlu1 %v6107_v25 }
 0x372   : > { %v2687_v36 = vadd.f32 %v5070_v17, %v2330_v20  ;;  %2258 = vperm.xlu1 %3488, %v6164_v47   ;;  %v6166_v17 = vmov 50  }
 0x374   : > { %v2708_v41 = vadd.f32 %v2687_v36, %v2684_v46  ;;  %v5405_v7 = vpop.permute.xlu1 %2333 }
 0x375   : > { %vm2341_vm9 = vcmp.eq.s32.totalorder %v5405_v7, %v4134_v19 }
 0x376   : > { %2264 = vperm.xlu1 %3488, %v5408_v39  }
 0x379   : > { %v5411_v60 = vpop.permute.xlu1 %2360 }
 0x37a   : > { %3489 = vset.pattern.permute.xlu1 %v6165_v53 }
 0x37b   : > { %2285 = vperm.xlu1 %3489, %v6164_v47  }
 0x37d   : > { %v2364_v5 = vpop.permute.xlu1 %2363 }
 0x37e   : > { %vm2369_vm11 = vcmp.eq.s32.totalorder %v2364_v5, %v4134_v19  ;;  %v6185_v5 = vmov 57  }
 0x37f   : > { %2291 = vperm.xlu1 %3489, %v5408_v39   ;;  %v2384_v29 = vsel %vm2369_vm11, %v6169_v34, 0.0  ;;  %v6187_v34 = vmov 59  }
 0x382   : > { %v2391_v21 = vpop.permute.xlu1 %2390 }
 0x383   : > { %3492 = vset.pattern.permute.xlu1 %v6166_v17  ;;  %vm2396_vm5 = vcmp.eq.s32.totalorder %v2391_v21, %v4134_v19 }
 0x384   : > { %2312 = vperm.xlu1 %3492, %v6164_v47   ;;  %v2411_v45 = vsel %vm2396_vm5, %v6168_v49, 0.0  ;;  %vm2368_vm5 = vcmp.eq.s32.totalorder %v5411_v60, %v4134_v19 }
 0x385   : > { %v2690_v44 = vadd.f32 %v2411_v45, %v2384_v29  ;;  %v6186_v45 = vmov 58  }
 0x387   : > { %v5418_v57 = vpop.permute.xlu1 %2414 }
 0x388   : > { %2318 = vperm.xlu1 %3492, %v5408_v39   ;;  %vm2422_vm11 = vcmp.eq.s32.totalorder %v5418_v57, %v4134_v19  ;;  %v6195_v57 = vld [vmem:[#allocation9_spill] sm:$0xff] }
 0x38c   : > { %3493 = vset.pattern.permute.xlu1 %v6167_v30  ;;  %v5422_v35 = vpop.permute.xlu1 %2441 }
 0x38d   : > { %2339 = vperm.xlu1 %3493, %v6164_v47  }
 0x390   : > { %v2445_v13 = vpop.permute.xlu1 %2444 }
 0x391   : > { %vm2450_vm6 = vcmp.eq.s32.totalorder %v2445_v13, %v4134_v19  ;;  %2345 = vperm.xlu1 %3493, %v5408_v39  }
 0x392   : > { %v2465_v10 = vsel %vm2450_vm6, %v6170_v43, 0.0  ;;  %vm2449_vm6 = vcmp.eq.s32.totalorder %v5422_v35, %v4134_v19  ;;  %v6196_v35 = vld [vmem:[#allocation67_spill] sm:$0xff] }
 0x393   : > { %v2693_v1 = vadd.f32 %v2465_v10, %v6171_v62  ;;  %v6188_v10 = vmov 60  }
 0x395   : > { %v2711_v33 = vadd.f32 %v2693_v1, %v2690_v44  ;;  %3494 = vset.pattern.permute.xlu1 %v6172_v14  ;;  %v2472_v22 = vpop.permute.xlu1 %2471  ;;  %v6189_v1 = vmov 61  }
 0x396   : > { %2366 = vperm.xlu1 %3494, %v6164_v47   ;;  %vm2477_vm13 = vcmp.eq.s32.totalorder %v2472_v22, %v4134_v19 }
 0x397   : > { %v2720_v6 = vadd.f32 %v2711_v33, %v2708_v41  ;;  %v2492_v31 = vsel %vm2477_vm13, %v6178_v52, 0.0 }
 0x398   : > { %v2696_v63 = vadd.f32 %v6182_v9, %v2492_v31 }
 0x39a   : > { %2372 = vperm.xlu1 %3494, %v5408_v39   ;;  %v5436_v3 = vpop.permute.xlu1 %2495 }
 0x39e   : > { %3497 = vset.pattern.permute.xlu1 %v6173_v32 }
 0x39f   : > { %2393 = vperm.xlu1 %3497, %v6164_v47   ;;  %v5440_v8 = vpop.permute.xlu1 %2522 }
 0x3a3   : > { %2399 = vperm.xlu1 %3497, %v5408_v39   ;;  %v2526_v2 = vpop.permute.xlu1 %2525 }
 0x3a4   : > { %vm2531_vm14 = vcmp.eq.s32.totalorder %v2526_v2, %v4134_v19 }
 0x3a5   : > { %v2546_v59 = vsel %vm2531_vm14, %v6179_v55, 0.0  ;;  %vm2503_vm14 = vcmp.eq.s32.totalorder %v5436_v3, %v4134_v19 }
 0x3a7   : > { %3498 = vset.pattern.permute.xlu1 %v6174_v61 }
 0x3a8   : > { %2420 = vperm.xlu1 %3498, %v6164_v47   ;;  %v2553_v54 = vpop.permute.xlu1 %2552 }
 0x3a9   : > { %vm2558_vm12 = vcmp.eq.s32.totalorder %v2553_v54, %v4134_v19  ;;  %v6191_v54 = vmov 63  }
 0x3aa   : > { %v2573_v37 = vsel %vm2558_vm12, %v6176_v11, 0.0 }
 0x3ab   : > { %v2699_v0 = vadd.f32 %v2573_v37, %v2546_v59  ;;  %v6192_v37 = vld [vmem:[#allocation4_spill] sm:$0xff] }
 0x3ac   : > { %2426 = vperm.xlu1 %3498, %v5408_v39   ;;  %vm2314_vm2 = vcmp.eq.s32.totalorder %v6192_v37, %v4134_v19 }
 0x3ad   : > { %v5446_v48 = vpop.permute.xlu1 %2576  ;;  %v2714_v20 = vadd.f32 %v2699_v0, %v2696_v63 }
 0x3b0   : > { %3499 = vset.pattern.permute.xlu1 %v6175_v40 }
 0x3b1   : > { %2447 = vperm.xlu1 %3499, %v6164_v47  }
 0x3b2   : > { %v5450_v50 = vpop.permute.xlu1 %2603 }
 0x3b5   : > { %2453 = vperm.xlu1 %3499, %v5408_v39  }
 0x3b6   : > { %v2607_v15 = vpop.permute.xlu1 %2606 }
 0x3b7   : > { %vm2612_vm15 = vcmp.eq.s32.totalorder %v2607_v15, %v4134_v19 }
 0x3b8   : > { %v2627_v28 = vsel %vm2612_vm15, %v6180_v12, 0.0  ;;  %vm2530_vm15 = vcmp.eq.s32.totalorder %v5440_v8, %v4134_v19  ;;  %v6200_v8 = vld [vmem:[#allocation3_spill] sm:$0xff] }
 0x3b9   : > { %3502 = vset.pattern.permute.xlu1 %v6177_v18  ;;  %v2702_v4 = vadd.f32 %v2627_v28, %v6183_v38 }
 0x3ba   : > { %2474 = vperm.xlu1 %3502, %v6164_v47  }
 0x3bb   : > { %v2634_v26 = vpop.permute.xlu1 %2633 }
 0x3bc   : > { %vm2639_vm7 = vcmp.eq.s32.totalorder %v2634_v26, %v4134_v19 }
 0x3bd   : > { %v2654_v51 = vsel %vm2639_vm7, %v6181_v58, 0.0  ;;  %vm2638_vm7 = vcmp.eq.s32.totalorder %v6200_v8, %v4134_v19  ;;  %v6208_v8 = vld [vmem:[#allocation52_spill] sm:$0xff] }
 0x3be   : > { %v2705_v16 = vadd.f32 %v6184_v42, %v2654_v51  ;;  %2480 = vperm.xlu1 %3502, %v5408_v39  }
 0x3c0   : > { %v2717_v46 = vadd.f32 %v2705_v16, %v2702_v4  ;;  %v5469_v36 = vpop.permute.xlu1 %2657  ;;  %v6194_v16 = vld [vmem:[#allocation7_spill] sm:$0xff] }
 0x3c2   : > { %v2723_v41 = vadd.f32 %v2717_v46, %v2714_v20  ;;  %3503 = vset.pattern.permute.xlu1 %v6185_v5 }
 0x3c3   : > { %2501 = vperm.xlu1 %3503, %v6164_v47  }
 0x3c4   : > { %v5473_v21 = vadd.f32 %v2723_v41, %v2720_v6  ;;  %v6190_v6 = vmov 62  }
 0x3c5   : > { %v5475_v17 = vpop.permute.xlu1 %1839 }
 0x3c7   : > { %2507 = vperm.xlu1 %3503, %v5408_v39  }
 0x3ca   : > { %v5478_v49 = vpop.permute.xlu1 %1866 }
 0x3cb   : > { %3504 = vset.pattern.permute.xlu1 %v6186_v45 }
 0x3cc   : > { %2528 = vperm.xlu1 %3504, %v6164_v47  }
 0x3cf   : > { %v5482_v13 = vpop.permute.xlu1 %1920 }
 0x3d0   : > { %2534 = vperm.xlu1 %3504, %v5408_v39  }
 0x3d4   : > { %3507 = vset.pattern.permute.xlu1 %v6187_v34  ;;  %v5486_v29 = vpop.permute.xlu1 %1947 }
 0x3d5   : > { %2555 = vperm.xlu1 %3507, %v6164_v47  }
 0x3d9   : > { %2561 = vperm.xlu1 %3507, %v5408_v39   ;;  %v5490_v43 = vpop.permute.xlu1 %2001 }
 0x3dd   : > { %3508 = vset.pattern.permute.xlu1 %v6188_v10 }
 0x3de   : > { %2582 = vperm.xlu1 %3508, %v6164_v47   ;;  %v5494_v44 = vpop.permute.xlu1 %2028 }
 0x3e2   : > { %2588 = vperm.xlu1 %3508, %v5408_v39  }
 0x3e3   : > { %v5497_v62 = vpop.permute.xlu1 %2082 }
 0x3e6   : > { %3509 = vset.pattern.permute.xlu1 %v6189_v1 }
 0x3e7   : > { %2609 = vperm.xlu1 %3509, %v6164_v47  }
 0x3e8   : > { %v5501_v33 = vpop.permute.xlu1 %2109 }
 0x3eb   : > { %2615 = vperm.xlu1 %3509, %v5408_v39  }
 0x3ed   : > { %v5504_v22 = vpop.permute.xlu1 %2258 }
 0x3ef   : > { %3512 = vset.pattern.permute.xlu1 %v6190_v6 }
 0x3f0   : > { %2636 = vperm.xlu1 %3512, %v6164_v47  }
 0x3f1   : > { %v2265_v32 = vpop.permute.xlu1 %2264 }
 0x3f4   : > { %2642 = vperm.xlu1 %3512, %v5408_v39  }
 0x3f6   : > { %v5509_v2 = vpop.permute.xlu1 %2285 }
 0x3f8   : > { %3513 = vset.pattern.permute.xlu1 %v6191_v54 }
 0x3f9   : > { %2663 = vperm.xlu1 %3513, %v6164_v47  }
 0x3fa   : > { %v2292_v15 = vpop.permute.xlu1 %2291 }
 0x3fb   : > { %v2302_v47 = vsel %vm2287_vm3, %v2292_v15, 0.0  ;;  %vm2584_vm3 = vcmp.eq.s32.totalorder %v5446_v48, %v4134_v19 }
 0x3fd   : > { %2669 = vperm.xlu1 %3513, %v5408_v39   ;;  %v2275_v39 = vsel %vm2260_vm4, %v2265_v32, 0.0  ;;  %vm2665_vm4 = vcmp.eq.s32.totalorder %v5469_v36, %v4134_v19  ;;  %v6201_v36 = vld [vmem:[#allocation13_spill] sm:$0xff] }
 0x3fe   : > { %v2683_v55 = vadd.f32 %v2302_v47, %v2275_v39 }
 0x3ff   : > { %v5514_v11 = vpop.permute.xlu1 %2312 }
 0x401   : > { %3515 = vset.pattern.permute.xlu1 %v6107_v25 }
 0x402   : > { %2272 = vperm.xlu1 %3515, %v5265_v27  }
 0x403   : > { %v2319_v18 = vpop.permute.xlu1 %2318 }
 0x404   : > { %v2329_v52 = vsel %vm2314_vm2, %v2319_v18, 0.0  ;;  %vm2611_vm2 = vcmp.eq.s32.totalorder %v5450_v50, %v4134_v19 }
 0x406   : > { %3516 = vset.pattern.permute.xlu1 %v6165_v53 }
 0x407   : > { %2299 = vperm.xlu1 %3516, %v5265_v27  }
 0x408   : > { %v5522_v31 = vpop.permute.xlu1 %2339 }
 0x40b   : > { %3518 = vset.pattern.permute.xlu1 %v6167_v30  ;;  %v6193_v30 = vld [vmem:[#allocation50_spill] sm:$0xff] }
 0x40c   : > { %2353 = vperm.xlu1 %3518, %v5265_v27   ;;  %v2346_v25 = vpop.permute.xlu1 %2345  ;;  %vm2395_vm10 = vcmp.eq.s32.totalorder %v6193_v30, %v4134_v19 }
 0x40d   : > { %v2356_v53 = vsel %vm2341_vm9, %v2346_v25, 0.0  ;;  %vm2316_vm9 = vcmp.eq.s32.totalorder %v5514_v11, %v4134_v19 }
 0x40e   : > { %v2686_v59 = vadd.f32 %v2356_v53, %v2329_v52 }
 0x410   : > { %v2707_v12 = vadd.f32 %v2686_v59, %v2683_v55  ;;  %3519 = vset.pattern.permute.xlu1 %v6172_v14 }
 0x411   : > { %2380 = vperm.xlu1 %3519, %v5265_v27   ;;  %v5534_v56 = vpop.permute.xlu1 %2366 }
 0x415   : > { %3521 = vset.pattern.permute.xlu1 %v6174_v61  ;;  %v2373_v24 = vpop.permute.xlu1 %2372 }
 0x416   : > { %2434 = vperm.xlu1 %3521, %v5265_v27   ;;  %v2383_v28 = vsel %vm2368_vm5, %v2373_v24, 0.0 }
 0x41a   : > { %3522 = vset.pattern.permute.xlu1 %v6175_v40  ;;  %v5539_v7 = vpop.permute.xlu1 %2393 }
 0x41b   : > { %2461 = vperm.xlu1 %3522, %v5265_v27   ;;  %vm2397_vm5 = vcmp.eq.s32.totalorder %v5539_v7, %v4134_v19 }
 0x41e   : > { %v2400_v14 = vpop.permute.xlu1 %2399 }
 0x41f   : > { %v2410_v26 = vsel %vm2395_vm10, %v2400_v14, 0.0  ;;  %3524 = vset.pattern.permute.xlu1 %v6185_v5  ;;  %v6197_v5 = vld [vmem:[#allocation65_spill] sm:$0xff]  ;;  %vm2343_vm10 = vcmp.eq.s32.totalorder %v5522_v31, %v4134_v19 }
 0x420   : > { %v2689_v61 = vadd.f32 %v2410_v26, %v2383_v28  ;;  %2515 = vperm.xlu1 %3524, %v5265_v27  }
 0x423   : > { %v5548_v0 = vpop.permute.xlu1 %2420 }
 0x424   : > { %3525 = vset.pattern.permute.xlu1 %v6186_v45 }
 0x425   : > { %2542 = vperm.xlu1 %3525, %v5265_v27  }
 0x427   : > { %v2427_v40 = vpop.permute.xlu1 %2426 }
 0x428   : > { %v2437_v51 = vsel %vm2422_vm11, %v2427_v40, 0.0  ;;  %vm2370_vm11 = vcmp.eq.s32.totalorder %v5534_v56, %v4134_v19 }
 0x429   : > { %3527 = vset.pattern.permute.xlu1 %v6188_v10  ;;  %v6198_v10 = vld [vmem:[#allocation54_spill] sm:$0xff] }
 0x42a   : > { %2596 = vperm.xlu1 %3527, %v5265_v27   ;;  %vm2476_vm12 = vcmp.eq.s32.totalorder %v6198_v10, %v4134_v19 }
 0x42c   : > { %v5554_v60 = vpop.permute.xlu1 %2447 }
 0x42e   : > { %3528 = vset.pattern.permute.xlu1 %v6189_v1  ;;  %v6199_v1 = vld [vmem:[#allocation32_spill] sm:$0xff] }
 0x42f   : > { %2623 = vperm.xlu1 %3528, %v5265_v27   ;;  %vm2557_vm13 = vcmp.eq.s32.totalorder %v6199_v1, %v4134_v19 }
 0x430   : > { %v2454_v58 = vpop.permute.xlu1 %2453 }
 0x431   : > { %v2464_v9 = vsel %vm2449_vm6, %v2454_v58, 0.0  ;;  %vm2289_vm6 = vcmp.eq.s32.totalorder %v5509_v2, %v4134_v19 }
 0x432   : > { %v2692_v63 = vadd.f32 %v2464_v9, %v2437_v51 }
 0x433   : > { %3529 = vset.pattern.permute.xlu1 %v6191_v54 }
 0x434   : > { %v2710_v38 = vadd.f32 %v2692_v63, %v2689_v61  ;;  %2677 = vperm.xlu1 %3529, %v5265_v27  }
 0x435   : > { %v5564_v4 = vpop.permute.xlu1 %2474 }
 0x436   : > { %v2719_v42 = vadd.f32 %v2710_v38, %v2707_v12 }
 0x438   : > { %2191 = vrot.lane.b32.xlu1 %v6194_v16, %s3646_s21  ;;  %v2331_v16 = vsel %vm2316_vm9, %v6201_v36, 0.0  ;;  %v6219_v36 = vld [vmem:[#allocation62_spill] sm:$0xff] }
 0x439   : > { %v2481_v20 = vpop.permute.xlu1 %2480 }
 0x43a   : > { %v2491_v54 = vsel %vm2476_vm12, %v2481_v20, 0.0  ;;  %vm2424_vm12 = vcmp.eq.s32.totalorder %v5548_v0, %v4134_v19 }
 0x43c   : > { %2189 = vrot.lane.b32.xlu1 %v6195_v57, %s3646_s21 }
 0x43e   : > { %v5568_v46 = vpop.permute.xlu1 %2501 }
 0x440   : > { %2798 = vrot.lane.b32.xlu1 %v6196_v35, %s3645_s20 }
 0x442   : > { %v2508_v41 = vpop.permute.xlu1 %2507 }
 0x443   : > { %v2518_v6 = vsel %vm2503_vm14, %v2508_v41, 0.0  ;;  %vm2262_vm14 = vcmp.eq.s32.totalorder %v5504_v22, %v4134_v19 }
 0x444   : > { %2802 = vrot.lane.b32.xlu1 %v6197_v5, %s3645_s20  ;;  %v2695_v18 = vadd.f32 %v2518_v6, %v2491_v54  ;;  %v6203_v54 = vld [vmem:[#allocation48_spill] sm:$0xff] }
 0x447   : > { %v5574_v45 = vpop.permute.xlu1 %2528 }
 0x44b   : > { %v2535_v27 = vpop.permute.xlu1 %2534 }
 0x44c   : > { %v2545_v15 = vsel %vm2530_vm15, %v2535_v27, 0.0  ;;  %vm2478_vm15 = vcmp.eq.s32.totalorder %v5564_v4, %v4134_v19  ;;  %v6204_v4 = vld [vmem:[#allocation10_spill] sm:$0xff] }
 0x450   : > { %v5576_v34 = vpop.permute.xlu1 %2555 }
 0x454   : > { %v2562_v32 = vpop.permute.xlu1 %2561 }
 0x455   : > { %v2572_v37 = vsel %vm2557_vm13, %v2562_v32, 0.0  ;;  %vm2451_vm13 = vcmp.eq.s32.totalorder %v5554_v60, %v4134_v19  ;;  %v2493_v60 = vsel %vm2478_vm15, %v6203_v54, 0.0  ;;  %vm2126_vm15 = vcmp.eq.s32.totalorder %v5349_v23, %v4134_v19  ;;  %v6224_v23 = vld [vmem:[#allocation69_spill] sm:$0xff] }
 0x456   : > { %v2698_v52 = vadd.f32 %v2572_v37, %v2545_v15 }
 0x458   : > { %v2713_v47 = vadd.f32 %v2698_v52, %v2695_v18  ;;  %v6205_v52 = vld [vmem:[#allocation23_spill] sm:$0xff] }
 0x459   : > { %v5586_v25 = vpop.permute.xlu1 %2582 }
 0x45d   : > { %v2589_v39 = vpop.permute.xlu1 %2588 }
 0x45e   : > { %v2599_v14 = vsel %vm2584_vm3, %v2589_v39, 0.0  ;;  %vm2532_vm3 = vcmp.eq.s32.totalorder %v5574_v45, %v4134_v19  ;;  %v6206_v39 = vld [vmem:[#allocation18_spill] sm:$0xff]  ;;  %v6210_v45 = vld [vmem:[#allocation24_spill] sm:$0xff] }
 0x45f   : > { %vm1802_vm9 = vcmp.eq.s32.totalorder %v6206_v39, %v4134_v19 }
 0x462   : > { %v5588_v53 = vpop.permute.xlu1 %2609 }
 0x466   : > { %v2616_v55 = vpop.permute.xlu1 %2615 }
 0x467   : > { %v2626_v24 = vsel %vm2611_vm2, %v2616_v55, 0.0  ;;  %vm2559_vm2 = vcmp.eq.s32.totalorder %v5576_v34, %v4134_v19  ;;  %v6209_v34 = vld [vmem:[#allocation6_spill] sm:$0xff] }
 0x468   : > { %v2701_v61 = vadd.f32 %v2626_v24, %v2599_v14 }
 0x46b   : > { %v5590_v59 = vpop.permute.xlu1 %2636 }
 0x46f   : > { %v2643_v3 = vpop.permute.xlu1 %2642 }
 0x470   : > { %v2653_v28 = vsel %vm2638_vm7, %v2643_v3, 0.0  ;;  %vm2505_vm7 = vcmp.eq.s32.totalorder %v5568_v46, %v4134_v19  ;;  %v6207_v3 = vld [vmem:[#allocation43_spill] sm:$0xff] }
 0x474   : > { %v5592_v12 = vpop.permute.xlu1 %2663 }
 0x478   : > { %v2670_v30 = vpop.permute.xlu1 %2669 }
 0x479   : > { %v2680_v26 = vsel %vm2665_vm4, %v2670_v30, 0.0  ;;  %vm1748_vm4 = vcmp.eq.s32.totalorder %v6204_v4, %v4134_v19 }
 0x47a   : > { %v2704_v40 = vadd.f32 %v2680_v26, %v2653_v28  ;;  %v1763_v30 = vsel %vm1748_vm4, %v6210_v45, 0.0  ;;  %v6211_v28 = vld [vmem:[#allocation19_spill] sm:$0xff]  ;;  %v6212_v26 = vld [vmem:[#allocation44_spill] sm:$0xff] }
 0x47c   : > { %v2716_v58 = vadd.f32 %v2704_v40, %v2701_v61  ;;  %v1817_v61 = vsel %vm1802_vm9, %v6212_v26, 0.0  ;;  %v6213_v40 = vld [vmem:[#allocation34_spill] sm:$0xff] }
 0x47d   : > { %v2273_v51 = vpop.permute.xlu1 %2272 }
 0x47e   : > { %v2722_v9 = vadd.f32 %v2716_v58, %v2713_v47  ;;  %v2277_v7 = vsel %vm2262_vm14, %v2273_v51, 0.0  ;;  %v2574_v47 = vsel %vm2559_vm2, %v6205_v52, 0.0  ;;  %v6214_v58 = vld [vmem:[#allocation68_spill] sm:$0xff]  ;;  %vm1937_vm2 = vcmp.eq.s32.totalorder %v6219_v36, %v4134_v19 }
 0x480   : > { %v2725_v63 = vadd.f32 %v2722_v9, %v2719_v42  ;;  %v6202_v42 = vld [vmem:[#allocation40_spill] sm:$0xff]  ;;  %v6215_v9 = vld [vmem:[#allocation45_spill] sm:$0xff] }
 0x481   : > { %v2412_v35 = vsel %vm2397_vm5, %v6202_v42, 0.0  ;;  %vm1883_vm5 = vcmp.eq.s32.totalorder %v6208_v8, %v4134_v19  ;;  %v6223_v42 = vld [vmem:[#allocation12_spill] sm:$0xff] }
 0x482   : > { %v2300_v38 = vpop.permute.xlu1 %2299  ;;  %v2728_v50 = vpack.c.bf16 %v5473_v21, %v2725_v63  ;;  %v6216_v63 = vld [vmem:[#allocation39_spill] sm:$0xff] }
 0x483   : > { %v2304_v31 = vsel %vm2289_vm6, %v2300_v38, 0.0  ;;  %vm1829_vm6 = vcmp.eq.s32.totalorder %v6213_v40, %v4134_v19  ;;  %v1898_v38 = vsel %vm1883_vm5, %v6216_v63, 0.0  ;;  %vm2586_vm5 = vcmp.eq.s32.totalorder %v5586_v25, %v4134_v19 }
 0x484   : > { %3242 = vmatprep.mubr.msk.bf16.mxu0 %vm1108_vm8, %v2728_v50  ;;  %v2685_v1 = vadd.f32 %v2304_v31, %v2277_v7  ;;  %v6217_v50 = vld [vmem:[#allocation27_spill] sm:$0xff] }
 0x485   : > { %vm2099_vm14 = vcmp.eq.s32.totalorder %v6217_v50, %v4134_v19 }
 0x487   : > { %v2354_v48 = vpop.permute.xlu1 %2353 }
 0x488   : > { %v2358_v20 = vsel %vm2343_vm10, %v2354_v48, 0.0  ;;  %vm1721_vm10 = vcmp.eq.s32.totalorder %v6207_v3, %v4134_v19  ;;  %v6218_v48 = vld [vmem:[#allocation31_spill] sm:$0xff] }
 0x489   : > { %v2688_v57 = vadd.f32 %v2358_v20, %v2331_v16  ;;  %v1736_v24 = vsel %vm1721_vm10, %v6209_v34, 0.0  ;;  %v6220_v16 = vld [vmem:[#allocation63_spill] sm:$0xff]  ;;  %v2114_v20 = vsel %vm2099_vm14, %v5501_v33, 0.0  ;;  %vm2072_vm10 = vcmp.eq.s32.totalorder %v6224_v23, %v4134_v19 }
 0x48a   : > { %vm2839_vm14 = vcmask 195584  }
 0x48b   : > { %v2709_v2 = vadd.f32 %v2688_v57, %v2685_v1  ;;  %v6221_v57 = vld [vmem:[#allocation64_spill] sm:$0xff] }
 0x48c   : > { %v2381_v21 = vpop.permute.xlu1 %2380  ;;  %vm1991_vm4 = vcmp.eq.s32.totalorder %v6221_v57, %v4134_v19 }
 0x48d   : > { %v2385_v41 = vsel %vm2370_vm11, %v2381_v21, 0.0  ;;  %vm1775_vm11 = vcmp.eq.s32.totalorder %v6211_v28, %v4134_v19  ;;  %v6222_v21 = vld [vmem:[#allocation66_spill] sm:$0xff] }
 0x48e   : > { %v2691_v5 = vadd.f32 %v2412_v35, %v2385_v41  ;;  %vm2018_vm9 = vcmp.eq.s32.totalorder %v6222_v21, %v4134_v19  ;;  %v6225_v41 = vld [vmem:[#allocation16_spill] sm:$0xff] }
 0x48f   : > { %v2033_v31 = vsel %vm2018_vm9, %v5494_v44, 0.0  ;;  %v2006_v44 = vsel %vm1991_vm4, %v5490_v43, 0.0 }
 0x491   : > { %v2435_v11 = vpop.permute.xlu1 %2434 }
 0x492   : > { %v2439_v27 = vsel %vm2424_vm12, %v2435_v11, 0.0  ;;  %vm2045_vm12 = vcmp.eq.s32.totalorder %v6214_v58, %v4134_v19 }
 0x493   : > { %v2060_v35 = vsel %vm2045_vm12, %v6223_v42, 0.0  ;;  %vm2613_vm12 = vcmp.eq.s32.totalorder %v5588_v53, %v4134_v19  ;;  %v6227_v53 = vld [vmem:[#allocation41_spill] sm:$0xff] }
 0x496   : > { %v2462_v56 = vpop.permute.xlu1 %2461 }
 0x497   : > { %v2466_v10 = vsel %vm2451_vm13, %v2462_v56, 0.0  ;;  %vm1856_vm13 = vcmp.eq.s32.totalorder %v6215_v9, %v4134_v19  ;;  %v2087_v56 = vsel %vm2072_vm10, %v5497_v62, 0.0 }
 0x498   : > { %v2694_v6 = vadd.f32 %v2466_v10, %v2439_v27  ;;  %v1871_v33 = vsel %vm1856_vm13, %v5478_v49, 0.0  ;;  %v2162_v49 = vadd.f32 %v2087_v56, %v2060_v35  ;;  %vm2640_vm13 = vcmp.eq.s32.totalorder %v5590_v59, %v4134_v19 }
 0x49a   : > { %v2712_v32 = vadd.f32 %v2694_v6, %v2691_v5  ;;  %v2141_v5 = vsel %vm2126_vm15, %v6225_v41, 0.0  ;;  %v2159_v6 = vadd.f32 %v2033_v31, %v2006_v44  ;;  %v6229_v41 = vld [vmem:[#allocation60_spill] sm:$0xff] }
 0x49b   : > { %v2516_v0 = vpop.permute.xlu1 %2515  ;;  %v2165_v7 = vadd.f32 %v2141_v5, %v2114_v20  ;;  %v2801_v20 = vpop.permute.xlu0 %2800 }
 0x49c   : > { %v5627_v15 = vadd.f32 %v2712_v32, %v2709_v2  ;;  %v2520_v22 = vsel %vm2505_vm7, %v2516_v0, 0.0  ;;  %vm1910_vm7 = vcmp.eq.s32.totalorder %v6218_v48, %v4134_v19  ;;  %v6226_v32 = vld [vmem:[#allocation8_spill] sm:$0xff] }
 0x49d   : > { %v2697_v37 = vadd.f32 %v2520_v22, %v2493_v60  ;;  %v1925_v11 = vsel %vm1910_vm7, %v5482_v13, 0.0  ;;  %v1952_v13 = vsel %vm1937_vm2, %v5486_v29, 0.0  ;;  %v1790_v25 = vsel %vm1775_vm11, %v6226_v32, 0.0  ;;  %v3536_v48 = vld [vmem:[%s5777_s6] sm:$0xff]  }
 0x49e   : > { %v2153_v1 = vadd.f32 %v1925_v11, %v1898_v38  ;;  %v1844_v29 = vsel %vm1829_vm6, %v5475_v17, 0.0  ;;  %v2147_v43 = vadd.f32 %v1817_v61, %v1790_v25  ;;  %v2177_v22 = vadd.f32 %v2165_v7, %v2162_v49  ;;  %v3535_v38 = vld [vmem:[%s5777_s6 + $0x8] sm:$0xff]  }
 0x49f   : > { %v2150_v54 = vadd.f32 %v1871_v33, %v1844_v29  ;;  %vm2667_vm11 = vcmp.eq.s32.totalorder %v5592_v12, %v4134_v19  ;;  %v3647_v61 = vmov 0.0   ;;  %vm2835_vm6 = vcmask 130048  }
 0x4a0   : > { %v2543_v18 = vpop.permute.xlu1 %2542  ;;  %520 = vst.msk [vmem:[#allocation2] sm:$0xff] %vm519_vm0, %v3647_v61  ;;  %521 = vst.msk [vmem:[#allocation2 + $0x8] sm:$0xff] %vm519_vm0, %v3647_v61 }
 0x4a1   : > { %v2547_v46 = vsel %vm2532_vm3, %v2543_v18, 0.0  ;;  %vm1964_vm3 = vcmp.eq.s32.totalorder %v6220_v16, %v4134_v19  ;;  %v2171_v4 = vadd.f32 %v2153_v1, %v2150_v54  ;;  %v6230_v1 = vld [vmem:[#allocation59_spill] sm:$0xff] }
 0x4a2   : > { %v2700_v55 = vadd.f32 %v2574_v47, %v2547_v46  ;;  %v1979_v0 = vsel %vm1964_vm3, %v6227_v53, 0.0  ;;  %v6228_v47 = vld [vmem:[#allocation61_spill] sm:$0xff] }
 0x4a3   : > { %v2156_v60 = vadd.f32 %v1979_v0, %v1952_v13  ;;  %v2655_v46 = vsel %vm2640_vm13, %v6228_v47, 0.0 }
 0x4a4   : > { %v2715_v14 = vadd.f32 %v2700_v55, %v2697_v37  ;;  %v2144_v37 = vadd.f32 %v1763_v30, %v1736_v24 }
 0x4a5   : > { %v2597_v51 = vpop.permute.xlu1 %2596  ;;  %v2174_v52 = vadd.f32 %v2159_v6, %v2156_v60 }
 0x4a6   : > { %v2601_v62 = vsel %vm2586_vm5, %v2597_v51, 0.0  ;;  %v2168_v3 = vadd.f32 %v2147_v43, %v2144_v37  ;;  %v3173_v37 = vld [vmem:[%s5778_s7] ss:$0 sm:$0xff] }
 0x4a7   : > { %v2183_v17 = vadd.f32 %v2177_v22, %v2174_v52  ;;  %v2792_v11 = vld [vmem:[#allocation2] sm:$0xff]  ;;  %v2793_v31 = vld [vmem:[#allocation2 + $0x8] sm:$0xff] }
 0x4a8   : > { %v2180_v59 = vadd.f32 %v2171_v4, %v2168_v3  ;;  %v2935_v4 = vld [vmem:[%s502_s12] sm:$0xff] }
 0x4aa   : > { %v2624_v27 = vpop.permute.xlu1 %2623  ;;  %v2186_v30 = vadd.f32 %v2183_v17, %v2180_v59  ;;  %v2936_v17 = vld [vmem:[%s502_s12 + $0x8] sm:$0xff] }
 0x4ab   : > { %v2628_v10 = vsel %vm2613_vm12, %v2624_v27, 0.0 }
 0x4ac   : > { %v2703_v2 = vadd.f32 %v2628_v10, %v2601_v62  ;;  %v2188_v26 = vpack.c.bf16 %v2186_v30, %v2186_v30 }
 0x4af   : > { %v2678_v18 = vpop.permute.xlu1 %2677 }
 0x4b0   : > { %v2682_v39 = vsel %vm2667_vm11, %v2678_v18, 0.0 }
 0x4b1   : > { %v2706_v55 = vadd.f32 %v2682_v39, %v2655_v46  ;;  %v2937_v46 = vld [vmem:[%s502_s12 + $0x10] sm:$0xf] }
 0x4b3   : > { %v2718_v8 = vadd.f32 %v2706_v55, %v2703_v2  ;;  %v2192_v34 = vpop.permute.xlu1 %2191 }
 0x4b4   : > { %v2201_v45 = vsel %vm1115_vm1, %v2192_v34, 0  ;;  %3256 = vmatprep.subr.msk.bf16.mxu1 %vm1115_vm1, %v2192_v34  ;;  %vm522_vm1 = vcmask 257024  }
 0x4b5   : > { %v2724_v24 = vadd.f32 %v2718_v8, %v2715_v14  ;;  %3231 = vmatpush3.bf16.msra.mxu1 %v2201_v45  ;;  %523 = vst.msk [vmem:[#allocation2 + $0x10] sm:$0xf] %vm522_vm1, %v3647_v61  ;;  %v1156_v14 = vpop.f32.mrf.mxu1 }
 0x4b7   : > { %v2727_v19 = vadd.f32 %v2724_v24, %v5627_v15  ;;  %v2190_v12 = vpop.permute.xlu1 %2189 }
 0x4b8   : > { %3232 = vmatprep.subr.bf16.mxu1 %v2190_v12 }
 0x4b9   : > { %v2729_v28 = vpack.c.bf16 %v2727_v19, %v2727_v19  ;;  %3233 = vmatpush3.bf16.msra.mxu1 %v2190_v12 }
 0x4ba   : > { %3246 = vmatprep.subr.bf16.mxu1 %v3535_v38 }
 0x4bb   : > { %3243 = vmatmul.mubr.msk.bf16.vlgmr.msra.gmra.mxu0 %vm1108_vm8, %v2729_v28  ;;  %v2799_v16 = vpop.permute.xlu1 %2798 }
 0x4bc   : > { %3235 = vmatmul.mubr.msk.bf16.vlgmr.msra.gmra.mxu1 %vm1108_vm8, %v2188_v26  ;;  %vm2831_vm8 = vcmask 64512   ;;  %v2794_v49 = vld [vmem:[#allocation2 + $0x10] sm:$0xf] }
 0x4bd   : > { %3247 = vmatpush3.bf16.msra.mxu1 %v3535_v38  ;;  %v2833_v23 = vsel %vm2831_vm8, %v1156_v14, %v2801_v20  ;;  %v2832_v5 = vsel %vm2831_vm8, %v6229_v41, %v2799_v16 }
 0x4be   : > { %3248 = vmatprep.subr.bf16.mxu1 %v3536_v48 }
 0x4bf   : > { %v2803_v57 = vpop.permute.xlu1 %2802 }
 0x4c0   : > { %v2834_v6 = vsel %vm2831_vm8, %v6230_v1, %v2803_v57 }
 0x4c1   : > { %3249 = vmatpush3.bf16.msra.mxu1 %v3536_v48 }
 0x57b   : > { %v3244_v40 = vpop.f32.mrf.mxu0 }
 0x57c   : > { %v3236_v15 = vpop.f32.mrf.mxu1 }
 0x57d   : > { %v2778_v58 = vpop.f32.mrf.mxu0 }
 0x57e   : > { %v2237_v51 = vpop.f32.mrf.mxu1 }
 0x57f   : > { %2810 = vrot.lane.b32.xlu0 %v2237_v51, %s3648_s22  ;;  %v3245_v9 = vpop.f32.mrf.mxu0 }
 0x580   : > { %v3237_v63 = vpop.f32.mrf.mxu1 }
 0x581   : > { %v2781_v36 = vpop.f32.mrf.mxu0 }
 0x582   : > { %v2240_v50 = vpop.f32.mrf.mxu1 }
 0x583   : > { %2814 = vrot.lane.b32.xlu0 %v3236_v15, %s3648_s22  ;;  %2812 = vrot.lane.b32.xlu1 %v2240_v50, %s3648_s22 }
 0x587   : > { %2822 = vrot.lane.b32.xlu1 %v2778_v58, %s3649_s27  ;;  %2824 = vrot.lane.b32.xlu0 %v2781_v36, %s3649_s27 }
 0x58b   : > { %2826 = vrot.lane.b32.xlu1 %v3244_v40, %s3649_s27 }
 0x5f1   : > { %v2811_v21 = vpop.permute.xlu0 %2810 }
 0x5f2   : > { %v2836_v56 = vsel %vm2835_vm6, %v2832_v5, %v2811_v21 }
 0x5f5   : > { %v2813_v42 = vpop.permute.xlu1 %2812  ;;  %v2815_v35 = vpop.permute.xlu0 %2814 }
 0x5f6   : > { %v2837_v33 = vsel %vm2835_vm6, %v2833_v23, %v2813_v42  ;;  %v2838_v2 = vsel %vm2835_vm6, %v2834_v6, %v2815_v35 }
 0x5f9   : > { %v2823_v7 = vpop.permute.xlu1 %2822  ;;  %v2825_v27 = vpop.permute.xlu0 %2824 }
 0x5fa   : > { %v2840_v13 = vsel %vm2839_vm14, %v2836_v56, %v2823_v7  ;;  %v2841_v44 = vsel %vm2839_vm14, %v2837_v33, %v2825_v27  ;;  %v3179_v56 = vld [vmem:[%s5780_s9] ss:$0 sm:$0xff] }
 0x5fb   : > { %v2843_v62 = vadd.f32 %v2840_v13, %v2792_v11  ;;  %v2844_v10 = vadd.f32 %v2841_v44, %v2793_v31  ;;  %v3178_v11 = vld [vmem:[%s5779_s8] ss:$0 sm:$0xff] }
 0x5fd   : > { %2846 = vst.msk [vmem:[#allocation2] sm:$0xff] %vm519_vm0, %v2843_v62  ;;  %2847 = vst.msk [vmem:[#allocation2 + $0x8] sm:$0xff] %vm519_vm0, %v2844_v10  ;;  %v2827_v32 = vpop.permute.xlu1 %2826 }
 0x5fe   : > { %v2842_v25 = vsel %vm2839_vm14, %v2838_v2, %v2827_v32 }
 0x5ff   : > { %v2845_v53 = vadd.f32 %v2842_v25, %v2794_v49 }
 0x601   : > { %2849 = vst.msk [vmem:[#allocation2 + $0x10] sm:$0xf] %vm522_vm1, %v2845_v53 }
 0x604   : > { %v2853_v0 = vld [vmem:[#allocation2] sm:$0xff]  ;;  %v2854_v29 = vld [vmem:[#allocation2 + $0x8] sm:$0xff] }
 0x605   : > { %v2856_v43 = vpack.c.bf16 %v2854_v29, %v2853_v0 }
 0x607   : > { %3250 = vmatprep.mubr.msk.bf16.mxu1 %vm519_vm0, %v2856_v43 }
 0x608   : > { %v2855_v54 = vld [vmem:[#allocation2 + $0x10] sm:$0xf] }
 0x609   : > { %v2857_v60 = vpack.c.bf16 %v2855_v54, %v2855_v54 }
 0x60b   : > { %3251 = vmatmul.mubr.msk.bf16.vlgmr.msra.gmra.mxu1 %vm519_vm0, %v2857_v60 }
 0x6cb   : > { %v3252_v22 = vpop.f32.mrf.mxu1 }
 0x6cc   : > { %v2930_v52 = vadd.f32 %v3252_v22, %v3173_v37 }
 0x6cd   : > { %v2921_v18 = vpop.f32.mrf.mxu1 }
 0x6ce   : > { %v2922_v47 = vadd.f32 %v3173_v37, %v2921_v18  ;;  %v2940_v8 = vadd.f32 %v2937_v46, %v2930_v52 }
 0x6cf   : > { %v3253_v39 = vpop.f32.mrf.mxu1 }
 0x6d0   : > { %v2938_v55 = vadd.f32 %v2935_v4, %v2922_v47  ;;  %v2947_v30 = vsel %vm522_vm1, %v2940_v8, 0.0 }
 0x6d1   : > { %v2924_v3 = vpop.f32.mrf.mxu1 }
 0x6d2   : > { %v2925_v34 = vadd.f32 %v3173_v37, %v2924_v3  ;;  %v2941_v59 = vsel %vm519_vm0, %v2938_v55, 0.0 }
 0x6d3   : > { %2942 = vadd.xlane.f32.xlu0 %v2941_v59 }
 0x6d4   : > { %v2939_v45 = vadd.f32 %v2936_v17, %v2925_v34 }
 0x6d6   : > { %v2944_v24 = vsel %vm519_vm0, %v2939_v45, 0.0 }
 0x6d7   : > { %2945 = vadd.xlane.f32.xlu1 %v2944_v24  ;;  %2948 = vadd.xlane.f32.xlu0 %v2947_v30 }
 0x75c   : > { %v2943_v19 = vpop.xlane.xlu0 %2942 }
 0x75d   : > { %v2951_v12 = vmul.f32 0.03125, %v2943_v19 }
 0x75f   : > { %v2954_v28 = vsub.f32 %v2938_v55, %v2951_v12 }
 0x760   : > { %v2946_v26 = vpop.xlane.xlu1 %2945  ;;  %v2949_v61 = vpop.xlane.xlu0 %2948 }
 0x761   : > { %v2952_v14 = vmul.f32 0.03125, %v2946_v26  ;;  %v2953_v40 = vmul.f32 0.03125, %v2949_v61  ;;  %v2957_v15 = vmul.f32 %v2954_v28, %v2954_v28 }
 0x763   : > { %v2955_v58 = vsub.f32 %v2939_v45, %v2952_v14  ;;  %v2956_v51 = vsub.f32 %v2940_v8, %v2953_v40  ;;  %v2960_v9 = vsel %vm519_vm0, %v2957_v15, 0.0 }
 0x764   : > { %2961 = vadd.xlane.f32.xlu0 %v2960_v9 }
 0x765   : > { %v2958_v63 = vmul.f32 %v2955_v58, %v2955_v58  ;;  %v2959_v38 = vmul.f32 %v2956_v51, %v2956_v51 }
 0x767   : > { %v2963_v50 = vsel %vm519_vm0, %v2958_v63, 0.0  ;;  %v2966_v48 = vsel %vm522_vm1, %v2959_v38, 0.0 }
 0x768   : > { %2964 = vadd.xlane.f32.xlu1 %v2963_v50  ;;  %2967 = vadd.xlane.f32.xlu0 %v2966_v48 }
 0x7ed   : > { %v2962_v36 = vpop.xlane.xlu0 %2961 }
 0x7ee   : > { %v2969_v16 = vmul.f32 0.03125, %v2962_v36 }
 0x7f0   : > { %v2972_v20 = vadd.f32 1e-05, %v2969_v16 }
 0x7f1   : > { %v2965_v57 = vpop.xlane.xlu1 %2964  ;;  %v2968_v21 = vpop.xlane.xlu0 %2967 }
 0x7f2   : > { %3537 = vrsqrt.f32 %v2972_v20  ;;  %v2970_v42 = vmul.f32 0.03125, %v2965_v57  ;;  %v2971_v35 = vmul.f32 0.03125, %v2968_v21 }
 0x7f4   : > { %v2973_v23 = vadd.f32 1e-05, %v2970_v42  ;;  %v2974_v41 = vadd.f32 1e-05, %v2971_v35 }
 0x7f6   : > { %3539 = vrsqrt.f32 %v2973_v23 }
 0x7f7   : > { %3541 = vrsqrt.f32 %v2974_v41 }
 0x7ff   : > { %v3538_v5 = vpop.eup %3537 }
 0x800   : > { %v2978_v31 = vmul.f32 %v3538_v5, %v2954_v28 }
 0x802   : > { %v2988_v33 = vmul.f32 %v3178_v11, %v2978_v31 }
 0x803   : > { %v3540_v7 = vpop.eup %3539 }
 0x804   : > { %v3542_v27 = vpop.eup %3541  ;;  %v2998_v13 = vadd.f32 %v3179_v56, %v2988_v33  ;;  %v2979_v44 = vmul.f32 %v3540_v7, %v2955_v58 }
 0x805   : > { %v2980_v62 = vmul.f32 %v3542_v27, %v2956_v51 }
 0x806   : > { %3001 = vst.msk [vmem:[%s512_s23] sm:$0xff] %vm519_vm0, %v2998_v13  ;;  %v2989_v10 = vmul.f32 %v3178_v11, %v2979_v44 }
 0x807   : > { %v2990_v1 = vmul.f32 %v3178_v11, %v2980_v62 }
 0x808   : > { %v2999_v6 = vadd.f32 %v3179_v56, %v2989_v10 }
 0x809   : > { %v3000_v49 = vadd.f32 %v3179_v56, %v2990_v1 }
 0x80a   : > { %3002 = vst.msk [vmem:[%s512_s23 + $0x8] sm:$0xff] %vm519_vm0, %v2999_v6 }
 0x80b   : > { %3003 = vst.msk [vmem:[%s512_s23 + $0x10] sm:$0xf] %vm522_vm1, %v3000_v49 }
 0x80c PF: > { %s20_s15 = sadd.s32 1, %s3577_s15   ;;  %s6231_s13 = smov %s3573_s14 }
 0x80d   : > { %p17_p5 = scmp.ge.s32.totalorder %s20_s15, 4   ;;  %s6232_s14 = smov %s6234_s16 }
 0x80f   :  { %19 = sbr.rel (!%p17_p5) target bundleno = 2 (0x2), region = 107 }

// kernel: deform_transformer_decoder.13
= control target key start
LH: loop header
LB: loop body
LE: loop exit
PB: predicated region body
PF: predicated region fallthrough
CT: control target
= control target key end

     0   :  { %s3846_s13 = smov 0   ;;  %s3848_s14 = smov 0   ;;  %s6036_s0 = inlined_call_operand.vmem [shape: s32[2,20,64], index: 0, kind: input, shape index: {}]   ;;  %s6037_s1 = inlined_call_operand.vmem [shape: f32[2,20,64], index: 1, kind: input, shape index: {}]   ;;  %s6038_s2 = inlined_call_operand.vmem [shape: bf16[2,80,32], index: 2, kind: input, shape index: {}]   ;;  %s6039_s3 = inlined_call_operand.vmem [shape: f32[2,20,32], index: 3, kind: input, shape index: {}]   ;;  %s6040_s4 = inlined_call_operand.vmem [shape: bf16[32,32], index: 4, kind: input, shape index: {}]   ;;  %s6041_s5 = inlined_call_operand.vmem [shape: f32[1,32], index: 5, kind: input, shape index: {}]   ;;  %s6042_s6 = inlined_call_operand.vmem [shape: bf16[32,32], index: 6, kind: input, shape index: {}]   ;;  %s6043_s7 = inlined_call_operand.vmem [shape: f32[1,32], index: 7, kind: input, shape index: {}]   ;;  %s6044_s8 = inlined_call_operand.vmem [shape: f32[1,32], index: 8, kind: input, shape index: {}]   ;;  %s6045_s9 = inlined_call_operand.vmem [shape: f32[1,32], index: 9, kind: input, shape index: {}]   ;;  %s6046_s10 = inlined_call_operand.vmem [shape: f32[2,20,32], index: 10, kind: output, shape index: {}]  }
   0x1   :  { %s3850_s15 = smov 0  }
   0x2 LB: > { %s39_s16 = sadd.s32 1, %s3713_s14  ;;  %p3233_p0 = scmp.ge.s32.totalorder %s3717_s15, 1  ;;  %s3717_s15 = sphi %s3850_s15, %s20_s15   ;;  %s3713_s14 = sphi %s3848_s14, %s6551_s14   ;;  %s3709_s13 = sphi %s3846_s13, %s6550_s13  }
   0x3   : > { %p41_p1 = scmp.ge.s32.totalorder %s39_s16, 2  ;;  %p391_p2 = scmp.lt.s32.totalorder %s3717_s15, 3 }
   0x5   : > { %s6553_s16 = smov (%p41_p1, %s39_s16), 0  ;;  %p392_p3 = pnand %p3233_p0, %p391_p2 }
   0x7   : > { %395 = sbr.rel (%p392_p3) target bundleno = 2077 (0x81d), region = 60 }
   0xc   : > { %p465_p4 = scmp.lt.s32.totalorder %s3709_s13, 1  ;;  %v3668_v0 = vld [vmem:[%s6040_s4 + $0x8] sm:$0xff]   ;;  %v3719_v1 = vmov 0   ;;  %v6047_v2 = vmov 0.0   ;;  %vm3721_vm0 = vmmov 0   ;;  %vm6159_vm1 = vcmask 261120  }
   0xd   : > { %3495 = vset.pattern.permute.xlu1 %v3719_v1  ;;  %3494 = vset.pattern.permute.xlu0 %v3719_v1  ;;  %v3669_v3 = vld [vmem:[%s6040_s4] sm:$0xff]   ;;  %520 = vst.msk [vmem:[#allocation2] sm:$0xff] %vm6159_vm1, %v6047_v2  ;;  %521 = vst.msk [vmem:[#allocation2 + $0x8] sm:$0xff] %vm6159_vm1, %v6047_v2  ;;  %v3722_v12 = vmov 1   ;;  %v3723_v14 = vmov 2   ;;  %v3724_v16 = vmov 3  }
   0xe   : > { %s6555_s13 = smov (!%p465_p4, %s3709_s13), 1  ;;  %3308 = vmatprep.subr.bf16.mxu0 %v6047_v2  ;;  %3312 = vmatprep.mubr.msk.bf16.mxu0 %vm3721_vm0, %v6047_v2  ;;  %v3725_v18 = vmov 4   ;;  %v3726_v19 = vmov 5   ;;  %v3727_v20 = vmov 6   ;;  %v3728_v21 = vmov 7   ;;  %s3753_s17 = smov 120  }
   0xf   : > { %s3868_s19 = smul.u32 24, %s6555_s13  ;;  %3309 = vmatpush3.bf16.msra.mxu0 %v3668_v0  ;;  %v3729_v22 = vmov 8   ;;  %v3730_v23 = vmov 9   ;;  %v3731_v24 = vmov 10   ;;  %v3732_v25 = vmov 11   ;;  %s3759_s18 = smov 112  }
  0x10   : > { %3310 = vmatprep.subr.bf16.mxu0 %v6047_v2  ;;  %s3397_s22 = smul.u32 40, %s6555_s13  ;;  %v3733_v32 = vmov 12   ;;  %v3734_v38 = vmov 13   ;;  %v3735_v45 = vmov 14   ;;  %v3736_v50 = vmov 15   ;;  %s3777_s20 = smov 104  }
  0x11   : > { %s3884_s25 = scalar_lea.vmem %s6036_s0, %s3868_s19  ;;  %s3890_s28 = scalar_lea.vmem %s6037_s1, %s3868_s19  ;;  %v6051_v57 = vmov 16   ;;  %v6050_v62 = vmov 17  }
  0x12   : > { %v3893_v4 = vld [vmem:[%s3884_s25 + $0x10] sm:$0xf]  ;;  %v3896_v5 = vld [vmem:[%s3884_s25] sm:$0xff]  ;;  %s3901_s11 = scalar_lea.vmem %s6038_s2, %s3397_s22  ;;  %v3909_v7 = vld [vmem:[%s3884_s25 + $0x8] sm:$0xff]  ;;  %s3788_s21 = smov 8  }
  0x13   : > { %689 = vperm.xlu1 %3495, %v3893_v4   ;;  %683 = vperm.xlu0 %3494, %v3896_v5   ;;  %v3906_v6 = vld [vmem:[%s3890_s28] sm:$0xff]  ;;  %v3915_v9 = vld [vmem:[%s3890_s28 + $0x10] sm:$0xf]  ;;  %v3918_v10 = vld [vmem:[%s3890_s28 + $0x8] sm:$0xff]  ;;  %s3789_s22 = smov 16   ;;  %s3790_s27 = smov 24  }
  0x14   : > { %3311 = vmatpush3.bf16.msra.mxu0 %v3669_v3  ;;  %v3670_v8 = vld [vmem:[%s3901_s11] sm:$0xff]   ;;  %v3671_v11 = vld [vmem:[%s3901_s11 + $0x8] sm:$0xff]   ;;  %v3672_v13 = vld [vmem:[%s3901_s11 + $0x10] sm:$0xff]   ;;  %s502_s12 = scalar_lea.vmem %s6039_s3, %s3868_s19  ;;  %s512_s23 = scalar_lea.vmem %s6046_s10, %s3868_s19 }
  0x15   : > { %v3673_v15 = vld [vmem:[%s3901_s11 + $0x18] sm:$0xff]   ;;  %v3674_v17 = vld [vmem:[%s3901_s11 + $0x20] sm:$0xff]  }
  0x17   : > { %696 = vperm.xlu1 %3495, %v3906_v6   ;;  %686 = vperm.xlu0 %3494, %v3909_v7  }
  0x18   : > { %3313 = vmatmul.mubr.msk.bf16.vlgmr.msra.gmra.mxu0 %vm6159_vm1, %v3670_v8 }
  0x19   : > { %3316 = vmatprep.mubr.msk.bf16.mxu0 %vm3721_vm0, %v6047_v2 }
  0x1b   : > { %706 = vperm.xlu1 %3495, %v3915_v9   ;;  %701 = vperm.xlu0 %3494, %v3918_v10  }
  0x1f   : > { %3497 = vset.pattern.permute.xlu1 %v3722_v12  ;;  %3496 = vset.pattern.permute.xlu0 %v3722_v12 }
  0x20   : > { %716 = vperm.xlu1 %3497, %v3909_v7   ;;  %713 = vperm.xlu0 %3496, %v3896_v5  }
  0x21   : > { %3317 = vmatmul.mubr.msk.bf16.gmra.mxu0 %vm6159_vm1, %v3671_v11 }
  0x22   : > { %3320 = vmatprep.mubr.msk.bf16.mxu0 %vm3721_vm0, %v6047_v2 }
  0x24   : > { %719 = vperm.xlu1 %3497, %v3893_v4   ;;  %725 = vperm.xlu0 %3496, %v3906_v6  }
  0x28   : > { %729 = vperm.xlu1 %3497, %v3918_v10   ;;  %733 = vperm.xlu0 %3496, %v3915_v9  }
  0x29   : > { %3321 = vmatmul.mubr.msk.bf16.gmra.mxu0 %vm6159_vm1, %v3672_v13 }
  0x2a   : > { %3324 = vmatprep.mubr.msk.bf16.mxu0 %vm3721_vm0, %v6047_v2 }
  0x2c   : > { %3498 = vset.pattern.permute.xlu1 %v3723_v14  ;;  %3499 = vset.pattern.permute.xlu0 %v3723_v14  ;;  %v6049_v14 = vmov 18  }
  0x2d   : > { %740 = vperm.xlu1 %3498, %v3896_v5   ;;  %743 = vperm.xlu0 %3499, %v3909_v7  }
  0x31   : > { %746 = vperm.xlu1 %3498, %v3893_v4   ;;  %756 = vperm.xlu0 %3499, %v3918_v10  }
  0x32   : > { %3325 = vmatmul.mubr.msk.bf16.gmra.mxu0 %vm6159_vm1, %v3673_v15 }
  0x33   : > { %3328 = vmatprep.mubr.msk.bf16.mxu0 %vm3721_vm0, %v6047_v2 }
  0x35   : > { %752 = vperm.xlu1 %3498, %v3906_v6   ;;  %3500 = vset.pattern.permute.xlu0 %v3724_v16 }
  0x36   : > { %767 = vperm.xlu0 %3500, %v3896_v5  }
  0x39   : > { %760 = vperm.xlu1 %3498, %v3915_v9  }
  0x3a   : > { %779 = vperm.xlu0 %3500, %v3906_v6   ;;  %3329 = vmatmul.mubr.msk.bf16.gmra.mxu0 %vm6159_vm1, %v3674_v17 }
  0x3d   : > { %3501 = vset.pattern.permute.xlu1 %v3724_v16 }
  0x3e   : > { %770 = vperm.xlu1 %3501, %v3909_v7   ;;  %787 = vperm.xlu0 %3500, %v3915_v9  }
  0x42   : > { %773 = vperm.xlu1 %3501, %v3893_v4   ;;  %3503 = vset.pattern.permute.xlu0 %v3725_v18 }
  0x43   : > { %797 = vperm.xlu0 %3503, %v3909_v7  }
  0x46   : > { %783 = vperm.xlu1 %3501, %v3918_v10  }
  0x47   : > { %810 = vperm.xlu0 %3503, %v3918_v10  }
  0x4a   : > { %3502 = vset.pattern.permute.xlu1 %v3725_v18 }
  0x4b   : > { %794 = vperm.xlu1 %3502, %v3896_v5   ;;  %3504 = vset.pattern.permute.xlu0 %v3726_v19 }
  0x4c   : > { %821 = vperm.xlu0 %3504, %v3896_v5  }
  0x4f   : > { %800 = vperm.xlu1 %3502, %v3893_v4  }
  0x50   : > { %833 = vperm.xlu0 %3504, %v3906_v6  }
  0x53   : > { %806 = vperm.xlu1 %3502, %v3906_v6  }
  0x54   : > { %841 = vperm.xlu0 %3504, %v3915_v9  }
  0x57   : > { %814 = vperm.xlu1 %3502, %v3915_v9  }
  0x58   : > { %3507 = vset.pattern.permute.xlu0 %v3727_v20 }
  0x59   : > { %851 = vperm.xlu0 %3507, %v3909_v7  }
  0x5b   : > { %3505 = vset.pattern.permute.xlu1 %v3726_v19 }
  0x5c   : > { %824 = vperm.xlu1 %3505, %v3909_v7  }
  0x5d   : > { %864 = vperm.xlu0 %3507, %v3918_v10  }
  0x60   : > { %827 = vperm.xlu1 %3505, %v3893_v4  }
  0x61   : > { %3508 = vset.pattern.permute.xlu0 %v3728_v21 }
  0x62   : > { %875 = vperm.xlu0 %3508, %v3896_v5  }
  0x64   : > { %837 = vperm.xlu1 %3505, %v3918_v10  }
  0x66   : > { %887 = vperm.xlu0 %3508, %v3906_v6  }
  0x68   : > { %3506 = vset.pattern.permute.xlu1 %v3727_v20 }
  0x69   : > { %848 = vperm.xlu1 %3506, %v3896_v5  }
  0x6a   : > { %895 = vperm.xlu0 %3508, %v3915_v9  }
  0x6d   : > { %854 = vperm.xlu1 %3506, %v3893_v4  }
  0x6e   : > { %3511 = vset.pattern.permute.xlu0 %v3729_v22 }
  0x6f   : > { %905 = vperm.xlu0 %3511, %v3909_v7  }
  0x71   : > { %860 = vperm.xlu1 %3506, %v3906_v6  }
  0x73   : > { %918 = vperm.xlu0 %3511, %v3918_v10  }
  0x75   : > { %868 = vperm.xlu1 %3506, %v3915_v9  }
  0x77   : > { %3512 = vset.pattern.permute.xlu0 %v3730_v23 }
  0x78   : > { %929 = vperm.xlu0 %3512, %v3896_v5  }
  0x79   : > { %3509 = vset.pattern.permute.xlu1 %v3728_v21 }
  0x7a   : > { %878 = vperm.xlu1 %3509, %v3909_v7  }
  0x7c   : > { %941 = vperm.xlu0 %3512, %v3906_v6  }
  0x7e   : > { %881 = vperm.xlu1 %3509, %v3893_v4  }
  0x80   : > { %949 = vperm.xlu0 %3512, %v3915_v9  }
  0x82   : > { %891 = vperm.xlu1 %3509, %v3918_v10  }
  0x84   : > { %3515 = vset.pattern.permute.xlu0 %v3731_v24 }
  0x85   : > { %959 = vperm.xlu0 %3515, %v3909_v7  }
  0x86   : > { %3510 = vset.pattern.permute.xlu1 %v3729_v22 }
  0x87   : > { %902 = vperm.xlu1 %3510, %v3896_v5  }
  0x89   : > { %972 = vperm.xlu0 %3515, %v3918_v10  }
  0x8b   : > { %908 = vperm.xlu1 %3510, %v3893_v4  }
  0x8d   : > { %3516 = vset.pattern.permute.xlu0 %v3732_v25 }
  0x8e   : > { %v3990_v26 = vpop.permute.xlu1 %689  ;;  %983 = vperm.xlu0 %3516, %v3896_v5   ;;  %v3993_v27 = vpop.permute.xlu0 %683 }
  0x8f   : > { %914 = vperm.xlu1 %3510, %v3906_v6  }
  0x92   : > { %v3996_v28 = vpop.permute.xlu1 %696  ;;  %995 = vperm.xlu0 %3516, %v3906_v6   ;;  %v3999_v29 = vpop.permute.xlu0 %686 }
  0x93   : > { %922 = vperm.xlu1 %3510, %v3915_v9  }
  0x96   : > { %v4002_v30 = vpop.permute.xlu1 %706  ;;  %1003 = vperm.xlu0 %3516, %v3915_v9   ;;  %v4005_v31 = vpop.permute.xlu0 %701 }
  0x97   : > { %3513 = vset.pattern.permute.xlu1 %v3730_v23  ;;  %v6048_v23 = vmov 19  }
  0x98   : > { %932 = vperm.xlu1 %3513, %v3909_v7  }
  0x9a   : > { %3519 = vset.pattern.permute.xlu0 %v3733_v32 }
  0x9b   : > { %v4008_v33 = vpop.permute.xlu1 %716  ;;  %1013 = vperm.xlu0 %3519, %v3909_v7   ;;  %v4011_v34 = vpop.permute.xlu0 %713 }
  0x9c   : > { %935 = vperm.xlu1 %3513, %v3893_v4  }
  0x9f   : > { %v4014_v35 = vpop.permute.xlu1 %719  ;;  %1026 = vperm.xlu0 %3519, %v3918_v10   ;;  %v4017_v36 = vpop.permute.xlu0 %725 }
  0xa0   : > { %945 = vperm.xlu1 %3513, %v3918_v10  }
  0xa3   : > { %v4020_v37 = vpop.permute.xlu1 %729  ;;  %3520 = vset.pattern.permute.xlu0 %v3734_v38  ;;  %v4022_v39 = vpop.permute.xlu0 %733 }
  0xa4   : > { %3514 = vset.pattern.permute.xlu1 %v3731_v24  ;;  %1037 = vperm.xlu0 %3520, %v3896_v5  }
  0xa5   : > { %956 = vperm.xlu1 %3514, %v3896_v5  }
  0xa8   : > { %v4026_v40 = vpop.permute.xlu1 %740  ;;  %1049 = vperm.xlu0 %3520, %v3906_v6   ;;  %v4029_v41 = vpop.permute.xlu0 %743 }
  0xa9   : > { %962 = vperm.xlu1 %3514, %v3893_v4  }
  0xac   : > { %v4032_v42 = vpop.permute.xlu1 %746  ;;  %1057 = vperm.xlu0 %3520, %v3915_v9   ;;  %v4035_v43 = vpop.permute.xlu0 %756 }
  0xad   : > { %968 = vperm.xlu1 %3514, %v3906_v6  }
  0xb0   : > { %v4038_v44 = vpop.permute.xlu1 %752  ;;  %3523 = vset.pattern.permute.xlu0 %v3735_v45 }
  0xb1   : > { %976 = vperm.xlu1 %3514, %v3915_v9   ;;  %1067 = vperm.xlu0 %3523, %v3909_v7   ;;  %v4042_v46 = vpop.permute.xlu0 %767 }
  0xb4   : > { %v4044_v47 = vpop.permute.xlu1 %760 }
  0xb5   : > { %3517 = vset.pattern.permute.xlu1 %v3732_v25  ;;  %1080 = vperm.xlu0 %3523, %v3918_v10   ;;  %v4047_v48 = vpop.permute.xlu0 %779 }
  0xb6   : > { %986 = vperm.xlu1 %3517, %v3909_v7  }
  0xb9   : > { %v4050_v49 = vpop.permute.xlu1 %770  ;;  %3524 = vset.pattern.permute.xlu0 %v3736_v50  ;;  %v4053_v51 = vpop.permute.xlu0 %787 }
  0xba   : > { %989 = vperm.xlu1 %3517, %v3893_v4   ;;  %1091 = vperm.xlu0 %3524, %v3896_v5  }
  0xbd   : > { %v4057_v52 = vpop.permute.xlu1 %773 }
  0xbe   : > { %999 = vperm.xlu1 %3517, %v3918_v10   ;;  %1103 = vperm.xlu0 %3524, %v3906_v6   ;;  %v4061_v53 = vpop.permute.xlu0 %797 }
  0xc1   : > { %v4063_v54 = vpop.permute.xlu1 %783 }
  0xc2   : > { %3518 = vset.pattern.permute.xlu1 %v3733_v32  ;;  %1111 = vperm.xlu0 %3524, %v3915_v9   ;;  %v4066_v55 = vpop.permute.xlu0 %810 }
  0xc3   : > { %1010 = vperm.xlu1 %3518, %v3896_v5  }
  0xc6   : > { %v4069_v56 = vpop.permute.xlu1 %794  ;;  %3527 = vset.pattern.permute.xlu0 %v6051_v57 }
  0xc7   : > { %1016 = vperm.xlu1 %3518, %v3893_v4   ;;  %1228 = vperm.xlu0 %3527, %v3909_v7   ;;  %v4074_v58 = vpop.permute.xlu0 %821 }
  0xca   : > { %v4076_v59 = vpop.permute.xlu1 %800 }
  0xcb   : > { %1022 = vperm.xlu1 %3518, %v3906_v6   ;;  %1241 = vperm.xlu0 %3527, %v3918_v10   ;;  %v4080_v60 = vpop.permute.xlu0 %833 }
  0xcc   : > { %6161 = vst [vmem:[#allocation3_spill] sm:$0xff] %v4080_v60 }
  0xce   : > { %v4082_v61 = vpop.permute.xlu1 %806 }
  0xcf   : > { %6162 = vst [vmem:[#allocation4_spill] sm:$0xff] %v4082_v61  ;;  %1030 = vperm.xlu1 %3518, %v3915_v9   ;;  %3528 = vset.pattern.permute.xlu0 %v6050_v62  ;;  %v4086_v63 = vpop.permute.xlu0 %841  ;;  %v6052_v62 = vmov 20   ;;  %v6178_v61 = vmov 16  }
  0xd0   : > { %6163 = vst [vmem:[#allocation5_spill] sm:$0xff] %v4086_v63  ;;  %1252 = vperm.xlu0 %3528, %v3896_v5  }
  0xd2   : > { %v4089_v0 = vpop.permute.xlu1 %814 }
  0xd3   : > { %6164 = vst [vmem:[#allocation6_spill] sm:$0xff] %v4089_v0  ;;  %3521 = vset.pattern.permute.xlu1 %v3734_v38 }
  0xd4   : > { %1040 = vperm.xlu1 %3521, %v3909_v7   ;;  %1264 = vperm.xlu0 %3528, %v3906_v6   ;;  %v4093_v1 = vpop.permute.xlu0 %851 }
  0xd7   : > { %v4095_v3 = vpop.permute.xlu1 %824 }
  0xd8   : > { %6165 = vst [vmem:[#allocation7_spill] sm:$0xff] %v4095_v3  ;;  %1043 = vperm.xlu1 %3521, %v3893_v4   ;;  %1272 = vperm.xlu0 %3528, %v3915_v9   ;;  %v4099_v8 = vpop.permute.xlu0 %864  ;;  %v4101_v11 = vpop.f32.mrf.mxu0 }
  0xd9   : > { %6166 = vst [vmem:[#allocation8_spill] sm:$0xff] %v4099_v8 }
  0xda   : > { %v3314_v12 = vpop.f32.mrf.mxu0 }
  0xdb   : > { %v4103_v13 = vpop.permute.xlu1 %827 }
  0xdc   : > { %1053 = vperm.xlu1 %3521, %v3918_v10   ;;  %3531 = vset.pattern.permute.xlu0 %v6049_v14  ;;  %v4107_v15 = vpop.f32.mrf.mxu0 }
  0xdd   : > { %1282 = vperm.xlu0 %3531, %v3909_v7   ;;  %v4110_v16 = vpop.permute.xlu0 %875 }
  0xde   : > { %v3315_v17 = vpop.f32.mrf.mxu0 }
  0xdf   : > { %v4112_v18 = vpop.permute.xlu1 %837 }
  0xe0   : > { %6167 = vst [vmem:[#allocation9_spill] sm:$0xff] %v4112_v18  ;;  %3522 = vset.pattern.permute.xlu1 %v3735_v45 }
  0xe1   : > { %1064 = vperm.xlu1 %3522, %v3896_v5   ;;  %1295 = vperm.xlu0 %3531, %v3918_v10   ;;  %v4116_v19 = vpop.permute.xlu0 %887  ;;  %v4118_v20 = vpop.f32.mrf.mxu0 }
  0xe2   : > { %6168 = vst [vmem:[#allocation10_spill] sm:$0xff] %v4116_v19 }
  0xe3   : > { %v3318_v21 = vpop.f32.mrf.mxu0 }
  0xe4   : > { %v4120_v22 = vpop.permute.xlu1 %848 }
  0xe5   : > { %1070 = vperm.xlu1 %3522, %v3893_v4   ;;  %3532 = vset.pattern.permute.xlu0 %v6048_v23  ;;  %v4124_v24 = vpop.permute.xlu0 %895  ;;  %v4126_v25 = vpop.f32.mrf.mxu0 }
  0xe6   : > { %6169 = vst [vmem:[#allocation11_spill] sm:$0xff] %v4124_v24  ;;  %1306 = vperm.xlu0 %3532, %v3896_v5  }
  0xe7   : > { %v3319_v32 = vpop.f32.mrf.mxu0 }
  0xe8   : > { %v4129_v38 = vpop.permute.xlu1 %854 }
  0xe9   : > { %6170 = vst [vmem:[#allocation12_spill] sm:$0xff] %v4129_v38  ;;  %1076 = vperm.xlu1 %3522, %v3906_v6   ;;  %v648_v45 = vpop.f32.mrf.mxu0 }
  0xea   : > { %1318 = vperm.xlu0 %3532, %v3906_v6   ;;  %v4133_v12 = vpop.permute.xlu0 %905 }
  0xeb   : > { %6171 = vst [vmem:[#allocation13_spill] sm:$0xff] %v4133_v12  ;;  %v3322_v17 = vpop.f32.mrf.mxu0 }
  0xec   : > { %v4135_v21 = vpop.permute.xlu1 %860 }
  0xed   : > { %1084 = vperm.xlu1 %3522, %v3915_v9   ;;  %v651_v2 = vpop.f32.mrf.mxu0 }
  0xee   : > { %1326 = vperm.xlu0 %3532, %v3915_v9   ;;  %v4139_v23 = vpop.permute.xlu0 %918 }
  0xef   : > { %6172 = vst [vmem:[#allocation14_spill] sm:$0xff] %v4139_v23  ;;  %v3323_v32 = vpop.f32.mrf.mxu0 }
  0xf0   : > { %v4141_v14 = vpop.permute.xlu1 %868 }
  0xf1   : > { %6173 = vst [vmem:[#allocation15_spill] sm:$0xff] %v4141_v14  ;;  %3525 = vset.pattern.permute.xlu1 %v3736_v50 }
  0xf2   : > { %1094 = vperm.xlu1 %3525, %v3909_v7   ;;  %3535 = vset.pattern.permute.xlu0 %v6052_v62  ;;  %v656_v17 = vpop.f32.mrf.mxu0  ;;  %v3239_v62 = vld [vmem:[%s6041_s5] ss:$0 sm:$0xff] }
  0xf3   : > { %1336 = vperm.xlu0 %3535, %v3909_v7   ;;  %v4147_v57 = vpop.permute.xlu0 %929 }
  0xf4   : > { %6174 = vst [vmem:[#allocation16_spill] sm:$0xff] %v4147_v57  ;;  %v3326_v0 = vpop.f32.mrf.mxu0 }
  0xf5   : > { %v4149_v12 = vpop.permute.xlu1 %878  ;;  %v6053_v0 = vmov 21  }
  0xf6   : > { %6175 = vst [vmem:[#allocation17_spill] sm:$0xff] %v4149_v12  ;;  %1097 = vperm.xlu1 %3525, %v3893_v4   ;;  %v659_v32 = vpop.f32.mrf.mxu0  ;;  %v652_v12 = vadd.f32 %v3239_v62, %v651_v2 }
  0xf7   : > { %1349 = vperm.xlu0 %3535, %v3918_v10   ;;  %v4153_v23 = vpop.permute.xlu0 %941 }
  0xf8   : > { %6176 = vst [vmem:[#allocation18_spill] sm:$0xff] %v4153_v23  ;;  %v3327_v50 = vpop.f32.mrf.mxu0  ;;  %v660_v23 = vadd.f32 %v3239_v62, %v659_v32 }
  0xf9   : > { %v4155_v14 = vpop.permute.xlu1 %881  ;;  %v657_v50 = vadd.f32 %v3239_v62, %v656_v17 }
  0xfa   : > { %1107 = vperm.xlu1 %3525, %v3918_v10   ;;  %v664_v57 = vpop.f32.mrf.mxu0 }
  0xfb   : > { %3536 = vset.pattern.permute.xlu0 %v6053_v0  ;;  %v4162_v18 = vpop.permute.xlu0 %949  ;;  %v665_v3 = vadd.f32 %v3239_v62, %v664_v57  ;;  %v4172_v19 = vpack.c.bf16 %v660_v23, %v657_v50  ;;  %v6055_v23 = vmov 22  }
  0xfc   : > { %6177 = vst [vmem:[#allocation19_spill] sm:$0xff] %v4162_v18  ;;  %1360 = vperm.xlu0 %3536, %v3896_v5   ;;  %v3330_v38 = vpop.f32.mrf.mxu0  ;;  %v649_v18 = vadd.f32 %v3239_v62, %v648_v45  ;;  %v636_v45 = vadd.f32 %v3239_v62, %v4107_v15  ;;  %v6054_v15 = vmov 23  }
  0xfd   : > { %v4165_v63 = vpop.permute.xlu1 %891  ;;  %6179 = vst [vmem:[#allocation20_spill] sm:$0xff] %v4172_v19 }
  0xfe   : > { %3526 = vset.pattern.permute.xlu1 %v6178_v61  ;;  %v667_v24 = vpop.f32.mrf.mxu0  ;;  %v4184_v61 = vpack.c.bf16 %v652_v12, %v649_v18  ;;  %v633_v18 = vadd.f32 %v3239_v62, %v4101_v11 }
  0xff   : > { %1225 = vperm.xlu1 %3526, %v3896_v5   ;;  %v668_v8 = vadd.f32 %v3239_v62, %v667_v24 }
 0x100   : > { %1372 = vperm.xlu0 %3536, %v3906_v6   ;;  %v4170_v60 = vpop.permute.xlu0 %959  ;;  %v3331_v0 = vpop.f32.mrf.mxu0  ;;  %6181 = vst [vmem:[#allocation22_spill] sm:$0xff] %v4184_v61  ;;  %v4209_v32 = vpack.c.bf16 %v636_v45, %v633_v18 }
 0x101   : > { %v4174_v38 = vpack.c.bf16 %v668_v8, %v665_v3  ;;  %v641_v3 = vadd.f32 %v3239_v62, %v4118_v20  ;;  %v644_v8 = vadd.f32 %v3239_v62, %v4126_v25  ;;  %v6184_v62 = vmov 17  }
 0x102   : > { %v4176_v17 = vpop.permute.xlu1 %902  ;;  %6183 = vst [vmem:[#allocation24_spill] sm:$0xff] %v4209_v32 }
 0x103   : > { %6180 = vst [vmem:[#allocation21_spill] sm:$0xff] %v4174_v38  ;;  %1231 = vperm.xlu1 %3526, %v3893_v4   ;;  %3332 = vmatprep.subr.bf16.mxu1 %v4174_v38  ;;  %v4203_v20 = vpack.c.bf16 %v644_v8, %v641_v3 }
 0x104   : > { %1380 = vperm.xlu0 %3536, %v3915_v9   ;;  %v4181_v57 = vpop.permute.xlu0 %972  ;;  %3333 = vmatpush3.bf16.msra.mxu1 %v4174_v38 }
 0x105   : > { %3334 = vmatprep.subr.bf16.mxu1 %v4172_v19  ;;  %6182 = vst [vmem:[#allocation23_spill] sm:$0xff] %v4203_v20 }
 0x106   : > { %v4187_v2 = vpop.permute.xlu1 %908 }
 0x107   : > { %1237 = vperm.xlu1 %3526, %v3906_v6  }
 0x108   : > { %3539 = vset.pattern.permute.xlu0 %v6055_v23  ;;  %3335 = vmatpush3.bf16.msra.mxu1 %v4172_v19 }
 0x109   : > { %1390 = vperm.xlu0 %3539, %v3909_v7   ;;  %v4195_v24 = vpop.permute.xlu0 %983  ;;  %3336 = vmatprep.subr.bf16.mxu1 %v4184_v61 }
 0x10a   : > { %v4200_v12 = vpop.permute.xlu1 %914 }
 0x10b   : > { %1245 = vperm.xlu1 %3526, %v3915_v9  }
 0x10c   : > { %3337 = vmatpush3.bf16.msra.mxu1 %v4184_v61 }
 0x10d   : > { %1403 = vperm.xlu0 %3539, %v3918_v10   ;;  %v4207_v25 = vpop.permute.xlu0 %995  ;;  %3338 = vmatprep.subr.bf16.mxu1 %v4203_v20 }
 0x10e   : > { %v4212_v11 = vpop.permute.xlu1 %922 }
 0x10f   : > { %3529 = vset.pattern.permute.xlu1 %v6184_v62  ;;  %v6188_v62 = vmov 18  }
 0x110   : > { %1255 = vperm.xlu1 %3529, %v3909_v7   ;;  %3339 = vmatpush3.bf16.msra.mxu1 %v4203_v20 }
 0x111   : > { %3540 = vset.pattern.permute.xlu0 %v6054_v15  ;;  %v4218_v0 = vpop.permute.xlu0 %1003  ;;  %3340 = vmatprep.subr.bf16.mxu1 %v4209_v32  ;;  %v6062_v15 = vmov 24  }
 0x112   : > { %6185 = vst [vmem:[#allocation25_spill] sm:$0xff] %v4218_v0  ;;  %1414 = vperm.xlu0 %3540, %v3896_v5  }
 0x113   : > { %v4222_v50 = vpop.permute.xlu1 %932 }
 0x114   : > { %1258 = vperm.xlu1 %3529, %v3893_v4   ;;  %3341 = vmatpush3.bf16.msra.mxu1 %v4209_v32 }
 0x116   : > { %1426 = vperm.xlu0 %3540, %v3906_v6   ;;  %v4227_v3 = vpop.permute.xlu0 %1013 }
 0x117   : > { %v4229_v8 = vpop.permute.xlu1 %935 }
 0x118   : > { %1268 = vperm.xlu1 %3529, %v3918_v10  }
 0x11a   : > { %1434 = vperm.xlu0 %3540, %v3915_v9   ;;  %v4233_v18 = vpop.permute.xlu0 %1026 }
 0x11b   : > { %6186 = vst [vmem:[#allocation26_spill] sm:$0xff] %v4233_v18  ;;  %v4235_v45 = vpop.permute.xlu1 %945  ;;  %v6070_v18 = vmov 27  }
 0x11c   : > { %6187 = vst [vmem:[#allocation27_spill] sm:$0xff] %v4235_v45  ;;  %3530 = vset.pattern.permute.xlu1 %v6188_v62  ;;  %v6067_v62 = vmov 25   ;;  %v6069_v45 = vmov 26  }
 0x11d   : > { %1279 = vperm.xlu1 %3530, %v3896_v5  }
 0x11e   : > { %3543 = vset.pattern.permute.xlu0 %v6062_v15 }
 0x11f   : > { %1444 = vperm.xlu0 %3543, %v3909_v7   ;;  %v4241_v23 = vpop.permute.xlu0 %1037 }
 0x120   : > { %6189 = vst [vmem:[#allocation28_spill] sm:$0xff] %v4241_v23  ;;  %v4243_v61 = vpop.permute.xlu1 %956 }
 0x121   : > { %1285 = vperm.xlu1 %3530, %v3893_v4  }
 0x123   : > { %1457 = vperm.xlu0 %3543, %v3918_v10   ;;  %v4247_v32 = vpop.permute.xlu0 %1049 }
 0x124   : > { %6190 = vst [vmem:[#allocation29_spill] sm:$0xff] %v4247_v32  ;;  %v4249_v38 = vpop.permute.xlu1 %962 }
 0x125   : > { %6191 = vst [vmem:[#allocation30_spill] sm:$0xff] %v4249_v38  ;;  %1291 = vperm.xlu1 %3530, %v3906_v6   ;;  %v6196_v38 = vmov 19  }
 0x127   : > { %3544 = vset.pattern.permute.xlu0 %v6067_v62  ;;  %v4253_v15 = vpop.permute.xlu0 %1057 }
 0x128   : > { %6192 = vst [vmem:[#allocation31_spill] sm:$0xff] %v4253_v15  ;;  %v4255_v19 = vpop.permute.xlu1 %968  ;;  %1468 = vperm.xlu0 %3544, %v3896_v5  }
 0x129   : > { %6193 = vst [vmem:[#allocation32_spill] sm:$0xff] %v4255_v19  ;;  %1299 = vperm.xlu1 %3530, %v3915_v9  }
 0x12c   : > { %v4259_v20 = vpop.permute.xlu1 %976  ;;  %1480 = vperm.xlu0 %3544, %v3906_v6   ;;  %v4262_v32 = vpop.permute.xlu0 %1067 }
 0x12d   : > { %6194 = vst [vmem:[#allocation33_spill] sm:$0xff] %v4259_v20  ;;  %6195 = vst [vmem:[#allocation34_spill] sm:$0xff] %v4262_v32  ;;  %3533 = vset.pattern.permute.xlu1 %v6196_v38 }
 0x12e   : > { %1309 = vperm.xlu1 %3533, %v3909_v7  }
 0x130   : > { %1488 = vperm.xlu0 %3544, %v3915_v9   ;;  %v4267_v62 = vpop.permute.xlu0 %1080 }
 0x131   : > { %6197 = vst [vmem:[#allocation35_spill] sm:$0xff] %v4267_v62  ;;  %v4269_v15 = vpop.permute.xlu1 %986 }
 0x132   : > { %6198 = vst [vmem:[#allocation36_spill] sm:$0xff] %v4269_v15  ;;  %1312 = vperm.xlu1 %3533, %v3893_v4   ;;  %v6201_v15 = vmov 20  }
 0x134   : > { %3547 = vset.pattern.permute.xlu0 %v6069_v45 }
 0x135   : > { %v4273_v20 = vpop.permute.xlu1 %989  ;;  %1498 = vperm.xlu0 %3547, %v3909_v7   ;;  %v4276_v32 = vpop.permute.xlu0 %1091 }
 0x136   : > { %1322 = vperm.xlu1 %3533, %v3918_v10  }
 0x139   : > { %v4279_v38 = vpop.permute.xlu1 %999  ;;  %1511 = vperm.xlu0 %3547, %v3918_v10   ;;  %v4282_v62 = vpop.permute.xlu0 %1103 }
 0x13a   : > { %6199 = vst [vmem:[#allocation37_spill] sm:$0xff] %v4279_v38  ;;  %6200 = vst [vmem:[#allocation38_spill] sm:$0xff] %v4282_v62  ;;  %3534 = vset.pattern.permute.xlu1 %v6201_v15 }
 0x13b   : > { %1333 = vperm.xlu1 %3534, %v3896_v5  }
 0x13d   : > { %3548 = vset.pattern.permute.xlu0 %v6070_v18  ;;  %v4287_v45 = vpop.permute.xlu0 %1111 }
 0x13e   : > { %6202 = vst [vmem:[#allocation39_spill] sm:$0xff] %v4287_v45  ;;  %v4289_v0 = vpop.permute.xlu1 %1010  ;;  %1522 = vperm.xlu0 %3548, %v3896_v5  }
 0x13f   : > { %6203 = vst [vmem:[#allocation40_spill] sm:$0xff] %v4289_v0  ;;  %1339 = vperm.xlu1 %3534, %v3893_v4   ;;  %v6071_v0 = vmov 28  }
 0x142   : > { %v4293_v38 = vpop.permute.xlu1 %1016  ;;  %1534 = vperm.xlu0 %3548, %v3906_v6   ;;  %v4296_v62 = vpop.permute.xlu0 %1228 }
 0x143   : > { %6204 = vst [vmem:[#allocation41_spill] sm:$0xff] %v4293_v38  ;;  %6205 = vst [vmem:[#allocation42_spill] sm:$0xff] %v4296_v62  ;;  %1345 = vperm.xlu1 %3534, %v3906_v6   ;;  %v6209_v38 = vmov 21  }
 0x146   : > { %v4299_v15 = vpop.permute.xlu1 %1022  ;;  %1542 = vperm.xlu0 %3548, %v3915_v9   ;;  %v4302_v18 = vpop.permute.xlu0 %1241 }
 0x147   : > { %6206 = vst [vmem:[#allocation43_spill] sm:$0xff] %v4299_v15  ;;  %6207 = vst [vmem:[#allocation44_spill] sm:$0xff] %v4302_v18  ;;  %1353 = vperm.xlu1 %3534, %v3915_v9   ;;  %v678_v15 = vlaneseq }
 0x14a   : > { %v4305_v45 = vpop.permute.xlu1 %1030  ;;  %3551 = vset.pattern.permute.xlu0 %v6071_v0 }
 0x14b   : > { %6208 = vst [vmem:[#allocation45_spill] sm:$0xff] %v4305_v45  ;;  %3537 = vset.pattern.permute.xlu1 %v6209_v38  ;;  %1552 = vperm.xlu0 %3551, %v3909_v7   ;;  %v4310_v62 = vpop.permute.xlu0 %1252  ;;  %v4319_v45 = vand.u32 127, %v678_v15  ;;  %v6073_v38 = vmov 29  }
 0x14c   : > { %1363 = vperm.xlu1 %3537, %v3909_v7  }
 0x14d   : > { %vm721_vm2 = vcmp.eq.s32.totalorder %v4011_v34, %v4319_v45  ;;  %vm692_vm3 = vcmp.eq.s32.totalorder %v3999_v29, %v4319_v45  ;;  %vm691_vm4 = vcmp.eq.s32.totalorder %v3993_v27, %v4319_v45  ;;  %vm722_vm5 = vcmp.eq.s32.totalorder %v4008_v33, %v4319_v45 }
 0x14e   : > { %v736_v15 = vsel %vm721_vm2, %v4017_v36, 0.0  ;;  %v737_v34 = vsel %vm722_vm5, %v4020_v37, 0.0  ;;  %vm775_vm6 = vcmp.eq.s32.totalorder %v4042_v46, %v4319_v45  ;;  %vm777_vm7 = vcmp.eq.s32.totalorder %v4057_v52, %v4319_v45 }
 0x14f   : > { %v4313_v19 = vpop.permute.xlu1 %1040  ;;  %1565 = vperm.xlu0 %3551, %v3918_v10   ;;  %v4316_v18 = vpop.permute.xlu0 %1264  ;;  %v6211_v29 = vmov 22   ;;  %vm693_vm8 = vcmp.eq.s32.totalorder %v3990_v26, %v4319_v45  ;;  %v709_v33 = vsel %vm691_vm4, %v3996_v28, 0.0  ;;  %vm723_vm9 = vcmp.eq.s32.totalorder %v4014_v35, %v4319_v45 }
 0x150   : > { %1366 = vperm.xlu1 %3537, %v3893_v4   ;;  %vm749_vm10 = vcmp.eq.s32.totalorder %v4029_v41, %v4319_v45  ;;  %v4358_v36 = vadd.f32 %v736_v15, %v709_v33  ;;  %v738_v37 = vsel %vm723_vm9, %v4022_v39, 0.0  ;;  %v790_v26 = vsel %vm775_vm6, %v4047_v48, 0.0  ;;  %v6215_v15 = vld [vmem:[#allocation8_spill] sm:$0xff] }
 0x151   : > { %vm776_vm11 = vcmp.eq.s32.totalorder %v4050_v49, %v4319_v45  ;;  %v792_v28 = vsel %vm777_vm7, %v4053_v51, 0.0  ;;  %vm748_vm12 = vcmp.eq.s32.totalorder %v4026_v40, %v4319_v45  ;;  %vm750_vm13 = vcmp.eq.s32.totalorder %v4032_v42, %v4319_v45  ;;  %v6217_v33 = vld [vmem:[#allocation4_spill] sm:$0xff] }
 0x152   : > { %v791_v35 = vsel %vm776_vm11, %v4063_v54, 0.0  ;;  %v763_v48 = vsel %vm748_vm12, %v4038_v44, 0.0  ;;  %v765_v49 = vsel %vm750_vm13, %v4044_v47, 0.0  ;;  %vm803_vm14 = vcmp.eq.s32.totalorder %v4061_v53, %v4319_v45  ;;  %v6212_v53 = vld [vmem:[#allocation10_spill] sm:$0xff] }
 0x153   : > { %v4321_v0 = vpop.permute.xlu1 %1043  ;;  %3552 = vset.pattern.permute.xlu0 %v6073_v38  ;;  %v4324_v23 = vpop.permute.xlu0 %1272  ;;  %v4385_v42 = vadd.f32 %v790_v26, %v763_v48  ;;  %vm883_vm15 = vcmp.eq.s32.totalorder %v4110_v16, %v4319_v45  ;;  %vm829_vm0 = vcmp.eq.s32.totalorder %v4074_v58, %v4319_v45  ;;  %vm857_vm2 = vcmp.eq.s32.totalorder %v4093_v1, %v4319_v45  ;;  %v6218_v58 = vld [vmem:[#allocation7_spill] sm:$0xff]  ;;  %v6220_v26 = vld [vmem:[#allocation12_spill] sm:$0xff]  ;;  %v6223_v48 = vld [vmem:[#allocation13_spill] sm:$0xff] }
 0x154   : > { %6210 = vst [vmem:[#allocation46_spill] sm:$0xff] %v4324_v23  ;;  %1376 = vperm.xlu1 %3537, %v3918_v10   ;;  %1576 = vperm.xlu0 %3552, %v3896_v5   ;;  %v710_v23 = vsel %vm692_vm3, %v4005_v31, 0.0  ;;  %v711_v31 = vsel %vm693_vm8, %v4002_v30, 0.0  ;;  %v764_v30 = vsel %vm749_vm10, %v4035_v43, 0.0  ;;  %v4387_v43 = vadd.f32 %v792_v28, %v765_v49 }
 0x155   : > { %v4361_v46 = vadd.f32 %v737_v34, %v710_v23  ;;  %v4383_v40 = vadd.f32 %v738_v37, %v711_v31  ;;  %v4391_v51 = vadd.f32 %v791_v35, %v764_v30  ;;  %vm885_vm3 = vcmp.eq.s32.totalorder %v4155_v14, %v4319_v45  ;;  %v6216_v34 = vld [vmem:[#allocation11_spill] sm:$0xff]  ;;  %v6219_v37 = vld [vmem:[#allocation5_spill] sm:$0xff] }
 0x156   : > { %vm802_vm4 = vcmp.eq.s32.totalorder %v4069_v56, %v4319_v45  ;;  %vm831_vm5 = vcmp.eq.s32.totalorder %v4103_v13, %v4319_v45  ;;  %vm856_vm6 = vcmp.eq.s32.totalorder %v4120_v22, %v4319_v45  ;;  %v3751_v47 = vmov 30   ;;  %v6214_v22 = vld [vmem:[#allocation3_spill] sm:$0xff]  ;;  %v6221_v14 = vld [vmem:[#allocation9_spill] sm:$0xff] }
 0x157   : > { %v4337_v38 = vpop.permute.xlu1 %1053  ;;  %vm804_vm7 = vcmp.eq.s32.totalorder %v4076_v59, %v4319_v45  ;;  %v871_v52 = vsel %vm856_vm6, %v4135_v21, 0.0  ;;  %v898_v54 = vsel %vm883_vm15, %v6212_v53, 0.0  ;;  %v844_v23 = vsel %vm829_vm0, %v6214_v22, 0.0 }
 0x158   : > { %3538 = vset.pattern.permute.xlu1 %v6211_v29  ;;  %1588 = vperm.xlu0 %3552, %v3906_v6   ;;  %v4347_v27 = vpop.permute.xlu0 %1282  ;;  %v872_v21 = vsel %vm857_vm2, %v6215_v15, 0.0  ;;  %v900_v29 = vsel %vm885_vm3, %v6216_v34, 0.0  ;;  %v817_v31 = vsel %vm802_vm4, %v6217_v33, 0.0  ;;  %vm830_vm9 = vcmp.eq.s32.totalorder %v6218_v58, %v4319_v45  ;;  %v6225_v15 = vld [vmem:[#allocation6_spill] sm:$0xff] }
 0x159   : > { %1387 = vperm.xlu1 %3538, %v3896_v5   ;;  %v846_v1 = vsel %vm831_vm5, %v6219_v37, 0.0  ;;  %vm858_vm10 = vcmp.eq.s32.totalorder %v6220_v26, %v4319_v45  ;;  %v845_v28 = vsel %vm830_vm9, %v6221_v14, 0.0  ;;  %v1126_v30 = vadd.f32 %v898_v54, %v871_v52  ;;  %v6226_v34 = vld [vmem:[#allocation14_spill] sm:$0xff] }
 0x15a   : > { %vm911_vm11 = vcmp.eq.s32.totalorder %v6223_v48, %v4319_v45  ;;  %v1123_v22 = vadd.f32 %v844_v23, %v817_v31  ;;  %v819_v52 = vsel %vm804_vm7, %v6225_v15, 0.0  ;;  %vm939_vm13 = vcmp.eq.s32.totalorder %v4229_v8, %v4319_v45  ;;  %v6236_v26 = vld [vmem:[#allocation38_spill] sm:$0xff]  ;;  %v6241_v15 = vld [vmem:[#allocation33_spill] sm:$0xff] }
 0x15b   : > { %v1125_v54 = vadd.f32 %v846_v1, %v819_v52  ;;  %vm991_vm15 = vcmp.eq.s32.totalorder %v4195_v24, %v4319_v45  ;;  %vm910_vm0 = vcmp.eq.s32.totalorder %v4176_v17, %v4319_v45  ;;  %v6229_v31 = vmov 23   ;;  %v6238_v48 = vld [vmem:[#allocation30_spill] sm:$0xff] }
 0x15c   : > { %v4373_v39 = vpop.permute.xlu1 %1064  ;;  %1596 = vperm.xlu0 %3552, %v3915_v9   ;;  %v4376_v41 = vpop.permute.xlu0 %1295  ;;  %vm912_vm2 = vcmp.eq.s32.totalorder %v4187_v2, %v4319_v45  ;;  %vm993_vm3 = vcmp.eq.s32.totalorder %v4273_v20, %v4319_v45  ;;  %vm1019_vm4 = vcmp.eq.s32.totalorder %v4227_v3, %v4319_v45  ;;  %v925_v17 = vsel %vm910_vm0, %v4200_v12, 0.0  ;;  %v6232_v2 = vld [vmem:[#allocation32_spill] sm:$0xff]  ;;  %v6233_v20 = vld [vmem:[#allocation25_spill] sm:$0xff] }
 0x15d   : > { %1393 = vperm.xlu1 %3538, %v3893_v4   ;;  %v818_v4 = vsel %vm803_vm14, %v4066_v55, 0.0  ;;  %v6213_v55 = vld [vmem:[#allocation17_spill] sm:$0xff]  ;;  %vm965_vm14 = vcmp.eq.s32.totalorder %v4170_v60, %v4319_v45  ;;  %v6086_v60 = vmov 31   ;;  %v927_v1 = vsel %vm912_vm2, %v4212_v11, 0.0  ;;  %v6234_v11 = vld [vmem:[#allocation26_spill] sm:$0xff]  ;;  %v6235_v3 = vld [vmem:[#allocation40_spill] sm:$0xff] }
 0x15e   : > { %vm884_vm8 = vcmp.eq.s32.totalorder %v6213_v55, %v4319_v45  ;;  %v6224_v55 = vld [vmem:[#allocation16_spill] sm:$0xff]  ;;  %v980_v37 = vsel %vm965_vm14, %v4181_v57, 0.0  ;;  %v1006_v57 = vsel %vm991_vm15, %v4207_v25, 0.0  ;;  %vm1099_vm5 = vcmp.eq.s32.totalorder %v4276_v32, %v4319_v45 }
 0x15f   : > { %vm937_vm12 = vcmp.eq.s32.totalorder %v6224_v55, %v4319_v45  ;;  %vm938_vm6 = vcmp.eq.s32.totalorder %v4222_v50, %v4319_v45  ;;  %vm964_vm7 = vcmp.eq.s32.totalorder %v4243_v61, %v4319_v45  ;;  %v1008_v24 = vsel %vm993_vm3, %v6233_v20, 0.0  ;;  %v6243_v50 = vld [vmem:[#allocation34_spill] sm:$0xff]  ;;  %v6248_v20 = vld [vmem:[#allocation45_spill] sm:$0xff] }
 0x160   : > { %v4406_v44 = vpop.permute.xlu1 %1070  ;;  %3555 = vset.pattern.permute.xlu0 %v3751_v47  ;;  %v979_v12 = vsel %vm964_vm7, %v6232_v2, 0.0  ;;  %v1034_v25 = vsel %vm1019_vm4, %v6234_v11, 0.0  ;;  %vm1072_vm9 = vcmp.eq.s32.totalorder %v4373_v39, %v4319_v45  ;;  %v1114_v14 = vsel %vm1099_vm5, %v6236_v26, 0.0  ;;  %v6237_v39 = vld [vmem:[#allocation27_spill] sm:$0xff]  ;;  %v4553_v2 = vld [vmem:[%s3890_s28 + $0x8] sm:$0xff] }
 0x161   : > { %1399 = vperm.xlu1 %3538, %v3906_v6   ;;  %1606 = vperm.xlu0 %3555, %v3909_v7   ;;  %v4417_v16 = vpop.permute.xlu0 %1306  ;;  %v899_v6 = vsel %vm884_vm8, %v4165_v63, 0.0  ;;  %v6222_v63 = vld [vmem:[#allocation15_spill] sm:$0xff]  ;;  %vm1073_vm14 = vcmp.eq.s32.totalorder %v6243_v50, %v4319_v45  ;;  %vm1074_vm0 = vcmp.eq.s32.totalorder %v4406_v44, %v4319_v45  ;;  %vm1046_vm3 = vcmp.eq.s32.totalorder %v4313_v19, %v4319_v45 }
 0x162   : > { %v873_v35 = vsel %vm858_vm10, %v6222_v63, 0.0  ;;  %v1127_v53 = vadd.f32 %v899_v6, %v872_v21  ;;  %v1124_v21 = vadd.f32 %v845_v28, %v818_v4  ;;  %v6228_v4 = vld [vmem:[#allocation19_spill] sm:$0xff]  ;;  %vm1018_vm10 = vcmp.eq.s32.totalorder %v6235_v3, %v4319_v45  ;;  %v4517_v28 = vld [vmem:[%s3884_s25 + $0x10] sm:$0xf] }
 0x163   : > { %v1128_v49 = vadd.f32 %v900_v29, %v873_v35  ;;  %v4461_v29 = vsel %vm911_vm11, %v6226_v34, 0.0  ;;  %v954_v33 = vsel %vm939_vm13, %v6228_v4, 0.0  ;;  %vm1047_vm11 = vcmp.eq.s32.totalorder %v4321_v0, %v4319_v45  ;;  %v6244_v34 = vld [vmem:[#allocation41_spill] sm:$0xff]  ;;  %v6249_v3 = vld [vmem:[#allocation39_spill] sm:$0xff] }
 0x164   : > { %v1077_v56 = vpop.permute.xlu1 %1076  ;;  %v4474_v8 = vadd.f32 %v1127_v53, %v1124_v21  ;;  %v953_v35 = vsel %vm938_vm6, %v6237_v39, 0.0  ;;  %v6240_v53 = vld [vmem:[#allocation29_spill] sm:$0xff]  ;;  %vm1020_vm15 = vcmp.eq.s32.totalorder %v6244_v34, %v4319_v45  ;;  %v1061_v26 = vsel %vm1046_vm3, %v4337_v38, 0.0 }
 0x165   : > { %1407 = vperm.xlu1 %3538, %v3915_v9   ;;  %1619 = vperm.xlu0 %3555, %v3918_v10   ;;  %v4452_v13 = vpop.permute.xlu0 %1318  ;;  %v4465_v9 = vadd.f32 %v1126_v30, %v1123_v22  ;;  %v6227_v10 = vld [vmem:[#allocation18_spill] sm:$0xff]  ;;  %v4472_v6 = vadd.f32 %v1128_v49, %v1125_v54  ;;  %v1087_v61 = vsel %vm1072_vm9, %v1077_v56, 0.0  ;;  %v4521_v30 = vld [vmem:[%s3890_s28] sm:$0xff]  ;;  %v6239_v56 = vld [vmem:[#allocation43_spill] sm:$0xff]  ;;  %v1132_v22 = vadd.f32 %v1006_v57, %v979_v12 }
 0x166   : > { %v4468_v23 = vsel %vm937_vm12, %v6227_v10, 0.0  ;;  %vm966_vm12 = vcmp.eq.s32.totalorder %v6238_v48, %v4319_v45  ;;  %v1033_v49 = vsel %vm1018_vm10, %v6239_v56, 0.0  ;;  %v6242_v54 = vld [vmem:[#allocation36_spill] sm:$0xff]  ;;  %v6245_v10 = vld [vmem:[#allocation31_spill] sm:$0xff]  ;;  %v4557_v12 = vld [vmem:[%s3890_s28 + $0x10] sm:$0xf]  ;;  %v1136_v34 = vadd.f32 %v1061_v26, %v1034_v25 }
 0x167   : > { %v981_v52 = vsel %vm966_vm12, %v6241_v15, 0.0  ;;  %vm992_vm13 = vcmp.eq.s32.totalorder %v6242_v54, %v4319_v45  ;;  %v1062_v4 = vsel %vm1047_vm11, %v6245_v10, 0.0  ;;  %6247 = vst [vmem:[#allocation17_spill] sm:$0xff] %v4557_v12  ;;  %v1129_v56 = vadd.f32 %v4468_v23, %v925_v17  ;;  %v6252_v54 = vld [vmem:[#allocation23_spill] sm:$0xff]  ;;  %v4578_v23 = vld [vmem:[%s3884_s25] sm:$0xff] }
 0x168   : > { %v1085_v59 = vpop.permute.xlu1 %1084  ;;  %v1134_v21 = vadd.f32 %v1008_v24, %v981_v52  ;;  %v1035_v24 = vsel %vm1020_vm15, %v6248_v20, 0.0  ;;  %v6251_v38 = vmov 24   ;;  %v1141_v17 = vadd.f32 %v4385_v42, %v4358_v36 }
 0x169   : > { %3541 = vset.pattern.permute.xlu1 %v6229_v31  ;;  %3556 = vset.pattern.permute.xlu0 %v6086_v60  ;;  %v4481_v58 = vpop.permute.xlu0 %1326  ;;  %v1089_v11 = vsel %vm1074_vm0, %v1085_v59, 0.0  ;;  %v1130_v59 = vadd.f32 %v953_v35, %v4461_v29  ;;  %v1147_v50 = vadd.f32 %v1132_v22, %v1129_v56  ;;  %v1142_v25 = vadd.f32 %v4391_v51, %v4361_v46 }
 0x16a   : > { %6230 = vst [vmem:[#allocation10_spill] sm:$0xff] %v4481_v58  ;;  %1417 = vperm.xlu1 %3541, %v3909_v7   ;;  %1630 = vperm.xlu0 %3556, %v3896_v5   ;;  %v1131_v7 = vadd.f32 %v954_v33, %v927_v1  ;;  %v6231_v5 = vld [vmem:[#allocation28_spill] sm:$0xff]  ;;  %v1138_v33 = vadd.f32 %v1114_v14, %v1087_v61  ;;  %v6246_v1 = vld [vmem:[#allocation37_spill] sm:$0xff]  ;;  %v6250_v14 = vld [vmem:[#allocation35_spill] sm:$0xff]  ;;  %vm6160_vm5 = vcmask 654336   ;;  %v6282_v58 = vmov 32  }
 0x16b   : > { %vm1045_vm8 = vcmp.eq.s32.totalorder %v6231_v5, %v4319_v45  ;;  %v1007_v57 = vsel %vm992_vm13, %v6246_v1, 0.0  ;;  %v1137_v61 = vadd.f32 %v1062_v4, %v1035_v24  ;;  %v1088_v39 = vsel %vm1073_vm14, %v6250_v14, 0.0 }
 0x16c   : > { %v1060_v55 = vsel %vm1045_vm8, %v6240_v53, 0.0  ;;  %v1153_v36 = vadd.f32 %v4465_v9, %v1141_v17  ;;  %v6263_v17 = vmov 27   ;;  %vm1260_vm7 = vcmp.eq.s32.totalorder %v4310_v62, %v4319_v45 }
 0x16d   : > { %v1095_v32 = vpop.permute.xlu1 %1094  ;;  %v1135_v5 = vadd.f32 %v1060_v55, %v1033_v49  ;;  %v1133_v49 = vadd.f32 %v1007_v57, %v980_v37  ;;  %v1149_v55 = vadd.f32 %v1134_v21, %v1131_v7  ;;  %v6085_v37 = vmov 32  }
 0x16e   : > { %1420 = vperm.xlu1 %3541, %v4517_v28   ;;  %1642 = vperm.xlu0 %3556, %v4521_v30   ;;  %v4524_v63 = vpop.permute.xlu0 %1336  ;;  %vm1100_vm4 = vcmp.eq.s32.totalorder %v1095_v32, %v4319_v45  ;;  %v1143_v7 = vadd.f32 %v4387_v43, %v4383_v40  ;;  %v1154_v40 = vadd.f32 %v4474_v8, %v1142_v25  ;;  %v6078_v25 = vmov 36  }
 0x16f   : > { %v1150_v53 = vadd.f32 %v1138_v33, %v1135_v5  ;;  %v1148_v35 = vadd.f32 %v1133_v49, %v1130_v59  ;;  %v6081_v49 = vmov 34   ;;  %vm1288_vm8 = vcmp.eq.s32.totalorder %v4347_v27, %v4319_v45 }
 0x170   : > { %v1155_v4 = vadd.f32 %v4472_v6, %v1143_v7  ;;  %vm1314_vm9 = vcmp.eq.s32.totalorder %v4417_v16, %v4319_v45  ;;  %vm1342_vm10 = vcmp.eq.s32.totalorder %v4524_v63, %v4319_v45  ;;  %v1275_v62 = vsel %vm1260_vm7, %v4316_v18, 0.0 }
 0x171   : > { %v1098_v31 = vpop.permute.xlu1 %1097  ;;  %v1156_v21 = vadd.f32 %v1150_v53, %v1147_v50  ;;  %v6259_v53 = vmov 26   ;;  %v6080_v50 = vmov 35   ;;  %v1303_v27 = vsel %vm1288_vm8, %v4376_v41, 0.0 }
 0x172   : > { %vm1101_vm2 = vcmp.eq.s32.totalorder %v1098_v31, %v4319_v45  ;;  %1430 = vperm.xlu1 %3541, %v4553_v2   ;;  %1650 = vperm.xlu0 %3556, %v4557_v12   ;;  %v4560_v0 = vpop.permute.xlu0 %1349  ;;  %v6253_v31 = vld [vmem:[#allocation20_spill] sm:$0xff]  ;;  %v1329_v16 = vsel %vm1314_vm9, %v4452_v13, 0.0 }
 0x173   : > { %v1116_v44 = vsel %vm1101_vm2, %v6249_v3, 0.0  ;;  %v1159_v51 = vadd.f32 %v1156_v21, %v1153_v36  ;;  %v4619_v3 = vld [vmem:[%s3884_s25 + $0x8] sm:$0xff] }
 0x174   : > { %v1140_v48 = vadd.f32 %v1116_v44, %v1089_v11  ;;  %v6257_v11 = vmov 25   ;;  %v6266_v21 = vld [vmem:[#allocation21_spill] sm:$0xff] }
 0x175   : > { %v1108_v19 = vpop.permute.xlu1 %1107 }
 0x176   : > { %v1152_v15 = vadd.f32 %v1140_v48, %v1137_v61  ;;  %v1115_v52 = vsel %vm1100_vm4, %v1108_v19, 0.0  ;;  %3542 = vset.pattern.permute.xlu1 %v6251_v38  ;;  %1710 = vrot.lane.b32.xlu0 %v6252_v54, %s3753_s17  ;;  %v6084_v61 = vmov 33   ;;  %v6091_v54 = vmov 45  }
 0x177   : > { %v1139_v10 = vadd.f32 %v1115_v52, %v1088_v39  ;;  %1441 = vperm.xlu1 %3542, %v4578_v23   ;;  %3558 = vset.pattern.permute.xlu0 %v6085_v37  ;;  %v4582_v29 = vpop.permute.xlu0 %1360 }
 0x178   : > { %v1158_v32 = vadd.f32 %v1152_v15, %v1149_v55  ;;  %vm1368_vm11 = vcmp.eq.s32.totalorder %v4582_v29, %v4319_v45  ;;  %v4968_v29 = vsel %vm1342_vm10, %v4560_v0, 0.0 }
 0x179   : > { %v1151_v22 = vadd.f32 %v1139_v10, %v1136_v34 }
 0x17a   : > { %v4591_v33 = vpop.permute.xlu1 %1225  ;;  %1714 = vrot.lane.b32.xlu0 %v6253_v31, %s3753_s17  ;;  %v1161_v46 = vadd.f32 %v1158_v32, %v1155_v4  ;;  %v6074_v4 = vmov 38  }
 0x17b   : > { %1447 = vperm.xlu1 %3542, %v4517_v28   ;;  %v1157_v42 = vadd.f32 %v1151_v22, %v1148_v35  ;;  %v4598_v43 = vpop.permute.xlu0 %1372  ;;  %vm1233_vm12 = vcmp.eq.s32.totalorder %v4591_v33, %v4319_v45 }
 0x17c   : > { %v1163_v9 = vpack.c.bf16 %v1161_v46, %v1161_v46 }
 0x17d   : > { %v1160_v1 = vadd.f32 %v1157_v42, %v1154_v40  ;;  %v6267_v42 = vmov 28  }
 0x17e   : > { %v4600_v57 = vpop.permute.xlu1 %1231  ;;  %1778 = vperm.xlu0 %3558, %v4578_v23  }
 0x17f   : > { %6254 = vst [vmem:[#allocation3_spill] sm:$0xff] %v4600_v57  ;;  %1453 = vperm.xlu1 %3542, %v4521_v30   ;;  %v1162_v6 = vpack.c.bf16 %v1160_v1, %v1159_v51  ;;  %v4604_v5 = vpop.permute.xlu0 %1380 }
 0x180   : > { %6255 = vst [vmem:[#allocation8_spill] sm:$0xff] %v4604_v5 }
 0x181   : > { %3342 = vmatprep.mubr.msk.bf16.mxu1 %vm6160_vm5, %v1162_v6 }
 0x182   : > { %v4607_v8 = vpop.permute.xlu1 %1237  ;;  %1790 = vperm.xlu0 %3558, %v4521_v30   ;;  %3343 = vmatmul.mubr.msk.bf16.vlgmr.msra.gmra.mxu1 %vm6160_vm5, %v1163_v9  ;;  %v6076_v9 = vmov 39  }
 0x183   : > { %1461 = vperm.xlu1 %3542, %v4557_v12   ;;  %v1248_v63 = vsel %vm1233_vm12, %v4607_v8, 0.0 }
 0x184   : > { %v4612_v20 = vpop.permute.xlu0 %1390  ;;  %v4989_v0 = vadd.f32 %v1275_v62, %v1248_v63 }
 0x185   : > { %vm1396_vm13 = vcmp.eq.s32.totalorder %v4612_v20, %v4319_v45 }
 0x186   : > { %v4614_v24 = vpop.permute.xlu1 %1245  ;;  %1798 = vperm.xlu0 %3558, %v4557_v12  }
 0x187   : > { %6256 = vst [vmem:[#allocation11_spill] sm:$0xff] %v4614_v24  ;;  %3545 = vset.pattern.permute.xlu1 %v6257_v11 }
 0x188   : > { %1471 = vperm.xlu1 %3545, %v4619_v3   ;;  %v4622_v44 = vpop.permute.xlu0 %1403 }
 0x189   : > { %v1411_v8 = vsel %vm1396_vm13, %v4622_v44, 0.0 }
 0x18a   : > { %3561 = vset.pattern.permute.xlu0 %v6084_v61 }
 0x18b   : > { %v4625_v26 = vpop.permute.xlu1 %1255  ;;  %1808 = vperm.xlu0 %3561, %v4619_v3  }
 0x18c   : > { %1474 = vperm.xlu1 %3545, %v4517_v28   ;;  %vm1261_vm14 = vcmp.eq.s32.totalorder %v4625_v26, %v4319_v45 }
 0x18d   : > { %v4629_v14 = vpop.permute.xlu0 %1414 }
 0x18e   : > { %vm1422_vm0 = vcmp.eq.s32.totalorder %v4629_v14, %v4319_v45 }
 0x18f   : > { %v4631_v39 = vpop.permute.xlu1 %1258  ;;  %1821 = vperm.xlu0 %3561, %v4553_v2  }
 0x190   : > { %6258 = vst [vmem:[#allocation4_spill] sm:$0xff] %v4631_v39  ;;  %1484 = vperm.xlu1 %3545, %v4553_v2   ;;  %v6108_v39 = vmov 46  }
 0x191   : > { %v4635_v48 = vpop.permute.xlu0 %1426 }
 0x192   : > { %v1437_v20 = vsel %vm1422_vm0, %v4635_v48, 0.0 }
 0x193   : > { %v4637_v56 = vpop.permute.xlu1 %1268  ;;  %3562 = vset.pattern.permute.xlu0 %v6081_v49  ;;  %v6087_v49 = vmov 42  }
 0x194   : > { %3546 = vset.pattern.permute.xlu1 %v6259_v53  ;;  %1832 = vperm.xlu0 %3562, %v4578_v23   ;;  %v1276_v18 = vsel %vm1261_vm14, %v4637_v56, 0.0  ;;  %v6330_v56 = vmov 41  }
 0x195   : > { %1495 = vperm.xlu1 %3546, %v4578_v23   ;;  %v4643_v19 = vpop.permute.xlu0 %1434 }
 0x196   : > { %6260 = vst [vmem:[#allocation7_spill] sm:$0xff] %v4643_v19  ;;  %v6095_v19 = vmov 37  }
 0x198   : > { %v4645_v59 = vpop.permute.xlu1 %1279  ;;  %1844 = vperm.xlu0 %3562, %v4521_v30  }
 0x199   : > { %1501 = vperm.xlu1 %3546, %v4517_v28   ;;  %vm1287_vm15 = vcmp.eq.s32.totalorder %v4645_v59, %v4319_v45  ;;  %v6138_v59 = vmov 62  }
 0x19a   : > { %v4649_v55 = vpop.permute.xlu0 %1444 }
 0x19b   : > { %vm1450_vm3 = vcmp.eq.s32.totalorder %v4649_v55, %v4319_v45 }
 0x19c   : > { %v4651_v15 = vpop.permute.xlu1 %1285  ;;  %1852 = vperm.xlu0 %3562, %v4557_v12  }
 0x19d   : > { %6261 = vst [vmem:[#allocation5_spill] sm:$0xff] %v4651_v15  ;;  %1507 = vperm.xlu1 %3546, %v4521_v30   ;;  %v6284_v15 = vld [vmem:[#allocation22_spill] sm:$0xff] }
 0x19e   : > { %v4655_v52 = vpop.permute.xlu0 %1457 }
 0x19f   : > { %v1465_v44 = vsel %vm1450_vm3, %v4655_v52, 0.0 }
 0x1a0   : > { %v4657_v38 = vpop.permute.xlu1 %1291  ;;  %3565 = vset.pattern.permute.xlu0 %v6080_v50 }
 0x1a1   : > { %1515 = vperm.xlu1 %3546, %v4557_v12   ;;  %1862 = vperm.xlu0 %3565, %v4619_v3   ;;  %v1302_v41 = vsel %vm1287_vm15, %v4657_v38, 0.0 }
 0x1a3   : > { %v4662_v34 = vpop.permute.xlu0 %1468 }
 0x1a4   : > { %v4664_v10 = vpop.permute.xlu1 %1299 }
 0x1a5   : > { %6262 = vst [vmem:[#allocation12_spill] sm:$0xff] %v4664_v10  ;;  %3549 = vset.pattern.permute.xlu1 %v6263_v17  ;;  %1875 = vperm.xlu0 %3565, %v4553_v2   ;;  %v6082_v17 = vmov 41   ;;  %v6101_v10 = vmov 40  }
 0x1a6   : > { %1525 = vperm.xlu1 %3549, %v4619_v3  }
 0x1a7   : > { %v4669_v7 = vpop.permute.xlu0 %1480 }
 0x1a9   : > { %v4671_v32 = vpop.permute.xlu1 %1309  ;;  %3566 = vset.pattern.permute.xlu0 %v6078_v25 }
 0x1aa   : > { %1528 = vperm.xlu1 %3549, %v4517_v28   ;;  %1886 = vperm.xlu0 %3566, %v4578_v23   ;;  %vm1315_vm2 = vcmp.eq.s32.totalorder %v4671_v32, %v4319_v45  ;;  %v5011_v32 = vadd.f32 %v1329_v16, %v1302_v41 }
 0x1ab   : > { %v4676_v35 = vpop.permute.xlu0 %1488 }
 0x1ac   : > { %6264 = vst [vmem:[#allocation9_spill] sm:$0xff] %v4676_v35 }
 0x1ad   : > { %v4678_v22 = vpop.permute.xlu1 %1312 }
 0x1ae   : > { %6265 = vst [vmem:[#allocation15_spill] sm:$0xff] %v4678_v22  ;;  %1538 = vperm.xlu1 %3549, %v4553_v2   ;;  %2264 = vrot.lane.b32.xlu0 %v6266_v21, %s3759_s18  ;;  %v6299_v22 = vmov 34  }
 0x1af   : > { %3570 = vset.pattern.permute.xlu0 %v6074_v4 }
 0x1b0   : > { %v4684_v36 = vpop.permute.xlu0 %1498 }
 0x1b1   : > { %v4686_v40 = vpop.permute.xlu1 %1322  ;;  %vm1504_vm7 = vcmp.eq.s32.totalorder %v4684_v36, %v4319_v45 }
 0x1b2   : > { %3550 = vset.pattern.permute.xlu1 %v6267_v42  ;;  %1943 = vperm.xlu0 %3570, %v4619_v3   ;;  %v1330_v33 = vsel %vm1315_vm2, %v4686_v40, 0.0 }
 0x1b3   : > { %1549 = vperm.xlu1 %3550, %v4578_v23   ;;  %v5023_v40 = vadd.f32 %v1330_v33, %v1303_v27 }
 0x1b4   : > { %v4691_v46 = vpop.permute.xlu0 %1511 }
 0x1b5   : > { %v1519_v55 = vsel %vm1504_vm7, %v4691_v46, 0.0  ;;  %v6332_v46 = vmov 42  }
 0x1b6   : > { %v4693_v51 = vpop.permute.xlu1 %1333  ;;  %1946 = vperm.xlu0 %3570, %v4517_v28  }
 0x1b7   : > { %1555 = vperm.xlu1 %3550, %v4517_v28   ;;  %vm1341_vm4 = vcmp.eq.s32.totalorder %v4693_v51, %v4319_v45 }
 0x1b9   : > { %v4697_v1 = vpop.permute.xlu0 %1522 }
 0x1ba   : > { %v4699_v6 = vpop.permute.xlu1 %1339  ;;  %3583 = vset.pattern.permute.xlu0 %v6076_v9  ;;  %v6271_v9 = vmov 29   ;;  %vm1530_vm8 = vcmp.eq.s32.totalorder %v4697_v1, %v4319_v45 }
 0x1bb   : > { %6268 = vst [vmem:[#allocation13_spill] sm:$0xff] %v4699_v6  ;;  %1561 = vperm.xlu1 %3550, %v4521_v30   ;;  %1973 = vperm.xlu0 %3583, %v4517_v28   ;;  %v6281_v6 = vld [vmem:[#allocation24_spill] sm:$0xff] }
 0x1bd   : > { %v4704_v11 = vpop.permute.xlu0 %1534 }
 0x1be   : > { %v4706_v53 = vpop.permute.xlu1 %1345  ;;  %v1545_v52 = vsel %vm1530_vm8, %v4704_v11, 0.0 }
 0x1bf   : > { %1569 = vperm.xlu1 %3550, %v4557_v12   ;;  %3584 = vset.pattern.permute.xlu0 %v6082_v17  ;;  %v1356_v26 = vsel %vm1341_vm4, %v4706_v53, 0.0 }
 0x1c0   : > { %2024 = vperm.xlu0 %3584, %v4619_v3  }
 0x1c1   : > { %v4711_v42 = vpop.permute.xlu0 %1542 }
 0x1c2   : > { %6269 = vst [vmem:[#allocation16_spill] sm:$0xff] %v4711_v42  ;;  %v4713_v4 = vpop.permute.xlu1 %1353  ;;  %v6278_v42 = vmov 31  }
 0x1c3   : > { %6270 = vst [vmem:[#allocation6_spill] sm:$0xff] %v4713_v4  ;;  %3553 = vset.pattern.permute.xlu1 %v6271_v9  ;;  %v6089_v9 = vmov 44  }
 0x1c4   : > { %1579 = vperm.xlu1 %3553, %v4619_v3   ;;  %2027 = vperm.xlu0 %3584, %v4517_v28  }
 0x1c6   : > { %v4718_v25 = vpop.permute.xlu0 %1552 }
 0x1c7   : > { %v4720_v50 = vpop.permute.xlu1 %1363  ;;  %vm1558_vm10 = vcmp.eq.s32.totalorder %v4718_v25, %v4319_v45 }
 0x1c8   : > { %1582 = vperm.xlu1 %3553, %v4517_v28   ;;  %3588 = vset.pattern.permute.xlu0 %v6087_v49 }
 0x1c9   : > { %2054 = vperm.xlu0 %3588, %v4517_v28  }
 0x1ca   : > { %v4725_v17 = vpop.permute.xlu0 %1565 }
 0x1cb   : > { %6272 = vst [vmem:[#allocation14_spill] sm:$0xff] %v4725_v17  ;;  %v4727_v61 = vpop.permute.xlu1 %1366  ;;  %v6112_v17 = vmov 50  }
 0x1cc   : > { %6273 = vst [vmem:[#allocation18_spill] sm:$0xff] %v4727_v61  ;;  %1592 = vperm.xlu1 %3553, %v4553_v2  }
 0x1cd   : > { %3589 = vset.pattern.permute.xlu0 %v6089_v9 }
 0x1ce   : > { %2105 = vperm.xlu0 %3589, %v4619_v3  }
 0x1cf   : > { %v4732_v37 = vpop.permute.xlu1 %1376  ;;  %v4734_v60 = vpop.permute.xlu0 %1576 }
 0x1d0   : > { %3554 = vset.pattern.permute.xlu1 %v3751_v47  ;;  %v6093_v47 = vmov 47   ;;  %vm1584_vm13 = vcmp.eq.s32.totalorder %v4734_v60, %v4319_v45 }
 0x1d1   : > { %1603 = vperm.xlu1 %3554, %v4578_v23  }
 0x1d2   : > { %2108 = vperm.xlu0 %3589, %v4517_v28  }
 0x1d3   : > { %v4739_v49 = vpop.permute.xlu0 %1588 }
 0x1d4   : > { %v4741_v31 = vpop.permute.xlu1 %1387 }
 0x1d5   : > { %1609 = vperm.xlu1 %3554, %v4517_v28   ;;  %vm1395_vm12 = vcmp.eq.s32.totalorder %v4741_v31, %v4319_v45 }
 0x1d6   : > { %3593 = vset.pattern.permute.xlu0 %v6091_v54 }
 0x1d7   : > { %2135 = vperm.xlu0 %3593, %v4517_v28   ;;  %v4746_v9 = vpop.permute.xlu0 %1596 }
 0x1d8   : > { %6274 = vst [vmem:[#allocation19_spill] sm:$0xff] %v4746_v9  ;;  %v4748_v24 = vpop.permute.xlu1 %1393 }
 0x1d9   : > { %6275 = vst [vmem:[#allocation28_spill] sm:$0xff] %v4748_v24  ;;  %1615 = vperm.xlu1 %3554, %v4521_v30  }
 0x1db   : > { %3594 = vset.pattern.permute.xlu0 %v6093_v47 }
 0x1dc   : > { %v4752_v4 = vpop.permute.xlu1 %1399  ;;  %2186 = vperm.xlu0 %3594, %v4619_v3   ;;  %v4755_v35 = vpop.permute.xlu0 %1606 }
 0x1dd   : > { %1623 = vperm.xlu1 %3554, %v4557_v12   ;;  %vm1612_vm3 = vcmp.eq.s32.totalorder %v4755_v35, %v4319_v45  ;;  %v6340_v35 = vld [vmem:[#allocation17_spill] sm:$0xff] }
 0x1e0   : > { %v4758_v54 = vpop.permute.xlu1 %1407  ;;  %2189 = vperm.xlu0 %3594, %v4517_v28   ;;  %v4761_v9 = vpop.permute.xlu0 %1619 }
 0x1e1   : > { %6276 = vst [vmem:[#allocation32_spill] sm:$0xff] %v4758_v54  ;;  %6277 = vst [vmem:[#allocation25_spill] sm:$0xff] %v4761_v9  ;;  %3557 = vset.pattern.permute.xlu1 %v6278_v42 }
 0x1e2   : > { %1633 = vperm.xlu1 %3557, %v4619_v3  }
 0x1e4   : > { %3597 = vset.pattern.permute.xlu0 %v6095_v19 }
 0x1e5   : > { %v4766_v47 = vpop.permute.xlu1 %1417  ;;  %1913 = vperm.xlu0 %3597, %v4578_v23   ;;  %v4769_v24 = vpop.permute.xlu0 %1630 }
 0x1e6   : > { %1636 = vperm.xlu1 %3557, %v4517_v28   ;;  %vm1638_vm9 = vcmp.eq.s32.totalorder %v4769_v24, %v4319_v45  ;;  %vm1423_vm15 = vcmp.eq.s32.totalorder %v4766_v47, %v4319_v45 }
 0x1e9   : > { %v4772_v54 = vpop.permute.xlu1 %1420  ;;  %1919 = vperm.xlu0 %3597, %v4517_v28   ;;  %v4775_v5 = vpop.permute.xlu0 %1642 }
 0x1ea   : > { %6279 = vst [vmem:[#allocation26_spill] sm:$0xff] %v4772_v54  ;;  %1646 = vperm.xlu1 %3557, %v4553_v2  }
 0x1ed   : > { %v4778_v42 = vpop.permute.xlu1 %1430  ;;  %1933 = vperm.xlu0 %3597, %v4557_v12   ;;  %v4781_v19 = vpop.permute.xlu0 %1650 }
 0x1ee   : > { %6280 = vst [vmem:[#allocation40_spill] sm:$0xff] %v4781_v19  ;;  %1708 = vrot.lane.b32.xlu1 %v6281_v6, %s3753_s17  ;;  %v6291_v19 = vmov 33   ;;  %v1438_v51 = vsel %vm1423_vm15, %v4778_v42, 0.0 }
 0x1ef   : > { %3559 = vset.pattern.permute.xlu1 %v6282_v58  ;;  %v1666_v60 = vadd.f32 %v1438_v51, %v1411_v8  ;;  %v6146_v51 = vmov 51  }
 0x1f1   : > { %3616 = vset.pattern.permute.xlu0 %v6101_v10  ;;  %v4787_v54 = vpop.permute.xlu0 %1710 }
 0x1f2   : > { %6283 = vst [vmem:[#allocation38_spill] sm:$0xff] %v4787_v54  ;;  %1712 = vrot.lane.b32.xlu1 %v6284_v15, %s3753_s17  ;;  %v4791_v57 = vpop.permute.xlu1 %1441  ;;  %1994 = vperm.xlu0 %3616, %v4578_v23  }
 0x1f3   : > { %vm1449_vm4 = vcmp.eq.s32.totalorder %v4791_v57, %v4319_v45 }
 0x1f5   : > { %v4794_v61 = vpop.permute.xlu0 %1714 }
 0x1f6   : > { %6285 = vst [vmem:[#allocation27_spill] sm:$0xff] %v4794_v61  ;;  %1716 = vrot.lane.b32.xlu1 %v6266_v21, %s3753_s17  ;;  %v4798_v6 = vpop.permute.xlu1 %1447  ;;  %2000 = vperm.xlu0 %3616, %v4517_v28   ;;  %v6105_v61 = vmov 43  }
 0x1f7   : > { %6286 = vst [vmem:[#allocation30_spill] sm:$0xff] %v4798_v6 }
 0x1f9   : > { %v4801_v58 = vpop.permute.xlu0 %1778 }
 0x1fa   : > { %6287 = vst [vmem:[#allocation43_spill] sm:$0xff] %v4801_v58  ;;  %1781 = vperm.xlu1 %3559, %v4619_v3   ;;  %v4804_v10 = vpop.permute.xlu1 %1453  ;;  %2014 = vperm.xlu0 %3616, %v4557_v12  }
 0x1fd   : > { %v4807_v15 = vpop.permute.xlu0 %1790 }
 0x1fe   : > { %6288 = vst [vmem:[#allocation29_spill] sm:$0xff] %v4807_v15  ;;  %1784 = vperm.xlu1 %3559, %v4517_v28   ;;  %v4810_v54 = vpop.permute.xlu1 %1461  ;;  %3619 = vset.pattern.permute.xlu0 %v6105_v61 }
 0x1ff   : > { %6289 = vst [vmem:[#allocation33_spill] sm:$0xff] %v4810_v54  ;;  %2075 = vperm.xlu0 %3619, %v4578_v23  }
 0x201   : > { %v4814_v6 = vpop.permute.xlu0 %1798 }
 0x202   : > { %6290 = vst [vmem:[#allocation36_spill] sm:$0xff] %v4814_v6  ;;  %1794 = vperm.xlu1 %3559, %v4553_v2  }
 0x203   : > { %v4817_v58 = vpop.permute.xlu1 %1471  ;;  %2081 = vperm.xlu0 %3619, %v4517_v28  }
 0x204   : > { %vm1477_vm7 = vcmp.eq.s32.totalorder %v4817_v58, %v4319_v45  ;;  %v6337_v58 = vld [vmem:[#allocation25_spill] sm:$0xff] }
 0x206   : > { %3560 = vset.pattern.permute.xlu1 %v6291_v19  ;;  %v4821_v15 = vpop.permute.xlu0 %1808 }
 0x207   : > { %6292 = vst [vmem:[#allocation34_spill] sm:$0xff] %v4821_v15  ;;  %1805 = vperm.xlu1 %3560, %v4578_v23   ;;  %v4824_v54 = vpop.permute.xlu1 %1474  ;;  %2095 = vperm.xlu0 %3619, %v4557_v12  }
 0x208   : > { %6293 = vst [vmem:[#allocation41_spill] sm:$0xff] %v4824_v54 }
 0x20a   : > { %v4827_v61 = vpop.permute.xlu0 %1821 }
 0x20b   : > { %6294 = vst [vmem:[#allocation31_spill] sm:$0xff] %v4827_v61  ;;  %1811 = vperm.xlu1 %3560, %v4517_v28   ;;  %v4830_v6 = vpop.permute.xlu1 %1484  ;;  %3622 = vset.pattern.permute.xlu0 %v6108_v39 }
 0x20c   : > { %6295 = vst [vmem:[#allocation37_spill] sm:$0xff] %v4830_v6  ;;  %2156 = vperm.xlu0 %3622, %v4578_v23   ;;  %v6115_v6 = vmov 52  }
 0x20f   : > { %1817 = vperm.xlu1 %3560, %v4521_v30   ;;  %v4835_v19 = vpop.permute.xlu0 %1832 }
 0x210   : > { %6296 = vst [vmem:[#allocation45_spill] sm:$0xff] %v4835_v19  ;;  %v4837_v15 = vpop.permute.xlu1 %1495  ;;  %2162 = vperm.xlu0 %3622, %v4517_v28   ;;  %v6110_v19 = vmov 49  }
 0x211   : > { %vm1503_vm0 = vcmp.eq.s32.totalorder %v4837_v15, %v4319_v45 }
 0x213   : > { %1825 = vperm.xlu1 %3560, %v4557_v12   ;;  %v4841_v61 = vpop.permute.xlu0 %1844  ;;  %v6334_v47 = vld [vmem:[#allocation37_spill] sm:$0xff] }
 0x214   : > { %6297 = vst [vmem:[#allocation39_spill] sm:$0xff] %v4841_v61  ;;  %v4843_v54 = vpop.permute.xlu1 %1501  ;;  %2176 = vperm.xlu0 %3622, %v4557_v12   ;;  %v1492_v42 = vsel %vm1477_vm7, %v6334_v47, 0.0  ;;  %v6351_v47 = vld [vmem:[#allocation12_spill] sm:$0xff] }
 0x215   : > { %6298 = vst [vmem:[#allocation35_spill] sm:$0xff] %v4843_v54  ;;  %v1669_v33 = vadd.f32 %v1492_v42, %v1465_v44 }
 0x217   : > { %3563 = vset.pattern.permute.xlu1 %v6299_v22  ;;  %v4847_v39 = vpop.permute.xlu0 %1852 }
 0x218   : > { %6300 = vst [vmem:[#allocation21_spill] sm:$0xff] %v4847_v39  ;;  %1835 = vperm.xlu1 %3563, %v4619_v3   ;;  %v4850_v9 = vpop.permute.xlu1 %1507  ;;  %3625 = vset.pattern.permute.xlu0 %v6110_v19  ;;  %v6304_v19 = vmov 35  }
 0x219   : > { %2356 = vperm.xlu0 %3625, %v4619_v3  }
 0x21c   : > { %1838 = vperm.xlu1 %3563, %v4517_v28   ;;  %v4855_v61 = vpop.permute.xlu1 %1515  ;;  %v4857_v54 = vpop.permute.xlu0 %1862 }
 0x21d   : > { %6301 = vst [vmem:[#allocation47_spill] sm:$0xff] %v4855_v61  ;;  %6302 = vst [vmem:[#allocation48_spill] sm:$0xff] %v4857_v54  ;;  %2359 = vperm.xlu0 %3625, %v4517_v28  }
 0x220   : > { %1848 = vperm.xlu1 %3563, %v4553_v2   ;;  %v4861_v22 = vpop.permute.xlu0 %1875 }
 0x221   : > { %6303 = vst [vmem:[#allocation49_spill] sm:$0xff] %v4861_v22  ;;  %v4863_v39 = vpop.permute.xlu1 %1525  ;;  %3629 = vset.pattern.permute.xlu0 %v6112_v17 }
 0x222   : > { %2386 = vperm.xlu0 %3629, %v4517_v28  }
 0x224   : > { %3564 = vset.pattern.permute.xlu1 %v6304_v19 }
 0x225   : > { %1859 = vperm.xlu1 %3564, %v4578_v23   ;;  %v4869_v61 = vpop.permute.xlu1 %1528  ;;  %v4871_v54 = vpop.permute.xlu0 %1886 }
 0x226   : > { %6305 = vst [vmem:[#allocation50_spill] sm:$0xff] %v4869_v61  ;;  %6306 = vst [vmem:[#allocation51_spill] sm:$0xff] %v4871_v54  ;;  %3630 = vset.pattern.permute.xlu0 %v6115_v6  ;;  %v6118_v54 = vmov 53  }
 0x227   : > { %2437 = vperm.xlu0 %3630, %v4619_v3  }
 0x229   : > { %1865 = vperm.xlu1 %3564, %v4517_v28   ;;  %v4876_v2 = vpop.permute.xlu1 %1538  ;;  %v2265_v17 = vpop.permute.xlu0 %2264 }
 0x22a   : > { %6307 = vst [vmem:[#allocation52_spill] sm:$0xff] %v4876_v2  ;;  %3360 = vmatprep.subr.bf16.mxu0 %v2265_v17  ;;  %v6121_v2 = vmov 55  }
 0x22b   : > { %2440 = vperm.xlu0 %3630, %v4517_v28   ;;  %3361 = vmatpush3.bf16.msra.mxu0 %v2265_v17  ;;  %v6311_v17 = vmov 36  }
 0x22d   : > { %1871 = vperm.xlu1 %3564, %v4521_v30   ;;  %v4880_v19 = vpop.permute.xlu0 %1943 }
 0x22e   : > { %6308 = vst [vmem:[#allocation53_spill] sm:$0xff] %v4880_v19  ;;  %v4882_v22 = vpop.permute.xlu1 %1549 }
 0x22f   : > { %3634 = vset.pattern.permute.xlu0 %v6118_v54  ;;  %vm1557_vm2 = vcmp.eq.s32.totalorder %v4882_v22, %v4319_v45 }
 0x230   : > { %2467 = vperm.xlu0 %3634, %v4517_v28  }
 0x231   : > { %1879 = vperm.xlu1 %3564, %v4557_v12   ;;  %v4887_v6 = vpop.permute.xlu0 %1946  ;;  %v6333_v53 = vld [vmem:[#allocation52_spill] sm:$0xff] }
 0x232   : > { %6309 = vst [vmem:[#allocation54_spill] sm:$0xff] %v4887_v6  ;;  %v4889_v61 = vpop.permute.xlu1 %1555 }
 0x233   : > { %6310 = vst [vmem:[#allocation55_spill] sm:$0xff] %v4889_v61  ;;  %v6124_v61 = vmov 56  }
 0x234   : > { %3635 = vset.pattern.permute.xlu0 %v6121_v2 }
 0x235   : > { %3567 = vset.pattern.permute.xlu1 %v6311_v17  ;;  %2518 = vperm.xlu0 %3635, %v4619_v3  }
 0x236   : > { %1889 = vperm.xlu1 %3567, %v4619_v3   ;;  %v4895_v30 = vpop.permute.xlu1 %1561  ;;  %v4897_v54 = vpop.permute.xlu0 %1973 }
 0x237   : > { %6312 = vst [vmem:[#allocation56_spill] sm:$0xff] %v4897_v54  ;;  %v6316_v54 = vmov 37  }
 0x239   : > { %2521 = vperm.xlu0 %3635, %v4517_v28  }
 0x23a   : > { %1892 = vperm.xlu1 %3567, %v4517_v28   ;;  %v4901_v6 = vpop.permute.xlu1 %1569 }
 0x23b   : > { %6313 = vst [vmem:[#allocation57_spill] sm:$0xff] %v4901_v6  ;;  %v4903_v19 = vpop.permute.xlu0 %2024 }
 0x23c   : > { %6314 = vst [vmem:[#allocation58_spill] sm:$0xff] %v4903_v19  ;;  %v6128_v19 = vmov 58  }
 0x23d   : > { %3639 = vset.pattern.permute.xlu0 %v6124_v61 }
 0x23e   : > { %2812 = vrot.lane.b32.xlu1 %v6266_v21, %s3777_s20  ;;  %2548 = vperm.xlu0 %3639, %v4517_v28  }
 0x23f   : > { %v4909_v2 = vpop.permute.xlu1 %1579  ;;  %3568 = vset.pattern.permute.xlu1 %v6316_v54  ;;  %v4912_v17 = vpop.permute.xlu0 %2027 }
 0x240   : > { %6315 = vst [vmem:[#allocation59_spill] sm:$0xff] %v4909_v2  ;;  %6317 = vst [vmem:[#allocation60_spill] sm:$0xff] %v4912_v17  ;;  %v6322_v2 = vmov 38  }
 0x242   : > { %1916 = vperm.xlu1 %3568, %v4619_v3   ;;  %v4915_v6 = vpop.f32.mrf.mxu1  ;;  %3640 = vset.pattern.permute.xlu0 %v6128_v19  ;;  %v6324_v19 = vmov 39  }
 0x243   : > { %6318 = vst [vmem:[#allocation61_spill] sm:$0xff] %v4915_v6  ;;  %v4918_v61 = vpop.permute.xlu1 %1582  ;;  %2599 = vperm.xlu0 %3640, %v4619_v3  }
 0x244   : > { %6319 = vst [vmem:[#allocation62_spill] sm:$0xff] %v4918_v61  ;;  %v4921_v21 = vpop.f32.mrf.mxu1  ;;  %v4923_v12 = vpop.permute.xlu0 %2054  ;;  %v6134_v61 = vmov 59  }
 0x245   : > { %6320 = vst [vmem:[#allocation63_spill] sm:$0xff] %v4921_v21  ;;  %6321 = vst [vmem:[#allocation64_spill] sm:$0xff] %v4923_v12  ;;  %v6326_v12 = vld [vmem:[#allocation42_spill] sm:$0xff] }
 0x246   : > { %3569 = vset.pattern.permute.xlu1 %v6322_v2  ;;  %v3345_v54 = vpop.f32.mrf.mxu1  ;;  %vm1234_vm6 = vcmp.eq.s32.totalorder %v6326_v12, %v4319_v45 }
 0x247   : > { %1940 = vperm.xlu1 %3569, %v4578_v23   ;;  %v4927_v17 = vpop.permute.xlu1 %1592  ;;  %2602 = vperm.xlu0 %3640, %v4517_v28   ;;  %v6335_v57 = vld [vmem:[#allocation59_spill] sm:$0xff] }
 0x248   : > { %vm1585_vm8 = vcmp.eq.s32.totalorder %v6335_v57, %v4319_v45  ;;  %v6353_v57 = vld [vmem:[#allocation13_spill] sm:$0xff] }
 0x249   : > { %v4930_v6 = vpop.permute.xlu0 %2105 }
 0x24a   : > { %6323 = vst [vmem:[#allocation65_spill] sm:$0xff] %v4930_v6  ;;  %v6132_v6 = vmov 61  }
 0x24b   : > { %3571 = vset.pattern.permute.xlu1 %v6324_v19  ;;  %3644 = vset.pattern.permute.xlu0 %v6134_v61 }
 0x24c   : > { %1967 = vperm.xlu1 %3571, %v4578_v23   ;;  %v4935_v21 = vpop.permute.xlu1 %1603  ;;  %2629 = vperm.xlu0 %3644, %v4517_v28  }
 0x24d   : > { %v4938_v54 = vpop.permute.xlu0 %2108  ;;  %vm1611_vm14 = vcmp.eq.s32.totalorder %v4935_v21, %v4319_v45  ;;  %v1627_v21 = vsel %vm1612_vm3, %v6337_v58, 0.0 }
 0x24e   : > { %6325 = vst [vmem:[#allocation66_spill] sm:$0xff] %v4938_v54  ;;  %v6329_v54 = vmov 40  }
 0x250   : > { %1970 = vperm.xlu1 %3571, %v4619_v3   ;;  %v4943_v2 = vpop.permute.xlu1 %1609  ;;  %3645 = vset.pattern.permute.xlu0 %v6132_v6  ;;  %v6328_v6 = vld [vmem:[#allocation44_spill] sm:$0xff] }
 0x251   : > { %2680 = vperm.xlu0 %3645, %v4619_v3   ;;  %v1249_v61 = vsel %vm1234_vm6, %v6328_v6, 0.0  ;;  %vm1476_vm6 = vcmp.eq.s32.totalorder %v4662_v34, %v4319_v45  ;;  %v1410_v34 = vsel %vm1395_vm12, %v4752_v4, 0.0  ;;  %v1572_v4 = vsel %vm1557_vm2, %v4895_v30, 0.0  ;;  %v6336_v30 = vld [vmem:[#allocation14_spill] sm:$0xff] }
 0x252   : > { %v4957_v12 = vpop.permute.xlu0 %2135  ;;  %v5009_v38 = vadd.f32 %v1276_v18, %v1249_v61  ;;  %v1491_v61 = vsel %vm1476_vm6, %v4669_v7, 0.0  ;;  %v1653_v7 = vsel %vm1638_vm9, %v4775_v5, 0.0  ;;  %v1599_v5 = vsel %vm1584_vm13, %v4739_v49, 0.0 }
 0x253   : > { %6327 = vst [vmem:[#allocation42_spill] sm:$0xff] %v4957_v12  ;;  %v1383_v12 = vsel %vm1368_vm11, %v4598_v43, 0.0  ;;  %vm1369_vm11 = vcmp.eq.s32.totalorder %v4720_v50, %v4319_v45  ;;  %v6148_v50 = vmov 48   ;;  %v1665_v1 = vadd.f32 %v1437_v20, %v1410_v34 }
 0x254   : > { %3572 = vset.pattern.permute.xlu1 %v6329_v54  ;;  %v1616_v19 = vpop.permute.xlu1 %1615  ;;  %v1662_v48 = vadd.f32 %v1383_v12, %v1356_v26  ;;  %v1384_v31 = vsel %vm1369_vm11, %v4732_v37, 0.0  ;;  %v1518_v37 = vsel %vm1503_vm0, %v4850_v9, 0.0  ;;  %vm1531_vm6 = vcmp.eq.s32.totalorder %v4863_v39, %v4319_v45 }
 0x255   : > { %1997 = vperm.xlu1 %3572, %v4619_v3   ;;  %2683 = vperm.xlu0 %3645, %v4517_v28   ;;  %v1626_v36 = vsel %vm1611_vm14, %v1616_v19, 0.0  ;;  %v1464_v49 = vsel %vm1449_vm4, %v4804_v10, 0.0  ;;  %v1546_v9 = vsel %vm1531_vm6, %v6333_v53, 0.0  ;;  %v1671_v22 = vadd.f32 %v1545_v52, %v1518_v37  ;;  %v6343_v37 = vld [vmem:[#allocation15_spill] sm:$0xff]  ;;  %v6348_v53 = vld [vmem:[#allocation26_spill] sm:$0xff] }
 0x256   : > { %v1677_v6 = vadd.f32 %v1653_v7, %v1626_v36  ;;  %v1674_v19 = vadd.f32 %v1599_v5, %v1572_v4  ;;  %v1663_v39 = vadd.f32 %v1384_v31, %v4968_v29  ;;  %v1573_v10 = vsel %vm1558_vm10, %v6336_v30, 0.0  ;;  %v6344_v4 = vld [vmem:[#allocation4_spill] sm:$0xff] }
 0x257   : > { %v4987_v13 = vpop.permute.xlu0 %2186  ;;  %v1600_v12 = vsel %vm1585_vm8, %v4927_v17, 0.0  ;;  %v1668_v27 = vadd.f32 %v1491_v61, %v1464_v49  ;;  %v1672_v16 = vadd.f32 %v1546_v9, %v1519_v55  ;;  %v1683_v18 = vadd.f32 %v1665_v1, %v1662_v48  ;;  %v6345_v1 = vld [vmem:[#allocation18_spill] sm:$0xff]  ;;  %v6347_v49 = vld [vmem:[#allocation5_spill] sm:$0xff] }
 0x258   : > { %v4996_v43 = vpop.permute.xlu1 %1623  ;;  %v1689_v63 = vadd.f32 %v1677_v6, %v1674_v19  ;;  %v1684_v41 = vadd.f32 %v1666_v60, %v1663_v39  ;;  %v1675_v26 = vadd.f32 %v1600_v12, %v1573_v10  ;;  %v6339_v52 = vmov 43   ;;  %v6346_v60 = vld [vmem:[#allocation3_spill] sm:$0xff]  ;;  %v6349_v9 = vld [vmem:[#allocation50_spill] sm:$0xff]  ;;  %v6354_v39 = vld [vmem:[#allocation40_spill] sm:$0xff] }
 0x259   : > { %3573 = vset.pattern.permute.xlu1 %v6330_v56  ;;  %3649 = vset.pattern.permute.xlu0 %v6138_v59  ;;  %v1686_v8 = vadd.f32 %v1671_v22, %v1668_v27  ;;  %v1680_v17 = vadd.f32 %v5011_v32, %v4989_v0  ;;  %v1681_v48 = vadd.f32 %v5023_v40, %v5009_v38  ;;  %v6342_v5 = vmov 44   ;;  %v6352_v22 = vld [vmem:[#allocation10_spill] sm:$0xff]  ;;  %v6357_v12 = vld [vmem:[#allocation8_spill] sm:$0xff] }
 0x25a   : > { %2021 = vperm.xlu1 %3573, %v4578_v23   ;;  %2710 = vperm.xlu0 %3649, %v4517_v28   ;;  %v1687_v55 = vadd.f32 %v1672_v16, %v1669_v33  ;;  %vm1316_vm10 = vcmp.eq.s32.totalorder %v6343_v37, %v4319_v45  ;;  %vm1262_vm12 = vcmp.eq.s32.totalorder %v6344_v4, %v4319_v45  ;;  %v6355_v10 = vmov 45   ;;  %v6358_v27 = vld [vmem:[#allocation28_spill] sm:$0xff]  ;;  %v6359_v16 = vld [vmem:[#allocation41_spill] sm:$0xff]  ;;  %v6362_v33 = vld [vmem:[#allocation19_spill] sm:$0xff] }
 0x25b   : > { %v5031_v14 = vpop.permute.xlu0 %2189  ;;  %v1695_v44 = vadd.f32 %v1689_v63, %v1686_v8  ;;  %v1692_v7 = vadd.f32 %v1683_v18, %v1680_v17  ;;  %v1693_v36 = vadd.f32 %v1684_v41, %v1681_v48  ;;  %vm1370_vm13 = vcmp.eq.s32.totalorder %v6345_v1, %v4319_v45  ;;  %v6360_v63 = vld [vmem:[#allocation7_spill] sm:$0xff]  ;;  %v6361_v18 = vld [vmem:[#allocation16_spill] sm:$0xff]  ;;  %v6371_v1 = vld [vmem:[#allocation30_spill] sm:$0xff] }
 0x25c   : > { %6331 = vst [vmem:[#allocation44_spill] sm:$0xff] %v5031_v14  ;;  %vm1235_vm14 = vcmp.eq.s32.totalorder %v6346_v60, %v4319_v45  ;;  %vm1289_vm15 = vcmp.eq.s32.totalorder %v6347_v49, %v4319_v45  ;;  %vm1424_vm0 = vcmp.eq.s32.totalorder %v6348_v53, %v4319_v45  ;;  %vm1532_vm2 = vcmp.eq.s32.totalorder %v6349_v9, %v4319_v45  ;;  %v6363_v8 = vld [vmem:[#allocation32_spill] sm:$0xff]  ;;  %v6365_v17 = vld [vmem:[#allocation55_spill] sm:$0xff]  ;;  %v6372_v53 = vld [vmem:[#allocation46_spill] sm:$0xff] }
 0x25d   : > { %v1634_v24 = vpop.permute.xlu1 %1633  ;;  %v1698_v0 = vadd.f32 %v1695_v44, %v1692_v7  ;;  %v1304_v42 = vsel %vm1289_vm15, %v6351_v47, 0.0  ;;  %v1331_v19 = vsel %vm1316_vm10, %v6352_v22, 0.0  ;;  %vm1343_vm4 = vcmp.eq.s32.totalorder %v6353_v57, %v4319_v45  ;;  %v6367_v44 = vld [vmem:[#allocation9_spill] sm:$0xff]  ;;  %v6368_v7 = vld [vmem:[#allocation47_spill] sm:$0xff]  ;;  %v6378_v60 = vld [vmem:[#allocation38_spill] sm:$0xff] }
 0x25e   : > { %3574 = vset.pattern.permute.xlu1 %v6332_v46  ;;  %3650 = vset.pattern.permute.xlu0 %v6148_v50  ;;  %vm1639_vm9 = vcmp.eq.s32.totalorder %v1634_v24, %v4319_v45  ;;  %vm1397_vm6 = vcmp.eq.s32.totalorder %v6358_v27, %v4319_v45  ;;  %vm1478_vm7 = vcmp.eq.s32.totalorder %v6359_v16, %v4319_v45  ;;  %v1547_v41 = vsel %vm1532_vm2, %v6361_v18, 0.0  ;;  %v6374_v22 = vld [vmem:[#allocation33_spill] sm:$0xff]  ;;  %v6375_v4 = vld [vmem:[#allocation11_spill] sm:$0xff] }
 0x25f   : > { %2048 = vperm.xlu1 %3574, %v4578_v23   ;;  %2326 = vperm.xlu0 %3650, %v4578_v23   ;;  %vm1613_vm8 = vcmp.eq.s32.totalorder %v4943_v2, %v4319_v45  ;;  %vm1559_vm10 = vcmp.eq.s32.totalorder %v6365_v17, %v4319_v45  ;;  %v1661_v9 = vadd.f32 %v1331_v19, %v1304_v42  ;;  %v6144_v27 = vmov 54  }
 0x260   : > { %v5073_v15 = vpop.permute.xlu0 %1913  ;;  %v1628_v2 = vsel %vm1613_vm8, %v4996_v43, 0.0  ;;  %v1250_v42 = vsel %vm1235_vm14, %v6375_v4, 0.0  ;;  %v6136_v4 = vmov 63  }
 0x261   : > { %v5079_v11 = vpop.permute.xlu1 %1636 }
 0x262   : > { %vm1640_vm11 = vcmp.eq.s32.totalorder %v5079_v11, %v4319_v45  ;;  %v6350_v11 = vld [vmem:[#allocation62_spill] sm:$0xff] }
 0x263   : > { %2051 = vperm.xlu1 %3574, %v4619_v3   ;;  %2332 = vperm.xlu0 %3650, %v4517_v28   ;;  %vm1586_vm3 = vcmp.eq.s32.totalorder %v6350_v11, %v4319_v45  ;;  %v1655_v30 = vsel %vm1640_vm11, %v6354_v39, 0.0  ;;  %vm1451_vm11 = vcmp.eq.s32.totalorder %v6371_v1, %v4319_v45  ;;  %v6373_v11 = vld [vmem:[#allocation6_spill] sm:$0xff]  ;;  %v6385_v1 = vmov 37  }
 0x264   : > { %v5100_v62 = vpop.permute.xlu0 %1919  ;;  %v1679_v48 = vadd.f32 %v1655_v30, %v1628_v2  ;;  %v1358_v47 = vsel %vm1343_vm4, %v6373_v11, 0.0  ;;  %v1466_v39 = vsel %vm1451_vm11, %v6374_v22, 0.0 }
 0x265   : > { %6338 = vst [vmem:[#allocation52_spill] sm:$0xff] %v5100_v62  ;;  %v1647_v29 = vpop.permute.xlu1 %1646 }
 0x266   : > { %v1654_v25 = vsel %vm1639_vm9, %v1647_v29, 0.0  ;;  %v1439_v29 = vsel %vm1424_vm0, %v6360_v63, 0.0  ;;  %v6377_v63 = vmov 46  }
 0x267   : > { %v1678_v20 = vadd.f32 %v1654_v25, %v1627_v21  ;;  %3575 = vset.pattern.permute.xlu1 %v6339_v52  ;;  %2346 = vperm.xlu0 %3650, %v6340_v35   ;;  %v1601_v25 = vsel %vm1586_vm3, %v6362_v33, 0.0 }
 0x268   : > { %2078 = vperm.xlu1 %3575, %v4619_v3   ;;  %v5108_v61 = vpop.permute.xlu0 %1933 }
 0x269   : > { %6341 = vst [vmem:[#allocation37_spill] sm:$0xff] %v5108_v61  ;;  %v1690_v24 = vadd.f32 %v1678_v20, %v1675_v26  ;;  %v5112_v34 = vpop.permute.xlu1 %1708  ;;  %v1412_v26 = vsel %vm1397_vm6, %v6363_v8, 0.0  ;;  %v6364_v20 = vld [vmem:[#allocation35_spill] sm:$0xff] }
 0x26a   : > { %vm1505_vm9 = vcmp.eq.s32.totalorder %v6364_v20, %v4319_v45  ;;  %v1667_v37 = vadd.f32 %v1439_v29, %v1412_v26  ;;  %v6379_v26 = vmov 47  }
 0x26b   : > { %v1696_v31 = vadd.f32 %v1690_v24, %v1687_v55  ;;  %3653 = vset.pattern.permute.xlu0 %v6146_v51  ;;  %v6366_v55 = vld [vmem:[#allocation27_spill] sm:$0xff]  ;;  %v1493_v24 = vsel %vm1478_vm7, %v6367_v44, 0.0  ;;  %v6381_v44 = vmov 36  }
 0x26c   : > { %3576 = vset.pattern.permute.xlu1 %v6342_v5  ;;  %2407 = vperm.xlu0 %3653, %v4578_v23  }
 0x26d   : > { %v1699_v32 = vadd.f32 %v1696_v31, %v1693_v36  ;;  %2102 = vperm.xlu1 %3576, %v4578_v23   ;;  %v5118_v38 = vpop.permute.xlu1 %1712  ;;  %v5120_v40 = vpop.permute.xlu0 %1994  ;;  %v1520_v36 = vsel %vm1505_vm9, %v6368_v7, 0.0  ;;  %v6369_v31 = vld [vmem:[#allocation57_spill] sm:$0xff] }
 0x26e   : > { %v1574_v43 = vsel %vm1559_vm10, %v6369_v31, 0.0  ;;  %v5249_v31 = vld [vmem:[%s3890_s28 + $0x8] sm:$0xff] }
 0x26f   : > { %v1701_v6 = vpack.c.bf16 %v1699_v32, %v1698_v0  ;;  %v1676_v49 = vadd.f32 %v1601_v25, %v1574_v43  ;;  %v3689_v25 = vld [vmem:[%s3884_s25 + $0x10] sm:$0xf]  ;;  %6384 = vst [vmem:[#allocation18_spill] sm:$0xff] %v5249_v31 }
 0x270   : > { %2413 = vperm.xlu0 %3653, %v4517_v28   ;;  %v1385_v28 = vsel %vm1370_vm13, %v6357_v12, 0.0 }
 0x271   : > { %3577 = vset.pattern.permute.xlu1 %v6355_v10  ;;  %v1717_v58 = vpop.permute.xlu1 %1716  ;;  %3356 = vmatprep.mubr.msk.bf16.mxu1 %vm6160_vm5, %v1701_v6  ;;  %v5148_v21 = vpop.permute.xlu0 %2000  ;;  %v1673_v6 = vadd.f32 %v1547_v41, %v1520_v36  ;;  %v1664_v30 = vadd.f32 %v1385_v28, %v1358_v47  ;;  %v1691_v12 = vadd.f32 %v1679_v48, %v1676_v49  ;;  %v5243_v36 = vld [vmem:[%s3884_s25] sm:$0xff]  ;;  %v6389_v47 = vmov 38  }
 0x272   : > { %6356 = vst [vmem:[#allocation59_spill] sm:$0xff] %v5148_v21  ;;  %2129 = vperm.xlu1 %3577, %v4578_v23   ;;  %3346 = vmatprep.subr.bf16.mxu1 %v1717_v58  ;;  %v6432_v21 = vmov 58  }
 0x273   : > { %3347 = vmatpush3.bf16.msra.mxu1 %v1717_v58  ;;  %v1670_v58 = vadd.f32 %v1493_v24, %v1466_v39  ;;  %v1685_v16 = vadd.f32 %v1667_v37, %v1664_v30  ;;  %v6142_v24 = vmov 57  }
 0x274   : > { %3348 = vmatprep.subr.bf16.mxu1 %v6366_v55  ;;  %2427 = vperm.xlu0 %3653, %v6340_v35   ;;  %v1277_v35 = vsel %vm1262_vm12, %v6372_v53, 0.0 }
 0x275   : > { %v5184_v0 = vpop.permute.xlu1 %1781  ;;  %v5186_v32 = vpop.permute.xlu0 %2014  ;;  %v1658_v57 = vadd.f32 %v1277_v35, %v1250_v42  ;;  %v1688_v28 = vadd.f32 %v1673_v6, %v1670_v58  ;;  %v6140_v35 = vmov 60  }
 0x276   : > { %6370 = vst [vmem:[#allocation14_spill] sm:$0xff] %v5186_v32  ;;  %2132 = vperm.xlu1 %3577, %v4619_v3   ;;  %v6430_v32 = vmov 56   ;;  %vm1787_vm9 = vcmp.eq.s32.totalorder %v5184_v0, %v4319_v45 }
 0x277   : > { %3349 = vmatpush3.bf16.msra.mxu1 %v6366_v55  ;;  %v1682_v18 = vadd.f32 %v1661_v9, %v1658_v57  ;;  %v1697_v41 = vadd.f32 %v1691_v12, %v1688_v28  ;;  %v6393_v12 = vmov 39  }
 0x278   : > { %3350 = vmatprep.subr.bf16.mxu1 %v5118_v38  ;;  %3656 = vset.pattern.permute.xlu0 %v6144_v27 }
 0x279   : > { %v5207_v19 = vpop.permute.xlu1 %1784  ;;  %2488 = vperm.xlu0 %3656, %v4578_v23   ;;  %v1694_v2 = vadd.f32 %v1685_v16, %v1682_v18 }
 0x27a   : > { %6376 = vst [vmem:[#allocation25_spill] sm:$0xff] %v5207_v19  ;;  %3578 = vset.pattern.permute.xlu1 %v6377_v63  ;;  %v5211_v29 = vpop.permute.xlu0 %2075 }
 0x27b   : > { %2159 = vperm.xlu1 %3578, %v4619_v3   ;;  %3351 = vmatpush3.bf16.msra.mxu1 %v5118_v38  ;;  %v1700_v20 = vadd.f32 %v1697_v41, %v1694_v2  ;;  %v5225_v3 = vld [vmem:[%s3890_s28 + $0x10] sm:$0xf] }
 0x27c   : > { %3352 = vmatprep.subr.bf16.mxu1 %v6378_v60  ;;  %v6399_v2 = vld [vmem:[#allocation22_spill] sm:$0xff] }
 0x27d   : > { %v5216_v33 = vpop.permute.xlu1 %1794  ;;  %2494 = vperm.xlu0 %3656, %v3689_v25   ;;  %v1702_v55 = vpack.c.bf16 %v1700_v20, %v1700_v20  ;;  %v6402_v20 = vld [vmem:[#allocation24_spill] sm:$0xff] }
 0x27e   : > { %v2082_v8 = vpop.permute.xlu0 %2081 }
 0x27f   : > { %3579 = vset.pattern.permute.xlu1 %v6379_v26  ;;  %3353 = vmatpush3.bf16.msra.mxu1 %v6378_v60  ;;  %vm2085_vm12 = vcmp.eq.s32.totalorder %v2082_v8, %v4319_v45 }
 0x280   : > { %2183 = vperm.xlu1 %3579, %v4578_v23   ;;  %3354 = vmatprep.subr.bf16.mxu1 %v5112_v34  ;;  %v5235_v23 = vld [vmem:[%s3890_s28] sm:$0xff] }
 0x281   : > { %2508 = vperm.xlu0 %3656, %v5225_v3   ;;  %6382 = vst [vmem:[#allocation15_spill] sm:$0xff] %v5235_v23 }
 0x282   : > { %v5228_v38 = vpop.permute.xlu1 %1805  ;;  %v2096_v17 = vpop.permute.xlu0 %2095 }
 0x283   : > { %3355 = vmatpush3.bf16.msra.mxu1 %v5112_v34  ;;  %v5231_v48 = vsel %vm2085_vm12, %v2096_v17, 0.0  ;;  %vm1813_vm10 = vcmp.eq.s32.totalorder %v5228_v38, %v4319_v45  ;;  %v6450_v38 = vld [vmem:[#allocation53_spill] sm:$0xff] }
 0x284   : > { %6380 = vst [vmem:[#allocation17_spill] sm:$0xff] %v5231_v48  ;;  %3580 = vset.pattern.permute.xlu1 %v6381_v44 }
 0x285   : > { %1898 = vperm.xlu1 %3580, %v5235_v23   ;;  %3659 = vset.pattern.permute.xlu0 %v6142_v24 }
 0x286   : > { %v5239_v7 = vpop.permute.xlu1 %1811  ;;  %3357 = vmatmul.mubr.msk.bf16.vlgmr.msra.gmra.mxu1 %vm6160_vm5, %v1702_v55  ;;  %2569 = vperm.xlu0 %3659, %v5243_v36  }
 0x287   : > { %6383 = vst [vmem:[#allocation4_spill] sm:$0xff] %v5239_v7  ;;  %v5246_v34 = vpop.permute.xlu0 %2156 }
 0x289   : > { %1902 = vperm.xlu1 %3580, %v5249_v31  }
 0x28a   : > { %v5252_v43 = vpop.permute.xlu1 %1817  ;;  %2575 = vperm.xlu0 %3659, %v3689_v25  }
 0x28b   : > { %v2163_v37 = vpop.permute.xlu0 %2162 }
 0x28c   : > { %vm2166_vm13 = vcmp.eq.s32.totalorder %v2163_v37, %v4319_v45 }
 0x28d   : > { %3581 = vset.pattern.permute.xlu1 %v6385_v1 }
 0x28e   : > { %1925 = vperm.xlu1 %3581, %v5235_v23   ;;  %v5257_v6 = vpop.permute.xlu1 %1825  ;;  %2589 = vperm.xlu0 %3659, %v5225_v3  }
 0x28f   : > { %6386 = vst [vmem:[#allocation3_spill] sm:$0xff] %v5257_v6  ;;  %v2177_v49 = vpop.permute.xlu0 %2176 }
 0x290   : > { %v5260_v53 = vsel %vm2166_vm13, %v2177_v49, 0.0 }
 0x291   : > { %6387 = vst [vmem:[#allocation5_spill] sm:$0xff] %v5260_v53  ;;  %v6429_v53 = vmov 55  }
 0x292   : > { %1929 = vperm.xlu1 %3581, %v5249_v31   ;;  %3662 = vset.pattern.permute.xlu0 %v6140_v35 }
 0x293   : > { %v5264_v9 = vpop.permute.xlu1 %1835  ;;  %2650 = vperm.xlu0 %3662, %v5243_v36  }
 0x294   : > { %v5267_v11 = vpop.permute.xlu0 %2356  ;;  %vm1841_vm11 = vcmp.eq.s32.totalorder %v5264_v9, %v4319_v45  ;;  %v6451_v9 = vld [vmem:[#allocation58_spill] sm:$0xff] }
 0x295   : > { %6388 = vst [vmem:[#allocation26_spill] sm:$0xff] %v5267_v11  ;;  %v6427_v11 = vmov 54  }
 0x296   : > { %3582 = vset.pattern.permute.xlu1 %v6389_v47 }
 0x297   : > { %1952 = vperm.xlu1 %3582, %v5235_v23   ;;  %v5271_v22 = vpop.permute.xlu1 %1838  ;;  %2656 = vperm.xlu0 %3662, %v3689_v25  }
 0x298   : > { %6390 = vst [vmem:[#allocation50_spill] sm:$0xff] %v5271_v22  ;;  %v5273_v39 = vpop.permute.xlu0 %2359 }
 0x299   : > { %6391 = vst [vmem:[#allocation62_spill] sm:$0xff] %v5273_v39 }
 0x29b   : > { %1956 = vperm.xlu1 %3582, %v5249_v31   ;;  %v5276_v30 = vpop.permute.xlu1 %1848  ;;  %2670 = vperm.xlu0 %3662, %v5225_v3  }
 0x29d   : > { %v5279_v58 = vpop.permute.xlu0 %2386 }
 0x29e   : > { %6392 = vst [vmem:[#allocation12_spill] sm:$0xff] %v5279_v58 }
 0x29f   : > { %3585 = vset.pattern.permute.xlu1 %v6393_v12  ;;  %3665 = vset.pattern.permute.xlu0 %v6136_v4 }
 0x2a0   : > { %1979 = vperm.xlu1 %3585, %v5235_v23   ;;  %v5284_v42 = vpop.permute.xlu1 %1859  ;;  %2731 = vperm.xlu0 %3665, %v5243_v36  }
 0x2a1   : > { %vm1867_vm12 = vcmp.eq.s32.totalorder %v5284_v42, %v4319_v45 }
 0x2a2   : > { %v5287_v57 = vpop.permute.xlu0 %2437 }
 0x2a3   : > { %6394 = vst [vmem:[#allocation10_spill] sm:$0xff] %v5287_v57 }
 0x2a4   : > { %1983 = vperm.xlu1 %3585, %v5249_v31   ;;  %v5290_v16 = vpop.permute.xlu1 %1865  ;;  %2737 = vperm.xlu0 %3665, %v3689_v25   ;;  %v6400_v25 = vld [vmem:[#allocation23_spill] sm:$0xff] }
 0x2a5   : > { %6395 = vst [vmem:[#allocation13_spill] sm:$0xff] %v5290_v16 }
 0x2a6   : > { %v5292_v28 = vpop.permute.xlu0 %2440 }
 0x2a7   : > { %6396 = vst [vmem:[#allocation40_spill] sm:$0xff] %v5292_v28  ;;  %v6418_v28 = vmov 49  }
 0x2a8   : > { %3586 = vset.pattern.permute.xlu1 %v6329_v54  ;;  %v5295_v18 = vpop.permute.xlu1 %1871  ;;  %2751 = vperm.xlu0 %3665, %v5225_v3  }
 0x2a9   : > { %2006 = vperm.xlu1 %3586, %v5235_v23   ;;  %v1882_v0 = vsel %vm1867_vm12, %v5295_v18, 0.0 }
 0x2ab   : > { %v5299_v41 = vpop.permute.xlu0 %2467 }
 0x2ac   : > { %6397 = vst [vmem:[#allocation8_spill] sm:$0xff] %v5299_v41  ;;  %v5301_v60 = vpop.permute.xlu1 %1879  ;;  %2808 = vrot.lane.b32.xlu0 %v6399_v2, %s3777_s20  ;;  %v6423_v2 = vmov 52  }
 0x2ad   : > { %6398 = vst [vmem:[#allocation28_spill] sm:$0xff] %v5301_v60  ;;  %2010 = vperm.xlu1 %3586, %v5249_v31  }
 0x2b0   : > { %2806 = vrot.lane.b32.xlu0 %v6400_v25, %s3777_s20  ;;  %v5308_v8 = vpop.permute.xlu0 %2518 }
 0x2b1   : > { %6401 = vst [vmem:[#allocation41_spill] sm:$0xff] %v5308_v8  ;;  %3587 = vset.pattern.permute.xlu1 %v6330_v56  ;;  %v5311_v54 = vpop.permute.xlu1 %1889 }
 0x2b2   : > { %2033 = vperm.xlu1 %3587, %v5235_v23  }
 0x2b4   : > { %2804 = vrot.lane.b32.xlu0 %v6402_v20, %s3777_s20  ;;  %v5316_v17 = vpop.permute.xlu0 %2521  ;;  %v6422_v20 = vmov 51  }
 0x2b5   : > { %6403 = vst [vmem:[#allocation7_spill] sm:$0xff] %v5316_v17  ;;  %v5318_v55 = vpop.permute.xlu1 %1892 }
 0x2b6   : > { %6404 = vst [vmem:[#allocation16_spill] sm:$0xff] %v5318_v55  ;;  %2037 = vperm.xlu1 %3587, %v5249_v31  }
 0x2b9   : > { %v2813_v37 = vpop.permute.xlu1 %2812  ;;  %v5321_v1 = vpop.permute.xlu0 %2548 }
 0x2ba   : > { %6405 = vst [vmem:[#allocation19_spill] sm:$0xff] %v5321_v1  ;;  %3590 = vset.pattern.permute.xlu1 %v6332_v46  ;;  %3374 = vmatprep.subr.bf16.mxu1 %v2813_v37  ;;  %v5387_v1 = vld [vmem:[%s3884_s25 + $0x8] sm:$0xff] }
 0x2bb   : > { %2060 = vperm.xlu1 %3590, %v5235_v23   ;;  %3375 = vmatpush3.bf16.msra.mxu1 %v2813_v37 }
 0x2bd   : > { %v5325_v49 = vpop.permute.xlu1 %1916 }
 0x2be   : > { %v5327_v4 = vpop.permute.xlu0 %2599 }
 0x2bf   : > { %6406 = vst [vmem:[#allocation32_spill] sm:$0xff] %v5327_v4  ;;  %2064 = vperm.xlu1 %3590, %v5249_v31  }
 0x2c2   : > { %v5330_v59 = vpop.permute.xlu1 %1940  ;;  %v5332_v35 = vpop.permute.xlu0 %2602 }
 0x2c3   : > { %6407 = vst [vmem:[#allocation35_spill] sm:$0xff] %v5332_v35  ;;  %3591 = vset.pattern.permute.xlu1 %v6339_v52  ;;  %v6415_v35 = vmov 48  }
 0x2c4   : > { %2087 = vperm.xlu1 %3591, %v5235_v23  }
 0x2c7   : > { %v5336_v24 = vpop.permute.xlu1 %1967  ;;  %v5338_v27 = vpop.permute.xlu0 %2629 }
 0x2c8   : > { %6408 = vst [vmem:[#allocation55_spill] sm:$0xff] %v5338_v27  ;;  %2091 = vperm.xlu1 %3591, %v5249_v31  }
 0x2cb   : > { %v5341_v37 = vpop.permute.xlu1 %1970 }
 0x2cc   : > { %3592 = vset.pattern.permute.xlu1 %v6342_v5  ;;  %v5344_v51 = vpop.permute.xlu0 %2680  ;;  %vm1976_vm12 = vcmp.eq.s32.totalorder %v5341_v37, %v4319_v45 }
 0x2cd   : > { %6409 = vst [vmem:[#allocation27_spill] sm:$0xff] %v5344_v51  ;;  %2114 = vperm.xlu1 %3592, %v5235_v23  }
 0x2d0   : > { %v5347_v50 = vpop.permute.xlu1 %1997  ;;  %v5349_v6 = vpop.permute.xlu0 %2683 }
 0x2d1   : > { %6410 = vst [vmem:[#allocation9_spill] sm:$0xff] %v5349_v6  ;;  %2118 = vperm.xlu1 %3592, %v5249_v31  }
 0x2d5   : > { %3595 = vset.pattern.permute.xlu1 %v6355_v10  ;;  %v5353_v52 = vpop.permute.xlu1 %2021  ;;  %v5355_v7 = vpop.permute.xlu0 %2710 }
 0x2d6   : > { %6411 = vst [vmem:[#allocation47_spill] sm:$0xff] %v5355_v7  ;;  %2141 = vperm.xlu1 %3595, %v5235_v23   ;;  %vm2029_vm1 = vcmp.eq.s32.totalorder %v5353_v52, %v4319_v45 }
 0x2da   : > { %2145 = vperm.xlu1 %3595, %v5249_v31   ;;  %v5359_v19 = vpop.permute.xlu1 %2048  ;;  %v5361_v60 = vpop.permute.xlu0 %2326 }
 0x2db   : > { %6412 = vst [vmem:[#allocation57_spill] sm:$0xff] %v5361_v60  ;;  %vm2056_vm5 = vcmp.eq.s32.totalorder %v5359_v19, %v4319_v45 }
 0x2de   : > { %3596 = vset.pattern.permute.xlu1 %v6377_v63  ;;  %v5364_v55 = vpop.permute.xlu1 %2051  ;;  %v2333_v16 = vpop.permute.xlu0 %2332 }
 0x2df   : > { %2168 = vperm.xlu1 %3596, %v5235_v23   ;;  %vm2336_vm14 = vcmp.eq.s32.totalorder %v2333_v16, %v4319_v45 }
 0x2e2   : > { %v2347_v22 = vpop.permute.xlu0 %2346 }
 0x2e3   : > { %2172 = vperm.xlu1 %3596, %v5249_v31   ;;  %v5369_v61 = vpop.permute.xlu1 %2078  ;;  %v5371_v7 = vsel %vm2336_vm14, %v2347_v22, 0.0  ;;  %vm1949_vm14 = vcmp.eq.s32.totalorder %v6450_v38, %v4319_v45 }
 0x2e4   : > { %6413 = vst [vmem:[#allocation30_spill] sm:$0xff] %v5371_v7  ;;  %v6419_v7 = vmov 50  }
 0x2e7   : > { %3598 = vset.pattern.permute.xlu1 %v6379_v26  ;;  %v5374_v62 = vpop.permute.xlu0 %2407  ;;  %v6446_v26 = vld [vmem:[#allocation31_spill] sm:$0xff] }
 0x2e8   : > { %6414 = vst [vmem:[#allocation46_spill] sm:$0xff] %v5374_v62  ;;  %2195 = vperm.xlu1 %3598, %v5235_v23   ;;  %v5377_v63 = vpop.permute.xlu1 %2102 }
 0x2eb   : > { %v2414_v6 = vpop.permute.xlu0 %2413 }
 0x2ec   : > { %2199 = vperm.xlu1 %3598, %v5249_v31   ;;  %vm2417_vm15 = vcmp.eq.s32.totalorder %v2414_v6, %v4319_v45 }
 0x2ed   : > { %v5380_v16 = vpop.permute.xlu1 %2129 }
 0x2ef   : > { %v2428_v27 = vpop.permute.xlu0 %2427 }
 0x2f0   : > { %3599 = vset.pattern.permute.xlu1 %v6415_v35  ;;  %v5384_v22 = vsel %vm2417_vm15, %v2428_v27, 0.0  ;;  %vm1921_vm15 = vcmp.eq.s32.totalorder %v5073_v15, %v4319_v45 }
 0x2f1   : > { %6416 = vst [vmem:[#allocation6_spill] sm:$0xff] %v5384_v22  ;;  %2329 = vperm.xlu1 %3599, %v5387_v1   ;;  %v5390_v17 = vpop.permute.xlu1 %2132 }
 0x2f4   : > { %v5392_v41 = vpop.permute.xlu0 %2488 }
 0x2f5   : > { %6417 = vst [vmem:[#allocation33_spill] sm:$0xff] %v5392_v41  ;;  %3600 = vset.pattern.permute.xlu1 %v6418_v28  ;;  %v6425_v41 = vmov 53  }
 0x2f6   : > { %2353 = vperm.xlu1 %3600, %v5243_v36   ;;  %v5396_v58 = vpop.permute.xlu1 %2159 }
 0x2f8   : > { %v2495_v6 = vpop.permute.xlu0 %2494 }
 0x2f9   : > { %vm2498_vm0 = vcmp.eq.s32.totalorder %v2495_v6, %v4319_v45 }
 0x2fa   : > { %3601 = vset.pattern.permute.xlu1 %v6419_v7  ;;  %v6437_v7 = vmov 62  }
 0x2fb   : > { %2380 = vperm.xlu1 %3601, %v5243_v36   ;;  %v5401_v27 = vpop.permute.xlu1 %2183 }
 0x2fc   : > { %v2509_v22 = vpop.permute.xlu0 %2508 }
 0x2fd   : > { %v5403_v39 = vsel %vm2498_vm0, %v2509_v22, 0.0  ;;  %vm2003_vm0 = vcmp.eq.s32.totalorder %v5347_v50, %v4319_v45 }
 0x2fe   : > { %6420 = vst [vmem:[#allocation11_spill] sm:$0xff] %v5403_v39 }
 0x2ff   : > { %2383 = vperm.xlu1 %3601, %v5387_v1  }
 0x300   : > { %v5406_v51 = vpop.permute.xlu1 %1898 }
 0x301   : > { %v5408_v4 = vpop.permute.xlu0 %2569 }
 0x302   : > { %6421 = vst [vmem:[#allocation38_spill] sm:$0xff] %v5408_v4 }
 0x303   : > { %3602 = vset.pattern.permute.xlu1 %v6422_v20 }
 0x304   : > { %2410 = vperm.xlu1 %3602, %v5387_v1   ;;  %v5412_v25 = vpop.permute.xlu1 %1902 }
 0x305   : > { %v2576_v6 = vpop.permute.xlu0 %2575 }
 0x306   : > { %vm2579_vm2 = vcmp.eq.s32.totalorder %v2576_v6, %v4319_v45 }
 0x308   : > { %3603 = vset.pattern.permute.xlu1 %v6423_v2 }
 0x309   : > { %2434 = vperm.xlu1 %3603, %v5243_v36   ;;  %v5417_v22 = vpop.permute.xlu1 %1925  ;;  %v2590_v39 = vpop.permute.xlu0 %2589 }
 0x30a   : > { %v5419_v8 = vsel %vm2579_vm2, %v2590_v39, 0.0  ;;  %vm2110_vm2 = vcmp.eq.s32.totalorder %v5377_v63, %v4319_v45 }
 0x30b   : > { %6424 = vst [vmem:[#allocation67_spill] sm:$0xff] %v5419_v8 }
 0x30d   : > { %3604 = vset.pattern.permute.xlu1 %v6425_v41  ;;  %v5422_v4 = vpop.permute.xlu1 %1929 }
 0x30e   : > { %2461 = vperm.xlu1 %3604, %v5243_v36   ;;  %v5425_v60 = vpop.permute.xlu0 %2650 }
 0x30f   : > { %6426 = vst [vmem:[#allocation68_spill] sm:$0xff] %v5425_v60 }
 0x312   : > { %2464 = vperm.xlu1 %3604, %v5387_v1   ;;  %v5428_v6 = vpop.permute.xlu1 %1952  ;;  %v2657_v57 = vpop.permute.xlu0 %2656 }
 0x313   : > { %vm2660_vm3 = vcmp.eq.s32.totalorder %v2657_v57, %v4319_v45 }
 0x316   : > { %3605 = vset.pattern.permute.xlu1 %v6427_v11  ;;  %v5432_v62 = vpop.permute.xlu1 %1956  ;;  %v2671_v39 = vpop.permute.xlu0 %2670 }
 0x317   : > { %2491 = vperm.xlu1 %3605, %v5387_v1   ;;  %v5435_v8 = vsel %vm2660_vm3, %v2671_v39, 0.0  ;;  %v6431_v39 = vmov 57   ;;  %vm2083_vm3 = vcmp.eq.s32.totalorder %v5211_v29, %v4319_v45 }
 0x318   : > { %6428 = vst [vmem:[#allocation69_spill] sm:$0xff] %v5435_v8 }
 0x31b   : > { %3606 = vset.pattern.permute.xlu1 %v6429_v53  ;;  %v5438_v48 = vpop.permute.xlu1 %1979 }
 0x31c   : > { %2515 = vperm.xlu1 %3606, %v5243_v36  }
 0x31f   : > { %v5441_v60 = vpop.permute.xlu1 %1983 }
 0x320   : > { %3607 = vset.pattern.permute.xlu1 %v6430_v32  ;;  %v6433_v32 = vmov 59   ;;  %v1991_v15 = vsel %vm1976_vm12, %v5441_v60, 0.0  ;;  %v1964_v60 = vsel %vm1949_vm14, %v5432_v62, 0.0  ;;  %vm6456_vm14 = vcmp.eq.s32.totalorder %v5364_v55, %v4319_v45 }
 0x321   : > { %2542 = vperm.xlu1 %3607, %v5243_v36  }
 0x324   : > { %v5445_v57 = vpop.permute.xlu1 %2006 }
 0x325   : > { %2545 = vperm.xlu1 %3607, %v5387_v1  }
 0x328   : > { %v5448_v14 = vpop.permute.xlu1 %2010 }
 0x329   : > { %3608 = vset.pattern.permute.xlu1 %v6431_v39  ;;  %v6434_v39 = vmov 60  }
 0x32a   : > { %2572 = vperm.xlu1 %3608, %v5387_v1  }
 0x32d   : > { %v5452_v8 = vpop.permute.xlu1 %2033 }
 0x32e   : > { %3609 = vset.pattern.permute.xlu1 %v6432_v21  ;;  %v6435_v21 = vmov 61  }
 0x32f   : > { %2596 = vperm.xlu1 %3609, %v5243_v36  }
 0x331   : > { %v5456_v53 = vpop.permute.xlu1 %2037 }
 0x333   : > { %3610 = vset.pattern.permute.xlu1 %v6433_v32  ;;  %v5473_v32 = vpop.f32.mrf.mxu1 }
 0x334   : > { %2623 = vperm.xlu1 %3610, %v5243_v36   ;;  %6436 = vst [vmem:[#allocation70_spill] sm:$0xff] %v5473_v32  ;;  %v6440_v32 = vmov 63  }
 0x336   : > { %v5460_v11 = vpop.permute.xlu1 %2060 }
 0x338   : > { %2626 = vperm.xlu1 %3610, %v5387_v1  }
 0x33a   : > { %v5463_v41 = vpop.permute.xlu1 %2064 }
 0x33c   : > { %3611 = vset.pattern.permute.xlu1 %v6434_v39 }
 0x33d   : > { %2653 = vperm.xlu1 %3611, %v5387_v1  }
 0x33f   : > { %v5467_v2 = vpop.permute.xlu1 %2087 }
 0x340   : > { %v2098_v37 = vsel %vm2083_vm3, %v5467_v2, 0.0  ;;  %vm6458_vm3 = vcmp.eq.s32.totalorder %v4987_v13, %v4319_v45 }
 0x341   : > { %3612 = vset.pattern.permute.xlu1 %v6435_v21 }
 0x342   : > { %2677 = vperm.xlu1 %3612, %v5243_v36  }
 0x343   : > { %v5471_v20 = vpop.permute.xlu1 %2091 }
 0x346   : > { %3613 = vset.pattern.permute.xlu1 %v6437_v7  ;;  %v5476_v28 = vpop.f32.mrf.mxu1 }
 0x347   : > { %6438 = vst [vmem:[#allocation71_spill] sm:$0xff] %v5476_v28  ;;  %2704 = vperm.xlu1 %3613, %v5243_v36   ;;  %v6441_v36 = vld [vmem:[#allocation43_spill] sm:$0xff] }
 0x348   : > { %v5479_v31 = vpop.permute.xlu1 %2114  ;;  %v5481_v39 = vpop.f32.mrf.mxu1  ;;  %vm1786_vm4 = vcmp.eq.s32.totalorder %v6441_v36, %v4319_v45 }
 0x349   : > { %6439 = vst [vmem:[#allocation72_spill] sm:$0xff] %v5481_v39  ;;  %v6442_v39 = vld [vmem:[#allocation34_spill] sm:$0xff] }
 0x34a   : > { %v3359_v23 = vpop.f32.mrf.mxu1  ;;  %vm1814_vm6 = vcmp.eq.s32.totalorder %v6442_v39, %v4319_v45  ;;  %v1828_v39 = vsel %vm1813_vm10, %v5252_v43, 0.0  ;;  %vm1948_vm10 = vcmp.eq.s32.totalorder %v5330_v59, %v4319_v45 }
 0x34b   : > { %2707 = vperm.xlu1 %3613, %v5387_v1   ;;  %v1829_v10 = vsel %vm1814_vm6, %v6446_v26, 0.0  ;;  %vm1895_vm6 = vcmp.eq.s32.totalorder %v5311_v54, %v4319_v45  ;;  %v2071_v54 = vsel %vm2056_vm5, %v5460_v11, 0.0  ;;  %vm6454_vm5 = vcmp.eq.s32.totalorder %v5120_v40, %v4319_v45 }
 0x34c   : > { %v5484_v21 = vpop.permute.xlu1 %2118  ;;  %v1766_v35 = vpop.f32.mrf.mxu1  ;;  %v2224_v11 = vadd.f32 %v2098_v37, %v2071_v54  ;;  %v6470_v54 = vmov 53  }
 0x34d   : > { %2881 = vrot.lane.b32.xlu0 %v1766_v35, %s3788_s21  ;;  %v6443_v35 = vld [vmem:[#allocation45_spill] sm:$0xff] }
 0x34e   : > { %vm1840_vm7 = vcmp.eq.s32.totalorder %v6443_v35, %v4319_v45  ;;  %v6448_v35 = vld [vmem:[#allocation49_spill] sm:$0xff] }
 0x34f   : > { %3614 = vset.pattern.permute.xlu1 %v6440_v32  ;;  %v6444_v32 = vld [vmem:[#allocation48_spill] sm:$0xff] }
 0x350   : > { %2734 = vperm.xlu1 %3614, %v5387_v1   ;;  %vm1868_vm8 = vcmp.eq.s32.totalorder %v6444_v32, %v4319_v45  ;;  %v6445_v1 = vld [vmem:[#allocation29_spill] sm:$0xff]  ;;  %v6447_v32 = vld [vmem:[#allocation39_spill] sm:$0xff] }
 0x351   : > { %v5489_v28 = vpop.permute.xlu1 %2141  ;;  %v1801_v7 = vsel %vm1786_vm4, %v6445_v1, 0.0  ;;  %v1855_v36 = vsel %vm1840_vm7, %v6447_v32, 0.0  ;;  %v1883_v26 = vsel %vm1868_vm8, %v6448_v35, 0.0  ;;  %v1856_v1 = vsel %vm1841_vm11, %v5276_v30, 0.0 }
 0x352   : > { %v5539_v42 = vadd.f32 %v1883_v26, %v1856_v1  ;;  %v5541_v18 = vadd.f32 %v1882_v0, %v1855_v36  ;;  %vm1922_vm7 = vcmp.eq.s32.totalorder %v5325_v49, %v4319_v45  ;;  %vm1975_vm11 = vcmp.eq.s32.totalorder %v5336_v24, %v4319_v45 }
 0x353   : > { %vm2137_vm4 = vcmp.eq.s32.totalorder %v5380_v16, %v4319_v45  ;;  %vm2138_vm8 = vcmp.eq.s32.totalorder %v5390_v17, %v4319_v45  ;;  %v1963_v16 = vsel %vm1948_vm10, %v5428_v6, 0.0 }
 0x354   : > { %3615 = vset.pattern.permute.xlu1 %v6381_v44  ;;  %v1802_v44 = vsel %vm1787_vm9, %v5216_v33, 0.0  ;;  %v6449_v33 = vld [vmem:[#allocation51_spill] sm:$0xff]  ;;  %vm2084_vm9 = vcmp.eq.s32.totalorder %v5369_v61, %v4319_v45  ;;  %v2152_v6 = vsel %vm2137_vm4, %v5489_v28, 0.0  ;;  %v2125_v28 = vsel %vm2110_vm2, %v5479_v31, 0.0 }
 0x355   : > { %1906 = vperm.xlu1 %3615, %v5225_v3   ;;  %v5497_v23 = vpop.permute.xlu1 %2145  ;;  %vm1894_vm13 = vcmp.eq.s32.totalorder %v6449_v33, %v4319_v45  ;;  %v5529_v30 = vadd.f32 %v1829_v10, %v1802_v44  ;;  %v6452_v10 = vld [vmem:[#allocation65_spill] sm:$0xff]  ;;  %v2219_v44 = vadd.f32 %v1991_v15, %v1964_v60  ;;  %v2099_v29 = vsel %vm2084_vm9, %v5471_v20, 0.0 }
 0x356   : > { %v2017_v20 = vsel %vm6454_vm5, %v5445_v57, 0.0  ;;  %v2072_v31 = vsel %vm6456_vm14, %v5463_v41, 0.0  ;;  %v2153_v52 = vsel %vm2138_vm8, %v5497_v23, 0.0  ;;  %vm6457_vm2 = vcmp.eq.s32.totalorder %v6452_v10, %v4319_v45 }
 0x357   : > { %v2126_v41 = vsel %vm6457_vm2, %v5484_v21, 0.0  ;;  %v6463_v10 = vmov 48   ;;  %v6468_v60 = vmov 51  }
 0x358   : > { %v2228_v36 = vadd.f32 %v2153_v52, %v2126_v41  ;;  %v6477_v41 = vmov 60  }
 0x359   : > { %3617 = vset.pattern.permute.xlu1 %v6389_v47  ;;  %v5533_v47 = vadd.f32 %v1828_v39, %v1801_v7  ;;  %v1990_v7 = vsel %vm1975_vm11, %v5438_v48, 0.0  ;;  %v1936_v48 = vsel %vm1921_vm15, %v5417_v22, 0.0  ;;  %vm2165_vm11 = vcmp.eq.s32.totalorder %v5396_v58, %v4319_v45 }
 0x35a   : > { %1960 = vperm.xlu1 %3617, %v5225_v3   ;;  %v2169_v43 = vpop.permute.xlu1 %2168  ;;  %vm2191_vm15 = vcmp.eq.s32.totalorder %v5401_v27, %v4319_v45  ;;  %v1909_v22 = vsel %vm1894_vm13, %v5406_v51, 0.0  ;;  %v2218_v59 = vadd.f32 %v1990_v7, %v1963_v16  ;;  %vm6455_vm13 = vcmp.eq.s32.totalorder %v6451_v9, %v4319_v45 }
 0x35b   : > { %v2215_v49 = vadd.f32 %v1936_v48, %v1909_v22  ;;  %v2225_v39 = vadd.f32 %v2099_v29, %v2072_v31  ;;  %v2233_v21 = vadd.f32 %v5541_v18, %v5533_v47  ;;  %v6462_v18 = vld [vmem:[#allocation20_spill] sm:$0xff]  ;;  %v6465_v48 = vld [vmem:[#allocation18_spill] sm:$0xff]  ;;  %v6466_v16 = vmov 49  }
 0x35e   : > { %3618 = vset.pattern.permute.xlu1 %v6393_v12  ;;  %v2173_v24 = vpop.permute.xlu1 %2172  ;;  %v1937_v12 = vsel %vm1922_vm7, %v5422_v4, 0.0  ;;  %v1910_v4 = vsel %vm1895_vm6, %v5412_v25, 0.0  ;;  %v2044_v25 = vsel %vm2029_vm1, %v5452_v8, 0.0  ;;  %vm6453_vm1 = vcmp.eq.s32.totalorder %v5246_v34, %v4319_v45 }
 0x35f   : > { %1987 = vperm.xlu1 %3618, %v5225_v3   ;;  %v2216_v51 = vadd.f32 %v1937_v12, %v1910_v4  ;;  %v2179_v2 = vsel %vm6453_vm1, %v2169_v43, 0.0  ;;  %v2227_v8 = vadd.f32 %v2152_v6, %v2125_v28  ;;  %v2045_v34 = vsel %vm6455_vm13, %v5456_v53, 0.0 }
 0x360   : > { %v2221_v27 = vadd.f32 %v2044_v25, %v2017_v20  ;;  %v2018_v53 = vsel %vm2003_vm0, %v5448_v14, 0.0  ;;  %v2180_v17 = vsel %vm2165_vm11, %v2173_v24, 0.0  ;;  %v2234_v14 = vadd.f32 %v5539_v42, %v5529_v30  ;;  %v6464_v24 = vld [vmem:[#allocation15_spill] sm:$0xff] }
 0x361   : > { %v2237_v63 = vadd.f32 %v2219_v44, %v2216_v51  ;;  %v2222_v23 = vadd.f32 %v2045_v34, %v2018_v53  ;;  %v6459_v30 = vmov 45   ;;  %vm6460_vm0 = vcmask 654336  }
 0x362   : > { %v2239_v32 = vadd.f32 %v2224_v11, %v2221_v27  ;;  %v6461_v42 = vmov 47   ;;  %v6467_v4 = vmov 50   ;;  %v6469_v51 = vmov 52  }
 0x363   : > { %3620 = vset.pattern.permute.xlu1 %v6330_v56  ;;  %v2196_v62 = vpop.permute.xlu1 %2195  ;;  %v2236_v56 = vadd.f32 %v2218_v59, %v2215_v49  ;;  %v2240_v58 = vadd.f32 %v2225_v39, %v2222_v23  ;;  %v2246_v0 = vadd.f32 %v2237_v63, %v2234_v14  ;;  %v6471_v28 = vmov 54   ;;  %v6479_v23 = vld [vmem:[#allocation42_spill] sm:$0xff] }
 0x364   : > { %v2206_v19 = vsel %vm2191_vm15, %v2196_v62, 0.0  ;;  %2041 = vperm.xlu1 %3620, %v5225_v3   ;;  %v6474_v34 = vmov 57   ;;  %v6475_v63 = vmov 58   ;;  %vm2139_vm6 = vcmp.eq.s32.totalorder %v6479_v23, %v4319_v45  ;;  %v6482_v14 = vld [vmem:[#allocation66_spill] sm:$0xff] }
 0x365   : > { %v2230_v61 = vadd.f32 %v2206_v19, %v2179_v2  ;;  %v2245_v13 = vadd.f32 %v2236_v56, %v2233_v21  ;;  %v6472_v56 = vmov 55   ;;  %vm2112_vm9 = vcmp.eq.s32.totalorder %v6482_v14, %v4319_v45  ;;  %v6483_v21 = vld [vmem:[#allocation44_spill] sm:$0xff] }
 0x366   : > { %vm2193_vm10 = vcmp.eq.s32.totalorder %v6483_v21, %v4319_v45  ;;  %v6490_v21 = vld [vmem:[#allocation46_spill] sm:$0xff] }
 0x367   : > { %v2242_v40 = vadd.f32 %v2230_v61, %v2227_v8  ;;  %v2200_v57 = vpop.permute.xlu1 %2199  ;;  %v6473_v61 = vmov 56   ;;  %vm2415_vm12 = vcmp.eq.s32.totalorder %v6490_v21, %v4319_v45 }
 0x368   : > { %v2207_v55 = vsel %vm6458_vm3, %v2200_v57, 0.0  ;;  %3621 = vset.pattern.permute.xlu1 %v6332_v46 }
 0x369   : > { %v2231_v50 = vadd.f32 %v2207_v55, %v2180_v17  ;;  %2068 = vperm.xlu1 %3621, %v5225_v3   ;;  %v2248_v35 = vadd.f32 %v2242_v40, %v2239_v32  ;;  %v6476_v40 = vmov 59   ;;  %v6478_v17 = vld [vmem:[#allocation64_spill] sm:$0xff]  ;;  %v6480_v32 = vld [vmem:[#allocation59_spill] sm:$0xff] }
 0x36a   : > { %vm2058_vm4 = vcmp.eq.s32.totalorder %v6478_v17, %v4319_v45  ;;  %vm2004_vm7 = vcmp.eq.s32.totalorder %v6480_v32, %v4319_v45  ;;  %v6489_v32 = vmov 63  }
 0x36b   : > { %v2243_v26 = vadd.f32 %v2231_v50, %v2228_v36  ;;  %v2251_v33 = vadd.f32 %v2248_v35, %v2245_v13  ;;  %v6481_v50 = vld [vmem:[#allocation60_spill] sm:$0xff] }
 0x36c   : > { %v5673_v1 = vpop.permute.xlu1 %2329  ;;  %vm2031_vm8 = vcmp.eq.s32.totalorder %v6481_v50, %v4319_v45 }
 0x36d   : > { %v2249_v46 = vadd.f32 %v2243_v26, %v2240_v58  ;;  %3623 = vset.pattern.permute.xlu1 %v6342_v5  ;;  %v6484_v58 = vld [vmem:[#allocation14_spill] sm:$0xff]  ;;  %vm2335_vm1 = vcmp.eq.s32.totalorder %v5673_v1, %v4319_v45 }
 0x36e   : > { %2122 = vperm.xlu1 %3623, %v5225_v3   ;;  %v2019_v35 = vsel %vm2004_vm7, %v6484_v58, 0.0  ;;  %v6491_v58 = vld [vmem:[#allocation26_spill] sm:$0xff] }
 0x36f   : > { %v2252_v38 = vadd.f32 %v2249_v46, %v2246_v0  ;;  %v6485_v0 = vld [vmem:[#allocation17_spill] sm:$0xff]  ;;  %vm2362_vm11 = vcmp.eq.s32.totalorder %v6491_v58, %v4319_v45 }
 0x371   : > { %v5677_v43 = vpop.permute.xlu1 %2353  ;;  %v2254_v9 = vpack.c.bf16 %v2252_v38, %v2251_v33 }
 0x372   : > { %3624 = vset.pattern.permute.xlu1 %v6459_v30  ;;  %v6486_v30 = vmov 61   ;;  %vm2361_vm7 = vcmp.eq.s32.totalorder %v5677_v43, %v4319_v45 }
 0x373   : > { %2149 = vperm.xlu1 %3624, %v5225_v3   ;;  %3370 = vmatprep.mubr.msk.bf16.mxu0 %vm6460_vm0, %v2254_v9 }
 0x376   : > { %v5682_v47 = vpop.permute.xlu1 %2380 }
 0x377   : > { %3626 = vset.pattern.permute.xlu1 %v6461_v42  ;;  %vm2388_vm15 = vcmp.eq.s32.totalorder %v5682_v47, %v4319_v45 }
 0x378   : > { %2203 = vperm.xlu1 %3626, %v5225_v3  }
 0x37a   : > { %v5686_v5 = vpop.permute.xlu1 %2383 }
 0x37b   : > { %vm2389_vm5 = vcmp.eq.s32.totalorder %v5686_v5, %v4319_v45 }
 0x37c   : > { %2262 = vrot.lane.b32.xlu1 %v6462_v18, %s3759_s18 }
 0x37d   : > { %3627 = vset.pattern.permute.xlu1 %v6463_v10 }
 0x37f   : > { %v5691_v7 = vpop.permute.xlu1 %2410 }
 0x380   : > { %2338 = vperm.xlu1 %3627, %v6464_v24   ;;  %vm2416_vm13 = vcmp.eq.s32.totalorder %v5691_v7, %v4319_v45 }
 0x384   : > { %2342 = vperm.xlu1 %3627, %v6465_v48   ;;  %v5695_v12 = vpop.permute.xlu1 %2434 }
 0x385   : > { %vm2442_vm2 = vcmp.eq.s32.totalorder %v5695_v12, %v4319_v45 }
 0x388   : > { %3628 = vset.pattern.permute.xlu1 %v6466_v16 }
 0x389   : > { %2365 = vperm.xlu1 %3628, %v6464_v24   ;;  %v5699_v15 = vpop.permute.xlu1 %2461 }
 0x38a   : > { %vm2469_vm3 = vcmp.eq.s32.totalorder %v5699_v15, %v4319_v45 }
 0x38d   : > { %2369 = vperm.xlu1 %3628, %v6465_v48   ;;  %v5702_v22 = vpop.permute.xlu1 %2464 }
 0x38e   : > { %vm2470_vm0 = vcmp.eq.s32.totalorder %v5702_v22, %v4319_v45  ;;  %v6494_v22 = vld [vmem:[#allocation33_spill] sm:$0xff] }
 0x391   : > { %3631 = vset.pattern.permute.xlu1 %v6467_v4 }
 0x392   : > { %2392 = vperm.xlu1 %3631, %v6464_v24   ;;  %v5706_v59 = vpop.permute.xlu1 %2491 }
 0x396   : > { %2396 = vperm.xlu1 %3631, %v6465_v48  }
 0x397   : > { %v5709_v49 = vpop.permute.xlu1 %2515 }
 0x39a   : > { %3632 = vset.pattern.permute.xlu1 %v6468_v60  ;;  %v6487_v60 = vld [vmem:[#allocation5_spill] sm:$0xff] }
 0x39b   : > { %2419 = vperm.xlu1 %3632, %v6464_v24  }
 0x39c   : > { %v5713_v37 = vpop.permute.xlu1 %2542 }
 0x39f   : > { %2423 = vperm.xlu1 %3632, %v6465_v48  }
 0x3a0   : > { %v5716_v6 = vpop.permute.xlu1 %2545 }
 0x3a3   : > { %3633 = vset.pattern.permute.xlu1 %v6469_v51 }
 0x3a4   : > { %2446 = vperm.xlu1 %3633, %v6464_v24  }
 0x3a5   : > { %v5720_v44 = vpop.permute.xlu1 %2572 }
 0x3a8   : > { %2450 = vperm.xlu1 %3633, %v6465_v48  }
 0x3aa   : > { %v5723_v25 = vpop.permute.xlu1 %2596 }
 0x3ac   : > { %3636 = vset.pattern.permute.xlu1 %v6470_v54 }
 0x3ad   : > { %2473 = vperm.xlu1 %3636, %v6464_v24  }
 0x3af   : > { %v5727_v62 = vpop.permute.xlu1 %2623 }
 0x3b1   : > { %2477 = vperm.xlu1 %3636, %v6465_v48  }
 0x3b3   : > { %v5730_v29 = vpop.permute.xlu1 %2626 }
 0x3b5   : > { %3637 = vset.pattern.permute.xlu1 %v6471_v28 }
 0x3b6   : > { %2500 = vperm.xlu1 %3637, %v6464_v24  }
 0x3b8   : > { %v5734_v2 = vpop.permute.xlu1 %2653 }
 0x3ba   : > { %2504 = vperm.xlu1 %3637, %v6465_v48  }
 0x3bd   : > { %v5737_v19 = vpop.permute.xlu1 %2677 }
 0x3be   : > { %3638 = vset.pattern.permute.xlu1 %v6472_v56 }
 0x3bf   : > { %2527 = vperm.xlu1 %3638, %v6464_v24  }
 0x3c2   : > { %v5741_v11 = vpop.permute.xlu1 %2704 }
 0x3c3   : > { %2531 = vperm.xlu1 %3638, %v6465_v48  }
 0x3c6   : > { %v5744_v8 = vpop.permute.xlu1 %2707 }
 0x3c7   : > { %3641 = vset.pattern.permute.xlu1 %v6473_v61 }
 0x3c8   : > { %2554 = vperm.xlu1 %3641, %v6464_v24  }
 0x3cb   : > { %v5748_v20 = vpop.permute.xlu1 %2734 }
 0x3cc   : > { %2558 = vperm.xlu1 %3641, %v6465_v48  }
 0x3d0   : > { %3642 = vset.pattern.permute.xlu1 %v6474_v34  ;;  %v5752_v31 = vpop.permute.xlu1 %1906 }
 0x3d1   : > { %2581 = vperm.xlu1 %3642, %v6464_v24  }
 0x3d5   : > { %2585 = vperm.xlu1 %3642, %v6465_v48   ;;  %v5756_v52 = vpop.permute.xlu1 %1960 }
 0x3d9   : > { %3643 = vset.pattern.permute.xlu1 %v6475_v63 }
 0x3da   : > { %2608 = vperm.xlu1 %3643, %v6464_v24   ;;  %v5760_v27 = vpop.permute.xlu1 %1987 }
 0x3de   : > { %2612 = vperm.xlu1 %3643, %v6465_v48  }
 0x3df   : > { %v2042_v39 = vpop.permute.xlu1 %2041 }
 0x3e0   : > { %v2046_v26 = vsel %vm2031_vm8, %v2042_v39, 0.0  ;;  %vm2523_vm8 = vcmp.eq.s32.totalorder %v5709_v49, %v4319_v45 }
 0x3e1   : > { %v2223_v42 = vadd.f32 %v2046_v26, %v2019_v35 }
 0x3e2   : > { %3646 = vset.pattern.permute.xlu1 %v6476_v40 }
 0x3e3   : > { %2635 = vperm.xlu1 %3646, %v6464_v24  }
 0x3e4   : > { %v2069_v57 = vpop.permute.xlu1 %2068 }
 0x3e5   : > { %v2073_v36 = vsel %vm2058_vm4, %v2069_v57, 0.0 }
 0x3e6   : > { %v2226_v46 = vadd.f32 %v6485_v0, %v2073_v36 }
 0x3e7   : > { %2639 = vperm.xlu1 %3646, %v6465_v48  }
 0x3e8   : > { %v2241_v34 = vadd.f32 %v2226_v46, %v2223_v42 }
 0x3e9   : > { %v2123_v53 = vpop.permute.xlu1 %2122 }
 0x3ea   : > { %v2127_v38 = vsel %vm2112_vm9, %v2123_v53, 0.0  ;;  %v6488_v53 = vmov 62  }
 0x3eb   : > { %3647 = vset.pattern.permute.xlu1 %v6477_v41 }
 0x3ec   : > { %2662 = vperm.xlu1 %3647, %v6464_v24  }
 0x3ee   : > { %v2150_v55 = vpop.permute.xlu1 %2149 }
 0x3ef   : > { %v2154_v13 = vsel %vm2139_vm6, %v2150_v55, 0.0  ;;  %vm2496_vm6 = vcmp.eq.s32.totalorder %v6494_v22, %v4319_v45 }
 0x3f0   : > { %2666 = vperm.xlu1 %3647, %v6465_v48   ;;  %v2229_v10 = vadd.f32 %v2154_v13, %v2127_v38 }
 0x3f3   : > { %v2204_v33 = vpop.permute.xlu1 %2203 }
 0x3f4   : > { %v2208_v9 = vsel %vm2193_vm10, %v2204_v33, 0.0  ;;  %3648 = vset.pattern.permute.xlu1 %v6486_v30  ;;  %vm2497_vm10 = vcmp.eq.s32.totalorder %v5706_v59, %v4319_v45  ;;  %v6497_v59 = vld [vmem:[#allocation23_spill] sm:$0xff] }
 0x3f5   : > { %v2232_v28 = vadd.f32 %v2208_v9, %v6487_v60  ;;  %2689 = vperm.xlu1 %3648, %v6464_v24  }
 0x3f7   : > { %v2244_v57 = vadd.f32 %v2232_v28, %v2229_v10  ;;  %v2263_v41 = vpop.permute.xlu1 %2262 }
 0x3f8   : > { %3362 = vmatprep.subr.bf16.mxu0 %v2263_v41 }
 0x3f9   : > { %v5786_v17 = vadd.f32 %v2244_v57, %v2241_v34  ;;  %2693 = vperm.xlu1 %3648, %v6465_v48   ;;  %3363 = vmatpush3.bf16.msra.mxu0 %v2263_v41  ;;  %v6495_v41 = vld [vmem:[#allocation41_spill] sm:$0xff] }
 0x3fa   : > { %vm2524_vm9 = vcmp.eq.s32.totalorder %v6495_v41, %v4319_v45 }
 0x3fb   : > { %v5789_v39 = vpop.permute.xlu1 %2338 }
 0x3fd   : > { %3651 = vset.pattern.permute.xlu1 %v6488_v53 }
 0x3fe   : > { %2716 = vperm.xlu1 %3651, %v6464_v24  }
 0x3ff   : > { %v2343_v55 = vpop.permute.xlu1 %2342 }
 0x400   : > { %v2350_v47 = vsel %vm2335_vm1, %v2343_v55, 0.0 }
 0x402   : > { %2720 = vperm.xlu1 %3651, %v6465_v48  }
 0x404   : > { %v2366_v23 = vpop.permute.xlu1 %2365 }
 0x406   : > { %3652 = vset.pattern.permute.xlu1 %v6489_v32 }
 0x407   : > { %2743 = vperm.xlu1 %3652, %v6464_v24  }
 0x408   : > { %v2370_v36 = vpop.permute.xlu1 %2369 }
 0x409   : > { %v2377_v26 = vsel %vm2362_vm11, %v2370_v36, 0.0 }
 0x40a   : > { %v2758_v46 = vadd.f32 %v2377_v26, %v2350_v47  ;;  %v6499_v26 = vld [vmem:[#allocation72_spill] sm:$0xff] }
 0x40b   : > { %2747 = vperm.xlu1 %3652, %v6465_v48  }
 0x40d   : > { %v2393_v50 = vpop.permute.xlu1 %2392 }
 0x40e   : > { %v2403_v48 = vsel %vm2388_vm15, %v2393_v50, 0.0 }
 0x40f   : > { %3654 = vset.pattern.permute.xlu1 %v6466_v16 }
 0x410   : > { %2373 = vperm.xlu1 %3654, %v5225_v3  }
 0x411   : > { %v2397_v14 = vpop.permute.xlu1 %2396 }
 0x412   : > { %v2404_v13 = vsel %vm2389_vm5, %v2397_v14, 0.0 }
 0x414   : > { %3655 = vset.pattern.permute.xlu1 %v6467_v4 }
 0x415   : > { %2400 = vperm.xlu1 %3655, %v5225_v3  }
 0x416   : > { %v2420_v24 = vpop.permute.xlu1 %2419 }
 0x417   : > { %v2430_v35 = vsel %vm2415_vm12, %v2420_v24, 0.0 }
 0x418   : > { %v2760_v16 = vadd.f32 %v2430_v35, %v2403_v48  ;;  %v6498_v35 = vld [vmem:[#allocation24_spill] sm:$0xff] }
 0x419   : > { %3657 = vset.pattern.permute.xlu1 %v6469_v51  ;;  %v6492_v51 = vld [vmem:[#allocation10_spill] sm:$0xff] }
 0x41a   : > { %2454 = vperm.xlu1 %3657, %v5225_v3   ;;  %v2424_v4 = vpop.permute.xlu1 %2423  ;;  %vm2443_vm14 = vcmp.eq.s32.totalorder %v6492_v51, %v4319_v45 }
 0x41b   : > { %v2431_v0 = vsel %vm2416_vm13, %v2424_v4, 0.0  ;;  %v6500_v4 = vld [vmem:[#allocation71_spill] sm:$0xff]  ;;  %vm2550_vm13 = vcmp.eq.s32.totalorder %v5713_v37, %v4319_v45 }
 0x41c   : > { %v2761_v33 = vadd.f32 %v2431_v0, %v2404_v13 }
 0x41e   : > { %v2782_v38 = vadd.f32 %v2761_v33, %v2758_v46  ;;  %3658 = vset.pattern.permute.xlu1 %v6470_v54 }
 0x41f   : > { %2481 = vperm.xlu1 %3658, %v5225_v3   ;;  %v2447_v1 = vpop.permute.xlu1 %2446 }
 0x420   : > { %v2457_v54 = vsel %vm2442_vm2, %v2447_v1, 0.0  ;;  %vm2578_vm2 = vcmp.eq.s32.totalorder %v5720_v44, %v4319_v45 }
 0x423   : > { %3660 = vset.pattern.permute.xlu1 %v6472_v56  ;;  %v2451_v5 = vpop.permute.xlu1 %2450 }
 0x424   : > { %v2458_v9 = vsel %vm2443_vm14, %v2451_v5, 0.0  ;;  %2535 = vperm.xlu1 %3660, %v5225_v3   ;;  %vm2551_vm14 = vcmp.eq.s32.totalorder %v5716_v6, %v4319_v45 }
 0x428   : > { %3661 = vset.pattern.permute.xlu1 %v6473_v61  ;;  %v2474_v7 = vpop.permute.xlu1 %2473  ;;  %v6493_v61 = vld [vmem:[#allocation57_spill] sm:$0xff] }
 0x429   : > { %v2484_v42 = vsel %vm2469_vm3, %v2474_v7, 0.0  ;;  %2562 = vperm.xlu1 %3661, %v5225_v3   ;;  %vm2334_vm4 = vcmp.eq.s32.totalorder %v6493_v61, %v4319_v45  ;;  %v6502_v7 = vld [vmem:[#allocation27_spill] sm:$0xff]  ;;  %vm2631_vm3 = vcmp.eq.s32.totalorder %v5727_v62, %v4319_v45 }
 0x42a   : > { %v2763_v10 = vadd.f32 %v2484_v42, %v2457_v54  ;;  %v2349_v34 = vsel %vm2334_vm4, %v5789_v39, 0.0  ;;  %vm2686_vm11 = vcmp.eq.s32.totalorder %v6502_v7, %v4319_v45  ;;  %v2732_v54 = vpop.permute.xlu0 %2731  ;;  %v6503_v42 = vld [vmem:[#allocation38_spill] sm:$0xff]  ;;  %vm2604_vm4 = vcmp.eq.s32.totalorder %v5723_v25, %v4319_v45 }
 0x42b   : > { %vm2577_vm15 = vcmp.eq.s32.totalorder %v6503_v42, %v4319_v45  ;;  %vm2739_vm5 = vcmp.eq.s32.totalorder %v2732_v54, %v4319_v45  ;;  %v6513_v54 = vld [vmem:[#allocation11_spill] sm:$0xff] }
 0x42c   : > { %v2478_v56 = vpop.permute.xlu1 %2477 }
 0x42d   : > { %v2485_v60 = vsel %vm2470_vm0, %v2478_v56, 0.0  ;;  %3663 = vset.pattern.permute.xlu1 %v6475_v63  ;;  %v2376_v63 = vsel %vm2361_vm7, %v2366_v23, 0.0  ;;  %vm2685_vm0 = vcmp.eq.s32.totalorder %v5737_v19, %v4319_v45  ;;  %vm2659_vm7 = vcmp.eq.s32.totalorder %v5734_v2, %v4319_v45 }
 0x42e   : > { %v2764_v28 = vadd.f32 %v2485_v60, %v2458_v9  ;;  %2616 = vperm.xlu1 %3663, %v5225_v3   ;;  %v2757_v55 = vadd.f32 %v2376_v63, %v2349_v34  ;;  %v6501_v9 = vld [vmem:[#allocation32_spill] sm:$0xff] }
 0x42f   : > { %vm2605_vm12 = vcmp.eq.s32.totalorder %v6501_v9, %v4319_v45 }
 0x430   : > { %v2781_v43 = vadd.f32 %v2760_v16, %v2757_v55 }
 0x431   : > { %v2501_v12 = vpop.permute.xlu1 %2500 }
 0x432   : > { %3664 = vset.pattern.permute.xlu1 %v6476_v40  ;;  %v2511_v57 = vsel %vm2496_vm6, %v2501_v12, 0.0  ;;  %vm2632_vm6 = vcmp.eq.s32.totalorder %v5730_v29, %v4319_v45 }
 0x433   : > { %2643 = vperm.xlu1 %3664, %v5225_v3  }
 0x435   : > { %v2505_v15 = vpop.permute.xlu1 %2504 }
 0x436   : > { %v2512_v36 = vsel %vm2497_vm10, %v2505_v15, 0.0  ;;  %vm2740_vm10 = vcmp.eq.s32.totalorder %v5748_v20, %v4319_v45  ;;  %v6505_v20 = vld [vmem:[#allocation62_spill] sm:$0xff] }
 0x437   : > { %3666 = vset.pattern.permute.xlu1 %v6486_v30 }
 0x438   : > { %2697 = vperm.xlu1 %3666, %v5225_v3  }
 0x43a   : > { %v2528_v40 = vpop.permute.xlu1 %2527 }
 0x43b   : > { %v2538_v30 = vsel %vm2523_vm8, %v2528_v40, 0.0  ;;  %vm2712_vm8 = vcmp.eq.s32.totalorder %v5741_v11, %v4319_v45 }
 0x43c   : > { %v2766_v32 = vadd.f32 %v2538_v30, %v2511_v57  ;;  %3667 = vset.pattern.permute.xlu1 %v6488_v53 }
 0x43d   : > { %2724 = vperm.xlu1 %3667, %v5225_v3   ;;  %v6496_v3 = vld [vmem:[#allocation22_spill] sm:$0xff] }
 0x43e   : > { %v2784_v23 = vadd.f32 %v2766_v32, %v2763_v10  ;;  %v2532_v49 = vpop.permute.xlu1 %2531  ;;  %v6504_v10 = vld [vmem:[#allocation68_spill] sm:$0xff] }
 0x43f   : > { %v2539_v50 = vsel %vm2524_vm9, %v2532_v49, 0.0  ;;  %vm2658_vm1 = vcmp.eq.s32.totalorder %v6504_v10, %v4319_v45  ;;  %vm2713_vm9 = vcmp.eq.s32.totalorder %v5744_v8, %v4319_v45 }
 0x440   : > { %v5850_v39 = vadd.f32 %v2784_v23, %v2781_v43  ;;  %v2767_v14 = vadd.f32 %v2539_v50, %v2512_v36 }
 0x441   : > { %2810 = vrot.lane.b32.xlu1 %v6462_v18, %s3777_s20 }
 0x442   : > { %v2785_v21 = vadd.f32 %v2767_v14, %v2764_v28 }
 0x443   : > { %v2555_v58 = vpop.permute.xlu1 %2554 }
 0x444   : > { %v5854_v24 = vadd.f32 %v2785_v21, %v2782_v38  ;;  %v2565_v11 = vsel %vm2550_vm13, %v2555_v58, 0.0 }
 0x445   : > { %2260 = vrot.lane.b32.xlu1 %v6496_v3, %s3759_s18 }
 0x447   : > { %v2559_v53 = vpop.permute.xlu1 %2558 }
 0x448   : > { %v2566_v44 = vsel %vm2551_vm14, %v2559_v53, 0.0  ;;  %v6506_v53 = vld [vmem:[#allocation30_spill] sm:$0xff] }
 0x449   : > { %2258 = vrot.lane.b32.xlu1 %v6497_v59, %s3759_s18 }
 0x44c   : > { %v2582_v48 = vpop.permute.xlu1 %2581 }
 0x44d   : > { %2256 = vrot.lane.b32.xlu1 %v6498_v35, %s3759_s18  ;;  %v2592_v28 = vsel %vm2577_vm15, %v2582_v48, 0.0  ;;  %vm6509_vm15 = vcmask 654336  }
 0x44e   : > { %v2769_v30 = vadd.f32 %v2592_v28, %v2565_v11 }
 0x450   : > { %v2586_v16 = vpop.permute.xlu1 %2585 }
 0x451   : > { %2879 = vrot.lane.b32.xlu1 %v6499_v26, %s3788_s21  ;;  %v2593_v40 = vsel %vm2578_vm2, %v2586_v16, 0.0  ;;  %v6507_v16 = vld [vmem:[#allocation12_spill] sm:$0xff] }
 0x452   : > { %v2770_v23 = vadd.f32 %v2593_v40, %v2566_v44 }
 0x455   : > { %v2609_v18 = vpop.permute.xlu1 %2608  ;;  %2883 = vrot.lane.b32.xlu1 %v6500_v4, %s3788_s21 }
 0x456   : > { %v2619_v12 = vsel %vm2604_vm4, %v2609_v18, 0.0 }
 0x459   : > { %v2613_v47 = vpop.permute.xlu1 %2612 }
 0x45a   : > { %v2620_v34 = vsel %vm2605_vm12, %v2613_v47, 0.0  ;;  %vm2363_vm12 = vcmp.eq.s32.totalorder %v6505_v20, %v4319_v45  ;;  %v6508_v47 = vld [vmem:[#allocation6_spill] sm:$0xff]  ;;  %v6524_v20 = vld [vmem:[#allocation37_spill] sm:$0xff] }
 0x45e   : > { %v2636_v13 = vpop.permute.xlu1 %2635 }
 0x45f   : > { %v2646_v56 = vsel %vm2631_vm3, %v2636_v13, 0.0 }
 0x460   : > { %v2772_v29 = vadd.f32 %v2646_v56, %v2619_v12  ;;  %v6514_v56 = vld [vmem:[#allocation19_spill] sm:$0xff] }
 0x461   : > { %vm2552_vm14 = vcmp.eq.s32.totalorder %v6514_v56, %v4319_v45 }
 0x462   : > { %v2640_v0 = vpop.permute.xlu1 %2639  ;;  %v2787_v49 = vadd.f32 %v2772_v29, %v2769_v30  ;;  %v2738_v29 = vpop.permute.xlu0 %2737 }
 0x463   : > { %v2647_v15 = vsel %vm2632_vm6, %v2640_v0, 0.0  ;;  %vm2741_vm4 = vcmp.eq.s32.totalorder %v2738_v29, %v4319_v45 }
 0x464   : > { %v2773_v41 = vadd.f32 %v2647_v15, %v2620_v34 }
 0x466   : > { %v2788_v14 = vadd.f32 %v2773_v41, %v2770_v23  ;;  %v2752_v41 = vpop.permute.xlu0 %2751 }
 0x467   : > { %v2663_v46 = vpop.permute.xlu1 %2662 }
 0x468   : > { %v2673_v19 = vsel %vm2658_vm1, %v2663_v46, 0.0 }
 0x46b   : > { %v2667_v33 = vpop.permute.xlu1 %2666 }
 0x46c   : > { %v2674_v55 = vsel %vm2659_vm7, %v2667_v33, 0.0  ;;  %v6510_v33 = vld [vmem:[#allocation40_spill] sm:$0xff] }
 0x46d   : > { %vm2444_vm1 = vcmp.eq.s32.totalorder %v6510_v33, %v4319_v45 }
 0x470   : > { %v2690_v38 = vpop.permute.xlu1 %2689 }
 0x471   : > { %v2700_v60 = vsel %vm2685_vm0, %v2690_v38, 0.0  ;;  %v6511_v38 = vld [vmem:[#allocation8_spill] sm:$0xff] }
 0x472   : > { %v2775_v22 = vadd.f32 %v2700_v60, %v2673_v19 }
 0x474   : > { %v2694_v1 = vpop.permute.xlu1 %2693 }
 0x475   : > { %v2701_v57 = vsel %vm2686_vm11, %v2694_v1, 0.0  ;;  %vm2390_vm11 = vcmp.eq.s32.totalorder %v6507_v16, %v4319_v45 }
 0x476   : > { %v2776_v36 = vadd.f32 %v2701_v57, %v2674_v55  ;;  %v6518_v57 = vld [vmem:[#allocation9_spill] sm:$0xff]  ;;  %v2756_v55 = vsel %vm2741_vm4, %v2752_v41, 0.0  ;;  %vm6540_vm4 = vcmask 261120  }
 0x477   : > { %vm2687_vm0 = vcmp.eq.s32.totalorder %v6518_v57, %v4319_v45 }
 0x479   : > { %v2717_v51 = vpop.permute.xlu1 %2716 }
 0x47a   : > { %v2727_v25 = vsel %vm2712_vm8, %v2717_v51, 0.0 }
 0x47d   : > { %v2721_v5 = vpop.permute.xlu1 %2720 }
 0x47e   : > { %v2728_v32 = vsel %vm2713_vm9, %v2721_v5, 0.0  ;;  %v6512_v5 = vld [vmem:[#allocation7_spill] sm:$0xff] }
 0x47f   : > { %vm2525_vm13 = vcmp.eq.s32.totalorder %v6512_v5, %v4319_v45 }
 0x482   : > { %v2744_v62 = vpop.permute.xlu1 %2743 }
 0x483   : > { %v2754_v61 = vsel %vm2739_vm5, %v2744_v62, 0.0  ;;  %vm2471_vm5 = vcmp.eq.s32.totalorder %v6511_v38, %v4319_v45  ;;  %v6515_v62 = vld [vmem:[#allocation67_spill] sm:$0xff] }
 0x484   : > { %v2778_v63 = vadd.f32 %v2754_v61, %v2727_v25  ;;  %v6516_v25 = vld [vmem:[#allocation35_spill] sm:$0xff] }
 0x485   : > { %vm2606_vm2 = vcmp.eq.s32.totalorder %v6516_v25, %v4319_v45  ;;  %v6517_v61 = vld [vmem:[#allocation55_spill] sm:$0xff] }
 0x486   : > { %v2790_v8 = vadd.f32 %v2778_v63, %v2775_v22  ;;  %v2748_v37 = vpop.permute.xlu1 %2747  ;;  %vm2633_vm3 = vcmp.eq.s32.totalorder %v6517_v61, %v4319_v45 }
 0x487   : > { %v2755_v43 = vsel %vm2740_vm10, %v2748_v37, 0.0  ;;  %v6519_v37 = vld [vmem:[#allocation69_spill] sm:$0xff] }
 0x488   : > { %v2779_v50 = vadd.f32 %v2755_v43, %v2728_v32  ;;  %v2796_v21 = vadd.f32 %v2790_v8, %v2787_v49  ;;  %v6520_v32 = vld [vmem:[#allocation52_spill] sm:$0xff]  ;;  %v6521_v43 = vld [vmem:[#allocation47_spill] sm:$0xff] }
 0x489   : > { %vm1923_vm6 = vcmp.eq.s32.totalorder %v6520_v32, %v4319_v45  ;;  %vm2714_vm7 = vcmp.eq.s32.totalorder %v6521_v43, %v4319_v45  ;;  %v6522_v49 = vld [vmem:[#allocation56_spill] sm:$0xff]  ;;  %v6538_v32 = vld [vmem:[#allocation63_spill] sm:$0xff] }
 0x48a   : > { %v2791_v58 = vadd.f32 %v2779_v50, %v2776_v36  ;;  %v2799_v2 = vadd.f32 %v2796_v21, %v5850_v39  ;;  %vm1977_vm8 = vcmp.eq.s32.totalorder %v6522_v49, %v4319_v45  ;;  %v6523_v50 = vld [vmem:[#allocation54_spill] sm:$0xff]  ;;  %v2874_v49 = vld [vmem:[#allocation2 + $0x8] sm:$0xff] }
 0x48b   : > { %v2374_v3 = vpop.permute.xlu1 %2373  ;;  %vm1950_vm9 = vcmp.eq.s32.totalorder %v6523_v50, %v4319_v45  ;;  %v1992_v21 = vsel %vm1977_vm8, %v5760_v27, 0.0  ;;  %vm6543_vm8 = vmmov %vm6540_vm4 }
 0x48c   : > { %v2797_v59 = vadd.f32 %v2791_v58, %v2788_v14  ;;  %v2378_v6 = vsel %vm2363_vm12, %v2374_v3, 0.0  ;;  %v2809_v14 = vpop.permute.xlu0 %2808  ;;  %v1938_v3 = vsel %vm1923_vm6, %v6524_v20, 0.0  ;;  %v1965_v16 = vsel %vm1950_vm9, %v5756_v52, 0.0  ;;  %v6533_v52 = vld [vmem:[#allocation36_spill] sm:$0xff]  ;;  %vm6541_vm6 = vmmov %vm6540_vm4 }
 0x48d   : > { %v2759_v48 = vadd.f32 %v2378_v6, %v6506_v53  ;;  %v6526_v6 = vld [vmem:[#allocation13_spill] sm:$0xff]  ;;  %v6527_v53 = vld [vmem:[#allocation16_spill] sm:$0xff]  ;;  %vm6544_vm9 = vmmov %vm6540_vm4 }
 0x48e   : > { %v2800_v35 = vadd.f32 %v2797_v59, %v5854_v24  ;;  %v6525_v59 = vld [vmem:[#allocation50_spill] sm:$0xff]  ;;  %vm1869_vm12 = vcmp.eq.s32.totalorder %v6526_v6, %v4319_v45  ;;  %v6539_v6 = vld [vmem:[#allocation61_spill] sm:$0xff] }
 0x48f   : > { %vm1842_vm10 = vcmp.eq.s32.totalorder %v6525_v59, %v4319_v45 }
 0x490   : > { %v2401_v26 = vpop.permute.xlu1 %2400  ;;  %v2802_v18 = vpack.c.bf16 %v2800_v35, %v2799_v2 }
 0x491   : > { %v2405_v4 = vsel %vm2390_vm11, %v2401_v26, 0.0  ;;  %vm1896_vm11 = vcmp.eq.s32.totalorder %v6527_v53, %v4319_v45 }
 0x492   : > { %v2762_v13 = vadd.f32 %v6508_v47, %v2405_v4  ;;  %3384 = vmatprep.mubr.msk.bf16.mxu1 %vm6509_vm15, %v2802_v18  ;;  %v1911_v35 = vsel %vm1896_vm11, %v5752_v31, 0.0  ;;  %v6529_v18 = vld [vmem:[#allocation25_spill] sm:$0xff]  ;;  %v6530_v4 = vld [vmem:[#allocation4_spill] sm:$0xff]  ;;  %v2220_v47 = vadd.f32 %v1992_v21, %v1965_v16  ;;  %vm6547_vm11 = vmmov %vm6540_vm4 }
 0x493   : > { %vm1788_vm15 = vcmp.eq.s32.totalorder %v6529_v18, %v4319_v45  ;;  %v2217_v31 = vadd.f32 %v1938_v3, %v1911_v35 }
 0x494   : > { %v2783_v0 = vadd.f32 %v2762_v13, %v2759_v48  ;;  %v6528_v48 = vld [vmem:[#allocation28_spill] sm:$0xff]  ;;  %v6531_v13 = vld [vmem:[#allocation3_spill] sm:$0xff] }
 0x495   : > { %v2455_v46 = vpop.permute.xlu1 %2454  ;;  %v1884_v2 = vsel %vm1869_vm12, %v6528_v48, 0.0  ;;  %vm6546_vm12 = vmmov %vm6540_vm4 }
 0x496   : > { %v2459_v24 = vsel %vm2444_vm1, %v2455_v46, 0.0  ;;  %vm1815_vm1 = vcmp.eq.s32.totalorder %v6530_v4, %v4319_v45  ;;  %v6532_v46 = vld [vmem:[#allocation21_spill] sm:$0xff] }
 0x497   : > { %v1857_v33 = vsel %vm1842_vm10, %v6532_v46, 0.0  ;;  %v3260_v46 = vld [vmem:[%s6043_s7] ss:$0 sm:$0xff]  ;;  %vm6545_vm10 = vmmov %vm6540_vm4 }
 0x49a   : > { %v2482_v39 = vpop.permute.xlu1 %2481 }
 0x49b   : > { %v2486_v1 = vsel %vm2471_vm5, %v2482_v39, 0.0  ;;  %v2214_v39 = vadd.f32 %v1884_v2, %v1857_v33  ;;  %vm6534_vm5 = vcmask 654336  }
 0x49c   : > { %v2765_v51 = vadd.f32 %v2486_v1, %v2459_v24  ;;  %v1803_v24 = vsel %vm1788_vm15, %v6533_v52, 0.0  ;;  %v2807_v1 = vpop.permute.xlu0 %2806  ;;  %v3018_v52 = vld [vmem:[%s502_s12 + $0x10] sm:$0xf]  ;;  %vm6548_vm15 = vmmov %vm6540_vm4 }
 0x49f   : > { %v2536_v9 = vpop.permute.xlu1 %2535 }
 0x4a0   : > { %v2540_v7 = vsel %vm2525_vm13, %v2536_v9, 0.0  ;;  %vm6535_vm13 = vmmov %vm6534_vm5 }
 0x4a1   : > { %v2768_v42 = vadd.f32 %v2540_v7, %v6513_v54  ;;  %v2238_v7 = vadd.f32 %v2220_v47, %v2217_v31 }
 0x4a3   : > { %v2786_v10 = vadd.f32 %v2768_v42, %v2765_v51 }
 0x4a4   : > { %v2563_v60 = vpop.permute.xlu1 %2562 }
 0x4a5   : > { %v2795_v28 = vadd.f32 %v2786_v10, %v2783_v0  ;;  %v2567_v12 = vsel %vm2552_vm14, %v2563_v60, 0.0  ;;  %v1830_v0 = vsel %vm1815_vm1, %v6531_v13, 0.0  ;;  %v2805_v10 = vpop.permute.xlu0 %2804  ;;  %vm522_vm14 = vcmask 257024   ;;  %vm6549_vm1 = vmmov %vm6540_vm4 }
 0x4a6   : > { %v2771_v15 = vadd.f32 %v6515_v62, %v2567_v12  ;;  %v2211_v9 = vadd.f32 %v1830_v0, %v1803_v24  ;;  %v6536_v62 = vmov 0.0  }
 0x4a7   : > { %523 = vst.msk [vmem:[#allocation2 + $0x10] sm:$0xf] %vm522_vm14, %v6536_v62 }
 0x4a8   : > { %v2235_v45 = vadd.f32 %v2214_v39, %v2211_v9 }
 0x4a9   : > { %v2617_v19 = vpop.permute.xlu1 %2616  ;;  %v2882_v57 = vpop.permute.xlu0 %2881 }
 0x4aa   : > { %v2621_v63 = vsel %vm2606_vm2, %v2617_v19, 0.0  ;;  %v2247_v42 = vadd.f32 %v2238_v7, %v2235_v45  ;;  %vm2912_vm2 = vcmask 64512  }
 0x4ac   : > { %v2253_v56 = vadd.f32 %v5786_v17, %v2247_v42 }
 0x4ae   : > { %v2644_v22 = vpop.permute.xlu1 %2643  ;;  %v2875_v48 = vld [vmem:[#allocation2 + $0x10] sm:$0xf] }
 0x4af   : > { %v2648_v11 = vsel %vm2633_vm3, %v2644_v22, 0.0  ;;  %v3675_v22 = vld [vmem:[%s6042_s6 + $0x8] sm:$0xff]   ;;  %vm2916_vm3 = vcmask 130048  }
 0x4b0   : > { %v2774_v40 = vadd.f32 %v2648_v11, %v2621_v63  ;;  %v3676_v11 = vld [vmem:[%s6042_s6] sm:$0xff]  }
 0x4b2   : > { %v2789_v34 = vadd.f32 %v2774_v40, %v2771_v15 }
 0x4b3   : > { %v2698_v30 = vpop.permute.xlu1 %2697 }
 0x4b4   : > { %v2702_v8 = vsel %vm2687_vm0, %v2698_v30, 0.0  ;;  %vm2920_vm0 = vcmask 195584  }
 0x4b5   : > { %v2777_v44 = vadd.f32 %v2702_v8, %v6519_v37 }
 0x4b8   : > { %v2725_v23 = vpop.permute.xlu1 %2724 }
 0x4b9   : > { %v2729_v36 = vsel %vm2714_vm7, %v2725_v23, 0.0  ;;  %v2873_v23 = vld [vmem:[#allocation2] sm:$0xff]  ;;  %vm6542_vm7 = vmmov %vm6540_vm4 }
 0x4ba   : > { %v2780_v58 = vadd.f32 %v2756_v55, %v2729_v36 }
 0x4bc   : > { %v2792_v26 = vadd.f32 %v2780_v58, %v2777_v44  ;;  %v2811_v27 = vpop.permute.xlu1 %2810  ;;  %v6537_v44 = vld [vmem:[#allocation70_spill] sm:$0xff] }
 0x4bd   : > { %3376 = vmatprep.subr.bf16.mxu1 %v2811_v27  ;;  %v2914_v55 = vsel %vm2912_vm2, %v6537_v44, %v2882_v57 }
 0x4be   : > { %v2798_v38 = vadd.f32 %v2792_v26, %v2789_v34  ;;  %3377 = vmatpush3.bf16.msra.mxu1 %v2811_v27 }
 0x4bf   : > { %3378 = vmatprep.subr.bf16.mxu1 %v2809_v14 }
 0x4c0   : > { %v2801_v51 = vadd.f32 %v2798_v38, %v2795_v28  ;;  %v2261_v5 = vpop.permute.xlu1 %2260  ;;  %v2255_v28 = vpack.c.bf16 %v2253_v56, %v2253_v56  ;;  %v3016_v38 = vld [vmem:[%s502_s12] sm:$0xff] }
 0x4c1   : > { %3364 = vmatprep.subr.bf16.mxu0 %v2261_v5 }
 0x4c2   : > { %3365 = vmatpush3.bf16.msra.mxu0 %v2261_v5  ;;  %3379 = vmatpush3.bf16.msra.mxu1 %v2809_v14  ;;  %v2803_v12 = vpack.c.bf16 %v2801_v51, %v2801_v51  ;;  %v3017_v5 = vld [vmem:[%s502_s12 + $0x8] sm:$0xff] }
 0x4c3   : > { %3380 = vmatprep.subr.bf16.mxu1 %v2807_v1 }
 0x4c4   : > { %v2259_v54 = vpop.permute.xlu1 %2258 }
 0x4c5   : > { %3366 = vmatprep.subr.bf16.mxu0 %v2259_v54 }
 0x4c6   : > { %3367 = vmatpush3.bf16.msra.mxu0 %v2259_v54  ;;  %3381 = vmatpush3.bf16.msra.mxu1 %v2807_v1 }
 0x4c7   : > { %3382 = vmatprep.subr.bf16.mxu1 %v2805_v10 }
 0x4c8   : > { %v2257_v60 = vpop.permute.xlu1 %2256 }
 0x4c9   : > { %3368 = vmatprep.subr.bf16.mxu0 %v2257_v60 }
 0x4ca   : > { %3369 = vmatpush3.bf16.msra.mxu0 %v2257_v60  ;;  %3383 = vmatpush3.bf16.msra.mxu1 %v2805_v10 }
 0x4cb   : > { %3388 = vmatprep.subr.bf16.mxu0 %v3675_v22 }
 0x4cc   : > { %v2880_v34 = vpop.permute.xlu1 %2879 }
 0x4cd   : > { %3371 = vmatmul.mubr.msk.bf16.vlgmr.msra.gmra.mxu0 %vm6534_vm5, %v2255_v28  ;;  %3385 = vmatmul.mubr.msk.bf16.vlgmr.msra.gmra.mxu1 %vm6535_vm13, %v2803_v12  ;;  %v2913_v43 = vsel %vm2912_vm2, %v6538_v32, %v2880_v34 }
 0x4ce   : > { %3389 = vmatpush3.bf16.msra.mxu0 %v3675_v22 }
 0x4cf   : > { %3390 = vmatprep.subr.bf16.mxu0 %v3676_v11 }
 0x4d0   : > { %v2884_v30 = vpop.permute.xlu1 %2883 }
 0x4d1   : > { %v2915_v53 = vsel %vm2912_vm2, %v6539_v6, %v2884_v30 }
 0x4d2   : > { %3391 = vmatpush3.bf16.msra.mxu0 %v3676_v11 }
 0x58d   : > { %v3372_v15 = vpop.f32.mrf.mxu0  ;;  %v3386_v19 = vpop.f32.mrf.mxu1 }
 0x58f   : > { %v2311_v25 = vpop.f32.mrf.mxu0  ;;  %v2859_v61 = vpop.f32.mrf.mxu1 }
 0x590   : > { %2891 = vrot.lane.b32.xlu0 %v2311_v25, %s3789_s22 }
 0x591   : > { %v3373_v17 = vpop.f32.mrf.mxu0  ;;  %v3387_v29 = vpop.f32.mrf.mxu1 }
 0x593   : > { %v2314_v63 = vpop.f32.mrf.mxu0  ;;  %v2862_v40 = vpop.f32.mrf.mxu1 }
 0x594   : > { %2895 = vrot.lane.b32.xlu0 %v3372_v15, %s3789_s22  ;;  %2893 = vrot.lane.b32.xlu1 %v2314_v63, %s3789_s22 }
 0x598   : > { %2903 = vrot.lane.b32.xlu1 %v2859_v61, %s3790_s27  ;;  %2905 = vrot.lane.b32.xlu0 %v2862_v40, %s3790_s27 }
 0x59c   : > { %2907 = vrot.lane.b32.xlu1 %v3386_v19, %s3790_s27 }
 0x602   : > { %v2892_v41 = vpop.permute.xlu0 %2891 }
 0x603   : > { %v2917_v36 = vsel %vm2916_vm3, %v2913_v43, %v2892_v41 }
 0x606   : > { %v2894_v8 = vpop.permute.xlu1 %2893  ;;  %v2896_v37 = vpop.permute.xlu0 %2895 }
 0x607   : > { %v2918_v50 = vsel %vm2916_vm3, %v2914_v55, %v2894_v8  ;;  %v2919_v2 = vsel %vm2916_vm3, %v2915_v53, %v2896_v37 }
 0x60a   : > { %v2904_v14 = vpop.permute.xlu1 %2903  ;;  %v2906_v21 = vpop.permute.xlu0 %2905 }
 0x60b   : > { %v2921_v58 = vsel %vm2920_vm0, %v2917_v36, %v2904_v14  ;;  %v2922_v20 = vsel %vm2920_vm0, %v2918_v50, %v2906_v21  ;;  %v3266_v36 = vld [vmem:[%s6045_s9] ss:$0 sm:$0xff] }
 0x60c   : > { %v2924_v3 = vadd.f32 %v2921_v58, %v2873_v23  ;;  %v2925_v59 = vadd.f32 %v2922_v20, %v2874_v49  ;;  %v3265_v23 = vld [vmem:[%s6044_s8] ss:$0 sm:$0xff] }
 0x60e   : > { %2927 = vst.msk [vmem:[#allocation2] sm:$0xff] %vm6540_vm4, %v2924_v3  ;;  %v2908_v35 = vpop.permute.xlu1 %2907 }
 0x60f   : > { %2928 = vst.msk [vmem:[#allocation2 + $0x8] sm:$0xff] %vm6541_vm6, %v2925_v59  ;;  %v2923_v16 = vsel %vm2920_vm0, %v2919_v2, %v2908_v35 }
 0x610   : > { %v2926_v26 = vadd.f32 %v2923_v16, %v2875_v48 }
 0x612   : > { %2930 = vst.msk [vmem:[#allocation2 + $0x10] sm:$0xf] %vm522_vm14, %v2926_v26 }
 0x615   : > { %v2934_v27 = vld [vmem:[#allocation2] sm:$0xff] }
 0x616   : > { %v2935_v18 = vld [vmem:[#allocation2 + $0x8] sm:$0xff] }
 0x617   : > { %v2937_v4 = vpack.c.bf16 %v2935_v18, %v2934_v27 }
 0x619   : > { %3392 = vmatprep.mubr.msk.bf16.mxu0 %vm6542_vm7, %v2937_v4  ;;  %v2936_v47 = vld [vmem:[#allocation2 + $0x10] sm:$0xf] }
 0x61a   : > { %v2938_v13 = vpack.c.bf16 %v2936_v47, %v2936_v47 }
 0x61c   : > { %3393 = vmatmul.mubr.msk.bf16.vlgmr.msra.gmra.mxu0 %vm6543_vm8, %v2938_v13 }
 0x6dc   : > { %v3394_v0 = vpop.f32.mrf.mxu0 }
 0x6dd   : > { %v3011_v39 = vadd.f32 %v3394_v0, %v3260_v46 }
 0x6de   : > { %v3002_v33 = vpop.f32.mrf.mxu0 }
 0x6df   : > { %v3003_v31 = vadd.f32 %v3260_v46, %v3002_v33  ;;  %v3021_v9 = vadd.f32 %v3018_v52, %v3011_v39 }
 0x6e0   : > { %v3395_v24 = vpop.f32.mrf.mxu0 }
 0x6e1   : > { %v3019_v1 = vadd.f32 %v3016_v38, %v3003_v31  ;;  %v3028_v10 = vsel %vm522_vm14, %v3021_v9, 0.0 }
 0x6e2   : > { %v3005_v51 = vpop.f32.mrf.mxu0 }
 0x6e3   : > { %v3006_v7 = vadd.f32 %v3260_v46, %v3005_v51  ;;  %v3022_v45 = vsel %vm6544_vm9, %v3019_v1, 0.0 }
 0x6e4   : > { %3023 = vadd.xlane.f32.xlu0 %v3022_v45 }
 0x6e5   : > { %v3020_v54 = vadd.f32 %v3017_v5, %v3006_v7 }
 0x6e7   : > { %v3025_v42 = vsel %vm6545_vm10, %v3020_v54, 0.0 }
 0x6e8   : > { %3026 = vadd.xlane.f32.xlu1 %v3025_v42  ;;  %3029 = vadd.xlane.f32.xlu0 %v3028_v10 }
 0x76d   : > { %v3024_v56 = vpop.xlane.xlu0 %3023 }
 0x76e   : > { %v3032_v60 = vmul.f32 0.03125, %v3024_v56 }
 0x770   : > { %v3035_v28 = vsub.f32 %v3019_v1, %v3032_v60 }
 0x771   : > { %v3027_v12 = vpop.xlane.xlu1 %3026  ;;  %v3030_v62 = vpop.xlane.xlu0 %3029 }
 0x772   : > { %v3033_v15 = vmul.f32 0.03125, %v3027_v12  ;;  %v3034_v19 = vmul.f32 0.03125, %v3030_v62  ;;  %v3038_v25 = vmul.f32 %v3035_v28, %v3035_v28 }
 0x774   : > { %v3036_v61 = vsub.f32 %v3020_v54, %v3033_v15  ;;  %v3037_v17 = vsub.f32 %v3021_v9, %v3034_v19  ;;  %v3041_v29 = vsel %vm6546_vm12, %v3038_v25, 0.0 }
 0x775   : > { %3042 = vadd.xlane.f32.xlu0 %v3041_v29 }
 0x776   : > { %v3039_v22 = vmul.f32 %v3036_v61, %v3036_v61  ;;  %v3040_v63 = vmul.f32 %v3037_v17, %v3037_v17 }
 0x778   : > { %v3044_v11 = vsel %vm6547_vm11, %v3039_v22, 0.0  ;;  %v3047_v40 = vsel %vm522_vm14, %v3040_v63, 0.0 }
 0x779   : > { %3045 = vadd.xlane.f32.xlu1 %v3044_v11  ;;  %3048 = vadd.xlane.f32.xlu0 %v3047_v40 }
 0x7fe   : > { %v3043_v34 = vpop.xlane.xlu0 %3042 }
 0x7ff   : > { %v3050_v57 = vmul.f32 0.03125, %v3043_v34 }
 0x801   : > { %v3053_v30 = vadd.f32 1e-05, %v3050_v57 }
 0x802   : > { %v3046_v41 = vpop.xlane.xlu1 %3045  ;;  %v3049_v8 = vpop.xlane.xlu0 %3048 }
 0x803   : > { %3677 = vrsqrt.f32 %v3053_v30  ;;  %v3051_v37 = vmul.f32 0.03125, %v3046_v41  ;;  %v3052_v44 = vmul.f32 0.03125, %v3049_v8 }
 0x805   : > { %v3054_v55 = vadd.f32 1e-05, %v3051_v37  ;;  %v3055_v32 = vadd.f32 1e-05, %v3052_v44 }
 0x807   : > { %3679 = vrsqrt.f32 %v3054_v55 }
 0x808   : > { %3681 = vrsqrt.f32 %v3055_v32 }
 0x810   : > { %v3678_v43 = vpop.eup %3677 }
 0x811   : > { %v3059_v49 = vmul.f32 %v3678_v43, %v3035_v28 }
 0x813   : > { %v3069_v50 = vmul.f32 %v3265_v23, %v3059_v49 }
 0x814   : > { %v3680_v14 = vpop.eup %3679 }
 0x815   : > { %v3682_v21 = vpop.eup %3681  ;;  %v3079_v58 = vadd.f32 %v3266_v36, %v3069_v50  ;;  %v3060_v20 = vmul.f32 %v3680_v14, %v3036_v61 }
 0x816   : > { %v3061_v3 = vmul.f32 %v3682_v21, %v3037_v17 }
 0x817   : > { %3082 = vst.msk [vmem:[%s512_s23] sm:$0xff] %vm6548_vm15, %v3079_v58  ;;  %v3070_v59 = vmul.f32 %v3265_v23, %v3060_v20 }
 0x818   : > { %v3071_v6 = vmul.f32 %v3265_v23, %v3061_v3 }
 0x819   : > { %v3080_v53 = vadd.f32 %v3266_v36, %v3070_v59 }
 0x81a   : > { %v3081_v48 = vadd.f32 %v3266_v36, %v3071_v6 }
 0x81b   : > { %3083 = vst.msk [vmem:[%s512_s23 + $0x8] sm:$0xff] %vm6549_vm1, %v3080_v53 }
 0x81c   : > { %3084 = vst.msk [vmem:[%s512_s23 + $0x10] sm:$0xf] %vm522_vm14, %v3081_v48 }
 0x81d PF: > { %s20_s15 = sadd.s32 1, %s3717_s15   ;;  %s6550_s13 = smov %s3713_s14 }
 0x81e   : > { %p17_p5 = scmp.ge.s32.totalorder %s20_s15, 4   ;;  %s6551_s14 = smov %s6553_s16 }
 0x820   :  { %19 = sbr.rel (!%p17_p5) target bundleno = 2 (0x2), region = 107 }

</bundles_post_ra>
